<compile_context>
chip_gen: v7x
topology: tpu7x:2x2x1
jax: 0.10.0
libtpu: 0.0.40
codegen_flags: <defaults>
</compile_context>

<pallas_src>
import functools

import jax
import jax.numpy as jnp
from jax import lax
from jax.experimental import pallas as pl
from jax.experimental.pallas import tpu as pltpu


def _im2col_conv_bn_relu(pad_ref, col_ref, w_ref, s_ref, b_ref, H, W):
    """One (conv3x3 => BN => ReLU) stage on data already resident in VMEM.

    pad_ref: (H+2, W+2, C)   zero-haloed input, bf16
    col_ref: (H*W, 9*C)      im2col scratch, bf16
    w_ref:   (9*C, Cout)     conv weights, bf16
    s_ref:   (1, Cout)       folded scale = gamma / sqrt(var + eps), f32
    b_ref:   (1, Cout)       folded bias  = beta + scale*(conv_bias - mean), f32
    returns: (H*W, Cout)     f32
    """
    C = pad_ref.shape[-1]
    # Build the im2col buffer once (9 shifted window copies), then do a single
    # big MXU matmul with K = 9*C instead of nine K=C matmuls.
    t = 0
    for dy in range(3):
        for dx in range(3):
            patch = pad_ref[pl.ds(dy, H), pl.ds(dx, W), :]        # (H, W, C)
            col_ref[:, pl.ds(t * C, C)] = patch.reshape(H * W, C)
            t += 1
    acc = jnp.dot(col_ref[...], w_ref[...],
                  preferred_element_type=jnp.float32)             # (H*W, Cout)
    y = acc * s_ref[0] + b_ref[0]     # folded conv-bias + BatchNorm affine
    return jnp.maximum(y, 0.0)        # ReLU (f32 epilogue)


def _double_conv_kernel(x_ref, w1_ref, s1_ref, b1_ref, w2_ref, s2_ref, b2_ref,
                        o_ref, xpad_ref, col1_ref, ypad_ref, col2_ref):
    """Fused (conv3x3+BN+ReLU) x 2 for one batch element.

    x_ref:  (1, H, W, Cin)   bf16 input tile
    o_ref:  (1, H, W, Cout)  f32 output tile
    scratch: xpad (H+2, W+2, Cin) bf16, col1 (H*W, 9*Cin) bf16,
             ypad (H+2, W+2, Cout) bf16, col2 (H*W, 9*Cout) bf16
    """
    _, H, W, Cout = o_ref.shape

    # ---- Stage 1: build zero halo in VMEM (no jnp.pad in the wrapper). ----
    xpad_ref[...] = jnp.zeros(xpad_ref.shape, xpad_ref.dtype)
    xpad_ref[pl.ds(1, H), pl.ds(1, W), :] = x_ref[0].astype(xpad_ref.dtype)
    y1 = _im2col_conv_bn_relu(xpad_ref, col1_ref, w1_ref, s1_ref, b1_ref, H, W)

    # ---- Stage 2: stage-1 activation stays in VMEM (never hits HBM). ----
    ypad_ref[...] = jnp.zeros(ypad_ref.shape, ypad_ref.dtype)
    ypad_ref[pl.ds(1, H), pl.ds(1, W), :] = (
        y1.reshape(H, W, Cout).astype(ypad_ref.dtype))
    y2 = _im2col_conv_bn_relu(ypad_ref, col2_ref, w2_ref, s2_ref, b2_ref, H, W)

    o_ref[...] = y2.reshape(1, H, W, Cout).astype(o_ref.dtype)


def _fold_bn(conv_bias, gamma, beta, running_mean, running_var, eps=1e-5):
    scale = gamma / jnp.sqrt(running_var + eps)
    bias = beta + scale * (conv_bias - running_mean)
    return (scale.reshape(1, -1).astype(jnp.float32),
            bias.reshape(1, -1).astype(jnp.float32))


def double_conv_nhwc(x_nhwc, params):
    """Fused double_conv in NHWC. x_nhwc: (N, H, W, Cin) (any float dtype)."""
    (w1, b1, bn1), (w2, b2, bn2) = params
    N, H, W, Cin = x_nhwc.shape
    C1 = w1.shape[0]

    # OIHW -> HWIO -> (9*Cin, Cout); row index = (dy*3 + dx)*Cin + cin,
    # matching the in-kernel im2col column ordering. Cast to bf16 for the MXU.
    w1_mat = jnp.transpose(w1, (2, 3, 1, 0)).reshape(9 * Cin, C1).astype(jnp.bfloat16)
    w2_mat = jnp.transpose(w2, (2, 3, 1, 0)).reshape(9 * C1, C1).astype(jnp.bfloat16)
    s1, bb1 = _fold_bn(b1, *bn1)
    s2, bb2 = _fold_bn(b2, *bn2)

    x_bf16 = x_nhwc.astype(jnp.bfloat16)   # halve HBM read of activations

    return pl.pallas_call(
        _double_conv_kernel,
        out_shape=jax.ShapeDtypeStruct((N, H, W, C1), jnp.float32),
        grid=(N,),
        in_specs=[
            pl.BlockSpec((1, H, W, Cin), lambda n: (n, 0, 0, 0)),
            pl.BlockSpec((9 * Cin, C1), lambda n: (0, 0)),
            pl.BlockSpec((1, C1), lambda n: (0, 0)),
            pl.BlockSpec((1, C1), lambda n: (0, 0)),
            pl.BlockSpec((9 * C1, C1), lambda n: (0, 0)),
            pl.BlockSpec((1, C1), lambda n: (0, 0)),
            pl.BlockSpec((1, C1), lambda n: (0, 0)),
        ],
        out_specs=pl.BlockSpec((1, H, W, C1), lambda n: (n, 0, 0, 0)),
        scratch_shapes=[
            pltpu.VMEM((H + 2, W + 2, Cin), jnp.bfloat16),   # stage-1 halo
            pltpu.VMEM((H * W, 9 * Cin), jnp.bfloat16),      # stage-1 im2col
            pltpu.VMEM((H + 2, W + 2, C1), jnp.bfloat16),    # stage-2 halo
            pltpu.VMEM((H * W, 9 * C1), jnp.bfloat16),       # stage-2 im2col
        ],
        compiler_params=pltpu.CompilerParams(
            dimension_semantics=("parallel",),
            vmem_limit_bytes=64 << 20,
        ),
    )(x_bf16, w1_mat, s1, bb1, w2_mat, s2, bb2)


def init_double_conv_params(key, in_ch, out_ch):
    """Deterministic parameter init (shapes match the PyTorch module)."""
    ks = jax.random.split(key, 12)

    def conv_params(kw, kb, ci, co):
        fan_in = ci * 9
        bound = 1.0 / jnp.sqrt(fan_in)
        w = jax.random.uniform(kw, (co, ci, 3, 3), jnp.float32, -bound, bound)  # OIHW
        b = jax.random.uniform(kb, (co,), jnp.float32, -bound, bound)
        return w, b

    def bn_params(kg, kb, km, kv, c):
        gamma = 1.0 + 0.1 * jax.random.normal(kg, (c,), jnp.float32)
        beta = 0.1 * jax.random.normal(kb, (c,), jnp.float32)
        mean = 0.1 * jax.random.normal(km, (c,), jnp.float32)
        var = 0.5 + jnp.abs(jax.random.normal(kv, (c,), jnp.float32))
        return gamma, beta, mean, var

    w1, b1 = conv_params(ks[0], ks[1], in_ch, out_ch)
    bn1 = bn_params(ks[2], ks[3], ks[4], ks[5], out_ch)
    w2, b2 = conv_params(ks[6], ks[7], out_ch, out_ch)
    bn2 = bn_params(ks[8], ks[9], ks[10], ks[11], out_ch)
    return (w1, b1, bn1), (w2, b2, bn2)


@jax.jit
def double_conv_forward(x_nchw, params):
    """double_conv(in_ch, out_ch, mobilenet=False).forward in eval mode."""
    # NCHW -> NHWC once at the module boundary (kernel itself is pure NHWC).
    x = jnp.transpose(x_nchw, (0, 2, 3, 1))
    y = double_conv_nhwc(x, params)
    return jnp.transpose(y, (0, 3, 1, 2))


def _reference_forward(x_nchw, params):
    """Pure-JAX f32 reference (lax conv) for numerical validation."""
    (w1, b1, bn1), (w2, b2, bn2) = params

    def stage(x, w, b, bn):
        y = lax.conv_general_dilated(
            x, w, window_strides=(1, 1), padding=((1, 1), (1, 1)),
            dimension_numbers=("NCHW", "OIHW", "NCHW"))
        y = y + b.reshape(1, -1, 1, 1)
        gamma, beta, mean, var = bn
        y = gamma.reshape(1, -1, 1, 1) * (y - mean.reshape(1, -1, 1, 1)) \
            / jnp.sqrt(var.reshape(1, -1, 1, 1) + 1e-5) + beta.reshape(1, -1, 1, 1)
        return jnp.maximum(y, 0.0)

    x = stage(x_nchw, w1, b1, bn1)
    x = stage(x, w2, b2, bn2)
    return x


if __name__ == "__main__":
    key = jax.random.PRNGKey(0)
    k_x, k_p = jax.random.split(key)

    N, in_ch, out_ch, H, W = 2, 4, 8, 16, 16
    x = jax.random.normal(k_x, (N, in_ch, H, W), jnp.float32)
    params = init_double_conv_params(k_p, in_ch, out_ch)

    out = double_conv_forward(x, params)
    out = jax.block_until_ready(out)

    ref = _reference_forward(x, params)
    assert out.shape == (N, out_ch, H, W), out.shape
    # bf16 matmul operands (f32 accumulation) => loosen tolerance vs f32 ref.
    max_err = float(jnp.max(jnp.abs(out - ref)))
    assert jnp.allclose(out, ref, atol=5e-2, rtol=5e-2), max_err

    print("KERNEL_OK")
</pallas_src>

<mosaic_0001>
module attributes {stable_mosaic.version = 11 : i64} {
  func.func @_double_conv_kernel(%arg0: i32, %arg1: memref<1x16x16x4xbf16, #tpu.memory_space<vmem>>, %arg2: memref<36x8xbf16, #tpu.memory_space<vmem>>, %arg3: memref<1x8xf32, #tpu.memory_space<vmem>>, %arg4: memref<1x8xf32, #tpu.memory_space<vmem>>, %arg5: memref<72x8xbf16, #tpu.memory_space<vmem>>, %arg6: memref<1x8xf32, #tpu.memory_space<vmem>>, %arg7: memref<1x8xf32, #tpu.memory_space<vmem>>, %arg8: memref<1x16x16x8xf32, #tpu.memory_space<vmem>>, %arg9: memref<18x18x4xbf16, #tpu.memory_space<vmem>>, %arg10: memref<256x36xbf16, #tpu.memory_space<vmem>>, %arg11: memref<18x18x8xbf16, #tpu.memory_space<vmem>>, %arg12: memref<256x72xbf16, #tpu.memory_space<vmem>>) attributes {dimension_semantics = [#tpu.dimension_semantics<parallel>], iteration_bounds = array<i64: 2>, scalar_prefetch = 0 : i64, scratch_operands = 4 : i64, tpu.core_type = #tpu.core_type<tc>, window_params = [{transform_indices = @transform_0, window_bounds = array<i64: 1, 16, 16, 4>}, {pipeline_mode = #tpu.pipeline_mode<synchronous>, transform_indices = @transform_1, window_bounds = array<i64: 36, 8>}, {pipeline_mode = #tpu.pipeline_mode<synchronous>, transform_indices = @transform_2, window_bounds = array<i64: 1, 8>}, {pipeline_mode = #tpu.pipeline_mode<synchronous>, transform_indices = @transform_3, window_bounds = array<i64: 1, 8>}, {pipeline_mode = #tpu.pipeline_mode<synchronous>, transform_indices = @transform_4, window_bounds = array<i64: 72, 8>}, {pipeline_mode = #tpu.pipeline_mode<synchronous>, transform_indices = @transform_5, window_bounds = array<i64: 1, 8>}, {pipeline_mode = #tpu.pipeline_mode<synchronous>, transform_indices = @transform_6, window_bounds = array<i64: 1, 8>}, {transform_indices = @transform_7, window_bounds = array<i64: 1, 16, 16, 8>}]} {
    %cst = arith.constant 0.000000e+00 : bf16
    %0 = vector.broadcast %cst : bf16 to vector<18x18x4xbf16>
    %c0 = arith.constant 0 : index
    %c0_0 = arith.constant 0 : index
    %c0_1 = arith.constant 0 : index
    %1 = vector.load %arg9[%c0, %c0_0, %c0_1] : memref<18x18x4xbf16, #tpu.memory_space<vmem>>, vector<18x18x4xbf16>
    tpu.vector_store %arg9[%c0, %c0_0, %c0_1], %0 {strides = array<i32>} : memref<18x18x4xbf16, #tpu.memory_space<vmem>>, vector<18x18x4xbf16>,
    %c0_2 = arith.constant 0 : index
    %c0_3 = arith.constant 0 : index
    %c0_4 = arith.constant 0 : index
    %c0_5 = arith.constant 0 : index
    %2 = vector.load %arg1[%c0_2, %c0_3, %c0_4, %c0_5] : memref<1x16x16x4xbf16, #tpu.memory_space<vmem>>, vector<1x16x16x4xbf16>
    %3 = vector.shape_cast %2 : vector<1x16x16x4xbf16> to vector<16x16x4xbf16>
    %c1 = arith.constant 1 : index
    %c1_6 = arith.constant 1 : index
    %c0_7 = arith.constant 0 : index
    %4 = vector.load %arg9[%c1, %c1_6, %c0_7] : memref<18x18x4xbf16, #tpu.memory_space<vmem>>, vector<16x16x4xbf16>
    tpu.vector_store %arg9[%c1, %c1_6, %c0_7], %3 {strides = array<i32>} : memref<18x18x4xbf16, #tpu.memory_space<vmem>>, vector<16x16x4xbf16>,
    %c0_8 = arith.constant 0 : index
    %c0_9 = arith.constant 0 : index
    %c0_10 = arith.constant 0 : index
    %5 = vector.load %arg9[%c0_8, %c0_9, %c0_10] : memref<18x18x4xbf16, #tpu.memory_space<vmem>>, vector<16x16x4xbf16>
    %6 = vector.shape_cast %5 : vector<16x16x4xbf16> to vector<256x4xbf16>
    %c0_11 = arith.constant 0 : index
    %c0_12 = arith.constant 0 : index
    %7 = vector.load %arg10[%c0_11, %c0_12] : memref<256x36xbf16, #tpu.memory_space<vmem>>, vector<256x4xbf16>
    tpu.vector_store %arg10[%c0_11, %c0_12], %6 {strides = array<i32>} : memref<256x36xbf16, #tpu.memory_space<vmem>>, vector<256x4xbf16>,
    %c0_13 = arith.constant 0 : index
    %c1_14 = arith.constant 1 : index
    %c0_15 = arith.constant 0 : index
    %8 = vector.load %arg9[%c0_13, %c1_14, %c0_15] : memref<18x18x4xbf16, #tpu.memory_space<vmem>>, vector<16x16x4xbf16>
    %9 = vector.shape_cast %8 : vector<16x16x4xbf16> to vector<256x4xbf16>
    %c0_16 = arith.constant 0 : index
    %c4 = arith.constant 4 : index
    %10 = vector.load %arg10[%c0_16, %c4] : memref<256x36xbf16, #tpu.memory_space<vmem>>, vector<256x4xbf16>
    tpu.vector_store %arg10[%c0_16, %c4], %9 {strides = array<i32>} : memref<256x36xbf16, #tpu.memory_space<vmem>>, vector<256x4xbf16>,
    %c0_17 = arith.constant 0 : index
    %c2 = arith.constant 2 : index
    %c0_18 = arith.constant 0 : index
    %11 = vector.load %arg9[%c0_17, %c2, %c0_18] : memref<18x18x4xbf16, #tpu.memory_space<vmem>>, vector<16x16x4xbf16>
    %12 = vector.shape_cast %11 : vector<16x16x4xbf16> to vector<256x4xbf16>
    %c0_19 = arith.constant 0 : index
    %c8 = arith.constant 8 : index
    %13 = vector.load %arg10[%c0_19, %c8] : memref<256x36xbf16, #tpu.memory_space<vmem>>, vector<256x4xbf16>
    tpu.vector_store %arg10[%c0_19, %c8], %12 {strides = array<i32>} : memref<256x36xbf16, #tpu.memory_space<vmem>>, vector<256x4xbf16>,
    %c1_20 = arith.constant 1 : index
    %c0_21 = arith.constant 0 : index
    %c0_22 = arith.constant 0 : index
    %14 = vector.load %arg9[%c1_20, %c0_21, %c0_22] : memref<18x18x4xbf16, #tpu.memory_space<vmem>>, vector<16x16x4xbf16>
    %15 = vector.shape_cast %14 : vector<16x16x4xbf16> to vector<256x4xbf16>
    %c0_23 = arith.constant 0 : index
    %c12 = arith.constant 12 : index
    %16 = vector.load %arg10[%c0_23, %c12] : memref<256x36xbf16, #tpu.memory_space<vmem>>, vector<256x4xbf16>
    tpu.vector_store %arg10[%c0_23, %c12], %15 {strides = array<i32>} : memref<256x36xbf16, #tpu.memory_space<vmem>>, vector<256x4xbf16>,
    %c1_24 = arith.constant 1 : index
    %c1_25 = arith.constant 1 : index
    %c0_26 = arith.constant 0 : index
    %17 = vector.load %arg9[%c1_24, %c1_25, %c0_26] : memref<18x18x4xbf16, #tpu.memory_space<vmem>>, vector<16x16x4xbf16>
    %18 = vector.shape_cast %17 : vector<16x16x4xbf16> to vector<256x4xbf16>
    %c0_27 = arith.constant 0 : index
    %c16 = arith.constant 16 : index
    %19 = vector.load %arg10[%c0_27, %c16] : memref<256x36xbf16, #tpu.memory_space<vmem>>, vector<256x4xbf16>
    tpu.vector_store %arg10[%c0_27, %c16], %18 {strides = array<i32>} : memref<256x36xbf16, #tpu.memory_space<vmem>>, vector<256x4xbf16>,
    %c1_28 = arith.constant 1 : index
    %c2_29 = arith.constant 2 : index
    %c0_30 = arith.constant 0 : index
    %20 = vector.load %arg9[%c1_28, %c2_29, %c0_30] : memref<18x18x4xbf16, #tpu.memory_space<vmem>>, vector<16x16x4xbf16>
    %21 = vector.shape_cast %20 : vector<16x16x4xbf16> to vector<256x4xbf16>
    %c0_31 = arith.constant 0 : index
    %c20 = arith.constant 20 : index
    %22 = vector.load %arg10[%c0_31, %c20] : memref<256x36xbf16, #tpu.memory_space<vmem>>, vector<256x4xbf16>
    tpu.vector_store %arg10[%c0_31, %c20], %21 {strides = array<i32>} : memref<256x36xbf16, #tpu.memory_space<vmem>>, vector<256x4xbf16>,
    %c2_32 = arith.constant 2 : index
    %c0_33 = arith.constant 0 : index
    %c0_34 = arith.constant 0 : index
    %23 = vector.load %arg9[%c2_32, %c0_33, %c0_34] : memref<18x18x4xbf16, #tpu.memory_space<vmem>>, vector<16x16x4xbf16>
    %24 = vector.shape_cast %23 : vector<16x16x4xbf16> to vector<256x4xbf16>
    %c0_35 = arith.constant 0 : index
    %c24 = arith.constant 24 : index
    %25 = vector.load %arg10[%c0_35, %c24] : memref<256x36xbf16, #tpu.memory_space<vmem>>, vector<256x4xbf16>
    tpu.vector_store %arg10[%c0_35, %c24], %24 {strides = array<i32>} : memref<256x36xbf16, #tpu.memory_space<vmem>>, vector<256x4xbf16>,
    %c2_36 = arith.constant 2 : index
    %c1_37 = arith.constant 1 : index
    %c0_38 = arith.constant 0 : index
    %26 = vector.load %arg9[%c2_36, %c1_37, %c0_38] : memref<18x18x4xbf16, #tpu.memory_space<vmem>>, vector<16x16x4xbf16>
    %27 = vector.shape_cast %26 : vector<16x16x4xbf16> to vector<256x4xbf16>
    %c0_39 = arith.constant 0 : index
    %c28 = arith.constant 28 : index
    %28 = vector.load %arg10[%c0_39, %c28] : memref<256x36xbf16, #tpu.memory_space<vmem>>, vector<256x4xbf16>
    tpu.vector_store %arg10[%c0_39, %c28], %27 {strides = array<i32>} : memref<256x36xbf16, #tpu.memory_space<vmem>>, vector<256x4xbf16>,
    %c2_40 = arith.constant 2 : index
    %c2_41 = arith.constant 2 : index
    %c0_42 = arith.constant 0 : index
    %29 = vector.load %arg9[%c2_40, %c2_41, %c0_42] : memref<18x18x4xbf16, #tpu.memory_space<vmem>>, vector<16x16x4xbf16>
    %30 = vector.shape_cast %29 : vector<16x16x4xbf16> to vector<256x4xbf16>
    %c0_43 = arith.constant 0 : index
    %c32 = arith.constant 32 : index
    %31 = vector.load %arg10[%c0_43, %c32] : memref<256x36xbf16, #tpu.memory_space<vmem>>, vector<256x4xbf16>
    tpu.vector_store %arg10[%c0_43, %c32], %30 {strides = array<i32>} : memref<256x36xbf16, #tpu.memory_space<vmem>>, vector<256x4xbf16>,
    %c0_44 = arith.constant 0 : index
    %c0_45 = arith.constant 0 : index
    %32 = vector.load %arg10[%c0_44, %c0_45] : memref<256x36xbf16, #tpu.memory_space<vmem>>, vector<256x36xbf16>
    %c0_46 = arith.constant 0 : index
    %c0_47 = arith.constant 0 : index
    %33 = vector.load %arg2[%c0_46, %c0_47] : memref<36x8xbf16, #tpu.memory_space<vmem>>, vector<36x8xbf16>
    %cst_48 = arith.constant dense<0.000000e+00> : vector<256x8xf32>
    %34 = tpu.matmul %32, %33, %cst_48 {dimension_numbers = #tpu.dot_dimension_numbers<[1], [0], [0], [1], [0, 0, 1, 1], [], []>} : vector<256x36xbf16>, vector<36x8xbf16>, vector<256x8xf32> -> vector<256x8xf32>
    %c0_49 = arith.constant 0 : index
    %c0_50 = arith.constant 0 : index
    %35 = vector.load %arg3[%c0_49, %c0_50] : memref<1x8xf32, #tpu.memory_space<vmem>>, vector<1x8xf32>
    %36 = vector.shape_cast %35 : vector<1x8xf32> to vector<8xf32>
    %37 = vector.shape_cast %36 : vector<8xf32> to vector<1x8xf32>
    %38 = vector.broadcast %37 : vector<1x8xf32> to vector<256x8xf32>
    %39 = arith.mulf %34, %38 : vector<256x8xf32>
    %c0_51 = arith.constant 0 : index
    %c0_52 = arith.constant 0 : index
    %40 = vector.load %arg4[%c0_51, %c0_52] : memref<1x8xf32, #tpu.memory_space<vmem>>, vector<1x8xf32>
    %41 = vector.shape_cast %40 : vector<1x8xf32> to vector<8xf32>
    %42 = vector.shape_cast %41 : vector<8xf32> to vector<1x8xf32>
    %43 = vector.broadcast %42 : vector<1x8xf32> to vector<256x8xf32>
    %44 = arith.addf %39, %43 : vector<256x8xf32>
    %cst_53 = arith.constant 0.000000e+00 : f32
    %45 = vector.broadcast %cst_53 : f32 to vector<256x8xf32>
    %46 = arith.maximumf %44, %45 : vector<256x8xf32>
    %cst_54 = arith.constant 0.000000e+00 : bf16
    %47 = vector.broadcast %cst_54 : bf16 to vector<18x18x8xbf16>
    %c0_55 = arith.constant 0 : index
    %c0_56 = arith.constant 0 : index
    %c0_57 = arith.constant 0 : index
    %48 = vector.load %arg11[%c0_55, %c0_56, %c0_57] : memref<18x18x8xbf16, #tpu.memory_space<vmem>>, vector<18x18x8xbf16>
    tpu.vector_store %arg11[%c0_55, %c0_56, %c0_57], %47 {strides = array<i32>} : memref<18x18x8xbf16, #tpu.memory_space<vmem>>, vector<18x18x8xbf16>,
    %49 = vector.shape_cast %46 : vector<256x8xf32> to vector<16x16x8xf32>
    %50 = arith.truncf %49 : vector<16x16x8xf32> to vector<16x16x8xbf16>
    %c1_58 = arith.constant 1 : index
    %c1_59 = arith.constant 1 : index
    %c0_60 = arith.constant 0 : index
    %51 = vector.load %arg11[%c1_58, %c1_59, %c0_60] : memref<18x18x8xbf16, #tpu.memory_space<vmem>>, vector<16x16x8xbf16>
    tpu.vector_store %arg11[%c1_58, %c1_59, %c0_60], %50 {strides = array<i32>} : memref<18x18x8xbf16, #tpu.memory_space<vmem>>, vector<16x16x8xbf16>,
    %c0_61 = arith.constant 0 : index
    %c0_62 = arith.constant 0 : index
    %c0_63 = arith.constant 0 : index
    %52 = vector.load %arg11[%c0_61, %c0_62, %c0_63] : memref<18x18x8xbf16, #tpu.memory_space<vmem>>, vector<16x16x8xbf16>
    %53 = vector.shape_cast %52 : vector<16x16x8xbf16> to vector<256x8xbf16>
    %c0_64 = arith.constant 0 : index
    %c0_65 = arith.constant 0 : index
    %54 = vector.load %arg12[%c0_64, %c0_65] : memref<256x72xbf16, #tpu.memory_space<vmem>>, vector<256x8xbf16>
    tpu.vector_store %arg12[%c0_64, %c0_65], %53 {strides = array<i32>} : memref<256x72xbf16, #tpu.memory_space<vmem>>, vector<256x8xbf16>,
    %c0_66 = arith.constant 0 : index
    %c1_67 = arith.constant 1 : index
    %c0_68 = arith.constant 0 : index
    %55 = vector.load %arg11[%c0_66, %c1_67, %c0_68] : memref<18x18x8xbf16, #tpu.memory_space<vmem>>, vector<16x16x8xbf16>
    %56 = vector.shape_cast %55 : vector<16x16x8xbf16> to vector<256x8xbf16>
    %c0_69 = arith.constant 0 : index
    %c8_70 = arith.constant 8 : index
    %57 = vector.load %arg12[%c0_69, %c8_70] : memref<256x72xbf16, #tpu.memory_space<vmem>>, vector<256x8xbf16>
    tpu.vector_store %arg12[%c0_69, %c8_70], %56 {strides = array<i32>} : memref<256x72xbf16, #tpu.memory_space<vmem>>, vector<256x8xbf16>,
    %c0_71 = arith.constant 0 : index
    %c2_72 = arith.constant 2 : index
    %c0_73 = arith.constant 0 : index
    %58 = vector.load %arg11[%c0_71, %c2_72, %c0_73] : memref<18x18x8xbf16, #tpu.memory_space<vmem>>, vector<16x16x8xbf16>
    %59 = vector.shape_cast %58 : vector<16x16x8xbf16> to vector<256x8xbf16>
    %c0_74 = arith.constant 0 : index
    %c16_75 = arith.constant 16 : index
    %60 = vector.load %arg12[%c0_74, %c16_75] : memref<256x72xbf16, #tpu.memory_space<vmem>>, vector<256x8xbf16>
    tpu.vector_store %arg12[%c0_74, %c16_75], %59 {strides = array<i32>} : memref<256x72xbf16, #tpu.memory_space<vmem>>, vector<256x8xbf16>,
    %c1_76 = arith.constant 1 : index
    %c0_77 = arith.constant 0 : index
    %c0_78 = arith.constant 0 : index
    %61 = vector.load %arg11[%c1_76, %c0_77, %c0_78] : memref<18x18x8xbf16, #tpu.memory_space<vmem>>, vector<16x16x8xbf16>
    %62 = vector.shape_cast %61 : vector<16x16x8xbf16> to vector<256x8xbf16>
    %c0_79 = arith.constant 0 : index
    %c24_80 = arith.constant 24 : index
    %63 = vector.load %arg12[%c0_79, %c24_80] : memref<256x72xbf16, #tpu.memory_space<vmem>>, vector<256x8xbf16>
    tpu.vector_store %arg12[%c0_79, %c24_80], %62 {strides = array<i32>} : memref<256x72xbf16, #tpu.memory_space<vmem>>, vector<256x8xbf16>,
    %c1_81 = arith.constant 1 : index
    %c1_82 = arith.constant 1 : index
    %c0_83 = arith.constant 0 : index
    %64 = vector.load %arg11[%c1_81, %c1_82, %c0_83] : memref<18x18x8xbf16, #tpu.memory_space<vmem>>, vector<16x16x8xbf16>
    %65 = vector.shape_cast %64 : vector<16x16x8xbf16> to vector<256x8xbf16>
    %c0_84 = arith.constant 0 : index
    %c32_85 = arith.constant 32 : index
    %66 = vector.load %arg12[%c0_84, %c32_85] : memref<256x72xbf16, #tpu.memory_space<vmem>>, vector<256x8xbf16>
    tpu.vector_store %arg12[%c0_84, %c32_85], %65 {strides = array<i32>} : memref<256x72xbf16, #tpu.memory_space<vmem>>, vector<256x8xbf16>,
    %c1_86 = arith.constant 1 : index
    %c2_87 = arith.constant 2 : index
    %c0_88 = arith.constant 0 : index
    %67 = vector.load %arg11[%c1_86, %c2_87, %c0_88] : memref<18x18x8xbf16, #tpu.memory_space<vmem>>, vector<16x16x8xbf16>
    %68 = vector.shape_cast %67 : vector<16x16x8xbf16> to vector<256x8xbf16>
    %c0_89 = arith.constant 0 : index
    %c40 = arith.constant 40 : index
    %69 = vector.load %arg12[%c0_89, %c40] : memref<256x72xbf16, #tpu.memory_space<vmem>>, vector<256x8xbf16>
    tpu.vector_store %arg12[%c0_89, %c40], %68 {strides = array<i32>} : memref<256x72xbf16, #tpu.memory_space<vmem>>, vector<256x8xbf16>,
    %c2_90 = arith.constant 2 : index
    %c0_91 = arith.constant 0 : index
    %c0_92 = arith.constant 0 : index
    %70 = vector.load %arg11[%c2_90, %c0_91, %c0_92] : memref<18x18x8xbf16, #tpu.memory_space<vmem>>, vector<16x16x8xbf16>
    %71 = vector.shape_cast %70 : vector<16x16x8xbf16> to vector<256x8xbf16>
    %c0_93 = arith.constant 0 : index
    %c48 = arith.constant 48 : index
    %72 = vector.load %arg12[%c0_93, %c48] : memref<256x72xbf16, #tpu.memory_space<vmem>>, vector<256x8xbf16>
    tpu.vector_store %arg12[%c0_93, %c48], %71 {strides = array<i32>} : memref<256x72xbf16, #tpu.memory_space<vmem>>, vector<256x8xbf16>,
    %c2_94 = arith.constant 2 : index
    %c1_95 = arith.constant 1 : index
    %c0_96 = arith.constant 0 : index
    %73 = vector.load %arg11[%c2_94, %c1_95, %c0_96] : memref<18x18x8xbf16, #tpu.memory_space<vmem>>, vector<16x16x8xbf16>
    %74 = vector.shape_cast %73 : vector<16x16x8xbf16> to vector<256x8xbf16>
    %c0_97 = arith.constant 0 : index
    %c56 = arith.constant 56 : index
    %75 = vector.load %arg12[%c0_97, %c56] : memref<256x72xbf16, #tpu.memory_space<vmem>>, vector<256x8xbf16>
    tpu.vector_store %arg12[%c0_97, %c56], %74 {strides = array<i32>} : memref<256x72xbf16, #tpu.memory_space<vmem>>, vector<256x8xbf16>,
    %c2_98 = arith.constant 2 : index
    %c2_99 = arith.constant 2 : index
    %c0_100 = arith.constant 0 : index
    %76 = vector.load %arg11[%c2_98, %c2_99, %c0_100] : memref<18x18x8xbf16, #tpu.memory_space<vmem>>, vector<16x16x8xbf16>
    %77 = vector.shape_cast %76 : vector<16x16x8xbf16> to vector<256x8xbf16>
    %c0_101 = arith.constant 0 : index
    %c64 = arith.constant 64 : index
    %78 = vector.load %arg12[%c0_101, %c64] : memref<256x72xbf16, #tpu.memory_space<vmem>>, vector<256x8xbf16>
    tpu.vector_store %arg12[%c0_101, %c64], %77 {strides = array<i32>} : memref<256x72xbf16, #tpu.memory_space<vmem>>, vector<256x8xbf16>,
    %c0_102 = arith.constant 0 : index
    %c0_103 = arith.constant 0 : index
    %79 = vector.load %arg12[%c0_102, %c0_103] : memref<256x72xbf16, #tpu.memory_space<vmem>>, vector<256x72xbf16>
    %c0_104 = arith.constant 0 : index
    %c0_105 = arith.constant 0 : index
    %80 = vector.load %arg5[%c0_104, %c0_105] : memref<72x8xbf16, #tpu.memory_space<vmem>>, vector<72x8xbf16>
    %cst_106 = arith.constant dense<0.000000e+00> : vector<256x8xf32>
    %81 = tpu.matmul %79, %80, %cst_106 {dimension_numbers = #tpu.dot_dimension_numbers<[1], [0], [0], [1], [0, 0, 1, 1], [], []>} : vector<256x72xbf16>, vector<72x8xbf16>, vector<256x8xf32> -> vector<256x8xf32>
    %c0_107 = arith.constant 0 : index
    %c0_108 = arith.constant 0 : index
    %82 = vector.load %arg6[%c0_107, %c0_108] : memref<1x8xf32, #tpu.memory_space<vmem>>, vector<1x8xf32>
    %83 = vector.shape_cast %82 : vector<1x8xf32> to vector<8xf32>
    %84 = vector.shape_cast %83 : vector<8xf32> to vector<1x8xf32>
    %85 = vector.broadcast %84 : vector<1x8xf32> to vector<256x8xf32>
    %86 = arith.mulf %81, %85 : vector<256x8xf32>
    %c0_109 = arith.constant 0 : index
    %c0_110 = arith.constant 0 : index
    %87 = vector.load %arg7[%c0_109, %c0_110] : memref<1x8xf32, #tpu.memory_space<vmem>>, vector<1x8xf32>
    %88 = vector.shape_cast %87 : vector<1x8xf32> to vector<8xf32>
    %89 = vector.shape_cast %88 : vector<8xf32> to vector<1x8xf32>
    %90 = vector.broadcast %89 : vector<1x8xf32> to vector<256x8xf32>
    %91 = arith.addf %86, %90 : vector<256x8xf32>
    %cst_111 = arith.constant 0.000000e+00 : f32
    %92 = vector.broadcast %cst_111 : f32 to vector<256x8xf32>
    %93 = arith.maximumf %91, %92 : vector<256x8xf32>
    %94 = vector.shape_cast %93 : vector<256x8xf32> to vector<1x16x16x8xf32>
    %c0_112 = arith.constant 0 : index
    %c0_113 = arith.constant 0 : index
    %c0_114 = arith.constant 0 : index
    %c0_115 = arith.constant 0 : index
    %95 = vector.load %arg8[%c0_112, %c0_113, %c0_114, %c0_115] : memref<1x16x16x8xf32, #tpu.memory_space<vmem>>, vector<1x16x16x8xf32>
    tpu.vector_store %arg8[%c0_112, %c0_113, %c0_114, %c0_115], %94 {strides = array<i32>} : memref<1x16x16x8xf32, #tpu.memory_space<vmem>>, vector<1x16x16x8xf32>,
    return
  }
  func.func @transform_0(%arg0: i32) -> (i32, i32, i32, i32) {
    %c0_i32 = arith.constant 0 : i32
    %c0_i32_0 = arith.constant 0 : i32
    %c0_i32_1 = arith.constant 0 : i32
    %c0_i32_2 = arith.constant 0 : i32
    return %arg0, %c0_i32, %c0_i32_0, %c0_i32_1 : i32, i32, i32, i32
  }
  func.func @transform_1(%arg0: i32) -> (i32, i32) {
    %c0_i32 = arith.constant 0 : i32
    %c0_i32_0 = arith.constant 0 : i32
    %c0_i32_1 = arith.constant 0 : i32
    return %c0_i32, %c0_i32_0 : i32, i32
  }
  func.func @transform_2(%arg0: i32) -> (i32, i32) {
    %c0_i32 = arith.constant 0 : i32
    %c0_i32_0 = arith.constant 0 : i32
    %c0_i32_1 = arith.constant 0 : i32
    return %c0_i32, %c0_i32_0 : i32, i32
  }
  func.func @transform_3(%arg0: i32) -> (i32, i32) {
    %c0_i32 = arith.constant 0 : i32
    %c0_i32_0 = arith.constant 0 : i32
    %c0_i32_1 = arith.constant 0 : i32
    return %c0_i32, %c0_i32_0 : i32, i32
  }
  func.func @transform_4(%arg0: i32) -> (i32, i32) {
    %c0_i32 = arith.constant 0 : i32
    %c0_i32_0 = arith.constant 0 : i32
    %c0_i32_1 = arith.constant 0 : i32
    return %c0_i32, %c0_i32_0 : i32, i32
  }
  func.func @transform_5(%arg0: i32) -> (i32, i32) {
    %c0_i32 = arith.constant 0 : i32
    %c0_i32_0 = arith.constant 0 : i32
    %c0_i32_1 = arith.constant 0 : i32
    return %c0_i32, %c0_i32_0 : i32, i32
  }
  func.func @transform_6(%arg0: i32) -> (i32, i32) {
    %c0_i32 = arith.constant 0 : i32
    %c0_i32_0 = arith.constant 0 : i32
    %c0_i32_1 = arith.constant 0 : i32
    return %c0_i32, %c0_i32_0 : i32, i32
  }
  func.func @transform_7(%arg0: i32) -> (i32, i32, i32, i32) {
    %c0_i32 = arith.constant 0 : i32
    %c0_i32_0 = arith.constant 0 : i32
    %c0_i32_1 = arith.constant 0 : i32
    %c0_i32_2 = arith.constant 0 : i32
    return %arg0, %c0_i32, %c0_i32_0, %c0_i32_1 : i32, i32, i32, i32
  }
}

</mosaic_0001>

<bundles_post_ra>
// kernel: double_conv_forward.1
= control target key start
LH: loop header
LB: loop body
LE: loop exit
PB: predicated region body
PF: predicated region fallthrough
CT: control target
= control target key end

     0   :  { %12 = vsyncpa [#allocation7], 0  ;;  %s12672_s0 = inlined_call_operand.hbm [shape: bf16[2,16,16,4], index: 0, kind: input, shape index: {}]   ;;  %s12673_s1 = inlined_call_operand.hbm [shape: bf16[36,8], index: 1, kind: input, shape index: {}]   ;;  %s12674_s2 = inlined_call_operand.hbm [shape: f32[1,8], index: 2, kind: input, shape index: {}]   ;;  %s12675_s3 = inlined_call_operand.hbm [shape: f32[1,8], index: 3, kind: input, shape index: {}]   ;;  %s12676_s4 = inlined_call_operand.hbm [shape: bf16[72,8], index: 4, kind: input, shape index: {}]   ;;  %s12677_s5 = inlined_call_operand.hbm [shape: f32[1,8], index: 5, kind: input, shape index: {}]   ;;  %s12678_s6 = inlined_call_operand.hbm [shape: f32[1,8], index: 6, kind: input, shape index: {}]   ;;  %s12679_s7 = inlined_call_operand.hbm [shape: f32[2,16,16,8], index: 7, kind: output, shape index: {}]  }
   0x1   :  { %14 = vsyncpa [#allocation7 + $0x1], 0 }
   0x2   :  { %15 = vsyncpa [#allocation10], 0 }
   0x3   :  { %16 = vsyncpa [#allocation13], 0 }
   0x4   :  { %17 = vsyncpa [#allocation16], 0 }
   0x5   :  { %18 = vsyncpa [#allocation8], 0 }
   0x6   :  { %20 = vsyncpa [#allocation8 + $0x1], 0  ;;  %s9826_s24 = smov 0   ;;  %s9828_s25 = smov 0  }
   0x7   :  { %s9830_s26 = smov 0   ;;  %s9832_s27 = smov 0  }
   0x8 LB: > { %s9762_s28 = smov [#allocation9]   ;;  %s9847_s30 = sadd.s32 4294967295, %s9760_s27   ;;  %s9760_s27 = sphi %s9832_s27, %s12767_s27   ;;  %s9756_s26 = sphi %s9830_s26, %s12766_s26   ;;  %s9752_s25 = sphi %s9828_s25, %s12765_s25   ;;  %s9748_s24 = sphi %s9826_s24, %s12764_s24  }
   0x9   : > { %s221_s29 = sshll.u32 %s9762_s28, 4  ;;  %p8610_p0 = scmp.ge.s32.totalorder %s9760_s27, 1  ;;  %s9852_s29 = int_to_ptr.vmem [resolvable:$true] %s221_s29 }
   0xa   : > { %p12680_p1 = scmp.eq.s32.totalorder %s9847_s30, 0  ;;  %p209_p2 = scmp.lt.s32.totalorder %s9760_s27, 3 }
   0xb   : > { %s9763_s9 = smov [#allocation12]   ;;  %s9764_s12 = smov [#allocation15]  }
   0xc   : > { %p9854_p3 = pnand %p8610_p0, %p209_p2  ;;  %s246_s10 = sshll.u32 %s9763_s9, 4  ;;  %s9867_s10 = int_to_ptr.vmem [resolvable:$true] %s246_s10 }
   0xd   : > { %s270_s13 = sshll.u32 %s9764_s12, 4  ;;  %s9484_s16 = scalar_lea.hbm %s12673_s1, 320  ;;  %s9869_s13 = int_to_ptr.vmem [resolvable:$true] %s270_s13 }
   0xe   : > { %s12688_s8 = scalar_select %p9854_p3, 1, 0 }
   0xf   : > { %p9279_p5 = pneg %p9854_p3  ;;  %p9485_p7 = scmp.ne.s32.totalorder %s12673_s1, %s9484_s16 }
  0x10   : > { %p9491_p11 = scmp.lt.u32.totalorder %s9484_s16, %s12673_s1 }
  0x11   : > { %p9863_p6 = pnand %p9279_p5, %p12680_p1 }
  0x13   : > { %p9879_p8 = pneg %p9863_p6 }
  0x15   : > { %p9487_p9 = pnand %p9879_p8, %p9485_p7 }
  0x17   : > { %p9488_p10 = pneg %p9487_p9 }
  0x19   : > { %p9493_p12 = pnand %p9491_p11, %p9488_p10 }
  0x1b   : > { %9496 = shalt.err (!%p9493_p12)
}
  0x1c   : > { %s9497_s22 = scalar_lea.vmem %s9852_s29, 320  ;;  %p9505_p5 = scmp.lt.s32.totalorder %s9852_s29, %s9852_s29 }
  0x1d   : > { %p9498_p13 = scmp.ne.s32.totalorder %s9852_s29, %s9497_s22  ;;  %p9506_p4 = scmp.lt.s32.totalorder %s9497_s22, %s9497_s22 }
  0x1f   : > { %p9500_p0 = pnand %p9498_p13, %p9879_p8  ;;  %p9507_p7 = por %p9506_p4, %p9505_p5 }
  0x21   : > { %p9501_p2 = pneg %p9500_p0 }
  0x23   : > { %p9508_p9 = pnand %p9507_p7, %p9501_p2 }
  0x25   : > { %9511 = shalt.err (!%p9508_p9)
}
  0x26   : > { %s12682_s23 = smov 64   ;;  %s9766_s28 = smov 4  }
  0x27   : > { %9282 = dma.hbm_to_vmem [thread:$0]  (!%p9863_p6), %s12673_s1, 320, %s9852_s29, [#allocation10], %s12682_s23, %s12682_s23, %s9766_s28  }
  0x28   : > { %s9512_s16 = scalar_lea.hbm %s12675_s3, 16 }
  0x29   : > { %p9513_p4 = scmp.ne.s32.totalorder %s12675_s3, %s9512_s16  ;;  %p9519_p12 = scmp.lt.u32.totalorder %s9512_s16, %s12675_s3 }
  0x2b   : > { %p9515_p10 = pnand %p9513_p4, %p9879_p8 }
  0x2d   : > { %p9516_p11 = pneg %p9515_p10 }
  0x2f   : > { %p9521_p13 = pnand %p9519_p12, %p9516_p11 }
  0x31   : > { %9524 = shalt.err (!%p9521_p13)
}
  0x32   : > { %s9525_s29 = scalar_lea.vmem %s9867_s10, 16  ;;  %s9532_s22 = scalar_lea.vmem %s9867_s10, 32 }
  0x33   : > { %p9526_p0 = scmp.ne.s32.totalorder %s9867_s10, %s9525_s29  ;;  %p9533_p7 = scmp.lt.s32.totalorder %s9867_s10, %s9867_s10 }
  0x34   : > { %p9534_p9 = scmp.lt.s32.totalorder %s9532_s22, %s9525_s29 }
  0x35   : > { %p9528_p2 = pnand %p9526_p0, %p9879_p8 }
  0x36   : > { %p9535_p4 = por %p9534_p9, %p9533_p7 }
  0x37   : > { %p9529_p5 = pneg %p9528_p2 }
  0x39   : > { %p9536_p10 = pnand %p9535_p4, %p9529_p5 }
  0x3b   : > { %9539 = shalt.err (!%p9536_p10)
}
  0x3c   : > { %9288 = dma.hbm_to_vmem [thread:$0]  (!%p9863_p6), %s12675_s3, 16, %s9867_s10, [#allocation13]  }
  0x3d   : > { %s9540_s16 = scalar_lea.hbm %s12677_s5, 16 }
  0x3e   : > { %p9541_p11 = scmp.ne.s32.totalorder %s12677_s5, %s9540_s16  ;;  %p9547_p0 = scmp.lt.u32.totalorder %s9540_s16, %s12677_s5 }
  0x40   : > { %p9543_p12 = pnand %p9541_p11, %p9879_p8 }
  0x42   : > { %p9544_p13 = pneg %p9543_p12 }
  0x44   : > { %p9549_p2 = pnand %p9547_p0, %p9544_p13 }
  0x46   : > { %9552 = shalt.err (!%p9549_p2)
}
  0x47   : > { %s9553_s10 = scalar_lea.vmem %s9869_s13, 16  ;;  %s9560_s29 = scalar_lea.vmem %s9869_s13, 32 }
  0x48   : > { %p9554_p5 = scmp.ne.s32.totalorder %s9869_s13, %s9553_s10  ;;  %p9561_p4 = scmp.lt.s32.totalorder %s9869_s13, %s9869_s13 }
  0x49   : > { %p9562_p10 = scmp.lt.s32.totalorder %s9560_s29, %s9553_s10 }
  0x4a   : > { %p9556_p7 = pnand %p9554_p5, %p9879_p8 }
  0x4b   : > { %p9563_p11 = por %p9562_p10, %p9561_p4 }
  0x4c   : > { %p9557_p9 = pneg %p9556_p7 }
  0x4e   : > { %p9564_p12 = pnand %p9563_p11, %p9557_p9 }
  0x50   : > { %9567 = shalt.err (!%p9564_p12)
}
  0x51   : > { %9294 = dma.hbm_to_vmem [thread:$0]  (!%p9863_p6), %s12677_s5, 16, %s9869_s13, [#allocation16]  }
  0x52   : > { %s9767_s12 = smov [#allocation11]   ;;  %s9768_s15 = smov [#allocation14]  }
  0x53   : > { %s235_s14 = sshll.u32 %s9767_s12, 4  ;;  %s256_s16 = sshll.u32 %s9768_s15, 4  ;;  %s236_s14 = int_to_ptr.vmem [resolvable:$true] %s235_s14  ;;  %s257_s16 = int_to_ptr.vmem [resolvable:$true] %s256_s16 }
  0x54   : > { %s9568_s20 = scalar_lea.hbm %s12674_s2, 16 }
  0x55   : > { %p9569_p13 = scmp.ne.s32.totalorder %s12674_s2, %s9568_s20  ;;  %p9575_p5 = scmp.lt.u32.totalorder %s9568_s20, %s12674_s2 }
  0x57   : > { %p9571_p0 = pnand %p9569_p13, %p9879_p8 }
  0x59   : > { %p9572_p2 = pneg %p9571_p0 }
  0x5b   : > { %p9577_p7 = pnand %p9575_p5, %p9572_p2 }
  0x5d   : > { %9580 = shalt.err (!%p9577_p7)
}
  0x5e   : > { %s9581_s13 = scalar_lea.vmem %s236_s14, 16  ;;  %s9588_s9 = scalar_lea.vmem %s236_s14, 32 }
  0x5f   : > { %p9582_p9 = scmp.ne.s32.totalorder %s236_s14, %s9581_s13  ;;  %p9589_p11 = scmp.lt.s32.totalorder %s236_s14, %s236_s14 }
  0x60   : > { %p9590_p12 = scmp.lt.s32.totalorder %s9588_s9, %s9581_s13 }
  0x61   : > { %p9584_p4 = pnand %p9582_p9, %p9879_p8 }
  0x62   : > { %p9591_p1 = por %p9590_p12, %p9589_p11 }
  0x63   : > { %p9585_p10 = pneg %p9584_p4 }
  0x65   : > { %p9592_p3 = pnand %p9591_p1, %p9585_p10 }
  0x67   : > { %9595 = shalt.err (!%p9592_p3)
}
  0x68   : > { %9285 = dma.hbm_to_vmem [thread:$0]  (!%p9863_p6), %s12674_s2, 16, %s236_s14, [#allocation10]  }
  0x69   : > { %s9596_s20 = scalar_lea.hbm %s12676_s4, 576 }
  0x6a   : > { %p9597_p13 = scmp.ne.s32.totalorder %s12676_s4, %s9596_s20  ;;  %p9603_p3 = scmp.lt.u32.totalorder %s9596_s20, %s12676_s4 }
  0x6c   : > { %p9599_p0 = pnand %p9597_p13, %p9879_p8 }
  0x6e   : > { %p9600_p1 = pneg %p9599_p0 }
  0x70   : > { %p9605_p2 = pnand %p9603_p3, %p9600_p1 }
  0x72   : > { %9608 = shalt.err (!%p9605_p2)
}
  0x73   : > { %s9609_s13 = scalar_lea.vmem %s257_s16, 576  ;;  %p9617_p4 = scmp.lt.s32.totalorder %s257_s16, %s257_s16 }
  0x74   : > { %p9610_p5 = scmp.ne.s32.totalorder %s257_s16, %s9609_s13  ;;  %p9618_p10 = scmp.lt.s32.totalorder %s9609_s13, %s9609_s13 }
  0x76   : > { %p9612_p7 = pnand %p9610_p5, %p9879_p8  ;;  %p9619_p11 = por %p9618_p10, %p9617_p4 }
  0x78   : > { %p9613_p9 = pneg %p9612_p7 }
  0x7a   : > { %p9620_p12 = pnand %p9619_p11, %p9613_p9 }
  0x7c   : > { %9623 = shalt.err (!%p9620_p12)
}
  0x7d   : > { %9291 = dma.hbm_to_vmem [thread:$0]  (!%p9863_p6), %s12676_s4, 576, %s257_s16, [#allocation13], %s12682_s23, %s12682_s23, %s9766_s28  }
  0x7e   : > { %s9769_s12 = smov [#allocation17]   ;;  %s9624_s20 = scalar_lea.hbm %s12678_s6, 16 }
  0x7f   : > { %s281_s15 = sshll.u32 %s9769_s12, 4  ;;  %p9625_p13 = scmp.ne.s32.totalorder %s12678_s6, %s9624_s20  ;;  %s282_s15 = int_to_ptr.vmem [resolvable:$true] %s281_s15 }
  0x80   : > { %p9631_p3 = scmp.lt.u32.totalorder %s9624_s20, %s12678_s6 }
  0x81   : > { %p9627_p0 = pnand %p9625_p13, %p9879_p8 }
  0x83   : > { %p9628_p1 = pneg %p9627_p0 }
  0x85   : > { %p9633_p2 = pnand %p9631_p3, %p9628_p1 }
  0x87   : > { %9636 = shalt.err (!%p9633_p2)
}
  0x88   : > { %s9637_s16 = scalar_lea.vmem %s282_s15, 16  ;;  %s9644_s13 = scalar_lea.vmem %s282_s15, 32 }
  0x89   : > { %p9638_p5 = scmp.ne.s32.totalorder %s282_s15, %s9637_s16  ;;  %p9645_p4 = scmp.lt.s32.totalorder %s282_s15, %s282_s15 }
  0x8a   : > { %p9646_p10 = scmp.lt.s32.totalorder %s9644_s13, %s9637_s16 }
  0x8b   : > { %p9640_p7 = pnand %p9638_p5, %p9879_p8 }
  0x8c   : > { %p9647_p11 = por %p9646_p10, %p9645_p4 }
  0x8d   : > { %p9641_p9 = pneg %p9640_p7 }
  0x8f   : > { %p9648_p12 = pnand %p9647_p11, %p9641_p9 }
  0x91   : > { %9651 = shalt.err (!%p9648_p12)
}
  0x92   : > { %9297 = dma.hbm_to_vmem [thread:$0]  (!%p9863_p6), %s12678_s6, 16, %s282_s15, [#allocation16]  }
  0x93   : > { %s8609_s19 = sadd.s32 4294967294, %s9760_s27   ;;  %s10010_s11 = sadd.s32 1, %s9760_s27  }
  0x94   : > { %s30_s12 = ssub.s32 %s9760_s27, %s10010_s11  ;;  %s33_s17 = sadd.s32 1, %s9756_s26 }
  0x95   : > { %p31_p8 = scmp.eq.s32.totalorder %s30_s12, 0  ;;  %p40_p13 = scmp.ne.s32.totalorder %s9756_s26, %s9752_s25 }
  0x96   : > { %p41_p0 = scmp.eq.s32.totalorder %s9760_s27, 0  ;;  %p46_p1 = scmp.ne.s32.totalorder %s9752_s25, %s9748_s24 }
  0x97   : > { %s10021_s18 = scalar_select %p31_p8, %s9756_s26, %s33_s17  }
  0x98   : > { %p10023_p3 = por %p41_p0, %p40_p13  ;;  %p12692_p2 = scmp.eq.s32.totalorder %s9847_s30, 0 }
  0x99   : > { %p196_p5 = scmp.eq.s32.totalorder %s9847_s30, 1  ;;  %p202_p7 = scmp.eq.s32.totalorder %s8609_s19, 1 }
  0x9a   : > { %p10029_p6 = por %p12692_p2, %p46_p1  ;;  %p9312_p9 = scmp.lt.s32.totalorder %s9760_s27, 2 }
  0x9b   : > { %s292_s21 = sand.u32 1, %s9756_s26   ;;  %p10036_p4 = por %p196_p5, %p40_p13 }
  0x9c   : > { %p10040_p10 = por %p202_p7, %p46_p1  ;;  %s8618_s22 = sshll.u32 %s292_s21, 7 }
  0x9d   : > { %s12694_s10 = scalar_select %p10036_p4, 1, 0 }
  0x9e   : > { %s12695_s29 = scalar_select %p10040_p10, 1, 0 }
  0x9f   : > { %s9095_s16 = sshll.u32 %s9760_s27, 11  ;;  %s296_s19 = scalar_lea.vmem [#allocation6], %s8618_s22 }
  0xa0   : > { %s10048_s9 = scalar_lea.hbm %s12672_s0, %s9095_s16  ;;  %s303_s12 = sshll.u32 %s296_s19, 4  ;;  %s10050_s12 = int_to_ptr.vmem [resolvable:$true] %s303_s12 }
  0xa1   : > { %p10054_p11 = pnand %p9312_p9, %p10023_p3  ;;  %s10058_s23 = scalar_lea.sflag [#allocation7], %s292_s21 }
  0xa2   : > { %s9652_s13 = scalar_lea.hbm %s10048_s9, 2048  ;;  %s9657_s20 = scalar_lea.hbm %s12672_s0, 4096 }
  0xa3   : > { %p9653_p12 = scmp.ne.s32.totalorder %s10048_s9, %s9652_s13  ;;  %p9654_p8 = pneg %p10054_p11 }
  0xa4   : > { %p9658_p1 = scmp.lt.u32.totalorder %s10048_s9, %s12672_s0  ;;  %p9659_p3 = scmp.lt.u32.totalorder %s9657_s20, %s9652_s13 }
  0xa5   : > { %p9655_p13 = pnand %p9654_p8, %p9653_p12  ;;  %p9661_p5 = scmp.lt.u32.totalorder %s9652_s13, %s10048_s9 }
  0xa6   : > { %p9660_p2 = por %p9659_p3, %p9658_p1 }
  0xa7   : > { %p9656_p0 = pneg %p9655_p13 }
  0xa8   : > { %p9662_p7 = por %p9661_p5, %p9660_p2 }
  0xaa   : > { %p9663_p9 = pnand %p9662_p7, %p9656_p0 }
  0xac   : > { %9666 = shalt.err (!%p9663_p9)
}
  0xad   : > { %s9667_s21 = scalar_lea.vmem %s10050_s12, 2048  ;;  %s9770_s22 = smov [#allocation6]  }
  0xae   : > { %p9668_p12 = scmp.ne.s32.totalorder %s10050_s12, %s9667_s21  ;;  %s9672_s16 = sshll.u32 %s9770_s22, 4  ;;  %s9673_s16 = int_to_ptr.vmem [resolvable:$false] %s9672_s16 }
  0xaf   : > { %s9674_s14 = scalar_lea.vmem %s9673_s16, 4096  ;;  %p9675_p4 = scmp.lt.s32.totalorder %s10050_s12, %s9673_s16 }
  0xb0   : > { %p9670_p13 = pnand %p9668_p12, %p9654_p8  ;;  %p9676_p1 = scmp.lt.s32.totalorder %s9674_s14, %s9667_s21 }
  0xb2   : > { %p9671_p10 = pneg %p9670_p13  ;;  %p9677_p3 = por %p9676_p1, %p9675_p4 }
  0xb4   : > { %p9678_p2 = pnand %p9677_p3, %p9671_p10 }
  0xb6   : > { %9681 = shalt.err (!%p9678_p2)
}
  0xb7   : > { %s12697_s13 = smov 64   ;;  %p12698_p8 = scmp.ne.s32.totalorder %s12688_s8, 0 }
  0xb8   : > { %9301 = dma.hbm_to_vmem [thread:$0]  (!%p10054_p11), %s10048_s9, 2048, %s10050_s12, %s10058_s23, %s12697_s13, %s12697_s13, %s9766_s28  }
  0xb9   : > { %315 = sbr.rel (%p12698_p8) target bundleno = 1422 (0x58e), region = 48  ;;  %s10092_s20 = sand.u32 (!%p12698_p8), 1, %s9752_s25  }
  0xba   : > { %s8622_s19 = sshll.u32 (!%p12698_p8), %s10092_s20, 7  ;;  %s318_s21 = scalar_lea.sflag (!%p12698_p8), [#allocation7], %s10092_s20 }
  0xbb   : > { %s10096_s22 = scalar_lea.vmem (!%p12698_p8), [#allocation6], %s8622_s19 }
  0xc0   : > { %9727 = dma.done.wait (%p10029_p6), %s318_s21, 2048  }
  0xc1   : > { %9729 = vsyncadd (%p10029_p6), %s318_s21, 4294965248  ;;  %p12699_p4 = scmp.eq.s32.totalorder %s9847_s30, 0 }
  0xc3   : > { %9731 = dma.done.wait (%p12699_p4), [#allocation10], 336   ;;  %p12700_p10 = pmov %p12699_p4 }
  0xc4   : > { %p12701_p11 = pmov %p12699_p4 }
  0xc5   : > { %9733 = vsyncadd (%p12700_p10), [#allocation10], 4294966960 }
  0xc6   : > { %9735 = dma.done.wait (%p12701_p11), [#allocation13], 592   ;;  %p12702_p0 = pmov %p12699_p4 }
  0xc8   : > { %9737 = vsyncadd (%p12702_p0), [#allocation13], 4294966704  ;;  %p12703_p5 = pmov %p12702_p0 }
  0xc9   : > { %p12704_p7 = pmov %p12702_p0 }
  0xca   : > { %9739 = dma.done.wait (%p12703_p5), [#allocation16], 32  }
  0xcb   : > { %9741 = vsyncadd (%p12704_p7), [#allocation16], 4294967264  ;;  %vm377_vm0 = vcmask 27648   ;;  %vm380_vm1 = vcmask 24576   ;;  %v9771_v0 = vmov 0   ;;  %vm1695_vm4 = vcmask 1042432  }
  0xcc   : > { %378 = vst.msk [vmem:[#allocation2] sm:$0xf] %vm377_vm0, %v9771_v0  ;;  %379 = vst.msk [vmem:[#allocation2 + $0x4] sm:$0xf] %vm377_vm0, %v9771_v0  ;;  %vm1099_vm2 = vsmask.f32 3328 }
  0xcd   : > { %381 = vst.msk [vmem:[#allocation2 + $0x8] sm:$0x1] %vm380_vm1, %v9771_v0  ;;  %384 = vst.msk [vmem:[#allocation2 + $0x14] sm:$0x1] %vm380_vm1, %v9771_v0  ;;  %vm1100_vm3 = vsmask.f32 7440 }
  0xce   : > { %382 = vst.msk [vmem:[#allocation2 + $0xc] sm:$0xf] %vm377_vm0, %v9771_v0  ;;  %383 = vst.msk [vmem:[#allocation2 + $0x10] sm:$0xf] %vm377_vm0, %v9771_v0  ;;  %vm1696_vm5 = vcmask 1046532   ;;  %s9772_s8 = smov 8  }
  0xcf   : > { %385 = vst.msk [vmem:[#allocation2 + $0x18] sm:$0xf] %vm377_vm0, %v9771_v0  ;;  %386 = vst.msk [vmem:[#allocation2 + $0x1c] sm:$0xf] %vm377_vm0, %v9771_v0  ;;  %vm12684_vm6 = vsmask.f32 256 }
  0xd0   : > { %387 = vst.msk [vmem:[#allocation2 + $0x20] sm:$0x1] %vm380_vm1, %v9771_v0  ;;  %390 = vst.msk [vmem:[#allocation2 + $0x2c] sm:$0x1] %vm380_vm1, %v9771_v0  ;;  %v433_v1 = vld [vmem:[%s10096_s22] sm:$0xf] }
  0xd1   : > { %388 = vst.msk [vmem:[#allocation2 + $0x24] sm:$0xf] %vm377_vm0, %v9771_v0  ;;  %389 = vst.msk [vmem:[#allocation2 + $0x28] sm:$0xf] %vm377_vm0, %v9771_v0  ;;  %vm466_vm7 = vsmask.f32 4368 }
  0xd2   : > { %391 = vst.msk [vmem:[#allocation2 + $0x30] sm:$0xf] %vm377_vm0, %v9771_v0  ;;  %392 = vst.msk [vmem:[#allocation2 + $0x34] sm:$0xf] %vm377_vm0, %v9771_v0  ;;  %vm12685_vm8 = vsmask.f32 7938 }
  0xd3   : > { %393 = vst.msk [vmem:[#allocation2 + $0x38] sm:$0x1] %vm380_vm1, %v9771_v0  ;;  %396 = vst.msk [vmem:[#allocation2 + $0x44] sm:$0x1] %vm380_vm1, %v9771_v0  ;;  %v1051_v2 = vld [vmem:[#allocation2] sm:$0xf] }
  0xd4   : > { %394 = vst.msk [vmem:[#allocation2 + $0x3c] sm:$0xf] %vm377_vm0, %v9771_v0  ;;  %395 = vst.msk [vmem:[#allocation2 + $0x40] sm:$0xf] %vm377_vm0, %v9771_v0  ;;  %v1052_v3 = vld [vmem:[#allocation2 + $0x4] sm:$0xf] }
  0xd5   : > { %397 = vst.msk [vmem:[#allocation2 + $0x48] sm:$0xf] %vm377_vm0, %v9771_v0  ;;  %398 = vst.msk [vmem:[#allocation2 + $0x4c] sm:$0xf] %vm377_vm0, %v9771_v0  ;;  %v1053_v4 = vld [vmem:[#allocation2 + $0x8] sm:$0x1] }
  0xd6   : > { %399 = vst.msk [vmem:[#allocation2 + $0x50] sm:$0x1] %vm380_vm1, %v9771_v0  ;;  %402 = vst.msk [vmem:[#allocation2 + $0x5c] sm:$0x1] %vm380_vm1, %v9771_v0  ;;  %v434_v5 = vld [vmem:[%s10096_s22 + $0x4] sm:$0xf] }
  0xd7   : > { %400 = vst.msk [vmem:[#allocation2 + $0x54] sm:$0xf] %vm377_vm0, %v9771_v0  ;;  %401 = vst.msk [vmem:[#allocation2 + $0x58] sm:$0xf] %vm377_vm0, %v9771_v0  ;;  %v1103_v6 = vshrl.u32 %v1051_v2, 16  ;;  %v1106_v7 = vshll.u32 %v1051_v2, 16 }
  0xd8   : > { %403 = vst.msk [vmem:[#allocation2 + $0x60] sm:$0xf] %vm377_vm0, %v9771_v0  ;;  %404 = vst.msk [vmem:[#allocation2 + $0x64] sm:$0xf] %vm377_vm0, %v9771_v0  ;;  %v1112_v8 = vshll.u32 %v1052_v3, 16  ;;  %v1116_v9 = vshrl.u32 %v1052_v3, 16 }
  0xd9   : > { %405 = vst.msk [vmem:[#allocation2 + $0x68] sm:$0x1] %vm380_vm1, %v9771_v0  ;;  %408 = vst.msk [vmem:[#allocation2 + $0x74] sm:$0x1] %vm380_vm1, %v9771_v0  ;;  %v1599_v10 = vld [vmem:[#allocation2] sm:$0xe] }
  0xda   : > { %406 = vst.msk [vmem:[#allocation2 + $0x6c] sm:$0xf] %vm377_vm0, %v9771_v0  ;;  %407 = vst.msk [vmem:[#allocation2 + $0x70] sm:$0xf] %vm377_vm0, %v9771_v0  ;;  %v1122_v11 = vshll.u32 %v1053_v4, 16  ;;  %v8662_v14 = vrot.slane %v1599_v10, 9 }
  0xdb   : > { %409 = vst.msk [vmem:[#allocation2 + $0x78] sm:$0xf] %vm377_vm0, %v9771_v0  ;;  %410 = vst.msk [vmem:[#allocation2 + $0x7c] sm:$0xf] %vm377_vm0, %v9771_v0  ;;  %v1600_v12 = vld [vmem:[#allocation2 + $0x4] sm:$0xf] }
  0xdc   : > { %411 = vst.msk [vmem:[#allocation2 + $0x80] sm:$0x1] %vm380_vm1, %v9771_v0  ;;  %414 = vst.msk [vmem:[#allocation2 + $0x8c] sm:$0x1] %vm380_vm1, %v9771_v0  ;;  %v1601_v13 = vld [vmem:[#allocation2 + $0x8] sm:$0x1] }
  0xdd   : > { %412 = vst.msk [vmem:[#allocation2 + $0x84] sm:$0xf] %vm377_vm0, %v9771_v0  ;;  %413 = vst.msk [vmem:[#allocation2 + $0x88] sm:$0xf] %vm377_vm0, %v9771_v0  ;;  %v1105_v15 = vrot.slane %v1103_v6, 4  ;;  %v1108_v16 = vrot.slane %v1106_v7, 5 }
  0xde   : > { %415 = vst.msk [vmem:[#allocation2 + $0x90] sm:$0xf] %vm377_vm0, %v9771_v0  ;;  %416 = vst.msk [vmem:[#allocation2 + $0x94] sm:$0xf] %vm377_vm0, %v9771_v0  ;;  %v1114_v17 = vrot.slane %v1112_v8, 5  ;;  %v1118_v18 = vrot.slane %v1116_v9, 4 }
  0xdf   : > { %417 = vst.msk [vmem:[#allocation2 + $0x98] sm:$0x1] %vm380_vm1, %v9771_v0  ;;  %420 = vst.msk [vmem:[#allocation2 + $0xa4] sm:$0x1] %vm380_vm1, %v9771_v0  ;;  %v1124_v20 = vrot.slane %v1122_v11, 5  ;;  %v1700_v21 = vrot.slane %v1600_v12, 5  ;;  %v1109_v25 = vor.u32 %v1108_v16, %v1105_v15 }
  0xe0   : > { %418 = vst.msk [vmem:[#allocation2 + $0x9c] sm:$0xf] %vm377_vm0, %v9771_v0  ;;  %419 = vst.msk [vmem:[#allocation2 + $0xa0] sm:$0xf] %vm377_vm0, %v9771_v0  ;;  %v1703_v22 = vrot.slane %v1601_v13, 5  ;;  %v469_v23 = vshrl.u32 %v433_v1, 16  ;;  %v1119_v26 = vor.u32 %v1118_v18, %v1114_v17 }
  0xe1   : > { %421 = vst.msk [vmem:[#allocation2 + $0xa8] sm:$0xf] %vm377_vm0, %v9771_v0  ;;  %422 = vst.msk [vmem:[#allocation2 + $0xac] sm:$0xf] %vm377_vm0, %v9771_v0  ;;  %v435_v24 = vld [vmem:[%s10096_s22 + $0x8] sm:$0xf] }
  0xe2   : > { %423 = vst.msk [vmem:[#allocation2 + $0xb0] sm:$0x1] %vm380_vm1, %v9771_v0  ;;  %426 = vst.msk [vmem:[#allocation2 + $0xbc] sm:$0x1] %vm380_vm1, %v9771_v0  ;;  %v472_v27 = vshll.u32 %v433_v1, 16  ;;  %v477_v28 = vshrl.u32 %v434_v5, 16 }
  0xe3   : > { %424 = vst.msk [vmem:[#allocation2 + $0xb4] sm:$0xf] %vm377_vm0, %v9771_v0  ;;  %425 = vst.msk [vmem:[#allocation2 + $0xb8] sm:$0xf] %vm377_vm0, %v9771_v0  ;;  %v1702_v31 = vrot.slane %v1700_v21, 4  ;;  %v471_v32 = vrot.slane %v469_v23, 7 }
  0xe4   : > { %427 = vst.msk [vmem:[#allocation2 + $0xc0] sm:$0xf] %vm377_vm0, %v9771_v0  ;;  %428 = vst.msk [vmem:[#allocation2 + $0xc4] sm:$0xf] %vm377_vm0, %v9771_v0  ;;  %v480_v33 = vshll.u32 %v434_v5, 16  ;;  %v1110_v34 = vrot.slane %v1109_v25, 4 }
  0xe5   : > { %429 = vst.msk [vmem:[#allocation2 + $0xc8] sm:$0x1] %vm380_vm1, %v9771_v0  ;;  %432 = vst.msk [vmem:[#allocation2 + $0xd4] sm:$0x1] %vm380_vm1, %v9771_v0  ;;  %v1120_v35 = vrot.slane %v1119_v26, 4  ;;  %v479_v36 = vrot.slane %v477_v28, 7  ;;  %v474_v42 = vor.u32 %v472_v27, %v471_v32 }
  0xe6   : > { %430 = vst.msk [vmem:[#allocation2 + $0xcc] sm:$0xf] %vm377_vm0, %v9771_v0  ;;  %431 = vst.msk [vmem:[#allocation2 + $0xd0] sm:$0xf] %vm377_vm0, %v9771_v0  ;;  %v792_v38 = vld [vmem:[#allocation2 + $0xc] sm:$0xf] }
  0xe7   : > { %vm10226_vm9 = vmor %vm1695_vm4, %vm1696_vm5  ;;  %v486_v39 = vshrl.u32 %v435_v24, 16  ;;  %v475_v43 = vrot.slane %v471_v32, 4  ;;  %v436_v44 = vld [vmem:[%s10096_s22 + $0xc] sm:$0xf]  ;;  %v489_v45 = vshll.u32 %v435_v24, 16  ;;  %v482_v50 = vor.u32 %v480_v33, %v479_v36  ;;  %s9773_s23 = smov 4  }
  0xe8   : > { %vm10233_vm10 = vmor %vm1099_vm2, %vm1100_vm3  ;;  %v1701_v30 = vsel %vm10226_vm9, %v8662_v14, %v1700_v21  ;;  %v1704_v40 = vsel %vm10226_vm9, %v1702_v31, %v1703_v22  ;;  %v437_v46 = vld [vmem:[%s10096_s22 + $0x10] sm:$0xf]  ;;  %v438_v51 = vld [vmem:[%s10096_s22 + $0x14] sm:$0xf]  ;;  %v484_v53 = vrot.slane %v479_v36, 4  ;;  %v494_v60 = vshrl.u32 %v436_v44, 16 }
  0xe9   : > { %vm10241_vm11 = vmand %vm377_vm0, %vm12685_vm8  ;;  %v1115_v47 = vsel %vm10233_vm10, %v1110_v34, %v1114_v17  ;;  %v1125_v48 = vsel %vm10233_vm10, %v1120_v35, %v1124_v20  ;;  %v8678_v49 = vcombine.low %v1701_v30, %v1704_v40  ;;  %v488_v55 = vrot.slane %v486_v39, 7  ;;  %v801_v56 = vld [vmem:[#allocation2 + $0x18] sm:$0xf]  ;;  %v798_v58 = vld [vmem:[#allocation2 + $0x14] sm:$0x1]  ;;  %s9774_s28 = smov 12  }
  0xea   : > { %vm10249_vm12 = vmor %vm12684_vm6, %vm466_vm7  ;;  %v8646_v52 = vcombine.low %v1115_v47, %v1125_v48  ;;  %v793_v54 = vsel %vm10241_vm11, %v474_v42, %v792_v38  ;;  %v497_v61 = vshll.u32 %v436_v44, 16  ;;  %v503_v62 = vshrl.u32 %v437_v46, 16  ;;  %v439_v63 = vld [vmem:[%s10096_s22 + $0x18] sm:$0xf]  ;;  %v808_v8 = vld [vmem:[#allocation2 + $0x24] sm:$0xf] }
  0xeb   : > { %vm10264_vm13 = vmand %vm380_vm1, %vm12684_vm6  ;;  %1858 = vrot.lane.b32.xlu1 %v8678_v49, %s9772_s8  ;;  %v483_v59 = vsel %vm10249_vm12, %v475_v43, %v482_v50  ;;  %794 = vst [vmem:[#allocation2 + $0xc] sm:$0xf] %v793_v54  ;;  %v491_v1 = vor.u32 %v489_v45, %v488_v55  ;;  %v492_v2 = vrot.slane %v488_v55, 4  ;;  %v506_v3 = vshll.u32 %v437_v46, 16  ;;  %v805_v12 = vld [vmem:[#allocation2 + $0x20] sm:$0x1] }
  0xec   : > { %1534 = vrot.lane.b32.xlu0 %v8646_v52, %s9773_s23  ;;  %795 = vst.msk [vmem:[#allocation2 + $0x10] sm:$0xf] %vm377_vm0, %v483_v59  ;;  %v511_v4 = vshrl.u32 %v438_v51, 16  ;;  %v496_v5 = vrot.slane %v494_v60, 7  ;;  %v505_v6 = vrot.slane %v503_v62, 7  ;;  %v514_v7 = vshll.u32 %v438_v51, 16 }
  0xed   : > { %v799_v9 = vsel %vm10264_vm13, %v484_v53, %v798_v58  ;;  %v802_v10 = vsel %vm10241_vm11, %v491_v1, %v801_v56  ;;  %v520_v13 = vshrl.u32 %v439_v63, 16  ;;  %v523_v14 = vshll.u32 %v439_v63, 16  ;;  %v812_v20 = vld [vmem:[#allocation2 + $0x2c] sm:$0x1]  ;;  %v815_v28 = vld [vmem:[#allocation2 + $0x30] sm:$0xf] }
  0xee   : > { %v513_v11 = vrot.slane %v511_v4, 7  ;;  %800 = vst [vmem:[#allocation2 + $0x14] sm:$0x1] %v799_v9  ;;  %v499_v15 = vor.u32 %v497_v61, %v496_v5  ;;  %v501_v16 = vrot.slane %v496_v5, 4  ;;  %803 = vst [vmem:[#allocation2 + $0x18] sm:$0xf] %v802_v10  ;;  %v508_v17 = vor.u32 %v506_v3, %v505_v6 }
  0xef   : > { %v509_v18 = vrot.slane %v505_v6, 4  ;;  %v10279_v23 = vld [vmem:[%s10096_s22 + $0x1c] sm:$0xf]  ;;  %v10281_v24 = vrot.slane %v520_v13, 7  ;;  %s9775_s15 = smov 24   ;;  %s9776_s9 = smov 20  }
  0xf0   : > { %v516_v21 = vor.u32 %v514_v7, %v513_v11  ;;  %v518_v22 = vrot.slane %v513_v11, 4  ;;  %v500_v25 = vsel %vm10249_vm12, %v492_v2, %v499_v15  ;;  %v809_v26 = vsel %vm10241_vm11, %v508_v17, %v808_v8  ;;  %s9777_s12 = smov 32   ;;  %s9778_s17 = smov 16  }
  0xf1   : > { %v806_v27 = vsel %vm10264_vm13, %v501_v16, %v805_v12  ;;  %804 = vst.msk [vmem:[#allocation2 + $0x1c] sm:$0xf] %vm377_vm0, %v500_v25  ;;  %810 = vst [vmem:[#allocation2 + $0x24] sm:$0xf] %v809_v26  ;;  %v525_v34 = vor.u32 %v523_v14, %v10281_v24  ;;  %v528_v38 = vshrl.u32 %v10279_v23, 16  ;;  %v531_v43 = vshll.u32 %v10279_v23, 16 }
  0xf2   : > { %v517_v30 = vsel %vm10249_vm12, %v509_v18, %v516_v21  ;;  %v2645_v31 = vld [vmem:[#allocation2 + $0xc] sm:$0xe]  ;;  %807 = vst [vmem:[#allocation2 + $0x20] sm:$0x1] %v806_v27  ;;  %v813_v33 = vsel %vm10264_vm13, %v518_v22, %v812_v20  ;;  %s9779_s16 = smov 28   ;;  %vm1034_vm14 = vcmask 31744  }
  0xf3   : > { %v1602_v32 = vld [vmem:[#allocation2 + $0xc] sm:$0xe]  ;;  %811 = vst.msk [vmem:[#allocation2 + $0x28] sm:$0xf] %vm377_vm0, %v517_v30  ;;  %v2646_v36 = vld [vmem:[#allocation2 + $0x10] sm:$0xf]  ;;  %v816_v44 = vsel %vm10241_vm11, %v525_v34, %v815_v28 }
  0xf4   : > { %v9374_v35 = vld [vmem:[#allocation2 + $0xc] sm:$0xff]   ;;  %814 = vst [vmem:[#allocation2 + $0x2c] sm:$0x1] %v813_v33  ;;  %v2743_v39 = vrot.slane %v2646_v36, 5  ;;  %v8726_v46 = vrot.slane %v2645_v31, 9  ;;  %v8663_v51 = vrot.slane %v1602_v32, 9 }
  0xf5   : > { %v1603_v40 = vld [vmem:[#allocation2 + $0x10] sm:$0xf]  ;;  %v10297_v42 = vld [vmem:[#allocation2 + $0xc] sm:$0xf]  ;;  %2035 = vrot.lane.b32.xlu0 %v9374_v35, %s9774_s28  ;;  %v2647_v45 = vld [vmem:[#allocation2 + $0x14] sm:$0x1] }
  0xf6   : > { %v1604_v47 = vld [vmem:[#allocation2 + $0x14] sm:$0x1]  ;;  %v1707_v48 = vrot.slane %v1603_v40, 5  ;;  %817 = vst [vmem:[#allocation2 + $0x30] sm:$0xf] %v816_v44  ;;  %v2745_v49 = vrot.slane %v2743_v39, 4  ;;  %v2744_v62 = vsel %vm10226_vm9, %v8726_v46, %v2743_v39 }
  0xf7   : > { %v2746_v50 = vrot.slane %v2647_v45, 5  ;;  %v3689_v52 = vld [vmem:[#allocation2 + $0x18] sm:$0xe]  ;;  %v1127_v54 = vshrl.u32 %v10297_v42, 16  ;;  %v1710_v56 = vrot.slane %v1604_v47, 5  ;;  %vm1582_vm15 = vcmask 64544  }
  0xf8   : > { %v2648_v53 = vld [vmem:[#allocation2 + $0x18] sm:$0xe]  ;;  %v1709_v55 = vrot.slane %v1707_v48, 4  ;;  %v8790_v58 = vrot.slane %v3689_v52, 9  ;;  %v1708_v5 = vsel %vm10226_vm9, %v8663_v51, %v1707_v48  ;;  %v3690_v6 = vld [vmem:[#allocation2 + $0x1c] sm:$0xf] }
  0xf9   : > { %v8727_v59 = vrot.slane %v2648_v53, 9  ;;  %v2103_v60 = vld [vmem:[#allocation2 + $0x18] sm:$0xf]  ;;  %v2747_v63 = vsel %vm10226_vm9, %v2745_v49, %v2746_v50  ;;  %v3691_v7 = vld [vmem:[#allocation2 + $0x20] sm:$0x1]  ;;  %v3787_v11 = vrot.slane %v3690_v6, 5 }
  0xfa   : > { %v9375_v61 = vld [vmem:[#allocation2 + $0x18] sm:$0xff]   ;;  %v2173_v1 = vshrl.u32 %v2103_v60, 16  ;;  %v2176_v3 = vshll.u32 %v2103_v60, 16  ;;  %v9377_v4 = vld [vmem:[#allocation2 + $0x24] sm:$0xff]   ;;  %v8742_v9 = vcombine.low %v2744_v62, %v2747_v63  ;;  %v1711_v10 = vsel %vm10226_vm9, %v1709_v55, %v1710_v56  ;;  %v2650_v14 = vld [vmem:[#allocation2 + $0x20] sm:$0x1] }
  0xfb   : > { %v9376_v2 = vld [vmem:[#allocation2 + $0x18] sm:$0xff]   ;;  %2037 = vrot.lane.b32.xlu1 %v9375_v61, %s9774_s28  ;;  %v3790_v12 = vrot.slane %v3691_v7, 5  ;;  %v2753_v16 = vrot.slane %v2650_v14, 5  ;;  %v3692_v17 = vld [vmem:[#allocation2 + $0x24] sm:$0xe]  ;;  %v3788_v20 = vsel %vm10226_vm9, %v8790_v58, %v3787_v11  ;;  %v3789_v21 = vrot.slane %v3787_v11, 4 }
  0xfc   : > { %v2175_v8 = vrot.slane %v2173_v1, 4  ;;  %3079 = vrot.lane.b32.xlu0 %v9376_v2, %s9775_s15  ;;  %v2649_v13 = vld [vmem:[#allocation2 + $0x1c] sm:$0xf]  ;;  %v3693_v18 = vld [vmem:[#allocation2 + $0x28] sm:$0xf]  ;;  %v8791_v25 = vrot.slane %v3692_v17, 9  ;;  %v8679_v27 = vcombine.low %v1708_v5, %v1711_v10 }
  0xfd   : > { %v2750_v15 = vrot.slane %v2649_v13, 5  ;;  %v3694_v22 = vld [vmem:[#allocation2 + $0x2c] sm:$0x1]  ;;  %v3794_v26 = vrot.slane %v3693_v18, 5  ;;  %v2104_v32 = vld [vmem:[#allocation2 + $0x1c] sm:$0xf]  ;;  %v3791_v34 = vsel %vm10226_vm9, %v3789_v21, %v3790_v12 }
  0xfe   : > { %v3797_v31 = vrot.slane %v3694_v22, 5  ;;  %v2105_v33 = vld [vmem:[#allocation2 + $0x20] sm:$0x1]  ;;  %v2178_v39 = vrot.slane %v2176_v3, 5  ;;  %v8806_v40 = vcombine.low %v3788_v20, %v3791_v34  ;;  %v2182_v45 = vshll.u32 %v2104_v32, 16  ;;  %s9780_s14 = smov 48  }
  0xff   : > { %3081 = vrot.lane.b32.xlu1 %v9377_v4, %s9775_s15  ;;  %v2751_v28 = vsel %vm10226_vm9, %v8727_v59, %v2750_v15  ;;  %v2752_v30 = vrot.slane %v2750_v15, 4  ;;  %v3795_v35 = vsel %vm10226_vm9, %v8791_v25, %v3794_v26  ;;  %v3796_v36 = vrot.slane %v3794_v26, 4  ;;  %v1055_v47 = vld [vmem:[#allocation2 + $0x10] sm:$0xf]  ;;  %v1056_v52 = vld [vmem:[#allocation2 + $0x14] sm:$0x1] }
 0x100   : > { %2901 = vrot.lane.b32.xlu0 %v8742_v9, %s9776_s9  ;;  %v2186_v46 = vshrl.u32 %v2104_v32, 16  ;;  %v2179_v50 = vor.u32 %v2178_v39, %v2175_v8  ;;  %v2192_v51 = vshll.u32 %v2105_v33, 16  ;;  %v3147_v53 = vld [vmem:[#allocation2 + $0x24] sm:$0xf]  ;;  %v2184_v56 = vrot.slane %v2182_v45, 5  ;;  %s9781_s13 = smov 40  }
 0x101   : > { %v2754_v44 = vsel %vm10226_vm9, %v2752_v30, %v2753_v16  ;;  %v3798_v49 = vsel %vm10226_vm9, %v3796_v36, %v3797_v31  ;;  %v1129_v59 = vrot.slane %v1127_v54, 4  ;;  %v1130_v62 = vshll.u32 %v10297_v42, 16  ;;  %v3148_v1 = vld [vmem:[#allocation2 + $0x28] sm:$0xf]  ;;  %v3149_v5 = vld [vmem:[#allocation2 + $0x2c] sm:$0x1] }
 0x102   : > { %v8743_v48 = vcombine.low %v2751_v28, %v2754_v44  ;;  %v8807_v55 = vcombine.low %v3795_v35, %v3798_v49  ;;  %v2188_v58 = vrot.slane %v2186_v46, 4  ;;  %v2180_v60 = vrot.slane %v2179_v50, 4  ;;  %v2100_v10 = vld [vmem:[#allocation2 + $0xc] sm:$0xf]  ;;  %v2101_v22 = vld [vmem:[#allocation2 + $0x10] sm:$0xf] }
 0x103   : > { %1860 = vrot.lane.b32.xlu1 %v8679_v27, %s9772_s8  ;;  %v2194_v61 = vrot.slane %v2192_v51, 5  ;;  %v1136_v63 = vshll.u32 %v1055_v47, 16  ;;  %v1140_v3 = vshrl.u32 %v1055_v47, 16  ;;  %v1146_v4 = vshll.u32 %v1056_v52, 16  ;;  %v2102_v31 = vld [vmem:[#allocation2 + $0x14] sm:$0x1] }
 0x104   : > { %3945 = vrot.lane.b32.xlu0 %v8806_v40, %s9777_s12  ;;  %v2189_v2 = vor.u32 %v2188_v58, %v2184_v56  ;;  %v3217_v6 = vshrl.u32 %v3147_v53, 16  ;;  %v2185_v7 = vsel %vm10233_vm10, %v2180_v60, %v2184_v56  ;;  %v1132_v8 = vrot.slane %v1130_v62, 5  ;;  %v1057_v45 = vld [vmem:[#allocation2 + $0x18] sm:$0xf]  ;;  %v1058_v50 = vld [vmem:[#allocation2 + $0x1c] sm:$0xf] }
 0x105   : > { %v1138_v9 = vrot.slane %v1136_v63, 5  ;;  %v3220_v54 = vshll.u32 %v3147_v53, 16  ;;  %v1142_v12 = vrot.slane %v1140_v3, 4  ;;  %v1148_v13 = vrot.slane %v1146_v4, 5  ;;  %v1059_v56 = vld [vmem:[#allocation2 + $0x20] sm:$0x1] }
 0x106   : > { %v2190_v11 = vrot.slane %v2189_v2, 4  ;;  %v3219_v42 = vrot.slane %v3217_v6, 4  ;;  %v1133_v14 = vor.u32 %v1132_v8, %v1129_v59  ;;  %v3226_v16 = vshll.u32 %v3148_v1, 16  ;;  %v3144_v58 = vld [vmem:[#allocation2 + $0x18] sm:$0xf]  ;;  %s9782_s19 = smov 64  }
 0x107   : > { %2903 = vrot.lane.b32.xlu1 %v8743_v48, %s9776_s9  ;;  %v3222_v15 = vrot.slane %v3220_v54, 5  ;;  %v3230_v17 = vshrl.u32 %v3148_v1, 16  ;;  %v1143_v20 = vor.u32 %v1142_v12, %v1138_v9  ;;  %v3236_v21 = vshll.u32 %v3149_v5, 16  ;;  %v3145_v8 = vld [vmem:[#allocation2 + $0x1c] sm:$0xf]  ;;  %s9783_s21 = smov 56  }
 0x108   : > { %3947 = vrot.lane.b32.xlu0 %v8807_v55, %s9777_s12  ;;  %v2195_v18 = vsel %vm10233_vm10, %v2190_v11, %v2194_v61  ;;  %v2149_v25 = vshrl.u32 %v2100_v10, 16  ;;  %v1134_v27 = vrot.slane %v1133_v14, 4  ;;  %v3228_v30 = vrot.slane %v3226_v16, 5  ;;  %p12761_p9 = scmp.ne.s32.totalorder %s12694_s10, 0 }
 0x109   : > { %v8711_v26 = vcombine.low %v2185_v7, %v2195_v18  ;;  %v3223_v28 = vor.u32 %v3222_v15, %v3219_v42  ;;  %v1144_v32 = vrot.slane %v1143_v20, 4  ;;  %v3232_v33 = vrot.slane %v3230_v17, 4  ;;  %v3146_v17 = vld [vmem:[#allocation2 + $0x20] sm:$0x1] }
 0x10a   : > { %v3238_v34 = vrot.slane %v3236_v21, 5  ;;  %v2151_v35 = vrot.slane %v2149_v25, 4  ;;  %v1139_v36 = vsel %vm10233_vm10, %v1134_v27, %v1138_v9  ;;  %v2152_v40 = vshll.u32 %v2100_v10, 16  ;;  %v1060_v21 = vld [vmem:[#allocation2 + $0x24] sm:$0xf] }
 0x10b   : > { %2582 = vrot.lane.b32.xlu1 %v8711_v26, %s9778_s17  ;;  %v3224_v39 = vrot.slane %v3223_v28, 4  ;;  %v2158_v44 = vshll.u32 %v2101_v22, 16  ;;  %v1149_v46 = vsel %vm10233_vm10, %v1144_v32, %v1148_v13  ;;  %v3233_v47 = vor.u32 %v3232_v33, %v3228_v30  ;;  %v1061_v28 = vld [vmem:[#allocation2 + $0x28] sm:$0xf] }
 0x10c   : > { %v2162_v48 = vshrl.u32 %v2101_v22, 16  ;;  %v2168_v49 = vshll.u32 %v2102_v31, 16  ;;  %v8647_v51 = vcombine.low %v1139_v36, %v1149_v46  ;;  %v2154_v53 = vrot.slane %v2152_v40, 5 }
 0x10d   : > { %v3229_v52 = vsel %vm10233_vm10, %v3224_v39, %v3228_v30  ;;  %v2160_v55 = vrot.slane %v2158_v44, 5  ;;  %v3234_v59 = vrot.slane %v3233_v47, 4  ;;  %v1151_v62 = vshrl.u32 %v1057_v45, 16 }
 0x10e   : > { %v2164_v60 = vrot.slane %v2162_v48, 4  ;;  %v2170_v61 = vrot.slane %v2168_v49, 5  ;;  %1536 = vrot.lane.b32.xlu0 %v8647_v51, %s9773_s23  ;;  %v2155_v63 = vor.u32 %v2154_v53, %v2151_v35  ;;  %v1154_v1 = vshll.u32 %v1057_v45, 16  ;;  %v1062_v45 = vld [vmem:[#allocation2 + $0x2c] sm:$0x1] }
 0x10f   : > { %v1160_v2 = vshll.u32 %v1058_v50, 16  ;;  %v1164_v3 = vshrl.u32 %v1058_v50, 16  ;;  %v3239_v4 = vsel %vm10233_vm10, %v3234_v59, %v3238_v34  ;;  %v1153_v6 = vrot.slane %v1151_v62, 4  ;;  %v1605_v48 = vld [vmem:[#allocation2 + $0x18] sm:$0xe] }
 0x110   : > { %v2165_v5 = vor.u32 %v2164_v60, %v2160_v55  ;;  %v1170_v7 = vshll.u32 %v1059_v56, 16  ;;  %v8775_v9 = vcombine.low %v3229_v52, %v3239_v4  ;;  %v2156_v54 = vrot.slane %v2155_v63, 4  ;;  %v1606_v53 = vld [vmem:[#allocation2 + $0x1c] sm:$0xf] }
 0x111   : > { %v1156_v10 = vrot.slane %v1154_v1, 5  ;;  %v1162_v11 = vrot.slane %v1160_v2, 5  ;;  %v1166_v13 = vrot.slane %v1164_v3, 4  ;;  %v3193_v14 = vshrl.u32 %v3144_v58, 16 }
 0x112   : > { %v2166_v12 = vrot.slane %v2165_v5, 4  ;;  %v1172_v42 = vrot.slane %v1170_v7, 5  ;;  %3626 = vrot.lane.b32.xlu1 %v8775_v9, %s9779_s16  ;;  %v2161_v15 = vsel %vm10233_vm10, %v2156_v54, %v2160_v55  ;;  %v3196_v18 = vshll.u32 %v3144_v58, 16  ;;  %v1607_v55 = vld [vmem:[#allocation2 + $0x20] sm:$0x1] }
 0x113   : > { %v1157_v16 = vor.u32 %v1156_v10, %v1153_v6  ;;  %v3202_v20 = vshll.u32 %v3145_v8, 16  ;;  %v1167_v25 = vor.u32 %v1166_v13, %v1162_v11  ;;  %v3195_v26 = vrot.slane %v3193_v14, 4  ;;  %v1609_v7 = vld [vmem:[#allocation2 + $0x28] sm:$0xf] }
 0x114   : > { %v2171_v22 = vsel %vm10233_vm10, %v2166_v12, %v2170_v61  ;;  %v3206_v27 = vshrl.u32 %v3145_v8, 16  ;;  %v3198_v32 = vrot.slane %v3196_v18, 5  ;;  %v3212_v36 = vshll.u32 %v3146_v17, 16  ;;  %v1608_v61 = vld [vmem:[#allocation2 + $0x24] sm:$0xe] }
 0x115   : > { %v8710_v30 = vcombine.low %v2161_v15, %v2171_v22  ;;  %v1158_v31 = vrot.slane %v1157_v16, 4  ;;  %v3204_v33 = vrot.slane %v3202_v20, 5  ;;  %v1168_v34 = vrot.slane %v1167_v25, 4  ;;  %v1610_v8 = vld [vmem:[#allocation2 + $0x2c] sm:$0x1] }
 0x116   : > { %v3208_v35 = vrot.slane %v3206_v27, 4  ;;  %v1175_v39 = vshrl.u32 %v1060_v21, 16  ;;  %v3199_v44 = vor.u32 %v3198_v32, %v3195_v26  ;;  %v1178_v46 = vshll.u32 %v1060_v21, 16  ;;  %v2106_v12 = vld [vmem:[#allocation2 + $0x24] sm:$0xf] }
 0x117   : > { %2580 = vrot.lane.b32.xlu0 %v8710_v30, %s9778_s17  ;;  %v1163_v40 = vsel %vm10233_vm10, %v1158_v31, %v1162_v11  ;;  %v1184_v47 = vshll.u32 %v1061_v28, 16  ;;  %v1173_v49 = vsel %vm10233_vm10, %v1168_v34, %v1172_v42  ;;  %v3214_v51 = vrot.slane %v3212_v36, 5  ;;  %v2107_v16 = vld [vmem:[#allocation2 + $0x28] sm:$0xf]  ;;  %v2108_v27 = vld [vmem:[#allocation2 + $0x2c] sm:$0x1] }
 0x118   : > { %v3209_v50 = vor.u32 %v3208_v35, %v3204_v33  ;;  %v1177_v52 = vrot.slane %v1175_v39, 4  ;;  %v8648_v56 = vcombine.low %v1163_v40, %v1173_v49  ;;  %v3200_v58 = vrot.slane %v3199_v44, 4  ;;  %v819_v30 = vld [vmem:[#allocation2 + $0x38] sm:$0x1]  ;;  %v2109_v34 = vld [vmem:[#allocation2 + $0x30] sm:$0xf] }
 0x119   : > { %v1180_v59 = vrot.slane %v1178_v46, 5  ;;  %v1186_v60 = vrot.slane %v1184_v47, 5  ;;  %v1188_v63 = vshrl.u32 %v1061_v28, 16  ;;  %v1194_v1 = vshll.u32 %v1062_v45, 16  ;;  %v2651_v35 = vld [vmem:[#allocation2 + $0x24] sm:$0xe] }
 0x11a   : > { %v3210_v62 = vrot.slane %v3209_v50, 4  ;;  %v8664_v2 = vrot.slane %v1605_v48, 9  ;;  %1538 = vrot.lane.b32.xlu1 %v8648_v56, %s9773_s23  ;;  %v3205_v3 = vsel %vm10233_vm10, %v3200_v58, %v3204_v33  ;;  %v1714_v5 = vrot.slane %v1606_v53, 5  ;;  %v2652_v45 = vld [vmem:[#allocation2 + $0x28] sm:$0xf] }
 0x11b   : > { %v1181_v4 = vor.u32 %v1180_v59, %v1177_v52  ;;  %v1717_v6 = vrot.slane %v1607_v55, 5  ;;  %v1190_v54 = vrot.slane %v1188_v63, 4  ;;  %v1196_v10 = vrot.slane %v1194_v1, 5  ;;  %v2653_v49 = vld [vmem:[#allocation2 + $0x2c] sm:$0x1] }
 0x11c   : > { %v3215_v9 = vsel %vm10233_vm10, %v3210_v62, %v3214_v51  ;;  %v8665_v11 = vrot.slane %v1608_v61, 9  ;;  %v1715_v14 = vsel %vm10226_vm9, %v8664_v2, %v1714_v5  ;;  %v1716_v15 = vrot.slane %v1714_v5, 4  ;;  %v10380_v50 = vld [vmem:[#allocation2 + $0x30] sm:$0xe]  ;;  %v10390_v61 = vld [vmem:[%s10096_s22 + $0x24] sm:$0xf] }
 0x11d   : > { %v8774_v13 = vcombine.low %v3205_v3, %v3215_v9  ;;  %v1182_v42 = vrot.slane %v1181_v4, 4  ;;  %v1191_v17 = vor.u32 %v1190_v54, %v1186_v60  ;;  %v1721_v18 = vrot.slane %v1609_v7, 5  ;;  %v441_v55 = vld [vmem:[%s10096_s22 + $0x20] sm:$0xf] }
 0x11e   : > { %v1724_v20 = vrot.slane %v1610_v8, 5  ;;  %v526_v21 = vrot.slane %v10281_v24, 4  ;;  %v1718_v25 = vsel %vm10226_vm9, %v1716_v15, %v1717_v6  ;;  %v530_v26 = vrot.slane %v528_v38, 7 }
 0x11f   : > { %3624 = vrot.lane.b32.xlu0 %v8774_v13, %s9779_s16  ;;  %v1187_v22 = vsel %vm10233_vm10, %v1182_v42, %v1186_v60  ;;  %v2197_v28 = vshrl.u32 %v2106_v12, 16  ;;  %v1192_v31 = vrot.slane %v1191_v17, 4  ;;  %v8680_v32 = vcombine.low %v1715_v14, %v1718_v25 }
 0x120   : > { %v1722_v33 = vsel %vm10226_vm9, %v8665_v11, %v1721_v18  ;;  %v1723_v24 = vrot.slane %v1721_v18, 4  ;;  %v533_v36 = vor.u32 %v531_v43, %v530_v26  ;;  %v535_v39 = vrot.slane %v530_v26, 4  ;;  %v9378_v43 = vld [vmem:[#allocation2 + $0x24] sm:$0xff]  }
 0x121   : > { %v2199_v40 = vrot.slane %v2197_v28, 4  ;;  %v2200_v44 = vshll.u32 %v2106_v12, 16  ;;  %v1197_v38 = vsel %vm10233_vm10, %v1192_v31, %v1196_v10  ;;  %v2206_v47 = vshll.u32 %v2107_v16, 16  ;;  %v822_v28 = vld [vmem:[#allocation2 + $0x3c] sm:$0xf] }
 0x122   : > { %v1725_v46 = vsel %vm10226_vm9, %v1723_v24, %v1724_v20  ;;  %v2210_v48 = vshrl.u32 %v2107_v16, 16  ;;  %v8649_v51 = vcombine.low %v1187_v22, %v1197_v38  ;;  %v534_v52 = vsel %vm10249_vm12, %v526_v21, %v533_v36 }
 0x123   : > { %1862 = vrot.lane.b32.xlu0 %v8680_v32, %s9772_s8  ;;  %v8681_v23 = vcombine.low %v1722_v33, %v1725_v46  ;;  %v2202_v53 = vrot.slane %v2200_v44, 5  ;;  %818 = vst.msk [vmem:[#allocation2 + $0x34] sm:$0xf] %vm377_vm0, %v534_v52  ;;  %v2208_v56 = vrot.slane %v2206_v47, 5  ;;  %v2216_v59 = vshll.u32 %v2108_v27, 16 }
 0x124   : > { %v2212_v58 = vrot.slane %v2210_v48, 4  ;;  %v820_v60 = vsel %vm10264_vm13, %v535_v39, %v819_v30  ;;  %1540 = vrot.lane.b32.xlu1 %v8649_v51, %s9773_s23  ;;  %v2221_v63 = vshrl.u32 %v2109_v34, 16  ;;  %v2224_v1 = vshll.u32 %v2109_v34, 16  ;;  %v3150_v30 = vld [vmem:[#allocation2 + $0x30] sm:$0xf] }
 0x125   : > { %v2203_v62 = vor.u32 %v2202_v53, %v2199_v40  ;;  %821 = vst [vmem:[#allocation2 + $0x38] sm:$0x1] %v820_v60  ;;  %v8728_v2 = vrot.slane %v2651_v35, 9  ;;  %v2218_v4 = vrot.slane %v2216_v59, 5  ;;  %v2757_v5 = vrot.slane %v2652_v45, 5 }
 0x126   : > { %v2213_v3 = vor.u32 %v2212_v58, %v2208_v56  ;;  %v2760_v6 = vrot.slane %v2653_v49, 5  ;;  %v2223_v8 = vrot.slane %v2221_v63, 4  ;;  %v2226_v9 = vrot.slane %v2224_v1, 5  ;;  %v3695_v58 = vld [vmem:[#allocation2 + $0x30] sm:$0xe] }
 0x127   : > { %2039 = vrot.lane.b32.xlu0 %v9378_v43, %s9774_s28  ;;  %v2204_v7 = vrot.slane %v2203_v62, 4  ;;  %v8729_v54 = vrot.slane %v10380_v50, 9  ;;  %v2758_v11 = vsel %vm10226_vm9, %v8728_v2, %v2757_v5  ;;  %v2759_v12 = vrot.slane %v2757_v5, 4  ;;  %v1063_v1 = vld [vmem:[#allocation2 + $0x30] sm:$0xf] }
 0x128   : > { %v2214_v10 = vrot.slane %v2213_v3, 4  ;;  %v537_v13 = vshrl.u32 %v441_v55, 16  ;;  %1864 = vrot.lane.b32.xlu1 %v8681_v23, %s9772_s8  ;;  %v2227_v14 = vor.u32 %v2226_v9, %v2223_v8  ;;  %v540_v15 = vshll.u32 %v441_v55, 16  ;;  %v826_v23 = vld [vmem:[#allocation2 + $0x44] sm:$0x1] }
 0x129   : > { %v2209_v42 = vsel %vm10233_vm10, %v2204_v7, %v2208_v56  ;;  %v545_v16 = vshrl.u32 %v10390_v61, 16  ;;  %v2761_v18 = vsel %vm10226_vm9, %v2759_v12, %v2760_v6  ;;  %v548_v21 = vshll.u32 %v10390_v61, 16 }
 0x12a   : > { %v2219_v17 = vsel %vm10233_vm10, %v2214_v10, %v2218_v4  ;;  %v539_v20 = vrot.slane %v537_v13, 7  ;;  %v9379_v22 = vld [vmem:[#allocation2 + $0x30] sm:$0xff]   ;;  %v2228_v27 = vrot.slane %v2227_v14, 4  ;;  %v8744_v36 = vcombine.low %v2758_v11, %v2761_v18 }
 0x12b   : > { %v8712_v25 = vcombine.low %v2209_v42, %v2219_v17  ;;  %v2110_v26 = vld [vmem:[#allocation2 + $0x34] sm:$0xf]  ;;  %v547_v50 = vrot.slane %v545_v16, 7  ;;  %v3241_v56 = vshrl.u32 %v3150_v30, 16  ;;  %v3244_v63 = vshll.u32 %v3150_v30, 16 }
 0x12c   : > { %v2111_v31 = vld [vmem:[#allocation2 + $0x38] sm:$0x1]  ;;  %v2230_v32 = vshll.u32 %v2110_v26, 16  ;;  %v2234_v33 = vshrl.u32 %v2110_v26, 16  ;;  %v2655_v24 = vld [vmem:[#allocation2 + $0x34] sm:$0xf]  ;;  %v542_v34 = vor.u32 %v540_v15, %v539_v20  ;;  %2041 = vrot.lane.b32.xlu1 %v9379_v22, %s9774_s28 }
 0x12d   : > { %2584 = vrot.lane.b32.xlu0 %v8712_v25, %s9778_s17  ;;  %v2240_v35 = vshll.u32 %v2111_v31, 16  ;;  %v2656_v39 = vld [vmem:[#allocation2 + $0x38] sm:$0x1]  ;;  %v2764_v40 = vrot.slane %v2655_v24, 5  ;;  %v543_v46 = vrot.slane %v539_v20, 4  ;;  %v9380_v60 = vld [vmem:[#allocation2 + $0x30] sm:$0xff]   ;;  %v550_v61 = vor.u32 %v548_v21, %v547_v50 }
 0x12e   : > { %v2232_v44 = vrot.slane %v2230_v32, 5  ;;  %v2236_v45 = vrot.slane %v2234_v33, 4  ;;  %v2767_v38 = vrot.slane %v2656_v39, 5  ;;  %v3151_v51 = vld [vmem:[#allocation2 + $0x34] sm:$0xf]  ;;  %v823_v53 = vsel %vm10241_vm11, %v542_v34, %v822_v28 }
 0x12f   : > { %v2242_v47 = vrot.slane %v2240_v35, 5  ;;  %v10410_v48 = vsel %vm10226_vm9, %v8729_v54, %v2764_v40  ;;  %v2766_v49 = vrot.slane %v2764_v40, 4  ;;  %v3152_v55 = vld [vmem:[#allocation2 + $0x38] sm:$0x1]  ;;  %v552_v62 = vrot.slane %v547_v50, 4 }
 0x130   : > { %v2233_v43 = vsel %vm10233_vm10, %v2228_v27, %v2232_v44  ;;  %v2237_v52 = vor.u32 %v2236_v45, %v2232_v44  ;;  %824 = vst [vmem:[#allocation2 + $0x3c] sm:$0xf] %v823_v53  ;;  %v3243_v4 = vrot.slane %v3241_v56, 4  ;;  %v3250_v5 = vshll.u32 %v3151_v51, 16  ;;  %v3696_v6 = vld [vmem:[#allocation2 + $0x34] sm:$0xf] }
 0x131   : > { %2905 = vrot.lane.b32.xlu0 %v8744_v36, %s9776_s9  ;;  %v2768_v59 = vsel %vm10226_vm9, %v2766_v49, %v2767_v38  ;;  %v551_v7 = vsel %vm10249_vm12, %v543_v46, %v550_v61  ;;  %v3246_v8 = vrot.slane %v3244_v63, 5  ;;  %v3254_v9 = vshrl.u32 %v3151_v51, 16  ;;  %v3697_v10 = vld [vmem:[#allocation2 + $0x38] sm:$0x1]  ;;  %v1064_v14 = vld [vmem:[#allocation2 + $0x34] sm:$0xf] }
 0x132   : > { %v2238_v2 = vrot.slane %v2237_v52, 4  ;;  %v8745_v3 = vcombine.low %v10410_v48, %v2768_v59  ;;  %v3260_v54 = vshll.u32 %v3152_v55, 16  ;;  %825 = vst.msk [vmem:[#allocation2 + $0x40] sm:$0xf] %vm377_vm0, %v551_v7  ;;  %v3252_v12 = vrot.slane %v3250_v5, 5 }
 0x133   : > { %v827_v13 = vsel %vm10264_vm13, %v552_v62, %v826_v23  ;;  %v8792_v42 = vrot.slane %v3695_v58, 9  ;;  %v3247_v16 = vor.u32 %v3246_v8, %v3243_v4  ;;  %v3256_v17 = vrot.slane %v3254_v9, 4  ;;  %v1065_v40 = vld [vmem:[#allocation2 + $0x38] sm:$0x1] }
 0x134   : > { %v2243_v11 = vsel %vm10233_vm10, %v2238_v2, %v2242_v47  ;;  %v3262_v18 = vrot.slane %v3260_v54, 5  ;;  %828 = vst [vmem:[#allocation2 + $0x44] sm:$0x1] %v827_v13  ;;  %v3801_v20 = vrot.slane %v3696_v6, 5  ;;  %v3804_v21 = vrot.slane %v3697_v10, 5 }
 0x135   : > { %v8713_v15 = vcombine.low %v2233_v43, %v2243_v11  ;;  %3083 = vrot.lane.b32.xlu0 %v9380_v60, %s9775_s15  ;;  %v1199_v22 = vshrl.u32 %v1063_v1, 16  ;;  %v1202_v25 = vshll.u32 %v1063_v1, 16  ;;  %v3248_v26 = vrot.slane %v3247_v16, 4  ;;  %v1611_v54 = vld [vmem:[#allocation2 + $0x30] sm:$0xe] }
 0x136   : > { %v3257_v27 = vor.u32 %v3256_v17, %v3252_v12  ;;  %v1208_v28 = vshll.u32 %v1064_v14, 16  ;;  %v1212_v30 = vshrl.u32 %v1064_v14, 16  ;;  %v3802_v32 = vsel %vm10226_vm9, %v8792_v42, %v3801_v20 }
 0x137   : > { %2586 = vrot.lane.b32.xlu1 %v8713_v15, %s9778_s17  ;;  %v3153_v31 = vld [vmem:[#allocation2 + $0x3c] sm:$0xf]  ;;  %v3803_v33 = vrot.slane %v3801_v20, 4  ;;  %v1201_v24 = vrot.slane %v1199_v22, 4  ;;  %v3253_v34 = vsel %vm10233_vm10, %v3248_v26, %v3252_v12  ;;  %v1204_v45 = vrot.slane %v1202_v25, 5 }
 0x138   : > { %v3258_v35 = vrot.slane %v3257_v27, 4  ;;  %v3265_v36 = vshrl.u32 %v3153_v31, 16  ;;  %v3268_v39 = vshll.u32 %v3153_v31, 16  ;;  %v1210_v38 = vrot.slane %v1208_v28, 5  ;;  %v3698_v47 = vld [vmem:[#allocation2 + $0x3c] sm:$0xe] }
 0x139   : > { %v3805_v44 = vsel %vm10226_vm9, %v3803_v33, %v3804_v21  ;;  %v1214_v46 = vrot.slane %v1212_v30, 4  ;;  %v9381_v48 = vld [vmem:[#allocation2 + $0x3c] sm:$0xff]   ;;  %v1205_v59 = vor.u32 %v1204_v45, %v1201_v24  ;;  %v1218_v61 = vshll.u32 %v1065_v40, 16  ;;  %v1612_v20 = vld [vmem:[#allocation2 + $0x34] sm:$0xf] }
 0x13a   : > { %v3263_v49 = vsel %vm10233_vm10, %v3258_v35, %v3262_v18  ;;  %v3154_v50 = vld [vmem:[#allocation2 + $0x40] sm:$0xf]  ;;  %v3267_v51 = vrot.slane %v3265_v36, 4  ;;  %v8808_v23 = vcombine.low %v3802_v32, %v3805_v44  ;;  %v3270_v53 = vrot.slane %v3268_v39, 5  ;;  %v1066_v5 = vld [vmem:[#allocation2 + $0x3c] sm:$0xf] }
 0x13b   : > { %2907 = vrot.lane.b32.xlu1 %v8745_v3, %s9776_s9  ;;  %v8776_v43 = vcombine.low %v3253_v34, %v3263_v49  ;;  %v3155_v52 = vld [vmem:[#allocation2 + $0x44] sm:$0x1]  ;;  %v3274_v55 = vshll.u32 %v3154_v50, 16  ;;  %v3278_v56 = vshrl.u32 %v3154_v50, 16  ;;  %v1215_v60 = vor.u32 %v1214_v46, %v1210_v38  ;;  %v3699_v62 = vld [vmem:[#allocation2 + $0x40] sm:$0xf] }
 0x13c   : > { %v3284_v58 = vshll.u32 %v3155_v52, 16  ;;  %v3700_v63 = vld [vmem:[#allocation2 + $0x44] sm:$0x1]  ;;  %v3271_v1 = vor.u32 %v3270_v53, %v3267_v51  ;;  %v8793_v4 = vrot.slane %v3698_v47, 9  ;;  %v1206_v7 = vrot.slane %v1205_v59, 4  ;;  %v9395_v28 = vld [vmem:[#allocation9] sm:$0xff]  }
 0x13d   : > { %3628 = vrot.lane.b32.xlu0 %v8776_v43, %s9779_s16  ;;  %v3276_v2 = vrot.slane %v3274_v55, 5  ;;  %v3280_v3 = vrot.slane %v3278_v56, 4  ;;  %v1216_v8 = vrot.slane %v1215_v60, 4  ;;  %v1220_v9 = vrot.slane %v1218_v61, 5  ;;  %v1067_v42 = vld [vmem:[#allocation2 + $0x40] sm:$0xf]  ;;  %9169 = vmatprep.subr.bf16.mxu0 %v9395_v28 }
 0x13e   : > { %v3286_v6 = vrot.slane %v3284_v58, 5  ;;  %v3272_v10 = vrot.slane %v3271_v1, 4  ;;  %v3808_v12 = vrot.slane %v3699_v62, 5  ;;  %v3811_v13 = vrot.slane %v3700_v63, 5  ;;  %v1068_v16 = vld [vmem:[#allocation2 + $0x44] sm:$0x1]  ;;  %9170 = vmatpush3.bf16.msra.mxu0 %v9395_v28 }
 0x13f   : > { %3085 = vrot.lane.b32.xlu1 %v9381_v48, %s9775_s15  ;;  %v3281_v11 = vor.u32 %v3280_v3, %v3276_v2  ;;  %v1211_v14 = vsel %vm10233_vm10, %v1206_v7, %v1210_v38  ;;  %v1221_v15 = vsel %vm10233_vm10, %v1216_v8, %v1220_v9  ;;  %v1223_v17 = vshrl.u32 %v1066_v5, 16  ;;  %v1613_v27 = vld [vmem:[#allocation2 + $0x38] sm:$0x1]  ;;  %v1614_v24 = vld [vmem:[#allocation2 + $0x3c] sm:$0xe] }
 0x140   : > { %v1226_v18 = vshll.u32 %v1066_v5, 16  ;;  %v3277_v21 = vsel %vm10233_vm10, %v3272_v10, %v3276_v2  ;;  %v8650_v25 = vcombine.low %v1211_v14, %v1221_v15  ;;  %v3809_v26 = vsel %vm10226_vm9, %v8793_v4, %v3808_v12  ;;  %v1615_v40 = vld [vmem:[#allocation2 + $0x40] sm:$0xf]  ;;  %v1616_v47 = vld [vmem:[#allocation2 + $0x44] sm:$0x1]  ;;  %v9398_v48 = vld [vmem:[#allocation9 + $0x8] sm:$0xff]  }
 0x141   : > { %v3282_v22 = vrot.slane %v3281_v11, 4  ;;  %3949 = vrot.lane.b32.xlu0 %v8808_v23, %s9777_s12  ;;  %v3810_v30 = vrot.slane %v3808_v12, 4  ;;  %v1225_v31 = vrot.slane %v1223_v17, 4  ;;  %v1232_v33 = vshll.u32 %v1067_v42, 16  ;;  %v443_v43 = vld [vmem:[%s10096_s22 + $0x28] sm:$0xf]  ;;  %9171 = vmatprep.subr.bf16.mxu0 %v9398_v48 }
 0x142   : > { %v1228_v32 = vrot.slane %v1226_v18, 5  ;;  %v1236_v35 = vshrl.u32 %v1067_v42, 16  ;;  %v1242_v36 = vshll.u32 %v1068_v16, 16  ;;  %v8666_v39 = vrot.slane %v1611_v54, 9  ;;  %v444_v58 = vld [vmem:[%s10096_s22 + $0x2c] sm:$0xf]  ;;  %9172 = vmatpush3.bf16.msra.mxu0 %v9398_v48 }
 0x143   : > { %v3287_v34 = vsel %vm10233_vm10, %v3282_v22, %v3286_v6  ;;  %v3812_v45 = vsel %vm10226_vm9, %v3810_v30, %v3811_v13  ;;  %v1234_v46 = vrot.slane %v1232_v33, 5  ;;  %v1728_v23 = vrot.slane %v1612_v20, 5  ;;  %v2112_v4 = vld [vmem:[#allocation2 + $0x3c] sm:$0xf]  ;;  %v2113_v5 = vld [vmem:[#allocation2 + $0x40] sm:$0xf] }
 0x144   : > { %v8777_v44 = vcombine.low %v3277_v21, %v3287_v34  ;;  %v1229_v38 = vor.u32 %v1228_v32, %v1225_v31  ;;  %v8809_v49 = vcombine.low %v3809_v26, %v3812_v45  ;;  %v1238_v50 = vrot.slane %v1236_v35, 4  ;;  %v829_v54 = vld [vmem:[#allocation2 + $0x48] sm:$0xf]  ;;  %v2114_v10 = vld [vmem:[#allocation2 + $0x44] sm:$0x1]  ;;  %v9382_v13 = vld [vmem:[#allocation2 + $0x3c] sm:$0xff]  }
 0x145   : > { %v1244_v51 = vrot.slane %v1242_v36, 5  ;;  %v1731_v53 = vrot.slane %v1613_v27, 5  ;;  %v8667_v55 = vrot.slane %v1614_v24, 9  ;;  %v1735_v56 = vrot.slane %v1615_v40, 5  ;;  %v833_v15 = vld [vmem:[#allocation2 + $0x50] sm:$0x1] }
 0x146   : > { %3630 = vrot.lane.b32.xlu1 %v8777_v44, %s9779_s16  ;;  %v1230_v52 = vrot.slane %v1229_v38, 4  ;;  %3951 = vrot.lane.b32.xlu0 %v8809_v49, %s9777_s12  ;;  %v1239_v59 = vor.u32 %v1238_v50, %v1234_v46  ;;  %v1729_v60 = vsel %vm10226_vm9, %v8666_v39, %v1728_v23  ;;  %v1730_v61 = vrot.slane %v1728_v23, 4  ;;  %v2657_v16 = vld [vmem:[#allocation2 + $0x3c] sm:$0xe]  ;;  %v2658_v22 = vld [vmem:[#allocation2 + $0x40] sm:$0xf] }
 0x147   : > { %v1738_v62 = vrot.slane %v1616_v47, 5  ;;  %v1736_v1 = vsel %vm10226_vm9, %v8667_v55, %v1735_v56  ;;  %v1737_v2 = vrot.slane %v1735_v56, 4  ;;  %v554_v3 = vshrl.u32 %v443_v43, 16  ;;  %v2659_v30 = vld [vmem:[#allocation2 + $0x44] sm:$0x1] }
 0x148   : > { %v1235_v63 = vsel %vm10233_vm10, %v1230_v52, %v1234_v46  ;;  %v1240_v6 = vrot.slane %v1239_v59, 4  ;;  %v1732_v7 = vsel %vm10226_vm9, %v1730_v61, %v1731_v53  ;;  %v557_v8 = vshll.u32 %v443_v43, 16  ;;  %v445_v31 = vld [vmem:[%s10096_s22 + $0x30] sm:$0xf]  ;;  %v446_v32 = vld [vmem:[%s10096_s22 + $0x34] sm:$0xf] }
 0x149   : > { %v562_v9 = vshrl.u32 %v444_v58, 16  ;;  %v8682_v11 = vcombine.low %v1729_v60, %v1732_v7  ;;  %v1739_v12 = vsel %vm10226_vm9, %v1737_v2, %v1738_v62  ;;  %v556_v42 = vrot.slane %v554_v3, 7 }
 0x14a   : > { %1542 = vrot.lane.b32.xlu1 %v8650_v25, %s9773_s23  ;;  %v565_v14 = vshll.u32 %v444_v58, 16  ;;  %v1245_v17 = vsel %vm10233_vm10, %v1240_v6, %v1244_v51  ;;  %v8683_v18 = vcombine.low %v1736_v1, %v1739_v12  ;;  %v2245_v21 = vshrl.u32 %v2112_v4, 16  ;;  %v836_v1 = vld [vmem:[#allocation2 + $0x54] sm:$0xf] }
 0x14b   : > { %v564_v20 = vrot.slane %v562_v9, 7  ;;  %v8651_v26 = vcombine.low %v1235_v63, %v1245_v17  ;;  %1866 = vrot.lane.b32.xlu0 %v8682_v11, %s9772_s8  ;;  %v559_v25 = vor.u32 %v557_v8, %v556_v42  ;;  %v560_v27 = vrot.slane %v556_v42, 4 }
 0x14c   : > { %v2248_v28 = vshll.u32 %v2112_v4, 16  ;;  %v2247_v34 = vrot.slane %v2245_v21, 4  ;;  %v2254_v35 = vshll.u32 %v2113_v5, 16  ;;  %v2258_v40 = vshrl.u32 %v2113_v5, 16 }
 0x14d   : > { %v567_v33 = vor.u32 %v565_v14, %v564_v20  ;;  %v569_v24 = vrot.slane %v564_v20, 4  ;;  %v830_v36 = vsel %vm10241_vm11, %v559_v25, %v829_v54  ;;  %v2264_v44 = vshll.u32 %v2114_v10, 16  ;;  %v10495_v54 = vld [vmem:[%s10096_s22 + $0x38] sm:$0xf] }
 0x14e   : > { %1544 = vrot.lane.b32.xlu1 %v8651_v26, %s9773_s23  ;;  %v2250_v39 = vrot.slane %v2248_v28, 5  ;;  %831 = vst [vmem:[#allocation2 + $0x48] sm:$0xf] %v830_v36  ;;  %v2256_v38 = vrot.slane %v2254_v35, 5  ;;  %v8730_v47 = vrot.slane %v2657_v16, 9  ;;  %v2260_v49 = vrot.slane %v2258_v40, 4 }
 0x14f   : > { %v568_v45 = vsel %vm10249_vm12, %v560_v27, %v567_v33  ;;  %v834_v46 = vsel %vm10264_vm13, %v569_v24, %v833_v15  ;;  %2043 = vrot.lane.b32.xlu0 %v9382_v13, %s9774_s28  ;;  %v2266_v50 = vrot.slane %v2264_v44, 5  ;;  %v2771_v51 = vrot.slane %v2658_v22, 5  ;;  %v840_v33 = vld [vmem:[#allocation2 + $0x5c] sm:$0x1] }
 0x150   : > { %832 = vst.msk [vmem:[#allocation2 + $0x4c] sm:$0xf] %vm377_vm0, %v568_v45  ;;  %v2251_v48 = vor.u32 %v2250_v39, %v2247_v34  ;;  %835 = vst [vmem:[#allocation2 + $0x50] sm:$0x1] %v834_v46  ;;  %v2774_v23 = vrot.slane %v2659_v30, 5  ;;  %v571_v43 = vshrl.u32 %v445_v31, 16  ;;  %v2261_v56 = vor.u32 %v2260_v49, %v2256_v38 }
 0x151   : > { %v574_v52 = vshll.u32 %v445_v31, 16  ;;  %v579_v53 = vshrl.u32 %v446_v32, 16  ;;  %v2773_v58 = vrot.slane %v2771_v51, 4  ;;  %v582_v61 = vshll.u32 %v446_v32, 16 }
 0x152   : > { %1868 = vrot.lane.b32.xlu1 %v8683_v18, %s9772_s8  ;;  %v2252_v55 = vrot.slane %v2251_v48, 4  ;;  %v573_v59 = vrot.slane %v571_v43, 7  ;;  %v2262_v63 = vrot.slane %v2261_v56, 4  ;;  %v2772_v7 = vsel %vm10226_vm9, %v8730_v47, %v2771_v51 }
 0x153   : > { %v10483_v60 = vrot.slane %v579_v53, 7  ;;  %v2775_v8 = vsel %vm10226_vm9, %v2773_v58, %v2774_v23  ;;  %v588_v36 = vshrl.u32 %v10495_v54, 16  ;;  %vm1906_vm1 = vcmask 97344  }
 0x154   : > { %v2257_v62 = vsel %vm10233_vm10, %v2252_v55, %v2256_v38  ;;  %v576_v2 = vor.u32 %v574_v52, %v573_v59  ;;  %v577_v3 = vrot.slane %v573_v59, 4  ;;  %v2267_v5 = vsel %vm10233_vm10, %v2262_v63, %v2266_v50 }
 0x155   : > { %v584_v4 = vor.u32 %v582_v61, %v10483_v60  ;;  %v2115_v6 = vld [vmem:[#allocation2 + $0x48] sm:$0xf]  ;;  %v8714_v11 = vcombine.low %v2257_v62, %v2267_v5  ;;  %v8746_v26 = vcombine.low %v2772_v7, %v2775_v8  ;;  %v586_v35 = vrot.slane %v10483_v60, 4 }
 0x156   : > { %v2660_v9 = vld [vmem:[#allocation2 + $0x48] sm:$0xe]  ;;  %v2269_v13 = vshrl.u32 %v2115_v6, 16  ;;  %v837_v14 = vsel %vm10241_vm11, %v576_v2, %v836_v1  ;;  %v2272_v16 = vshll.u32 %v2115_v6, 16  ;;  %v591_v61 = vshll.u32 %v10495_v54, 16  ;;  %v9403_v54 = vld [vmem:[#allocation2 + $0x30] sm:$0xff]  }
 0x157   : > { %v9383_v10 = vld [vmem:[#allocation2 + $0x48] sm:$0xff]   ;;  %v585_v42 = vsel %vm10249_vm12, %v577_v3, %v584_v4  ;;  %v2117_v15 = vld [vmem:[#allocation2 + $0x50] sm:$0x1]  ;;  %v8731_v20 = vrot.slane %v2660_v9, 9  ;;  %838 = vst [vmem:[#allocation2 + $0x54] sm:$0xf] %v837_v14  ;;  %2588 = vrot.lane.b32.xlu0 %v8714_v11, %s9778_s17  ;;  %v841_v60 = vsel %vm10264_vm13, %v586_v35, %v840_v33 }
 0x158   : > { %v2116_v12 = vld [vmem:[#allocation2 + $0x4c] sm:$0xf]  ;;  %839 = vst.msk [vmem:[#allocation2 + $0x58] sm:$0xf] %vm377_vm0, %v585_v42  ;;  %2045 = vrot.lane.b32.xlu1 %v9383_v10, %s9774_s28  ;;  %v2271_v21 = vrot.slane %v2269_v13, 4  ;;  %v2288_v22 = vshll.u32 %v2117_v15, 16 }
 0x159   : > { %v2278_v17 = vshll.u32 %v2116_v12, 16  ;;  %v2282_v18 = vshrl.u32 %v2116_v12, 16  ;;  %v2661_v25 = vld [vmem:[#allocation2 + $0x4c] sm:$0xf]  ;;  %v2662_v27 = vld [vmem:[#allocation2 + $0x50] sm:$0x1] }
 0x15a   : > { %v2274_v28 = vrot.slane %v2272_v16, 5  ;;  %v2778_v32 = vrot.slane %v2661_v25, 5  ;;  %v2290_v24 = vrot.slane %v2288_v22, 5  ;;  %v2781_v34 = vrot.slane %v2662_v27, 5  ;;  %v9384_v38 = vld [vmem:[#allocation2 + $0x48] sm:$0xff]   ;;  %1039 = vst.msk [vmem:[#allocation3 + $0x20] sm:$0xff] %vm1034_vm14, %v9403_v54 }
 0x15b   : > { %v2280_v30 = vrot.slane %v2278_v17, 5  ;;  %v2284_v31 = vrot.slane %v2282_v18, 4  ;;  %v3156_v46 = vld [vmem:[#allocation2 + $0x48] sm:$0xf]  ;;  %v3157_v47 = vld [vmem:[#allocation2 + $0x4c] sm:$0xf]  ;;  %2909 = vrot.lane.b32.xlu0 %v8746_v26, %s9776_s9 }
 0x15c   : > { %v2275_v39 = vor.u32 %v2274_v28, %v2271_v21  ;;  %v10508_v44 = vsel %vm10226_vm9, %v8731_v20, %v2778_v32  ;;  %v2780_v45 = vrot.slane %v2778_v32, 4  ;;  %v3158_v48 = vld [vmem:[#allocation2 + $0x50] sm:$0x1]  ;;  %v3289_v49 = vshrl.u32 %v3156_v46, 16  ;;  %v3701_v56 = vld [vmem:[#allocation2 + $0x48] sm:$0xe] }
 0x15d   : > { %v2285_v40 = vor.u32 %v2284_v31, %v2280_v30  ;;  %v3292_v50 = vshll.u32 %v3156_v46, 16  ;;  %v3298_v51 = vshll.u32 %v3157_v47, 16  ;;  %v3302_v23 = vshrl.u32 %v3157_v47, 16  ;;  %842 = vst [vmem:[#allocation2 + $0x5c] sm:$0x1] %v841_v60  ;;  %v10527_v33 = vpop.permute.xlu1 %1858 }
 0x15e   : > { %v2276_v43 = vrot.slane %v2275_v39, 4  ;;  %v2782_v53 = vsel %vm10226_vm9, %v2780_v45, %v2781_v34  ;;  %v3308_v55 = vshll.u32 %v3158_v48, 16  ;;  %v3291_v59 = vrot.slane %v3289_v49, 4  ;;  %v3159_v3 = vld [vmem:[#allocation2 + $0x54] sm:$0xf]  ;;  %v10521_v5 = vpop.permute.xlu0 %1534 }
 0x15f   : > { %v2286_v52 = vrot.slane %v2285_v40, 4  ;;  %v8747_v58 = vcombine.low %v10508_v44, %v2782_v53  ;;  %v3294_v1 = vrot.slane %v3292_v50, 5  ;;  %v3300_v2 = vrot.slane %v3298_v51, 5  ;;  %v3160_v4 = vld [vmem:[#allocation2 + $0x58] sm:$0xf]  ;;  %3087 = vrot.lane.b32.xlu0 %v9384_v38, %s9775_s15 }
 0x160   : > { %v2281_v62 = vsel %vm10233_vm10, %v2276_v43, %v2280_v30  ;;  %v3304_v7 = vrot.slane %v3302_v23, 4  ;;  %v3310_v8 = vrot.slane %v3308_v55, 5  ;;  %v3313_v9 = vshrl.u32 %v3159_v3, 16  ;;  %v3702_v10 = vld [vmem:[#allocation2 + $0x4c] sm:$0xf] }
 0x161   : > { %v2291_v63 = vsel %vm10233_vm10, %v2286_v52, %v2290_v24  ;;  %v3295_v11 = vor.u32 %v3294_v1, %v3291_v59  ;;  %v3316_v12 = vshll.u32 %v3159_v3, 16  ;;  %v3322_v13 = vshll.u32 %v3160_v4, 16  ;;  %v3703_v14 = vld [vmem:[#allocation2 + $0x50] sm:$0x1]  ;;  %v1069_v20 = vld [vmem:[#allocation2 + $0x48] sm:$0xf] }
 0x162   : > { %v8715_v6 = vcombine.low %v2281_v62, %v2291_v63  ;;  %v3326_v42 = vshrl.u32 %v3160_v4, 16  ;;  %v3305_v15 = vor.u32 %v3304_v7, %v3300_v2  ;;  %v3315_v16 = vrot.slane %v3313_v9, 4  ;;  %v1070_v27 = vld [vmem:[#allocation2 + $0x4c] sm:$0xf]  ;;  %v9385_v24 = vld [vmem:[#allocation2 + $0x54] sm:$0xff]  }
 0x163   : > { %v8794_v17 = vrot.slane %v3701_v56, 9  ;;  %v3815_v18 = vrot.slane %v3702_v10, 5  ;;  %v3296_v21 = vrot.slane %v3295_v11, 4  ;;  %v3318_v22 = vrot.slane %v3316_v12, 5  ;;  %v1071_v40 = vld [vmem:[#allocation2 + $0x50] sm:$0x1] }
 0x164   : > { %2590 = vrot.lane.b32.xlu1 %v8715_v6, %s9778_s17  ;;  %v3324_v26 = vrot.slane %v3322_v13, 5  ;;  %v3328_v25 = vrot.slane %v3326_v42, 4  ;;  %v3306_v28 = vrot.slane %v3305_v15, 4  ;;  %v3818_v32 = vrot.slane %v3703_v14, 5  ;;  %v3704_v45 = vld [vmem:[#allocation2 + $0x54] sm:$0xe] }
 0x165   : > { %v3816_v30 = vsel %vm10226_vm9, %v8794_v17, %v3815_v18  ;;  %v3817_v31 = vrot.slane %v3815_v18, 4  ;;  %v3301_v34 = vsel %vm10233_vm10, %v3296_v21, %v3300_v2  ;;  %v3319_v35 = vor.u32 %v3318_v22, %v3315_v16  ;;  %v3161_v47 = vld [vmem:[#allocation2 + $0x5c] sm:$0x1]  ;;  %v3705_v51 = vld [vmem:[#allocation2 + $0x58] sm:$0xf] }
 0x166   : > { %v3329_v39 = vor.u32 %v3328_v25, %v3324_v26  ;;  %v1247_v44 = vshrl.u32 %v1069_v20, 16  ;;  %v3311_v46 = vsel %vm10233_vm10, %v3306_v28, %v3310_v8  ;;  %v1250_v49 = vshll.u32 %v1069_v20, 16  ;;  %v3706_v55 = vld [vmem:[#allocation2 + $0x5c] sm:$0x1]  ;;  %v1073_v4 = vld [vmem:[#allocation2 + $0x58] sm:$0xf] }
 0x167   : > { %v10531_v38 = vpop.permute.xlu0 %2035  ;;  %v3819_v48 = vsel %vm10226_vm9, %v3817_v31, %v3818_v32  ;;  %v1256_v50 = vshll.u32 %v1070_v27, 16  ;;  %v8778_v23 = vcombine.low %v3301_v34, %v3311_v46  ;;  %v3320_v43 = vrot.slane %v3319_v35, 4  ;;  %v1074_v10 = vld [vmem:[#allocation2 + $0x5c] sm:$0x1]  ;;  %v1617_v15 = vld [vmem:[#allocation2 + $0x48] sm:$0xe] }
 0x168   : > { %2911 = vrot.lane.b32.xlu1 %v8747_v58, %s9776_s9  ;;  %v3330_v52 = vrot.slane %v3329_v39, 4  ;;  %v3332_v53 = vshll.u32 %v3161_v47, 16  ;;  %v8810_v56 = vcombine.low %v3816_v30, %v3819_v48  ;;  %v1249_v59 = vrot.slane %v1247_v44, 4  ;;  %v1072_v58 = vld [vmem:[#allocation2 + $0x54] sm:$0xf] }
 0x169   : > { %v1252_v60 = vrot.slane %v1250_v49, 5  ;;  %v1258_v62 = vrot.slane %v1256_v50, 5  ;;  %3632 = vrot.lane.b32.xlu0 %v8778_v23, %s9779_s16  ;;  %v3325_v63 = vsel %vm10233_vm10, %v3320_v43, %v3324_v26  ;;  %v1260_v2 = vshrl.u32 %v1070_v27, 16  ;;  %v1618_v22 = vld [vmem:[#allocation2 + $0x4c] sm:$0xf] }
 0x16a   : > { %v3334_v1 = vrot.slane %v3332_v53, 5  ;;  %v1266_v3 = vshll.u32 %v1071_v40, 16  ;;  %v8795_v7 = vrot.slane %v3704_v45, 9  ;;  %v3822_v8 = vrot.slane %v3705_v51, 5  ;;  %v1619_v26 = vld [vmem:[#allocation2 + $0x50] sm:$0x1] }
 0x16b   : > { %v1253_v6 = vor.u32 %v1252_v60, %v1249_v59  ;;  %v3825_v9 = vrot.slane %v3706_v55, 5  ;;  %v1262_v13 = vrot.slane %v1260_v2, 4  ;;  %v1271_v14 = vshrl.u32 %v1072_v58, 16  ;;  %v1620_v31 = vld [vmem:[#allocation2 + $0x54] sm:$0xe] }
 0x16c   : > { %3089 = vrot.lane.b32.xlu1 %v9385_v24, %s9775_s15  ;;  %v3335_v12 = vsel %vm10233_vm10, %v3330_v52, %v3334_v1  ;;  %v1268_v42 = vrot.slane %v1266_v3, 5  ;;  %v3823_v20 = vsel %vm10226_vm9, %v8795_v7, %v3822_v8  ;;  %v3824_v21 = vrot.slane %v3822_v8, 4  ;;  %v1621_v39 = vld [vmem:[#allocation2 + $0x58] sm:$0xf]  ;;  %v1622_v43 = vld [vmem:[#allocation2 + $0x5c] sm:$0x1] }
 0x16d   : > { %v10542_v11 = vpop.permute.xlu1 %2037  ;;  %v8779_v17 = vcombine.low %v3325_v63, %v3335_v12  ;;  %v1254_v18 = vrot.slane %v1253_v6, 4  ;;  %3953 = vrot.lane.b32.xlu0 %v8810_v56, %s9777_s12  ;;  %v1263_v25 = vor.u32 %v1262_v13, %v1258_v62  ;;  %v1273_v27 = vrot.slane %v1271_v14, 4  ;;  %v448_v59 = vld [vmem:[%s10096_s22 + $0x3c] sm:$0xf]  ;;  %v2118_v13 = vld [vmem:[#allocation2 + $0x54] sm:$0xf] }
 0x16e   : > { %v10546_v16 = vpop.permute.xlu0 %3079  ;;  %v1274_v28 = vshll.u32 %v1072_v58, 16  ;;  %v1280_v30 = vshll.u32 %v1073_v4, 16  ;;  %v3826_v24 = vsel %vm10226_vm9, %v3824_v21, %v3825_v9  ;;  %v1284_v34 = vshrl.u32 %v1073_v4, 16 }
 0x16f   : > { %v1259_v32 = vsel %vm10233_vm10, %v1254_v18, %v1258_v62  ;;  %v1290_v35 = vshll.u32 %v1074_v10, 16  ;;  %v1264_v44 = vrot.slane %v1263_v25, 4  ;;  %v8811_v45 = vcombine.low %v3823_v20, %v3826_v24  ;;  %v843_v18 = vld [vmem:[#allocation2 + $0x60] sm:$0xf]  ;;  %v847_v20 = vld [vmem:[#allocation2 + $0x68] sm:$0x1] }
 0x170   : > { %3634 = vrot.lane.b32.xlu1 %v8779_v17, %s9779_s16  ;;  %v1276_v46 = vrot.slane %v1274_v28, 5  ;;  %v1282_v47 = vrot.slane %v1280_v30, 5  ;;  %v1286_v49 = vrot.slane %v1284_v34, 4  ;;  %v8668_v51 = vrot.slane %v1617_v15, 9  ;;  %v9386_v17 = vld [vmem:[#allocation2 + $0x54] sm:$0xff]  }
 0x171   : > { %v10556_v40 = vpop.permute.xlu1 %3081  ;;  %v1292_v50 = vrot.slane %v1290_v35, 5  ;;  %v1742_v23 = vrot.slane %v1618_v22, 5  ;;  %v1269_v52 = vsel %vm10233_vm10, %v1264_v44, %v1268_v42  ;;  %3955 = vrot.lane.b32.xlu0 %v8811_v45, %s9777_s12  ;;  %v1745_v55 = vrot.slane %v1619_v26, 5  ;;  %v2120_v28 = vld [vmem:[#allocation2 + $0x5c] sm:$0x1]  ;;  %v9393_v44 = vld [vmem:[#allocation2 + $0xc] sm:$0xff]  }
 0x172   : > { %v10558_v48 = vpop.permute.xlu0 %2901  ;;  %v1277_v53 = vor.u32 %v1276_v46, %v1273_v27  ;;  %v8669_v56 = vrot.slane %v1620_v31, 9  ;;  %v8652_v60 = vcombine.low %v1259_v32, %v1269_v52  ;;  %v1287_v62 = vor.u32 %v1286_v49, %v1282_v47  ;;  %v2119_v27 = vld [vmem:[#allocation2 + $0x58] sm:$0xf]  ;;  %v2663_v34 = vld [vmem:[#allocation2 + $0x54] sm:$0xe]  ;;  %v9396_v46 = vld [vmem:[#allocation2 + $0x24] sm:$0xff]  }
 0x173   : > { %v1743_v58 = vsel %vm10226_vm9, %v8668_v51, %v1742_v23  ;;  %v1744_v63 = vrot.slane %v1742_v23, 4  ;;  %v1749_v2 = vrot.slane %v1621_v39, 5  ;;  %v1752_v3 = vrot.slane %v1622_v43, 5  ;;  %v2664_v35 = vld [vmem:[#allocation2 + $0x58] sm:$0xf]  ;;  %v9388_v39 = vld [vmem:[#allocation2] sm:$0xff]  }
 0x174   : > { %v1278_v1 = vrot.slane %v1277_v53, 4  ;;  %v590_v4 = vrot.slane %v588_v36, 7  ;;  %1546 = vrot.lane.b32.xlu1 %v8652_v60, %s9773_s23  ;;  %v1288_v8 = vrot.slane %v1287_v62, 4  ;;  %v596_v10 = vshrl.u32 %v448_v59, 16  ;;  %v9394_v45 = vld [vmem:[#allocation2 + $0x18] sm:$0xff]   ;;  %1035 = vst.msk [vmem:[#allocation3] sm:$0xff] %vm1034_vm14, %v9388_v39 }
 0x175   : > { %v10568_v6 = vpop.permute.xlu1 %1860  ;;  %v1746_v9 = vsel %vm10226_vm9, %v1744_v63, %v1745_v55  ;;  %v599_v12 = vshll.u32 %v448_v59, 16  ;;  %v1750_v36 = vsel %vm10226_vm9, %v8669_v56, %v1749_v2  ;;  %v1751_v15 = vrot.slane %v1749_v2, 4  ;;  %v2665_v51 = vld [vmem:[#allocation2 + $0x5c] sm:$0x1]  ;;  %1036 = vst.msk [vmem:[#allocation3 + $0x8] sm:$0xff] %vm1034_vm14, %v9393_v44  ;;  %1037 = vst.msk [vmem:[#allocation3 + $0x10] sm:$0xff] %vm1034_vm14, %v9394_v45 }
 0x176   : > { %v10570_v7 = vpop.permute.xlu0 %3945  ;;  %v1283_v42 = vsel %vm10233_vm10, %v1278_v1, %v1282_v47  ;;  %v8684_v14 = vcombine.low %v1743_v58, %v1746_v9  ;;  %v1293_v21 = vsel %vm10233_vm10, %v1288_v8, %v1292_v50  ;;  %v593_v22 = vor.u32 %v591_v61, %v590_v4  ;;  %v9404_v23 = vld [vmem:[#allocation2 + $0x3c] sm:$0xff]   ;;  %1038 = vst.msk [vmem:[#allocation3 + $0x18] sm:$0xff] %vm1034_vm14, %v9396_v46 }
 0x177   : > { %v594_v26 = vrot.slane %v590_v4, 4  ;;  %v598_v25 = vrot.slane %v596_v10, 7  ;;  %v8653_v30 = vcombine.low %v1283_v42, %v1293_v21  ;;  %v1753_v31 = vsel %vm10226_vm9, %v1751_v15, %v1752_v3  ;;  %v449_v4 = vld [vmem:[%s10096_s22 + $0x40] sm:$0xf]  ;;  %v10601_v10 = vld [vmem:[%s10096_s22 + $0x44] sm:$0xf] }
 0x178   : > { %1870 = vrot.lane.b32.xlu0 %v8684_v14, %s9772_s8  ;;  %v2293_v32 = vshrl.u32 %v2118_v13, 16  ;;  %v2296_v24 = vshll.u32 %v2118_v13, 16  ;;  %v8685_v61 = vcombine.low %v1750_v36, %v1753_v31  ;;  %v844_v50 = vsel %vm10241_vm11, %v593_v22, %v843_v18  ;;  %1040 = vst.msk [vmem:[#allocation3 + $0x28] sm:$0xff] %vm1034_vm14, %v9404_v23 }
 0x179   : > { %v601_v47 = vor.u32 %v599_v12, %v598_v25  ;;  %v603_v49 = vrot.slane %v598_v25, 4  ;;  %1548 = vrot.lane.b32.xlu1 %v8653_v30, %s9773_s23  ;;  %845 = vst [vmem:[#allocation2 + $0x60] sm:$0xf] %v844_v50  ;;  %v2302_v53 = vshll.u32 %v2119_v27, 16  ;;  %v2306_v55 = vshrl.u32 %v2119_v27, 16  ;;  %v10589_v56 = vpop.permute.xlu1 %2903  ;;  %1583 = vst.msk [vmem:[#allocation3] sm:$0xff] %vm1582_vm15, %v10521_v5 }
 0x17a   : > { %v2295_v43 = vrot.slane %v2293_v32, 4  ;;  %v2298_v52 = vrot.slane %v2296_v24, 5  ;;  %v10591_v59 = vpop.permute.xlu0 %3947  ;;  %v2312_v62 = vshll.u32 %v2120_v28, 16  ;;  %v2785_v3 = vrot.slane %v2664_v35, 5  ;;  %1907 = vst.msk [vmem:[#allocation3] sm:$0xff] %vm1906_vm1, %v10527_v33 }
 0x17b   : > { %v602_v60 = vsel %vm10249_vm12, %v594_v26, %v601_v47  ;;  %v848_v58 = vsel %vm10264_vm13, %v603_v49, %v847_v20  ;;  %v2304_v1 = vrot.slane %v2302_v53, 5  ;;  %v2308_v2 = vrot.slane %v2306_v55, 4 }
 0x17c   : > { %2047 = vrot.lane.b32.xlu0 %v9386_v17, %s9774_s28  ;;  %846 = vst.msk [vmem:[#allocation2 + $0x64] sm:$0xf] %vm377_vm0, %v602_v60  ;;  %v2299_v63 = vor.u32 %v2298_v52, %v2295_v43  ;;  %849 = vst [vmem:[#allocation2 + $0x68] sm:$0x1] %v848_v58  ;;  %v8732_v8 = vrot.slane %v2663_v34, 9  ;;  %v2788_v9 = vrot.slane %v2665_v51, 5 }
 0x17d   : > { %1872 = vrot.lane.b32.xlu1 %v8685_v61, %s9772_s8  ;;  %v2309_v13 = vor.u32 %v2308_v2, %v2304_v1  ;;  %v2314_v42 = vrot.slane %v2312_v62, 5  ;;  %v2787_v14 = vrot.slane %v2785_v3, 4  ;;  %v605_v36 = vshrl.u32 %v449_v4, 16  ;;  %v10617_v21 = vpop.permute.xlu1 %2582  ;;  %v850_v61 = vld [vmem:[#allocation2 + $0x6c] sm:$0xf] }
 0x17e   : > { %v2300_v12 = vrot.slane %v2299_v63, 4  ;;  %v608_v18 = vshll.u32 %v449_v4, 16  ;;  %v613_v20 = vshrl.u32 %v10601_v10, 16  ;;  %v2786_v25 = vsel %vm10226_vm9, %v8732_v8, %v2785_v3 }
 0x17f   : > { %v2310_v17 = vrot.slane %v2309_v13, 4  ;;  %v2789_v5 = vsel %vm10226_vm9, %v2787_v14, %v2788_v9  ;;  %v607_v35 = vrot.slane %v605_v36, 7  ;;  %vm2083_vm2 = vcmask 130144  }
 0x180   : > { %v2305_v15 = vsel %vm10233_vm10, %v2300_v12, %v2304_v1  ;;  %v1537_v22 = vpop.permute.xlu0 %1536  ;;  %v2121_v26 = vld [vmem:[#allocation2 + $0x60] sm:$0xf]  ;;  %v8748_v49 = vcombine.low %v2786_v25, %v2789_v5  ;;  %v615_v1 = vrot.slane %v613_v20, 7  ;;  %2084 = vst.msk [vmem:[#allocation3] sm:$0xff] %vm2083_vm2, %v10531_v38  ;;  %vm2628_vm3 = vcmask 162944  }
 0x181   : > { %v2666_v27 = vld [vmem:[#allocation2 + $0x60] sm:$0xe]  ;;  %1584 = vst.msk [vmem:[#allocation3 + $0x8] sm:$0xff] %vm1582_vm15, %v1537_v22  ;;  %v2315_v28 = vsel %vm10233_vm10, %v2310_v17, %v2314_v42  ;;  %v2317_v33 = vshrl.u32 %v2121_v26, 16  ;;  %v2320_v30 = vshll.u32 %v2121_v26, 16  ;;  %v610_v23 = vor.u32 %v608_v18, %v607_v35 }
 0x182   : > { %v8733_v31 = vrot.slane %v2666_v27, 9  ;;  %1908 = vst.msk [vmem:[#allocation3 + $0x8] sm:$0xff] %vm1906_vm1, %v10568_v6  ;;  %v8716_v24 = vcombine.low %v2305_v15, %v2315_v28  ;;  %v616_v6 = vshll.u32 %v10601_v10, 16  ;;  %v611_v63 = vrot.slane %v607_v35, 4  ;;  %v3162_v2 = vld [vmem:[#allocation2 + $0x60] sm:$0xf] }
 0x183   : > { %v9387_v32 = vld [vmem:[#allocation2 + $0x60] sm:$0xff]   ;;  %v2123_v39 = vld [vmem:[#allocation2 + $0x68] sm:$0x1]  ;;  %v2319_v44 = vrot.slane %v2317_v33, 4  ;;  %v2322_v45 = vrot.slane %v2320_v30, 5  ;;  %v620_v42 = vrot.slane %v615_v1, 4  ;;  %v851_v14 = vsel %vm10241_vm11, %v610_v23, %v850_v61 }
 0x184   : > { %v2122_v34 = vld [vmem:[#allocation2 + $0x64] sm:$0xf]  ;;  %2049 = vrot.lane.b32.xlu1 %v9387_v32, %s9774_s28  ;;  %2592 = vrot.lane.b32.xlu0 %v8716_v24, %s9778_s17  ;;  %v2336_v47 = vshll.u32 %v2123_v39, 16  ;;  %v2668_v51 = vld [vmem:[#allocation2 + $0x68] sm:$0x1]  ;;  %v10631_v60 = vpop.permute.xlu1 %3626  ;;  %v618_v13 = vor.u32 %v616_v6, %v615_v1  ;;  %v3337_v20 = vshrl.u32 %v3162_v2, 16 }
 0x185   : > { %v2326_v46 = vshll.u32 %v2122_v34, 16  ;;  %v2330_v54 = vshrl.u32 %v2122_v34, 16  ;;  %v2667_v50 = vld [vmem:[#allocation2 + $0x64] sm:$0xf]  ;;  %v2323_v43 = vor.u32 %v2322_v45, %v2319_v44  ;;  %v2795_v58 = vrot.slane %v2668_v51, 5  ;;  %2085 = vst.msk [vmem:[#allocation3 + $0x8] sm:$0xff] %vm2083_vm2, %v10542_v11 }
 0x186   : > { %v2792_v55 = vrot.slane %v2667_v50, 5  ;;  %v2338_v62 = vrot.slane %v2336_v47, 5  ;;  %v3163_v12 = vld [vmem:[#allocation2 + $0x64] sm:$0xf]  ;;  %v3164_v36 = vld [vmem:[#allocation2 + $0x68] sm:$0x1]  ;;  %v619_v27 = vsel %vm10249_vm12, %v611_v63, %v618_v13 }
 0x187   : > { %v2328_v52 = vrot.slane %v2326_v46, 5  ;;  %v2332_v53 = vrot.slane %v2330_v54, 4  ;;  %v2324_v3 = vrot.slane %v2323_v43, 4  ;;  %v9389_v10 = vld [vmem:[#allocation2 + $0x60] sm:$0xff]   ;;  %852 = vst [vmem:[#allocation2 + $0x6c] sm:$0xf] %v851_v14 }
 0x188   : > { %v10635_v8 = vsel %vm10226_vm9, %v8733_v31, %v2792_v55  ;;  %v2794_v9 = vrot.slane %v2792_v55, 4  ;;  %2913 = vrot.lane.b32.xlu0 %v8748_v49, %s9776_s9  ;;  %v854_v22 = vld [vmem:[#allocation2 + $0x74] sm:$0x1]  ;;  %v3707_v26 = vld [vmem:[#allocation2 + $0x60] sm:$0xe]  ;;  %v3340_v28 = vshll.u32 %v3162_v2, 16 }
 0x189   : > { %v2333_v4 = vor.u32 %v2332_v53, %v2328_v52  ;;  %v2329_v15 = vsel %vm10233_vm10, %v2324_v3, %v2328_v52  ;;  %v10648_v25 = vpop.permute.xlu0 %2580  ;;  %v3346_v33 = vshll.u32 %v3163_v12, 16  ;;  %v3708_v30 = vld [vmem:[#allocation2 + $0x64] sm:$0xf]  ;;  %v3709_v31 = vld [vmem:[#allocation2 + $0x68] sm:$0x1]  ;;  %v3339_v32 = vrot.slane %v3337_v20, 4 }
 0x18a   : > { %v2796_v18 = vsel %vm10226_vm9, %v2794_v9, %v2795_v58  ;;  %853 = vst.msk [vmem:[#allocation2 + $0x70] sm:$0xf] %vm377_vm0, %v619_v27  ;;  %v3350_v24 = vshrl.u32 %v3163_v12, 16  ;;  %v3356_v34 = vshll.u32 %v3164_v36, 16  ;;  %v1075_v11 = vld [vmem:[#allocation2 + $0x60] sm:$0xf]  ;;  %v855_v46 = vsel %vm10264_vm13, %v620_v42, %v854_v22 }
 0x18b   : > { %v2334_v17 = vrot.slane %v2333_v4, 4  ;;  %v8749_v5 = vcombine.low %v10635_v8, %v2796_v18  ;;  %v3342_v44 = vrot.slane %v3340_v28, 5  ;;  %v3348_v45 = vrot.slane %v3346_v33, 5  ;;  %v1076_v54 = vld [vmem:[#allocation2 + $0x64] sm:$0xf]  ;;  %2630 = vst.msk [vmem:[#allocation3 + $0x8] sm:$0xff] %vm2628_vm3, %v10617_v21 }
 0x18c   : > { %v1539_v35 = vpop.permute.xlu1 %1538  ;;  %3091 = vrot.lane.b32.xlu0 %v9389_v10, %s9775_s15  ;;  %v3352_v61 = vrot.slane %v3350_v24, 4  ;;  %v3358_v47 = vrot.slane %v3356_v34, 5  ;;  %856 = vst [vmem:[#allocation2 + $0x74] sm:$0x1] %v855_v46  ;;  %v8796_v49 = vrot.slane %v3707_v26, 9  ;;  %v3829_v50 = vrot.slane %v3708_v30, 5 }
 0x18d   : > { %v2339_v38 = vsel %vm10233_vm10, %v2334_v17, %v2338_v62  ;;  %1585 = vst.msk [vmem:[#allocation3 + $0x10] sm:$0xff] %vm1582_vm15, %v1539_v35  ;;  %v3343_v51 = vor.u32 %v3342_v44, %v3339_v32  ;;  %v3832_v23 = vrot.slane %v3709_v31, 5  ;;  %v1295_v6 = vshrl.u32 %v1075_v11, 16  ;;  %v1077_v12 = vld [vmem:[#allocation2 + $0x68] sm:$0x1] }
 0x18e   : > { %v8717_v39 = vcombine.low %v2329_v15, %v2339_v38  ;;  %v1298_v43 = vshll.u32 %v1075_v11, 16  ;;  %v3353_v52 = vor.u32 %v3352_v61, %v3348_v45  ;;  %v10663_v53 = vsel %vm10226_vm9, %v8796_v49, %v3829_v50  ;;  %v3165_v1 = vld [vmem:[#allocation2 + $0x6c] sm:$0xf]  ;;  %2629 = vst.msk [vmem:[#allocation3] sm:$0xff] %vm2628_vm3, %v10648_v25 }
 0x18f   : > { %v3831_v55 = vrot.slane %v3829_v50, 4  ;;  %v1304_v62 = vshll.u32 %v1076_v54, 16  ;;  %v3344_v63 = vrot.slane %v3343_v51, 4  ;;  %v1297_v2 = vrot.slane %v1295_v6, 4  ;;  %v3710_v22 = vld [vmem:[#allocation2 + $0x6c] sm:$0xe] }
 0x190   : > { %2594 = vrot.lane.b32.xlu1 %v8717_v39, %s9778_s17  ;;  %v3354_v3 = vrot.slane %v3353_v52, 4  ;;  %v3361_v4 = vshrl.u32 %v3165_v1, 16  ;;  %v3364_v8 = vshll.u32 %v3165_v1, 16  ;;  %v1300_v36 = vrot.slane %v1298_v43, 5  ;;  %v1078_v61 = vld [vmem:[#allocation2 + $0x6c] sm:$0xf] }
 0x191   : > { %v10665_v58 = vpop.permute.xlu0 %3624  ;;  %v3833_v9 = vsel %vm10226_vm9, %v3831_v55, %v3832_v23  ;;  %v9390_v10 = vld [vmem:[#allocation2 + $0x6c] sm:$0xff]   ;;  %v3349_v13 = vsel %vm10233_vm10, %v3344_v63, %v3348_v45  ;;  %v10675_v30 = vrot.slane %v1304_v62, 5  ;;  %v1308_v34 = vshrl.u32 %v1076_v54, 16 }
 0x192   : > { %v3166_v42 = vld [vmem:[#allocation2 + $0x70] sm:$0xf]  ;;  %v8812_v14 = vcombine.low %v10663_v53, %v3833_v9  ;;  %v3359_v15 = vsel %vm10233_vm10, %v3354_v3, %v3358_v47  ;;  %v3363_v17 = vrot.slane %v3361_v4, 4  ;;  %v3366_v18 = vrot.slane %v3364_v8, 5  ;;  %v1623_v3 = vld [vmem:[#allocation2 + $0x60] sm:$0xe] }
 0x193   : > { %v3370_v20 = vshll.u32 %v3166_v42, 16  ;;  %v8780_v27 = vcombine.low %v3349_v13, %v3359_v15  ;;  %v3167_v28 = vld [vmem:[#allocation2 + $0x74] sm:$0x1]  ;;  %v3374_v33 = vshrl.u32 %v3166_v42, 16  ;;  %v3711_v31 = vld [vmem:[#allocation2 + $0x70] sm:$0xf] }
 0x194   : > { %2915 = vrot.lane.b32.xlu1 %v8749_v5, %s9776_s9  ;;  %v1301_v5 = vor.u32 %v1300_v36, %v1297_v2  ;;  %v3367_v38 = vor.u32 %v3366_v18, %v3363_v17  ;;  %v3380_v24 = vshll.u32 %v3167_v28, 16  ;;  %v3712_v11 = vld [vmem:[#allocation2 + $0x74] sm:$0x1]  ;;  %v1314_v45 = vshll.u32 %v1077_v12, 16  ;;  %v1079_v23 = vld [vmem:[#allocation2 + $0x70] sm:$0xf] }
 0x195   : > { %v1863_v26 = vpop.permute.xlu0 %1862  ;;  %v3372_v32 = vrot.slane %v3370_v20, 5  ;;  %3636 = vrot.lane.b32.xlu0 %v8780_v27, %s9779_s16  ;;  %v3376_v39 = vrot.slane %v3374_v33, 4  ;;  %v8797_v46 = vrot.slane %v3710_v22, 9  ;;  %v1310_v50 = vrot.slane %v1308_v34, 4  ;;  %v1080_v55 = vld [vmem:[#allocation2 + $0x74] sm:$0x1] }
 0x196   : > { %1909 = vst.msk [vmem:[#allocation3 + $0x10] sm:$0xff] %vm1906_vm1, %v1863_v26  ;;  %v1541_v35 = vpop.permute.xlu1 %1540  ;;  %v1302_v44 = vrot.slane %v1301_v5, 4  ;;  %v3368_v47 = vrot.slane %v3367_v38, 4  ;;  %v3382_v49 = vrot.slane %v3380_v24, 5  ;;  %v3836_v51 = vrot.slane %v3711_v31, 5  ;;  %v9409_v8 = vld [vmem:[#allocation2 + $0x48] sm:$0xff]  }
 0x197   : > { %1586 = vst.msk [vmem:[#allocation3 + $0x18] sm:$0xff] %vm1582_vm15, %v1541_v35  ;;  %v3377_v54 = vor.u32 %v3376_v39, %v3372_v32  ;;  %v1316_v52 = vrot.slane %v1314_v45, 5  ;;  %v3839_v53 = vrot.slane %v3712_v11, 5  ;;  %v1311_v63 = vor.u32 %v1310_v50, %v10675_v30  ;;  %v1624_v18 = vld [vmem:[#allocation2 + $0x64] sm:$0xf]  ;;  %v9410_v22 = vld [vmem:[#allocation2 + $0x54] sm:$0xff]  }
 0x198   : > { %3093 = vrot.lane.b32.xlu1 %v9390_v10, %s9775_s15  ;;  %v1307_v43 = vsel %vm10233_vm10, %v1302_v44, %v10675_v30  ;;  %v3373_v62 = vsel %vm10233_vm10, %v3368_v47, %v3372_v32  ;;  %v3837_v1 = vsel %vm10226_vm9, %v8797_v46, %v3836_v51  ;;  %v3838_v2 = vrot.slane %v3836_v51, 4  ;;  %v451_v20 = vld [vmem:[%s10096_s22 + $0x48] sm:$0xf]  ;;  %1041 = vst.msk [vmem:[#allocation3 + $0x30] sm:$0xff] %vm1034_vm14, %v9409_v8  ;;  %v1625_v33 = vld [vmem:[#allocation2 + $0x68] sm:$0x1] }
 0x199   : > { %v2040_v6 = vpop.permute.xlu0 %2039  ;;  %v3378_v9 = vrot.slane %v3377_v54, 4  ;;  %3957 = vrot.lane.b32.xlu0 %v8812_v14, %s9777_s12  ;;  %v1319_v12 = vshrl.u32 %v1078_v61, 16  ;;  %v1322_v10 = vshll.u32 %v1078_v61, 16  ;;  %v1328_v13 = vshll.u32 %v1079_v23, 16  ;;  %v1626_v5 = vld [vmem:[#allocation2 + $0x6c] sm:$0xe] }
 0x19a   : > { %2086 = vst.msk [vmem:[#allocation3 + $0x10] sm:$0xff] %vm2083_vm2, %v2040_v6  ;;  %v1865_v4 = vpop.permute.xlu1 %1864  ;;  %v1312_v42 = vrot.slane %v1311_v63, 4  ;;  %v3840_v36 = vsel %vm10226_vm9, %v3838_v2, %v3839_v53  ;;  %v1332_v15 = vshrl.u32 %v1079_v23, 16  ;;  %v1338_v17 = vshll.u32 %v1080_v55, 16  ;;  %v1627_v24 = vld [vmem:[#allocation2 + $0x70] sm:$0xf] }
 0x19b   : > { %1910 = vst.msk [vmem:[#allocation3 + $0x18] sm:$0xff] %vm1906_vm1, %v1865_v4  ;;  %v3383_v26 = vsel %vm10233_vm10, %v3378_v9, %v3382_v49  ;;  %v8813_v14 = vcombine.low %v3837_v1, %v3840_v36  ;;  %v1321_v27 = vrot.slane %v1319_v12, 4  ;;  %v1324_v28 = vrot.slane %v1322_v10, 5  ;;  %v1628_v34 = vld [vmem:[#allocation2 + $0x74] sm:$0x1] }
 0x19c   : > { %v8781_v30 = vcombine.low %v3373_v62, %v3383_v26  ;;  %v1317_v31 = vsel %vm10233_vm10, %v1312_v42, %v1316_v52  ;;  %v1330_v38 = vrot.slane %v1328_v13, 5  ;;  %v1334_v32 = vrot.slane %v1332_v15, 4  ;;  %1042 = vst.msk [vmem:[#allocation3 + $0x38] sm:$0xff] %vm1034_vm14, %v9410_v22  ;;  %v452_v54 = vld [vmem:[%s10096_s22 + $0x4c] sm:$0xf] }
 0x19d   : > { %v8654_v39 = vcombine.low %v1307_v43, %v1317_v31  ;;  %3959 = vrot.lane.b32.xlu0 %v8813_v14, %s9777_s12  ;;  %v1325_v44 = vor.u32 %v1324_v28, %v1321_v27  ;;  %v1340_v45 = vrot.slane %v1338_v17, 5  ;;  %v8670_v46 = vrot.slane %v1623_v3, 9  ;;  %v857_v63 = vld [vmem:[#allocation2 + $0x78] sm:$0xf]  ;;  %v861_v22 = vld [vmem:[#allocation2 + $0x80] sm:$0x1] }
 0x19e   : > { %v2042_v11 = vpop.permute.xlu1 %2041  ;;  %3638 = vrot.lane.b32.xlu1 %v8781_v30, %s9779_s16  ;;  %v1335_v61 = vor.u32 %v1334_v32, %v1330_v38  ;;  %v1756_v47 = vrot.slane %v1624_v18, 5  ;;  %v1759_v49 = vrot.slane %v1625_v33, 5  ;;  %v8671_v50 = vrot.slane %v1626_v5, 9  ;;  %v2124_v18 = vld [vmem:[#allocation2 + $0x6c] sm:$0xf] }
 0x19f   : > { %v2585_v35 = vpop.permute.xlu0 %2584  ;;  %2087 = vst.msk [vmem:[#allocation3 + $0x18] sm:$0xff] %vm2083_vm2, %v2042_v11  ;;  %v1326_v51 = vrot.slane %v1325_v44, 4  ;;  %v1763_v23 = vrot.slane %v1627_v24, 5  ;;  %v1766_v6 = vrot.slane %v1628_v34, 5  ;;  %v622_v52 = vshrl.u32 %v451_v20, 16  ;;  %v9391_v5 = vld [vmem:[#allocation2 + $0x6c] sm:$0xff]  }
 0x1a0   : > { %v1336_v53 = vrot.slane %v1335_v61, 4  ;;  %v1757_v43 = vsel %vm10226_vm9, %v8670_v46, %v1756_v47  ;;  %v1758_v55 = vrot.slane %v1756_v47, 4  ;;  %v625_v62 = vshll.u32 %v451_v20, 16  ;;  %v2125_v20 = vld [vmem:[#allocation2 + $0x70] sm:$0xf]  ;;  %2631 = vst.msk [vmem:[#allocation3 + $0x10] sm:$0xff] %vm2628_vm3, %v2585_v35 }
 0x1a1   : > { %v1331_v2 = vsel %vm10233_vm10, %v1326_v51, %v1330_v38  ;;  %v10711_v3 = vsel %vm10226_vm9, %v8671_v50, %v1763_v23  ;;  %v1765_v4 = vrot.slane %v1763_v23, 4  ;;  %v624_v8 = vrot.slane %v622_v52, 7  ;;  %v2126_v28 = vld [vmem:[#allocation2 + $0x74] sm:$0x1]  ;;  %v10729_v31 = vld [vmem:[%s10096_s22 + $0x50] sm:$0xf] }
 0x1a2   : > { %1550 = vrot.lane.b32.xlu1 %v8654_v39, %s9773_s23  ;;  %v1341_v9 = vsel %vm10233_vm10, %v1336_v53, %v1340_v45  ;;  %v1760_v12 = vsel %vm10226_vm9, %v1758_v55, %v1759_v49  ;;  %v630_v10 = vshrl.u32 %v452_v54, 16  ;;  %v633_v13 = vshll.u32 %v452_v54, 16  ;;  %v2669_v21 = vld [vmem:[#allocation2 + $0x6c] sm:$0xe]  ;;  %v10738_v34 = vld [vmem:[%s10096_s22 + $0x54] sm:$0xf] }
 0x1a3   : > { %v2906_v1 = vpop.permute.xlu0 %2905  ;;  %v8655_v42 = vcombine.low %v1331_v2, %v1341_v9  ;;  %v8686_v36 = vcombine.low %v1757_v43, %v1760_v12  ;;  %v1767_v15 = vsel %vm10226_vm9, %v1765_v4, %v1766_v6  ;;  %v627_v17 = vor.u32 %v625_v62, %v624_v8  ;;  %v2671_v46 = vld [vmem:[#allocation2 + $0x74] sm:$0x1]  ;;  %v864_v62 = vld [vmem:[#allocation2 + $0x84] sm:$0xf] }
 0x1a4   : > { %v8687_v26 = vcombine.low %v10711_v3, %v1767_v15  ;;  %v628_v14 = vrot.slane %v624_v8, 4  ;;  %v632_v27 = vrot.slane %v630_v10, 7  ;;  %vm2949_vm4 = vcmask 195744  }
 0x1a5   : > { %1874 = vrot.lane.b32.xlu0 %v8686_v36, %s9772_s8  ;;  %v858_v30 = vsel %vm10241_vm11, %v627_v17, %v857_v63  ;;  %vm3127_vm5 = vcmask 228544   ;;  %vm3672_vm7 = vcmask 261344   ;;  %vm12686_vm6 = vcmask 294144   ;;  %2951 = vst.msk [vmem:[#allocation3 + $0x8] sm:$0xff] %vm2949_vm4, %v10589_v56  ;;  %2950 = vst.msk [vmem:[#allocation3] sm:$0xff] %vm2949_vm4, %v10558_v48 }
 0x1a6   : > { %1552 = vrot.lane.b32.xlu1 %v8655_v42, %s9773_s23  ;;  %v635_v38 = vor.u32 %v633_v13, %v632_v27  ;;  %v637_v32 = vrot.slane %v632_v27, 4  ;;  %859 = vst [vmem:[#allocation2 + $0x78] sm:$0xf] %v858_v30  ;;  %v2341_v24 = vshrl.u32 %v2124_v18, 16  ;;  %2952 = vst.msk [vmem:[#allocation3 + $0x10] sm:$0xff] %vm2949_vm4, %v2906_v1  ;;  %v2344_v11 = vshll.u32 %v2124_v18, 16 }
 0x1a7   : > { %v3084_v33 = vpop.permute.xlu0 %3083  ;;  %3129 = vst.msk [vmem:[#allocation3 + $0x8] sm:$0xff] %vm3127_vm5, %v10556_v40  ;;  %v2350_v35 = vshll.u32 %v2125_v20, 16  ;;  %v2354_v39 = vshrl.u32 %v2125_v20, 16  ;;  %v2360_v44 = vshll.u32 %v2126_v28, 16  ;;  %3128 = vst.msk [vmem:[#allocation3] sm:$0xff] %vm3127_vm5, %v10546_v16  ;;  %v8734_v49 = vrot.slane %v2669_v21, 9 }
 0x1a8   : > { %v2670_v56 = vld [vmem:[#allocation2 + $0x70] sm:$0xf]  ;;  %3130 = vst.msk [vmem:[#allocation3 + $0x10] sm:$0xff] %vm3127_vm5, %v3084_v33  ;;  %v636_v48 = vsel %vm10249_vm12, %v628_v14, %v635_v38  ;;  %v2343_v45 = vrot.slane %v2341_v24, 4  ;;  %v862_v40 = vsel %vm10264_vm13, %v637_v32, %v861_v22  ;;  %v2346_v61 = vrot.slane %v2344_v11, 5 }
 0x1a9   : > { %v2587_v25 = vpop.permute.xlu1 %2586  ;;  %3674 = vst.msk [vmem:[#allocation3 + $0x8] sm:$0xff] %vm3672_vm7, %v10631_v60  ;;  %3673 = vst.msk [vmem:[#allocation3] sm:$0xff] %vm3672_vm7, %v10665_v58  ;;  %v10755_v16 = vld [vmem:[#allocation9 + $0x10] ss:$0 sps:$4 sm:$0x33]   ;;  %2051 = vrot.lane.b32.xlu0 %v9391_v5, %s9774_s28  ;;  %v2352_v47 = vrot.slane %v2350_v35, 5 }
 0x1aa   : > { %2632 = vst.msk [vmem:[#allocation3 + $0x18] sm:$0xff] %vm2628_vm3, %v2587_v25  ;;  %v2356_v60 = vrot.slane %v2354_v39, 4  ;;  %863 = vst [vmem:[#allocation2 + $0x80] sm:$0x1] %v862_v40  ;;  %1876 = vrot.lane.b32.xlu1 %v8687_v26, %s9772_s8  ;;  %v2362_v58 = vrot.slane %v2360_v44, 5  ;;  %v2799_v50 = vrot.slane %v2670_v56, 5  ;;  %v2347_v54 = vor.u32 %v2346_v61, %v2343_v45 }
 0x1ab   : > { %860 = vst.msk [vmem:[#allocation2 + $0x7c] sm:$0xf] %vm377_vm0, %v636_v48  ;;  %v639_v51 = vshrl.u32 %v10729_v31, 16  ;;  %v642_v23 = vshll.u32 %v10729_v31, 16  ;;  %v647_v53 = vshrl.u32 %v10738_v34, 16  ;;  %vm4095_vm8 = vcmask 1041408  }
 0x1ac   : > { %3995 = vst.msk [vmem:[#allocation3 + $0x8] sm:$0xff] %vm12686_vm6, %v10591_v59  ;;  %3994 = vst.msk [vmem:[#allocation3] sm:$0xff] %vm12686_vm6, %v10570_v7  ;;  %v2357_v52 = vor.u32 %v2356_v60, %v2352_v47  ;;  %v2802_v59 = vrot.slane %v2671_v46, 5  ;;  %v2801_v43 = vrot.slane %v2799_v50, 4  ;;  %v650_v7 = vshll.u32 %v10738_v34, 16  ;;  %9249 = vmatprep.subr.msk.bf16.mxu0 %vm4095_vm8, %v10755_v16 }
 0x1ad   : > { %v2908_v6 = vpop.permute.xlu1 %2907  ;;  %v10768_v55 = vrot.slane %v639_v51, 7  ;;  %v2348_v63 = vrot.slane %v2347_v54, 4  ;;  %v2127_v2 = vld [vmem:[#allocation2 + $0x78] sm:$0xf]  ;;  %v2800_v36 = vsel %vm10226_vm9, %v8734_v49, %v2799_v50  ;;  %v649_v48 = vrot.slane %v647_v53, 7 }
 0x1ae   : > { %2953 = vst.msk [vmem:[#allocation3 + $0x18] sm:$0xff] %vm2949_vm4, %v2908_v6  ;;  %v2358_v1 = vrot.slane %v2357_v52, 4  ;;  %v2365_v4 = vshrl.u32 %v2127_v2, 16  ;;  %v2368_v8 = vshll.u32 %v2127_v2, 16  ;;  %v2672_v9 = vld [vmem:[#allocation2 + $0x78] sm:$0xe]  ;;  %v2803_v15 = vsel %vm10226_vm9, %v2801_v43, %v2802_v59 }
 0x1af   : > { %v3629_v3 = vpop.permute.xlu0 %3628  ;;  %v644_v12 = vor.u32 %v642_v23, %v10768_v55  ;;  %v2353_v13 = vsel %vm10233_vm10, %v2348_v63, %v2352_v47  ;;  %v3168_v17 = vld [vmem:[#allocation2 + $0x78] sm:$0xf]  ;;  %v8735_v30 = vrot.slane %v2672_v9, 9  ;;  %v8750_v32 = vcombine.low %v2800_v36, %v2803_v15  ;;  %v868_v49 = vld [vmem:[#allocation2 + $0x8c] sm:$0x1] }
 0x1b0   : > { %3675 = vst.msk [vmem:[#allocation3 + $0x10] sm:$0xff] %vm3672_vm7, %v3629_v3  ;;  %v2363_v42 = vsel %vm10233_vm10, %v2358_v1, %v2362_v58  ;;  %v2367_v26 = vrot.slane %v2365_v4, 4  ;;  %v2370_v28 = vrot.slane %v2368_v8, 5  ;;  %v645_v34 = vrot.slane %v10768_v55, 4 }
 0x1b1   : > { %v3086_v10 = vpop.permute.xlu1 %3085  ;;  %v8718_v20 = vcombine.low %v2353_v13, %v2363_v42  ;;  %v865_v14 = vsel %vm10241_vm11, %v644_v12, %v864_v62  ;;  %v2129_v27 = vld [vmem:[#allocation2 + $0x80] sm:$0x1]  ;;  %v3385_v40 = vshrl.u32 %v3168_v17, 16  ;;  %v652_v50 = vor.u32 %v650_v7, %v649_v48  ;;  %v3713_v62 = vld [vmem:[#allocation2 + $0x78] sm:$0xe] }
 0x1b2   : > { %3131 = vst.msk [vmem:[#allocation3 + $0x18] sm:$0xff] %vm3127_vm5, %v3086_v10  ;;  %v9392_v18 = vld [vmem:[#allocation2 + $0x78] sm:$0xff]   ;;  %866 = vst [vmem:[#allocation2 + $0x84] sm:$0xf] %v865_v14  ;;  %v2384_v38 = vshll.u32 %v2129_v27, 16  ;;  %v2371_v25 = vor.u32 %v2370_v28, %v2367_v26  ;;  %v654_v51 = vrot.slane %v649_v48, 4 }
 0x1b3   : > { %v2128_v22 = vld [vmem:[#allocation2 + $0x7c] sm:$0xf]  ;;  %v3950_v31 = vpop.permute.xlu0 %3949  ;;  %2053 = vrot.lane.b32.xlu1 %v9392_v18, %s9774_s28  ;;  %2596 = vrot.lane.b32.xlu0 %v8718_v20, %s9778_s17  ;;  %v2674_v21 = vld [vmem:[#allocation2 + $0x80] sm:$0x1]  ;;  %v3387_v6 = vrot.slane %v3385_v40, 4  ;;  %v3388_v54 = vshll.u32 %v3168_v17, 16  ;;  %v653_v7 = vsel %vm10249_vm12, %v645_v34, %v652_v50 }
 0x1b4   : > { %v2374_v33 = vshll.u32 %v2128_v22, 16  ;;  %v2378_v5 = vshrl.u32 %v2128_v22, 16  ;;  %v2673_v24 = vld [vmem:[#allocation2 + $0x7c] sm:$0xf]  ;;  %3996 = vst.msk [vmem:[#allocation3 + $0x10] sm:$0xff] %vm12686_vm6, %v3950_v31  ;;  %v2386_v44 = vrot.slane %v2384_v38, 5  ;;  %v869_v10 = vsel %vm10264_vm13, %v654_v51, %v868_v49 }
 0x1b5   : > { %v2806_v39 = vrot.slane %v2673_v24, 5  ;;  %v2809_v56 = vrot.slane %v2674_v21, 5  ;;  %v3169_v45 = vld [vmem:[#allocation2 + $0x7c] sm:$0xf]  ;;  %v2372_v46 = vrot.slane %v2371_v25, 4  ;;  %v3390_v2 = vrot.slane %v3388_v54, 5 }
 0x1b6   : > { %v2376_v11 = vrot.slane %v2374_v33, 5  ;;  %v2380_v35 = vrot.slane %v2378_v5, 4  ;;  %v9397_v58 = vld [vmem:[#allocation2 + $0x78] sm:$0xff]   ;;  %v3170_v23 = vld [vmem:[#allocation2 + $0x80] sm:$0x1]  ;;  %v3394_v55 = vshll.u32 %v3169_v45, 16 }
 0x1b7   : > { %v10792_v47 = vsel %vm10226_vm9, %v8735_v30, %v2806_v39  ;;  %v2808_v60 = vrot.slane %v2806_v39, 4  ;;  %2917 = vrot.lane.b32.xlu0 %v8750_v32, %s9776_s9  ;;  %v3398_v3 = vshrl.u32 %v3169_v45, 16  ;;  %867 = vst.msk [vmem:[#allocation2 + $0x88] sm:$0xf] %vm377_vm0, %v653_v7  ;;  %v3404_v12 = vshll.u32 %v3170_v23, 16  ;;  %v4010_v33 = vld [vmem:[#allocation3] sm:$0xff] }
 0x1b8   : > { %v2381_v61 = vor.u32 %v2380_v35, %v2376_v11  ;;  %v3631_v52 = vpop.permute.xlu1 %3630  ;;  %v2377_v59 = vsel %vm10233_vm10, %v2372_v46, %v2376_v11  ;;  %v3952_v63 = vpop.permute.xlu0 %3951  ;;  %v3396_v9 = vrot.slane %v3394_v55, 5  ;;  %v3714_v13 = vld [vmem:[#allocation2 + $0x7c] sm:$0xf]  ;;  %v3391_v36 = vor.u32 %v3390_v2, %v3387_v6  ;;  %870 = vst [vmem:[#allocation2 + $0x8c] sm:$0x1] %v869_v10  ;;  %v4011_v11 = vld [vmem:[#allocation3 + $0x8] sm:$0xff] }
 0x1b9   : > { %v2810_v43 = vsel %vm10226_vm9, %v2808_v60, %v2809_v56  ;;  %3676 = vst.msk [vmem:[#allocation3 + $0x18] sm:$0xff] %vm3672_vm7, %v3631_v52  ;;  %v3171_v4 = vld [vmem:[#allocation2 + $0x84] sm:$0xf]  ;;  %v3400_v15 = vrot.slane %v3398_v3, 4  ;;  %v3715_v18 = vld [vmem:[#allocation2 + $0x80] sm:$0x1] }
 0x1ba   : > { %v2382_v53 = vrot.slane %v2381_v61, 4  ;;  %v8751_v1 = vcombine.low %v10792_v47, %v2810_v43  ;;  %3997 = vst.msk [vmem:[#allocation3 + $0x18] sm:$0xff] %vm12686_vm6, %v3952_v63  ;;  %v3409_v17 = vshrl.u32 %v3171_v4, 16  ;;  %v1081_v20 = vld [vmem:[#allocation2 + $0x78] sm:$0xf]  ;;  %v3406_v26 = vrot.slane %v3404_v12, 5 }
 0x1bb   : > { %3095 = vrot.lane.b32.xlu0 %v9397_v58, %s9775_s15  ;;  %v3412_v14 = vshll.u32 %v3171_v4, 16  ;;  %v4097_v27 = vsel %vm4095_vm8, %v10755_v16, 0  ;;  %v8798_v28 = vrot.slane %v3713_v62, 9  ;;  %v3392_v5 = vrot.slane %v3391_v36, 4  ;;  %v1082_v32 = vld [vmem:[#allocation2 + $0x7c] sm:$0xf] }
 0x1bc   : > { %v2387_v8 = vsel %vm10233_vm10, %v2382_v53, %v2386_v44  ;;  %v1543_v22 = vpop.permute.xlu1 %1542  ;;  %v3401_v30 = vor.u32 %v3400_v15, %v3396_v9  ;;  %v3411_v31 = vrot.slane %v3409_v17, 4  ;;  %9174 = vmatpush3.bf16.msra.mxu0 %v4097_v27  ;;  %v3843_v38 = vrot.slane %v3714_v13, 5  ;;  %v4012_v16 = vld [vmem:[#allocation3 + $0x10] sm:$0xff]  ;;  %v1083_v48 = vld [vmem:[#allocation2 + $0x80] sm:$0x1] }
 0x1bd   : > { %v8719_v42 = vcombine.low %v2377_v59, %v2387_v8  ;;  %1587 = vst.msk [vmem:[#allocation3 + $0x20] sm:$0xff] %vm1582_vm15, %v1543_v22  ;;  %v1867_v24 = vpop.permute.xlu0 %1866  ;;  %v3414_v21 = vrot.slane %v3412_v14, 5  ;;  %v3846_v34 = vrot.slane %v3715_v18, 5  ;;  %vm4046_vm6 = vcmask 293888   ;;  %v3716_v60 = vld [vmem:[#allocation2 + $0x84] sm:$0xe] }
 0x1be   : > { %v1343_v25 = vshrl.u32 %v1081_v20, 16  ;;  %1911 = vst.msk [vmem:[#allocation3 + $0x20] sm:$0xff] %vm1906_vm1, %v1867_v24  ;;  %v3397_v35 = vsel %vm10233_vm10, %v3392_v5, %v3396_v9  ;;  %v3402_v39 = vrot.slane %v3401_v30, 4  ;;  %v3844_v44 = vsel %vm10226_vm9, %v8798_v28, %v3843_v38  ;;  %9175 = vmatprep.mubr.msk.bf16.mxu0 %vm4046_vm6, %v4010_v33  ;;  %v9399_v49 = vld [vmem:[#allocation2 + $0x84] sm:$0xff]  }
 0x1bf   : > { %2598 = vrot.lane.b32.xlu1 %v8719_v42, %s9778_s17  ;;  %v3845_v56 = vrot.slane %v3843_v38, 4  ;;  %v3415_v40 = vor.u32 %v3414_v21, %v3411_v31  ;;  %v1346_v61 = vshll.u32 %v1081_v20, 16  ;;  %v1352_v47 = vshll.u32 %v1082_v32, 16  ;;  %9176 = vmatmul.mubr.msk.bf16.vlgmr.msra.gmra.mrb[0].mxu0 %vm4046_vm6, %v4011_v11  ;;  %v3172_v50 = vld [vmem:[#allocation2 + $0x88] sm:$0xf]  ;;  %v9415_v3 = vld [vmem:[#allocation2 + $0x60] sm:$0xff]  }
 0x1c0   : > { %v1545_v45 = vpop.permute.xlu1 %1544  ;;  %v1345_v46 = vrot.slane %v1343_v25, 4  ;;  %v3407_v58 = vsel %vm10233_vm10, %v3402_v39, %v3406_v26  ;;  %v1356_v23 = vshrl.u32 %v1082_v32, 16  ;;  %9179 = vmatprep.mubr.msk.bf16.mxu0 %vm4046_vm6, %v4012_v16  ;;  %v3173_v52 = vld [vmem:[#allocation2 + $0x8c] sm:$0x1]  ;;  %v3418_v53 = vshll.u32 %v3172_v50, 16  ;;  %1043 = vst.msk [vmem:[#allocation3 + $0x40] sm:$0xff] %vm1034_vm14, %v9415_v3 }
 0x1c1   : > { %1588 = vst.msk [vmem:[#allocation3 + $0x28] sm:$0xff] %vm1582_vm15, %v1545_v45  ;;  %v3847_v51 = vsel %vm10226_vm9, %v3845_v56, %v3846_v34  ;;  %v2044_v6 = vpop.permute.xlu0 %2043  ;;  %v8782_v54 = vcombine.low %v3397_v35, %v3407_v58  ;;  %v3416_v59 = vrot.slane %v3415_v40, 4  ;;  %v3422_v43 = vshrl.u32 %v3172_v50, 16  ;;  %v3717_v7 = vld [vmem:[#allocation2 + $0x88] sm:$0xf]  ;;  %v4013_v18 = vld [vmem:[#allocation3 + $0x18] sm:$0xff] }
 0x1c2   : > { %2088 = vst.msk [vmem:[#allocation3 + $0x20] sm:$0xff] %vm2083_vm2, %v2044_v6  ;;  %v3428_v55 = vshll.u32 %v3173_v52, 16  ;;  %v8814_v62 = vcombine.low %v3844_v44, %v3847_v51  ;;  %v1348_v63 = vrot.slane %v1346_v61, 5  ;;  %v3420_v4 = vrot.slane %v3418_v53, 5  ;;  %v3718_v10 = vld [vmem:[#allocation2 + $0x8c] sm:$0x1] }
 0x1c3   : > { %2919 = vrot.lane.b32.xlu1 %v8751_v1, %s9776_s9  ;;  %v1354_v1 = vrot.slane %v1352_v47, 5  ;;  %3640 = vrot.lane.b32.xlu0 %v8782_v54, %s9779_s16  ;;  %v3424_v8 = vrot.slane %v3422_v43, 4  ;;  %v1358_v9 = vrot.slane %v1356_v23, 4  ;;  %v1362_v12 = vshll.u32 %v1083_v48, 16  ;;  %v1084_v17 = vld [vmem:[#allocation2 + $0x84] sm:$0xf] }
 0x1c4   : > { %v1869_v2 = vpop.permute.xlu1 %1868  ;;  %v3430_v13 = vrot.slane %v3428_v55, 5  ;;  %v1349_v42 = vor.u32 %v1348_v63, %v1345_v46  ;;  %v8799_v36 = vrot.slane %v3716_v60, 9  ;;  %v3850_v15 = vrot.slane %v3717_v7, 5  ;;  %v1085_v27 = vld [vmem:[#allocation2 + $0x88] sm:$0xf]  ;;  %v9416_v32 = vld [vmem:[#allocation2 + $0x6c] sm:$0xff]  }
 0x1c5   : > { %1912 = vst.msk [vmem:[#allocation3 + $0x28] sm:$0xff] %vm1906_vm1, %v1869_v2  ;;  %v3421_v20 = vsel %vm10233_vm10, %v3416_v59, %v3420_v4  ;;  %v3425_v22 = vor.u32 %v3424_v8, %v3420_v4  ;;  %v1359_v26 = vor.u32 %v1358_v9, %v1354_v1  ;;  %v1364_v14 = vrot.slane %v1362_v12, 5  ;;  %v1629_v31 = vld [vmem:[#allocation2 + $0x78] sm:$0xe]  ;;  %v1630_v38 = vld [vmem:[#allocation2 + $0x7c] sm:$0xf] }
 0x1c6   : > { %v1350_v28 = vrot.slane %v1349_v42, 4  ;;  %v3851_v33 = vsel %vm10226_vm9, %v8799_v36, %v3850_v15  ;;  %v3852_v5 = vrot.slane %v3850_v15, 4  ;;  %v3853_v30 = vrot.slane %v3718_v10, 5  ;;  %v1086_v35 = vld [vmem:[#allocation2 + $0x8c] sm:$0x1]  ;;  %1044 = vst.msk [vmem:[#allocation3 + $0x48] sm:$0xff] %vm1034_vm14, %v9416_v32 }
 0x1c7   : > { %3097 = vrot.lane.b32.xlu1 %v9399_v49, %s9775_s15  ;;  %v3426_v24 = vrot.slane %v3425_v22, 4  ;;  %3961 = vrot.lane.b32.xlu0 %v8814_v62, %s9777_s12  ;;  %v1360_v21 = vrot.slane %v1359_v26, 4  ;;  %v1367_v34 = vshrl.u32 %v1084_v17, 16  ;;  %v1370_v25 = vshll.u32 %v1084_v17, 16  ;;  %v1631_v56 = vld [vmem:[#allocation2 + $0x80] sm:$0x1] }
 0x1c8   : > { %9180 = vmatmul.mubr.msk.bf16.gmra.mrb[4].mxu0 %vm4046_vm6, %v4013_v18  ;;  %v1355_v11 = vsel %vm10233_vm10, %v1350_v28, %v1354_v1  ;;  %v3854_v16 = vsel %vm10226_vm9, %v3852_v5, %v3853_v30  ;;  %v1376_v39 = vshll.u32 %v1085_v27, 16  ;;  %v1380_v44 = vshrl.u32 %v1085_v27, 16  ;;  %v1632_v61 = vld [vmem:[#allocation2 + $0x84] sm:$0xe]  ;;  %v1633_v47 = vld [vmem:[#allocation2 + $0x88] sm:$0xf] }
 0x1c9   : > { %v3431_v48 = vsel %vm10233_vm10, %v3426_v24, %v3430_v13  ;;  %v1365_v45 = vsel %vm10233_vm10, %v1360_v21, %v1364_v14  ;;  %v8815_v40 = vcombine.low %v3851_v33, %v3854_v16  ;;  %v1369_v46 = vrot.slane %v1367_v34, 4  ;;  %v2589_v49 = vpop.permute.xlu0 %2588  ;;  %v1634_v53 = vld [vmem:[#allocation2 + $0x8c] sm:$0x1]  ;;  %v455_v1 = vld [vmem:[%s10096_s22 + $0x58] sm:$0xf] }
 0x1ca   : > { %v2046_v60 = vpop.permute.xlu1 %2045  ;;  %v8783_v58 = vcombine.low %v3421_v20, %v3431_v48  ;;  %v8656_v50 = vcombine.low %v1355_v11, %v1365_v45  ;;  %v1372_v51 = vrot.slane %v1370_v25, 5  ;;  %v1378_v23 = vrot.slane %v1376_v39, 5  ;;  %2633 = vst.msk [vmem:[#allocation3 + $0x20] sm:$0xff] %vm2628_vm3, %v2589_v49  ;;  %v456_v8 = vld [vmem:[%s10096_s22 + $0x5c] sm:$0xf]  ;;  %v9401_v11 = vld [vmem:[#allocation2 + $0x84] sm:$0xff]  }
 0x1cb   : > { %2089 = vst.msk [vmem:[#allocation3 + $0x28] sm:$0xff] %vm2083_vm2, %v2046_v60  ;;  %3963 = vrot.lane.b32.xlu0 %v8815_v40, %s9777_s12  ;;  %v1382_v6 = vrot.slane %v1380_v44, 4  ;;  %v1386_v54 = vshll.u32 %v1086_v35, 16  ;;  %v8672_v52 = vrot.slane %v1629_v31, 9  ;;  %v1770_v59 = vrot.slane %v1630_v38, 5  ;;  %v9419_v44 = vld [vmem:[#allocation2 + $0x78] sm:$0xff]  }
 0x1cc   : > { %3642 = vrot.lane.b32.xlu1 %v8783_v58, %s9779_s16  ;;  %v1373_v43 = vor.u32 %v1372_v51, %v1369_v46  ;;  %v1773_v55 = vrot.slane %v1631_v56, 5  ;;  %v8673_v62 = vrot.slane %v1632_v61, 9  ;;  %v1777_v63 = vrot.slane %v1633_v47, 5  ;;  %v2130_v36 = vld [vmem:[#allocation2 + $0x84] sm:$0xf]  ;;  %1045 = vst.msk [vmem:[#allocation3 + $0x50] sm:$0xff] %vm1034_vm14, %v9419_v44 }
 0x1cd   : > { %v1383_v7 = vor.u32 %v1382_v6, %v1378_v23  ;;  %v1388_v2 = vrot.slane %v1386_v54, 5  ;;  %v1771_v3 = vsel %vm10226_vm9, %v8672_v52, %v1770_v59  ;;  %v1772_v4 = vrot.slane %v1770_v59, 4  ;;  %v2910_v9 = vpop.permute.xlu0 %2909  ;;  %v2131_v22 = vld [vmem:[#allocation2 + $0x88] sm:$0xf]  ;;  %v871_v33 = vld [vmem:[#allocation2 + $0x90] sm:$0xf] }
 0x1ce   : > { %v1374_v12 = vrot.slane %v1373_v43, 4  ;;  %v10858_v10 = vsel %vm10226_vm9, %v8673_v62, %v1777_v63  ;;  %v1779_v13 = vrot.slane %v1777_v63, 4  ;;  %v1780_v42 = vrot.slane %v1634_v53, 5  ;;  %2954 = vst.msk [vmem:[#allocation3 + $0x20] sm:$0xff] %vm2949_vm4, %v2910_v9  ;;  %v2132_v5 = vld [vmem:[#allocation2 + $0x8c] sm:$0x1] }
 0x1cf   : > { %v1384_v15 = vrot.slane %v1383_v7, 4  ;;  %v1774_v17 = vsel %vm10226_vm9, %v1772_v4, %v1773_v55  ;;  %v656_v18 = vshrl.u32 %v455_v1, 16  ;;  %v659_v20 = vshll.u32 %v455_v1, 16  ;;  %v875_v24 = vld [vmem:[#allocation2 + $0x98] sm:$0x1]  ;;  %v9420_v56 = vld [vmem:[#allocation2 + $0x84] sm:$0xff]  }
 0x1d0   : > { %1554 = vrot.lane.b32.xlu1 %v8656_v50, %s9773_s23  ;;  %v1379_v26 = vsel %vm10233_vm10, %v1374_v12, %v1378_v23  ;;  %v8688_v14 = vcombine.low %v1771_v3, %v1774_v17  ;;  %v1781_v27 = vsel %vm10226_vm9, %v1779_v13, %v1780_v42  ;;  %v664_v28 = vshrl.u32 %v456_v8, 16  ;;  %v2675_v21 = vld [vmem:[#allocation2 + $0x84] sm:$0xe]  ;;  %v2676_v61 = vld [vmem:[#allocation2 + $0x88] sm:$0xf]  ;;  %1046 = vst.msk [vmem:[#allocation3 + $0x58] sm:$0xff] %vm1034_vm14, %v9420_v56 }
 0x1d1   : > { %v1389_v30 = vsel %vm10233_vm10, %v1384_v15, %v1388_v2  ;;  %v8689_v31 = vcombine.low %v10858_v10, %v1781_v27  ;;  %v658_v38 = vrot.slane %v656_v18, 7  ;;  %v667_v32 = vshll.u32 %v456_v8, 16  ;;  %v3088_v34 = vpop.permute.xlu0 %3087  ;;  %v457_v47 = vld [vmem:[%s10096_s22 + $0x60] sm:$0xf]  ;;  %v2677_v23 = vld [vmem:[#allocation2 + $0x8c] sm:$0x1] }
 0x1d2   : > { %v8657_v25 = vcombine.low %v1379_v26, %v1389_v30  ;;  %1878 = vrot.lane.b32.xlu0 %v8688_v14, %s9772_s8  ;;  %v666_v16 = vrot.slane %v664_v28, 7  ;;  %v2389_v35 = vshrl.u32 %v2130_v36, 16  ;;  %v2392_v39 = vshll.u32 %v2130_v36, 16  ;;  %3132 = vst.msk [vmem:[#allocation3 + $0x20] sm:$0xff] %vm3127_vm5, %v3088_v34  ;;  %v458_v53 = vld [vmem:[%s10096_s22 + $0x64] sm:$0xf] }
 0x1d3   : > { %v661_v48 = vor.u32 %v659_v20, %v658_v38  ;;  %v662_v45 = vrot.slane %v658_v38, 4  ;;  %v2398_v40 = vshll.u32 %v2131_v22, 16  ;;  %v2402_v46 = vshrl.u32 %v2131_v22, 16  ;;  %v10890_v13 = vld [vmem:[%s10096_s22 + $0x68] sm:$0xf] }
 0x1d4   : > { %1556 = vrot.lane.b32.xlu1 %v8657_v25, %s9773_s23  ;;  %v669_v49 = vor.u32 %v667_v32, %v666_v16  ;;  %v671_v58 = vrot.slane %v666_v16, 4  ;;  %v2391_v50 = vrot.slane %v2389_v35, 4  ;;  %v2394_v51 = vrot.slane %v2392_v39, 5  ;;  %v10893_v17 = vld [vmem:[%s10096_s22 + $0x6c] sm:$0xf] }
 0x1d5   : > { %v872_v6 = vsel %vm10241_vm11, %v661_v48, %v871_v33  ;;  %v2400_v54 = vrot.slane %v2398_v40, 5  ;;  %v2404_v52 = vrot.slane %v2402_v46, 4  ;;  %v2408_v59 = vshll.u32 %v2132_v5, 16  ;;  %v878_v33 = vld [vmem:[#allocation2 + $0x9c] sm:$0xf] }
 0x1d6   : > { %v2591_v60 = vpop.permute.xlu1 %2590  ;;  %2055 = vrot.lane.b32.xlu0 %v9401_v11, %s9774_s28  ;;  %v670_v43 = vsel %vm10249_vm12, %v662_v45, %v669_v49  ;;  %873 = vst [vmem:[#allocation2 + $0x90] sm:$0xf] %v872_v6  ;;  %v2395_v55 = vor.u32 %v2394_v51, %v2391_v50  ;;  %v876_v62 = vsel %vm10264_vm13, %v671_v58, %v875_v24  ;;  %v8736_v63 = vrot.slane %v2675_v21, 9 }
 0x1d7   : > { %2634 = vst.msk [vmem:[#allocation3 + $0x28] sm:$0xff] %vm2628_vm3, %v2591_v60  ;;  %v2405_v1 = vor.u32 %v2404_v52, %v2400_v54  ;;  %v2410_v7 = vrot.slane %v2408_v59, 5  ;;  %877 = vst [vmem:[#allocation2 + $0x98] sm:$0x1] %v876_v62  ;;  %v2813_v2 = vrot.slane %v2676_v61, 5  ;;  %v2816_v3 = vrot.slane %v2677_v23, 5 }
 0x1d8   : > { %874 = vst.msk [vmem:[#allocation2 + $0x94] sm:$0xf] %vm377_vm0, %v670_v43  ;;  %1880 = vrot.lane.b32.xlu1 %v8689_v31, %s9772_s8  ;;  %v2396_v8 = vrot.slane %v2395_v55, 4  ;;  %v673_v9 = vshrl.u32 %v457_v47, 16  ;;  %v676_v12 = vshll.u32 %v457_v47, 16  ;;  %v681_v10 = vshrl.u32 %v458_v53, 16 }
 0x1d9   : > { %v2406_v42 = vrot.slane %v2405_v1, 4  ;;  %v2815_v36 = vrot.slane %v2813_v2, 4  ;;  %v684_v15 = vshll.u32 %v458_v53, 16  ;;  %v2814_v20 = vsel %vm10226_vm9, %v8736_v63, %v2813_v2 }
 0x1da   : > { %v2912_v4 = vpop.permute.xlu1 %2911  ;;  %v2401_v18 = vsel %vm10233_vm10, %v2396_v8, %v2400_v54  ;;  %v675_v22 = vrot.slane %v673_v9, 7  ;;  %v10899_v26 = vrot.slane %v681_v10, 7  ;;  %v690_v30 = vshrl.u32 %v10890_v13, 16  ;;  %v882_v9 = vld [vmem:[#allocation2 + $0xa4] sm:$0x1] }
 0x1db   : > { %2955 = vst.msk [vmem:[#allocation3 + $0x28] sm:$0xff] %vm2949_vm4, %v2912_v4  ;;  %v3633_v14 = vpop.permute.xlu0 %3632  ;;  %v2411_v27 = vsel %vm10233_vm10, %v2406_v42, %v2410_v7  ;;  %v2817_v28 = vsel %vm10226_vm9, %v2815_v36, %v2816_v3  ;;  %v693_v31 = vshll.u32 %v10890_v13, 16  ;;  %v698_v21 = vshrl.u32 %v10893_v17, 16 }
 0x1dc   : > { %3677 = vst.msk [vmem:[#allocation3 + $0x20] sm:$0xff] %vm3672_vm7, %v3633_v14  ;;  %v8720_v38 = vcombine.low %v2401_v18, %v2411_v27  ;;  %v678_v32 = vor.u32 %v676_v12, %v675_v22  ;;  %v679_v24 = vrot.slane %v675_v22, 4  ;;  %v686_v11 = vor.u32 %v684_v15, %v10899_v26 }
 0x1dd   : > { %v2133_v34 = vld [vmem:[#allocation2 + $0x90] sm:$0xf]  ;;  %v8752_v44 = vcombine.low %v2814_v20, %v2817_v28  ;;  %vm12715_vm8 = vcmask 294144   ;;  %v688_v62 = vrot.slane %v10899_v26, 4 }
 0x1de   : > { %v3090_v5 = vpop.permute.xlu1 %3089  ;;  %v2678_v25 = vld [vmem:[#allocation2 + $0x90] sm:$0xe]  ;;  %2600 = vrot.lane.b32.xlu0 %v8720_v38, %s9778_s17  ;;  %v2413_v39 = vshrl.u32 %v2133_v34, 16  ;;  %v879_v56 = vsel %vm10241_vm11, %v678_v32, %v878_v33  ;;  %v2135_v45 = vld [vmem:[#allocation2 + $0x98] sm:$0x1]  ;;  %v2416_v40 = vshll.u32 %v2133_v34, 16  ;;  %v687_v23 = vsel %vm10249_vm12, %v679_v24, %v686_v11 }
 0x1df   : > { %3133 = vst.msk [vmem:[#allocation3 + $0x28] sm:$0xff] %vm3127_vm5, %v3090_v5  ;;  %v9402_v16 = vld [vmem:[#allocation2 + $0x90] sm:$0xff]   ;;  %v3954_v48 = vpop.permute.xlu0 %3953  ;;  %v8737_v47 = vrot.slane %v2678_v25, 9  ;;  %880 = vst [vmem:[#allocation2 + $0x9c] sm:$0xf] %v879_v56  ;;  %v2432_v58 = vshll.u32 %v2135_v45, 16  ;;  %v883_v56 = vsel %vm10264_vm13, %v688_v62, %v882_v9 }
 0x1e0   : > { %v2134_v35 = vld [vmem:[#allocation2 + $0x94] sm:$0xf]  ;;  %3998 = vst.msk [vmem:[#allocation3 + $0x20] sm:$0xff] %vm12715_vm8, %v3954_v48  ;;  %2057 = vrot.lane.b32.xlu1 %v9402_v16, %s9774_s28  ;;  %v2415_v49 = vrot.slane %v2413_v39, 4  ;;  %v2680_v51 = vld [vmem:[#allocation2 + $0x98] sm:$0x1] }
 0x1e1   : > { %v2422_v46 = vshll.u32 %v2134_v35, 16  ;;  %v2426_v61 = vshrl.u32 %v2134_v35, 16  ;;  %v2679_v50 = vld [vmem:[#allocation2 + $0x94] sm:$0xf]  ;;  %v2418_v6 = vrot.slane %v2416_v40, 5  ;;  %v2434_v53 = vrot.slane %v2432_v58, 5 }
 0x1e2   : > { %v3635_v60 = vpop.permute.xlu1 %3634  ;;  %v2820_v59 = vrot.slane %v2679_v50, 5  ;;  %881 = vst.msk [vmem:[#allocation2 + $0xa0] sm:$0xf] %vm377_vm0, %v687_v23  ;;  %2921 = vrot.lane.b32.xlu0 %v8752_v44, %s9776_s9  ;;  %v2823_v43 = vrot.slane %v2680_v51, 5  ;;  %v9405_v55 = vld [vmem:[#allocation2 + $0x90] sm:$0xff]  }
 0x1e3   : > { %3678 = vst.msk [vmem:[#allocation3 + $0x28] sm:$0xff] %vm3672_vm7, %v3635_v60  ;;  %v2424_v54 = vrot.slane %v2422_v46, 5  ;;  %v2428_v52 = vrot.slane %v2426_v61, 4  ;;  %v3956_v63 = vpop.permute.xlu0 %3955  ;;  %v2419_v1 = vor.u32 %v2418_v6, %v2415_v49  ;;  %v3174_v4 = vld [vmem:[#allocation2 + $0x90] sm:$0xf] }
 0x1e4   : > { %v10924_v2 = vsel %vm10226_vm9, %v8737_v47, %v2820_v59  ;;  %v2822_v3 = vrot.slane %v2820_v59, 4  ;;  %v3175_v8 = vld [vmem:[#allocation2 + $0x94] sm:$0xf]  ;;  %3999 = vst.msk [vmem:[#allocation3 + $0x28] sm:$0xff] %vm12715_vm8, %v3956_v63  ;;  %v3176_v12 = vld [vmem:[#allocation2 + $0x98] sm:$0x1] }
 0x1e5   : > { %v2429_v7 = vor.u32 %v2428_v52, %v2424_v54  ;;  %v3433_v10 = vshrl.u32 %v3174_v4, 16  ;;  %v3436_v42 = vshll.u32 %v3174_v4, 16  ;;  %v3442_v36 = vshll.u32 %v3175_v8, 16  ;;  %v3719_v14 = vld [vmem:[#allocation2 + $0x90] sm:$0xe] }
 0x1e6   : > { %v3446_v15 = vshrl.u32 %v3175_v8, 16  ;;  %v2420_v18 = vrot.slane %v2419_v1, 4  ;;  %v2824_v22 = vsel %vm10226_vm9, %v2822_v3, %v2823_v43  ;;  %v3452_v26 = vshll.u32 %v3176_v12, 16  ;;  %v1547_v27 = vpop.permute.xlu1 %1546  ;;  %3099 = vrot.lane.b32.xlu0 %v9405_v55, %s9775_s15  ;;  %v3177_v16 = vld [vmem:[#allocation2 + $0x9c] sm:$0xf] }
 0x1e7   : > { %v2430_v20 = vrot.slane %v2429_v7, 4  ;;  %v8753_v28 = vcombine.low %v10924_v2, %v2824_v22  ;;  %v3435_v33 = vrot.slane %v3433_v10, 4  ;;  %v3438_v5 = vrot.slane %v3436_v42, 5  ;;  %1589 = vst.msk [vmem:[#allocation3 + $0x30] sm:$0xff] %vm1582_vm15, %v1547_v27  ;;  %v4014_v32 = vld [vmem:[#allocation3 + $0x20] sm:$0xff] }
 0x1e8   : > { %v3444_v38 = vrot.slane %v3442_v36, 5  ;;  %v2425_v24 = vsel %vm10233_vm10, %v2420_v18, %v2424_v54  ;;  %v3448_v25 = vrot.slane %v3446_v15, 4  ;;  %v3454_v11 = vrot.slane %v3452_v26, 5  ;;  %v3720_v35 = vld [vmem:[#allocation2 + $0x94] sm:$0xf]  ;;  %9183 = vmatprep.mubr.msk.bf16.mxu0 %vm4046_vm6, %v4014_v32 }
 0x1e9   : > { %v2435_v34 = vsel %vm10233_vm10, %v2430_v20, %v2434_v53  ;;  %v3439_v44 = vor.u32 %v3438_v5, %v3435_v33  ;;  %v3178_v48 = vld [vmem:[#allocation2 + $0xa0] sm:$0xf]  ;;  %v3457_v45 = vshrl.u32 %v3177_v16, 16  ;;  %884 = vst [vmem:[#allocation2 + $0xa4] sm:$0x1] %v883_v56  ;;  %v3460_v61 = vshll.u32 %v3177_v16, 16 }
 0x1ea   : > { %v8721_v39 = vcombine.low %v2425_v24, %v2435_v34  ;;  %v1871_v40 = vpop.permute.xlu0 %1870  ;;  %v3449_v46 = vor.u32 %v3448_v25, %v3444_v38  ;;  %v3466_v47 = vshll.u32 %v3178_v48, 16  ;;  %v3470_v60 = vshrl.u32 %v3178_v48, 16  ;;  %v3721_v49 = vld [vmem:[#allocation2 + $0x98] sm:$0x1]  ;;  %v1087_v6 = vld [vmem:[#allocation2 + $0x90] sm:$0xf] }
 0x1eb   : > { %1913 = vst.msk [vmem:[#allocation3 + $0x30] sm:$0xff] %vm1906_vm1, %v1871_v40  ;;  %v3440_v58 = vrot.slane %v3439_v44, 4  ;;  %v3459_v50 = vrot.slane %v3457_v45, 4  ;;  %v8800_v51 = vrot.slane %v3719_v14, 9  ;;  %v3857_v23 = vrot.slane %v3720_v35, 5  ;;  %v1549_v54 = vpop.permute.xlu1 %1548  ;;  %v9406_v62 = vld [vmem:[#allocation2 + $0x9c] sm:$0xff]  }
 0x1ec   : > { %2602 = vrot.lane.b32.xlu1 %v8721_v39, %s9778_s17  ;;  %v3450_v52 = vrot.slane %v3449_v46, 4  ;;  %v3462_v59 = vrot.slane %v3460_v61, 5  ;;  %v10941_v53 = vrot.slane %v3466_v47, 5  ;;  %v3472_v43 = vrot.slane %v3470_v60, 4  ;;  %v1088_v55 = vld [vmem:[#allocation2 + $0x94] sm:$0xf] }
 0x1ed   : > { %1590 = vst.msk [vmem:[#allocation3 + $0x38] sm:$0xff] %vm1582_vm15, %v1549_v54  ;;  %v3445_v63 = vsel %vm10233_vm10, %v3440_v58, %v3444_v38  ;;  %v3858_v1 = vsel %vm10226_vm9, %v8800_v51, %v3857_v23  ;;  %v3859_v7 = vrot.slane %v3857_v23, 4  ;;  %v3860_v2 = vrot.slane %v3721_v49, 5  ;;  %v1089_v12 = vld [vmem:[#allocation2 + $0x98] sm:$0x1]  ;;  %v4015_v36 = vld [vmem:[#allocation3 + $0x28] sm:$0xff] }
 0x1ee   : > { %v2048_v3 = vpop.permute.xlu0 %2047  ;;  %v3455_v4 = vsel %vm10233_vm10, %v3450_v52, %v3454_v11  ;;  %v3463_v8 = vor.u32 %v3462_v59, %v3459_v50  ;;  %v3473_v9 = vor.u32 %v3472_v43, %v10941_v53  ;;  %v1391_v10 = vshrl.u32 %v1087_v6, 16  ;;  %v3722_v42 = vld [vmem:[#allocation2 + $0x9c] sm:$0xe]  ;;  %v3723_v26 = vld [vmem:[#allocation2 + $0xa0] sm:$0xf]  ;;  %9184 = vmatmul.mubr.msk.bf16.gmra.mrb[8].mxu0 %vm4046_vm6, %v4015_v36  ;;  %v9421_v34 = vld [vmem:[#allocation2 + $0x90] sm:$0xff]  }
 0x1ef   : > { %2090 = vst.msk [vmem:[#allocation3 + $0x30] sm:$0xff] %vm2083_vm2, %v2048_v3  ;;  %v8784_v15 = vcombine.low %v3445_v63, %v3455_v4  ;;  %v3861_v18 = vsel %vm10226_vm9, %v3859_v7, %v3860_v2  ;;  %v1394_v20 = vshll.u32 %v1087_v6, 16  ;;  %v1400_v22 = vshll.u32 %v1088_v55, 16  ;;  %v1090_v14 = vld [vmem:[#allocation2 + $0x9c] sm:$0xf]  ;;  %v1873_v27 = vpop.permute.xlu1 %1872 }
 0x1f0   : > { %2923 = vrot.lane.b32.xlu1 %v8753_v28, %s9776_s9  ;;  %v3464_v33 = vrot.slane %v3463_v8, 4  ;;  %v3474_v5 = vrot.slane %v3473_v9, 4  ;;  %v8816_v38 = vcombine.low %v3858_v1, %v3861_v18  ;;  %v1393_v32 = vrot.slane %v1391_v10, 4  ;;  %v1091_v24 = vld [vmem:[#allocation2 + $0xa0] sm:$0xf]  ;;  %1914 = vst.msk [vmem:[#allocation3 + $0x38] sm:$0xff] %vm1906_vm1, %v1873_v27 }
 0x1f1   : > { %3644 = vrot.lane.b32.xlu0 %v8784_v15, %s9779_s16  ;;  %v3179_v28 = vld [vmem:[#allocation2 + $0xa4] sm:$0x1]  ;;  %v1396_v25 = vrot.slane %v1394_v20, 5  ;;  %v1402_v11 = vrot.slane %v1400_v22, 5  ;;  %v1404_v16 = vshrl.u32 %v1088_v55, 16  ;;  %v1410_v35 = vshll.u32 %v1089_v12, 16 }
 0x1f2   : > { %v3469_v39 = vsel %vm10233_vm10, %v3464_v33, %v10941_v53  ;;  %v3476_v44 = vshll.u32 %v3179_v28, 16  ;;  %v3724_v56 = vld [vmem:[#allocation2 + $0xa4] sm:$0x1]  ;;  %v8801_v48 = vrot.slane %v3722_v42, 9  ;;  %v3864_v45 = vrot.slane %v3723_v26, 5  ;;  %1047 = vst.msk [vmem:[#allocation3 + $0x60] sm:$0xff] %vm1034_vm14, %v9421_v34 }
 0x1f3   : > { %v9422_v40 = vld [vmem:[#allocation2 + $0x9c] sm:$0xff]   ;;  %v1397_v46 = vor.u32 %v1396_v25, %v1393_v32  ;;  %v1406_v61 = vrot.slane %v1404_v16, 4  ;;  %v1412_v47 = vrot.slane %v1410_v35, 5  ;;  %v3867_v60 = vrot.slane %v3724_v56, 5  ;;  %v1635_v23 = vld [vmem:[#allocation2 + $0x90] sm:$0xe] }
 0x1f4   : > { %3101 = vrot.lane.b32.xlu1 %v9406_v62, %s9775_s15  ;;  %v3478_v49 = vrot.slane %v3476_v44, 5  ;;  %v3865_v58 = vsel %vm10226_vm9, %v8801_v48, %v3864_v45  ;;  %v3866_v50 = vrot.slane %v3864_v45, 4  ;;  %v1415_v51 = vshrl.u32 %v1090_v14, 16  ;;  %v1636_v6 = vld [vmem:[#allocation2 + $0x94] sm:$0xf]  ;;  %1048 = vst.msk [vmem:[#allocation3 + $0x68] sm:$0xff] %vm1034_vm14, %v9422_v40 }
 0x1f5   : > { %3965 = vrot.lane.b32.xlu0 %v8816_v38, %s9777_s12  ;;  %v1398_v54 = vrot.slane %v1397_v46, 4  ;;  %v1407_v52 = vor.u32 %v1406_v61, %v1402_v11  ;;  %v1092_v59 = vld [vmem:[#allocation2 + $0xa4] sm:$0x1]  ;;  %v1418_v53 = vshll.u32 %v1090_v14, 16  ;;  %v1424_v43 = vshll.u32 %v1091_v24, 16 }
 0x1f6   : > { %v3479_v55 = vsel %vm10233_vm10, %v3474_v5, %v3478_v49  ;;  %v3868_v62 = vsel %vm10226_vm9, %v3866_v50, %v3867_v60  ;;  %v1417_v63 = vrot.slane %v1415_v51, 4  ;;  %v1428_v1 = vshrl.u32 %v1091_v24, 16  ;;  %v1637_v7 = vld [vmem:[#allocation2 + $0x98] sm:$0x1]  ;;  %v1638_v2 = vld [vmem:[#allocation2 + $0x9c] sm:$0xe]  ;;  %v2050_v3 = vpop.permute.xlu1 %2049  ;;  %v2593_v4 = vpop.permute.xlu0 %2592 }
 0x1f7   : > { %v8785_v8 = vcombine.low %v3469_v39, %v3479_v55  ;;  %v1403_v9 = vsel %vm10233_vm10, %v1398_v54, %v1402_v11  ;;  %v1408_v12 = vrot.slane %v1407_v52, 4  ;;  %v8817_v10 = vcombine.low %v3865_v58, %v3868_v62  ;;  %2091 = vst.msk [vmem:[#allocation3 + $0x38] sm:$0xff] %vm2083_vm2, %v2050_v3  ;;  %v1639_v20 = vld [vmem:[#allocation2 + $0xa0] sm:$0xf]  ;;  %v1640_v33 = vld [vmem:[#allocation2 + $0xa4] sm:$0x1] }
 0x1f8   : > { %2635 = vst.msk [vmem:[#allocation3 + $0x30] sm:$0xff] %vm2628_vm3, %v2593_v4  ;;  %v1420_v42 = vrot.slane %v1418_v53, 5  ;;  %v1426_v36 = vrot.slane %v1424_v43, 5  ;;  %v1430_v15 = vrot.slane %v1428_v1, 4  ;;  %v1434_v18 = vshll.u32 %v1092_v59, 16  ;;  %v9407_v62 = vld [vmem:[#allocation2 + $0x9c] sm:$0xff]  }
 0x1f9   : > { %3646 = vrot.lane.b32.xlu1 %v8785_v8, %s9779_s16  ;;  %v1413_v22 = vsel %vm10233_vm10, %v1408_v12, %v1412_v47  ;;  %3967 = vrot.lane.b32.xlu0 %v8817_v10, %s9777_s12  ;;  %v8674_v26 = vrot.slane %v1635_v23, 9  ;;  %v1784_v14 = vrot.slane %v1636_v6, 5  ;;  %v1787_v27 = vrot.slane %v1637_v7, 5  ;;  %v885_v35 = vld [vmem:[#allocation2 + $0xa8] sm:$0xf] }
 0x1fa   : > { %v8658_v5 = vcombine.low %v1403_v9, %v1413_v22  ;;  %v1421_v38 = vor.u32 %v1420_v42, %v1417_v63  ;;  %v1431_v32 = vor.u32 %v1430_v15, %v1426_v36  ;;  %v1436_v24 = vrot.slane %v1434_v18, 5  ;;  %v2914_v34 = vpop.permute.xlu0 %2913  ;;  %v2136_v45 = vld [vmem:[#allocation2 + $0x9c] sm:$0xf]  ;;  %v889_v60 = vld [vmem:[#allocation2 + $0xb0] sm:$0x1] }
 0x1fb   : > { %v1785_v28 = vsel %vm10226_vm9, %v8674_v26, %v1784_v14  ;;  %v1786_v25 = vrot.slane %v1784_v14, 4  ;;  %v8675_v11 = vrot.slane %v1638_v2, 9  ;;  %v1791_v16 = vrot.slane %v1639_v20, 5  ;;  %2956 = vst.msk [vmem:[#allocation3 + $0x30] sm:$0xff] %vm2949_vm4, %v2914_v34  ;;  %v2137_v51 = vld [vmem:[#allocation2 + $0xa0] sm:$0xf] }
 0x1fc   : > { %v1422_v39 = vrot.slane %v1421_v38, 4  ;;  %v1432_v44 = vrot.slane %v1431_v32, 4  ;;  %v1794_v56 = vrot.slane %v1640_v33, 5  ;;  %v692_v48 = vrot.slane %v690_v30, 7  ;;  %v2138_v59 = vld [vmem:[#allocation2 + $0xa4] sm:$0x1] }
 0x1fd   : > { %1558 = vrot.lane.b32.xlu1 %v8658_v5, %s9773_s23  ;;  %v1788_v40 = vsel %vm10226_vm9, %v1786_v25, %v1787_v27  ;;  %v1792_v46 = vsel %vm10226_vm9, %v8675_v11, %v1791_v16  ;;  %v1793_v61 = vrot.slane %v1791_v16, 4  ;;  %v700_v47 = vrot.slane %v698_v21, 7  ;;  %v2681_v53 = vld [vmem:[#allocation2 + $0x9c] sm:$0xe]  ;;  %v461_v43 = vld [vmem:[%s10096_s22 + $0x70] sm:$0xf] }
 0x1fe   : > { %v1427_v49 = vsel %vm10233_vm10, %v1422_v39, %v1426_v36  ;;  %v1437_v30 = vsel %vm10233_vm10, %v1432_v44, %v1436_v24  ;;  %v8690_v58 = vcombine.low %v1785_v28, %v1788_v40  ;;  %v695_v50 = vor.u32 %v693_v31, %v692_v48  ;;  %v3092_v23 = vpop.permute.xlu0 %3091  ;;  %v2682_v1 = vld [vmem:[#allocation2 + $0xa0] sm:$0xf]  ;;  %v2683_v8 = vld [vmem:[#allocation2 + $0xa4] sm:$0x1]  ;;  %v11015_v38 = vld [vmem:[%s10096_s22 + $0x78] sm:$0xf] }
 0x1ff   : > { %v8659_v6 = vcombine.low %v1427_v49, %v1437_v30  ;;  %v1795_v54 = vsel %vm10226_vm9, %v1793_v61, %v1794_v56  ;;  %v696_v52 = vrot.slane %v692_v48, 4  ;;  %v701_v21 = vshll.u32 %v10893_v17, 16  ;;  %3134 = vst.msk [vmem:[#allocation3 + $0x30] sm:$0xff] %vm3127_vm5, %v3092_v23  ;;  %v462_v36 = vld [vmem:[%s10096_s22 + $0x74] sm:$0xf] }
 0x200   : > { %1882 = vrot.lane.b32.xlu0 %v8690_v58, %s9772_s8  ;;  %v8691_v55 = vcombine.low %v1792_v46, %v1795_v54  ;;  %v705_v13 = vrot.slane %v700_v47, 4  ;;  %v886_v31 = vsel %vm10241_vm11, %v695_v50, %v885_v35  ;;  %v2437_v63 = vshrl.u32 %v2136_v45, 16  ;;  %v892_v56 = vld [vmem:[#allocation2 + $0xb4] sm:$0xf] }
 0x201   : > { %1560 = vrot.lane.b32.xlu1 %v8659_v6, %s9773_s23  ;;  %v703_v17 = vor.u32 %v701_v21, %v700_v47  ;;  %887 = vst [vmem:[#allocation2 + $0xa8] sm:$0xf] %v886_v31  ;;  %v2440_v2 = vshll.u32 %v2136_v45, 16  ;;  %v2446_v3 = vshll.u32 %v2137_v51, 16  ;;  %v2450_v4 = vshrl.u32 %v2137_v51, 16 }
 0x202   : > { %v2595_v7 = vpop.permute.xlu1 %2594  ;;  %v2439_v9 = vrot.slane %v2437_v63, 4  ;;  %v2456_v12 = vshll.u32 %v2138_v59, 16  ;;  %v890_v10 = vsel %vm10264_vm13, %v705_v13, %v889_v60  ;;  %v8738_v42 = vrot.slane %v2681_v53, 9 }
 0x203   : > { %2636 = vst.msk [vmem:[#allocation3 + $0x38] sm:$0xff] %vm2628_vm3, %v2595_v7  ;;  %v704_v15 = vsel %vm10249_vm12, %v696_v52, %v703_v17  ;;  %v2442_v18 = vrot.slane %v2440_v2, 5  ;;  %v2448_v20 = vrot.slane %v2446_v3, 5  ;;  %v2452_v22 = vrot.slane %v2450_v4, 4  ;;  %891 = vst [vmem:[#allocation2 + $0xb0] sm:$0x1] %v890_v10 }
 0x204   : > { %2059 = vrot.lane.b32.xlu0 %v9407_v62, %s9774_s28  ;;  %888 = vst.msk [vmem:[#allocation2 + $0xac] sm:$0xf] %vm377_vm0, %v704_v15  ;;  %v2458_v26 = vrot.slane %v2456_v12, 5  ;;  %v2827_v14 = vrot.slane %v2682_v1, 5  ;;  %v2830_v27 = vrot.slane %v2683_v8, 5  ;;  %v707_v33 = vshrl.u32 %v461_v43, 16 }
 0x205   : > { %1884 = vrot.lane.b32.xlu1 %v8691_v55, %s9772_s8  ;;  %v2443_v32 = vor.u32 %v2442_v18, %v2439_v9  ;;  %v2453_v24 = vor.u32 %v2452_v22, %v2448_v20  ;;  %v710_v34 = vshll.u32 %v461_v43, 16  ;;  %v715_v28 = vshrl.u32 %v462_v36, 16 }
 0x206   : > { %v2916_v5 = vpop.permute.xlu1 %2915  ;;  %v2829_v25 = vrot.slane %v2827_v14, 4  ;;  %v709_v11 = vrot.slane %v707_v33, 7  ;;  %v718_v16 = vshll.u32 %v462_v36, 16  ;;  %v724_v48 = vshrl.u32 %v11015_v38, 16 }
 0x207   : > { %2957 = vst.msk [vmem:[#allocation3 + $0x38] sm:$0xff] %vm2949_vm4, %v2916_v5  ;;  %v2444_v35 = vrot.slane %v2443_v32, 4  ;;  %v2454_v39 = vrot.slane %v2453_v24, 4  ;;  %v11019_v44 = vrot.slane %v715_v28, 7  ;;  %v2828_v40 = vsel %vm10226_vm9, %v8738_v42, %v2827_v14  ;;  %v3637_v49 = vpop.permute.xlu0 %3636  ;;  %v896_v28 = vld [vmem:[#allocation2 + $0xbc] sm:$0x1] }
 0x208   : > { %v2139_v45 = vld [vmem:[#allocation2 + $0xa8] sm:$0xf]  ;;  %v2831_v46 = vsel %vm10226_vm9, %v2829_v25, %v2830_v27  ;;  %v712_v47 = vor.u32 %v710_v34, %v709_v11  ;;  %3679 = vst.msk [vmem:[#allocation3 + $0x30] sm:$0xff] %vm3672_vm7, %v3637_v49  ;;  %v713_v21 = vrot.slane %v709_v11, 4 }
 0x209   : > { %v2684_v61 = vld [vmem:[#allocation2 + $0xa8] sm:$0xe]  ;;  %v2449_v30 = vsel %vm10233_vm10, %v2444_v35, %v2448_v20  ;;  %v2459_v58 = vsel %vm10233_vm10, %v2454_v39, %v2458_v26  ;;  %v2461_v50 = vshrl.u32 %v2139_v45, 16  ;;  %v2464_v51 = vshll.u32 %v2139_v45, 16 }
 0x20a   : > { %v3094_v60 = vpop.permute.xlu1 %3093  ;;  %v8722_v23 = vcombine.low %v2449_v30, %v2459_v58  ;;  %v2141_v6 = vld [vmem:[#allocation2 + $0xb0] sm:$0x1]  ;;  %v8739_v52 = vrot.slane %v2684_v61, 9  ;;  %v3180_v59 = vld [vmem:[#allocation2 + $0xa8] sm:$0xf]  ;;  %v8754_v62 = vcombine.low %v2828_v40, %v2831_v46  ;;  %v720_v13 = vor.u32 %v718_v16, %v11019_v44 }
 0x20b   : > { %3135 = vst.msk [vmem:[#allocation3 + $0x38] sm:$0xff] %vm3127_vm5, %v3094_v60  ;;  %v2686_v54 = vld [vmem:[#allocation2 + $0xb0] sm:$0x1]  ;;  %v9408_v53 = vld [vmem:[#allocation2 + $0xa8] sm:$0xff]   ;;  %v2463_v55 = vrot.slane %v2461_v50, 4  ;;  %v893_v31 = vsel %vm10241_vm11, %v712_v47, %v892_v56  ;;  %v2466_v63 = vrot.slane %v2464_v51, 5  ;;  %v3958_v3 = vpop.permute.xlu0 %3957 }
 0x20c   : > { %v2140_v43 = vld [vmem:[#allocation2 + $0xac] sm:$0xf]  ;;  %2604 = vrot.lane.b32.xlu0 %v8722_v23, %s9778_s17  ;;  %v2480_v17 = vshll.u32 %v2141_v6, 16  ;;  %894 = vst [vmem:[#allocation2 + $0xb4] sm:$0xf] %v893_v31  ;;  %2061 = vrot.lane.b32.xlu1 %v9408_v53, %s9774_s28  ;;  %v2837_v8 = vrot.slane %v2686_v54, 5  ;;  %v721_v9 = vsel %vm10249_vm12, %v713_v21, %v720_v13 }
 0x20d   : > { %v2470_v1 = vshll.u32 %v2140_v43, 16  ;;  %v2474_v7 = vshrl.u32 %v2140_v43, 16  ;;  %v2685_v2 = vld [vmem:[#allocation2 + $0xac] sm:$0xf]  ;;  %v722_v12 = vrot.slane %v11019_v44, 4  ;;  %4000 = vst.msk [vmem:[#allocation3 + $0x30] sm:$0xff] %vm12715_vm8, %v3958_v3  ;;  %v2467_v10 = vor.u32 %v2466_v63, %v2463_v55 }
 0x20e   : > { %v2834_v4 = vrot.slane %v2685_v2, 5  ;;  %v2482_v15 = vrot.slane %v2480_v17, 5  ;;  %895 = vst.msk [vmem:[#allocation2 + $0xb8] sm:$0xf] %vm377_vm0, %v721_v9  ;;  %v3181_v18 = vld [vmem:[#allocation2 + $0xac] sm:$0xf] }
 0x20f   : > { %v2472_v42 = vrot.slane %v2470_v1, 5  ;;  %v2476_v36 = vrot.slane %v2474_v7, 4  ;;  %v3182_v26 = vld [vmem:[#allocation2 + $0xb0] sm:$0x1]  ;;  %v3481_v14 = vshrl.u32 %v3180_v59, 16  ;;  %v3484_v27 = vshll.u32 %v3180_v59, 16  ;;  %v3960_v25 = vpop.permute.xlu0 %3959 }
 0x210   : > { %v11044_v20 = vsel %vm10226_vm9, %v8739_v52, %v2834_v4  ;;  %v2836_v22 = vrot.slane %v2834_v4, 4  ;;  %v2468_v33 = vrot.slane %v2467_v10, 4  ;;  %2925 = vrot.lane.b32.xlu0 %v8754_v62, %s9776_s9  ;;  %v9411_v32 = vld [vmem:[#allocation2 + $0xa8] sm:$0xff]   ;;  %v3490_v24 = vshll.u32 %v3181_v18, 16  ;;  %v3639_v56 = vpop.permute.xlu1 %3638  ;;  %v3727_v47 = vld [vmem:[#allocation2 + $0xb0] sm:$0x1] }
 0x211   : > { %v2477_v5 = vor.u32 %v2476_v36, %v2472_v42  ;;  %v3494_v34 = vshrl.u32 %v3181_v18, 16  ;;  %v3483_v16 = vrot.slane %v3481_v14, 4  ;;  %v3486_v35 = vrot.slane %v3484_v27, 5  ;;  %v3725_v44 = vld [vmem:[#allocation2 + $0xa8] sm:$0xe]  ;;  %3680 = vst.msk [vmem:[#allocation3 + $0x38] sm:$0xff] %vm3672_vm7, %v3639_v56 }
 0x212   : > { %v11049_v11 = vsel %vm10226_vm9, %v2836_v22, %v2837_v8  ;;  %v3500_v39 = vshll.u32 %v3182_v26, 16  ;;  %v2473_v45 = vsel %vm10233_vm10, %v2468_v33, %v2472_v42  ;;  %v3492_v46 = vrot.slane %v3490_v24, 5  ;;  %v3726_v61 = vld [vmem:[#allocation2 + $0xac] sm:$0xf]  ;;  %4001 = vst.msk [vmem:[#allocation3 + $0x38] sm:$0xff] %vm12715_vm8, %v3960_v25 }
 0x213   : > { %v2478_v40 = vrot.slane %v2477_v5, 4  ;;  %v8755_v60 = vcombine.low %v11044_v20, %v11049_v11  ;;  %v3487_v49 = vor.u32 %v3486_v35, %v3483_v16  ;;  %v3496_v30 = vrot.slane %v3494_v34, 4  ;;  %v3183_v50 = vld [vmem:[#allocation2 + $0xb4] sm:$0xf]  ;;  %v1093_v52 = vld [vmem:[#allocation2 + $0xa8] sm:$0xf] }
 0x214   : > { %v897_v58 = vsel %vm10264_vm13, %v722_v12, %v896_v28  ;;  %3103 = vrot.lane.b32.xlu0 %v9411_v32, %s9775_s15  ;;  %v3502_v23 = vrot.slane %v3500_v39, 5  ;;  %v3505_v6 = vshrl.u32 %v3183_v50, 16  ;;  %v3508_v54 = vshll.u32 %v3183_v50, 16  ;;  %v4016_v21 = vld [vmem:[#allocation3 + $0x30] sm:$0xff]  ;;  %v1551_v13 = vpop.permute.xlu1 %1550  ;;  %v1095_v14 = vld [vmem:[#allocation2 + $0xb0] sm:$0x1] }
 0x215   : > { %v2483_v51 = vsel %vm10233_vm10, %v2478_v40, %v2482_v15  ;;  %898 = vst [vmem:[#allocation2 + $0xbc] sm:$0x1] %v897_v58  ;;  %v3488_v53 = vrot.slane %v3487_v49, 4  ;;  %v3497_v43 = vor.u32 %v3496_v30, %v3492_v46  ;;  %v3184_v55 = vld [vmem:[#allocation2 + $0xb8] sm:$0xf]  ;;  %v8802_v62 = vrot.slane %v3725_v44, 9  ;;  %9187 = vmatprep.mubr.msk.bf16.mxu0 %vm4046_vm6, %v4016_v21 }
 0x216   : > { %v8723_v59 = vcombine.low %v2473_v45, %v2483_v51  ;;  %v3507_v31 = vrot.slane %v3505_v6, 4  ;;  %v3510_v63 = vrot.slane %v3508_v54, 5  ;;  %v3514_v1 = vshll.u32 %v3184_v55, 16  ;;  %1591 = vst.msk [vmem:[#allocation3 + $0x40] sm:$0xff] %vm1582_vm15, %v1551_v13  ;;  %v1094_v10 = vld [vmem:[#allocation2 + $0xac] sm:$0xf] }
 0x217   : > { %v3518_v7 = vshrl.u32 %v3184_v55, 16  ;;  %v3493_v17 = vsel %vm10233_vm10, %v3488_v53, %v3492_v46  ;;  %v3498_v2 = vrot.slane %v3497_v43, 4  ;;  %v3871_v3 = vrot.slane %v3726_v61, 5  ;;  %v1875_v36 = vpop.permute.xlu0 %1874  ;;  %v9423_v15 = vld [vmem:[#allocation2 + $0xa8] sm:$0xff]   ;;  %v9412_v18 = vld [vmem:[#allocation2 + $0xb4] sm:$0xff]  }
 0x218   : > { %2606 = vrot.lane.b32.xlu1 %v8723_v59, %s9778_s17  ;;  %v3874_v4 = vrot.slane %v3727_v47, 5  ;;  %v3511_v8 = vor.u32 %v3510_v63, %v3507_v31  ;;  %v11067_v9 = vrot.slane %v3514_v1, 5  ;;  %v1439_v42 = vshrl.u32 %v1093_v52, 16  ;;  %v1553_v33 = vpop.permute.xlu1 %1552  ;;  %1915 = vst.msk [vmem:[#allocation3 + $0x40] sm:$0xff] %vm1906_vm1, %v1875_v36  ;;  %v3728_v28 = vld [vmem:[#allocation2 + $0xb4] sm:$0xe] }
 0x219   : > { %v3520_v12 = vrot.slane %v3518_v7, 4  ;;  %v3503_v20 = vsel %vm10233_vm10, %v3498_v2, %v3502_v23  ;;  %v3872_v22 = vsel %vm10226_vm9, %v8802_v62, %v3871_v3  ;;  %v3873_v26 = vrot.slane %v3871_v3, 4  ;;  %v3729_v25 = vld [vmem:[#allocation2 + $0xb8] sm:$0xf]  ;;  %1592 = vst.msk [vmem:[#allocation3 + $0x48] sm:$0xff] %vm1582_vm15, %v1553_v33  ;;  %v4017_v56 = vld [vmem:[#allocation3 + $0x38] sm:$0xff] }
 0x21a   : > { %v1442_v27 = vshll.u32 %v1093_v52, 16  ;;  %v8786_v5 = vcombine.low %v3493_v17, %v3503_v20  ;;  %v3512_v32 = vrot.slane %v3511_v8, 4  ;;  %v1441_v34 = vrot.slane %v1439_v42, 4  ;;  %1049 = vst.msk [vmem:[#allocation3 + $0x70] sm:$0xff] %vm1034_vm14, %v9423_v15  ;;  %v1096_v49 = vld [vmem:[#allocation2 + $0xb4] sm:$0xf]  ;;  %9188 = vmatmul.mubr.msk.bf16.gmra.mrb[12].mxu0 %vm4046_vm6, %v4017_v56 }
 0x21b   : > { %v3521_v24 = vor.u32 %v3520_v12, %v11067_v9  ;;  %v3875_v16 = vsel %vm10226_vm9, %v3873_v26, %v3874_v4  ;;  %v1448_v39 = vshll.u32 %v1094_v10, 16  ;;  %v1452_v44 = vshrl.u32 %v1094_v10, 16  ;;  %v9424_v6 = vld [vmem:[#allocation2 + $0xb4] sm:$0xff]   ;;  %v1641_v31 = vld [vmem:[#allocation2 + $0xa8] sm:$0xe] }
 0x21c   : > { %2927 = vrot.lane.b32.xlu1 %v8755_v60, %s9776_s9  ;;  %v3185_v11 = vld [vmem:[#allocation2 + $0xbc] sm:$0x1]  ;;  %v1444_v35 = vrot.slane %v1442_v27, 5  ;;  %3648 = vrot.lane.b32.xlu0 %v8786_v5, %s9779_s16  ;;  %v3517_v45 = vsel %vm10233_vm10, %v3512_v32, %v11067_v9  ;;  %v8818_v61 = vcombine.low %v3872_v22, %v3875_v16  ;;  %v2052_v60 = vpop.permute.xlu0 %2051  ;;  %v1458_v51 = vshll.u32 %v1095_v14, 16  ;;  %v1877_v23 = vpop.permute.xlu1 %1876  ;;  %v1097_v53 = vld [vmem:[#allocation2 + $0xb8] sm:$0xf] }
 0x21d   : > { %v3522_v40 = vrot.slane %v3521_v24, 4  ;;  %v3524_v46 = vshll.u32 %v3185_v11, 16  ;;  %v3730_v47 = vld [vmem:[#allocation2 + $0xbc] sm:$0x1]  ;;  %v1450_v58 = vrot.slane %v1448_v39, 5  ;;  %v1454_v50 = vrot.slane %v1452_v44, 4 }
 0x21e   : > { %v1445_v30 = vor.u32 %v1444_v35, %v1441_v34  ;;  %2092 = vst.msk [vmem:[#allocation3 + $0x40] sm:$0xff] %vm2083_vm2, %v2052_v60  ;;  %v8803_v52 = vrot.slane %v3728_v28, 9  ;;  %v3878_v21 = vrot.slane %v3729_v25, 5  ;;  %v3881_v59 = vrot.slane %v3730_v47, 5  ;;  %v1098_v17 = vld [vmem:[#allocation2 + $0xbc] sm:$0x1] }
 0x21f   : > { %v3526_v54 = vrot.slane %v3524_v46, 5  ;;  %1916 = vst.msk [vmem:[#allocation3 + $0x48] sm:$0xff] %vm1906_vm1, %v1877_v23  ;;  %v1455_v55 = vor.u32 %v1454_v50, %v1450_v58  ;;  %v1460_v62 = vrot.slane %v1458_v51, 5  ;;  %v1463_v13 = vshrl.u32 %v1096_v49, 16  ;;  %v1642_v3 = vld [vmem:[#allocation2 + $0xac] sm:$0xf] }
 0x220   : > { %3105 = vrot.lane.b32.xlu1 %v9412_v18, %s9775_s15  ;;  %v1446_v43 = vrot.slane %v1445_v30, 4  ;;  %1050 = vst.msk [vmem:[#allocation3 + $0x78] sm:$0xff] %vm1034_vm14, %v9424_v6  ;;  %3969 = vrot.lane.b32.xlu0 %v8818_v61, %s9777_s12  ;;  %v3879_v1 = vsel %vm10226_vm9, %v8803_v52, %v3878_v21  ;;  %v3880_v7 = vrot.slane %v3878_v21, 4  ;;  %v1466_v2 = vshll.u32 %v1096_v49, 16  ;;  %v1643_v10 = vld [vmem:[#allocation2 + $0xb0] sm:$0x1] }
 0x221   : > { %v3527_v63 = vsel %vm10233_vm10, %v3522_v40, %v3526_v54  ;;  %v1456_v9 = vrot.slane %v1455_v55, 4  ;;  %v1465_v12 = vrot.slane %v1463_v13, 4  ;;  %v1472_v15 = vshll.u32 %v1097_v53, 16  ;;  %v1644_v20 = vld [vmem:[#allocation2 + $0xb4] sm:$0xe] }
 0x222   : > { %v8787_v4 = vcombine.low %v3517_v45, %v3527_v63  ;;  %v1451_v8 = vsel %vm10233_vm10, %v1446_v43, %v1450_v58  ;;  %v3882_v42 = vsel %vm10226_vm9, %v3880_v7, %v3881_v59  ;;  %v1468_v36 = vrot.slane %v1466_v2, 5  ;;  %v1645_v33 = vld [vmem:[#allocation2 + $0xb8] sm:$0xf]  ;;  %v1646_v5 = vld [vmem:[#allocation2 + $0xbc] sm:$0x1] }
 0x223   : > { %v1476_v18 = vshrl.u32 %v1097_v53, 16  ;;  %v1461_v22 = vsel %vm10233_vm10, %v1456_v9, %v1460_v62  ;;  %v8819_v26 = vcombine.low %v3879_v1, %v3882_v42  ;;  %v1482_v14 = vshll.u32 %v1098_v17, 16  ;;  %v464_v25 = vld [vmem:[%s10096_s22 + $0x7c] sm:$0xf]  ;;  %v899_v6 = vld [vmem:[#allocation2 + $0xc0] sm:$0xf] }
 0x224   : > { %3650 = vrot.lane.b32.xlu1 %v8787_v4, %s9779_s16  ;;  %v8676_v27 = vrot.slane %v1641_v31, 9  ;;  %v8660_v32 = vcombine.low %v1451_v8, %v1461_v22  ;;  %v1469_v24 = vor.u32 %v1468_v36, %v1465_v12  ;;  %v1474_v34 = vrot.slane %v1472_v15, 5  ;;  %v2142_v53 = vld [vmem:[#allocation2 + $0xb4] sm:$0xf]  ;;  %v2143_v43 = vld [vmem:[#allocation2 + $0xb8] sm:$0xf] }
 0x225   : > { %v1478_v28 = vrot.slane %v1476_v18, 4  ;;  %3971 = vrot.lane.b32.xlu0 %v8819_v26, %s9777_s12  ;;  %v1484_v11 = vrot.slane %v1482_v14, 5  ;;  %v1798_v16 = vrot.slane %v1642_v3, 5  ;;  %v1801_v35 = vrot.slane %v1643_v10, 5  ;;  %v2054_v44 = vpop.permute.xlu1 %2053  ;;  %v2597_v56 = vpop.permute.xlu0 %2596  ;;  %v2144_v31 = vld [vmem:[#allocation2 + $0xbc] sm:$0x1] }
 0x226   : > { %v8677_v39 = vrot.slane %v1644_v20, 9  ;;  %v1470_v45 = vrot.slane %v1469_v24, 4  ;;  %v1805_v46 = vrot.slane %v1645_v33, 5  ;;  %v1808_v61 = vrot.slane %v1646_v5, 5  ;;  %2093 = vst.msk [vmem:[#allocation3 + $0x48] sm:$0xff] %vm2083_vm2, %v2054_v44  ;;  %v9413_v17 = vld [vmem:[#allocation2 + $0xb4] sm:$0xff]  }
 0x227   : > { %v1479_v40 = vor.u32 %v1478_v28, %v1474_v34  ;;  %2637 = vst.msk [vmem:[#allocation3 + $0x40] sm:$0xff] %vm2628_vm3, %v2597_v56  ;;  %v1799_v47 = vsel %vm10226_vm9, %v8676_v27, %v1798_v16  ;;  %v1800_v49 = vrot.slane %v1798_v16, 4  ;;  %v726_v60 = vrot.slane %v724_v48, 7  ;;  %v2687_v63 = vld [vmem:[#allocation2 + $0xb4] sm:$0xe]  ;;  %s8629_s22 = sshll.u32 %s10092_s20, 8 }
 0x228   : > { %1562 = vrot.lane.b32.xlu1 %v8660_v32, %s9773_s23  ;;  %v727_v30 = vshll.u32 %v11015_v38, 16  ;;  %v1475_v58 = vsel %vm10233_vm10, %v1470_v45, %v1474_v34  ;;  %v1806_v51 = vsel %vm10226_vm9, %v8677_v39, %v1805_v46  ;;  %v1807_v23 = vrot.slane %v1805_v46, 4  ;;  %v903_v4 = vld [vmem:[#allocation2 + $0xc8] sm:$0x1]  ;;  %v3189_v8 = vld [vmem:[#allocation2 + $0xcc] sm:$0xf] }
 0x229   : > { %v1480_v50 = vrot.slane %v1479_v40, 4  ;;  %v1802_v54 = vsel %vm10226_vm9, %v1800_v49, %v1801_v35  ;;  %v730_v21 = vrot.slane %v726_v60, 4  ;;  %v732_v59 = vshrl.u32 %v464_v25, 16  ;;  %v2918_v48 = vpop.permute.xlu0 %2917  ;;  %v2688_v36 = vld [vmem:[#allocation2 + $0xb8] sm:$0xf] }
 0x22a   : > { %v729_v52 = vor.u32 %v727_v30, %v726_v60  ;;  %v8692_v55 = vcombine.low %v1799_v47, %v1802_v54  ;;  %v1809_v62 = vsel %vm10226_vm9, %v1807_v23, %v1808_v61  ;;  %v735_v13 = vshll.u32 %v464_v25, 16  ;;  %2958 = vst.msk [vmem:[#allocation3 + $0x40] sm:$0xff] %vm2949_vm4, %v2918_v48  ;;  %v2689_v22 = vld [vmem:[#allocation2 + $0xbc] sm:$0x1]  ;;  %v11131_v25 = vld [vmem:[#allocation2 + $0xd0] sm:$0xf] }
 0x22b   : > { %v1485_v38 = vsel %vm10233_vm10, %v1480_v50, %v1484_v11  ;;  %v8693_v7 = vcombine.low %v1806_v51, %v1809_v62  ;;  %v734_v2 = vrot.slane %v732_v59, 7  ;;  %v2485_v9 = vshrl.u32 %v2142_v53, 16 }
 0x22c   : > { %v8661_v1 = vcombine.low %v1475_v58, %v1485_v38  ;;  %v900_v3 = vsel %vm10241_vm11, %v729_v52, %v899_v6  ;;  %1886 = vrot.lane.b32.xlu0 %v8692_v55, %s9772_s8  ;;  %v2488_v12 = vshll.u32 %v2142_v53, 16  ;;  %v2494_v10 = vshll.u32 %v2143_v43, 16 }
 0x22d   : > { %901 = vst [vmem:[#allocation2 + $0xc0] sm:$0xf] %v900_v3  ;;  %v2498_v42 = vshrl.u32 %v2143_v43, 16  ;;  %v737_v15 = vor.u32 %v735_v13, %v734_v2  ;;  %v739_v18 = vrot.slane %v734_v2, 4  ;;  %v2504_v20 = vshll.u32 %v2144_v31, 16  ;;  %v3096_v14 = vpop.permute.xlu0 %3095 }
 0x22e   : > { %1564 = vrot.lane.b32.xlu1 %v8661_v1, %s9773_s23  ;;  %v8740_v26 = vrot.slane %v2687_v63, 9  ;;  %v2487_v37 = vrot.slane %v2485_v9, 4  ;;  %v2490_v27 = vrot.slane %v2488_v12, 5  ;;  %v2496_v33 = vrot.slane %v2494_v10, 5  ;;  %3136 = vst.msk [vmem:[#allocation3 + $0x40] sm:$0xff] %vm3127_vm5, %v3096_v14  ;;  %s12497_s23 = scalar_lea.vmem [#allocation18], %s8629_s22 }
 0x22f   : > { %v2500_v5 = vrot.slane %v2498_v42, 4  ;;  %v738_v32 = vsel %vm10249_vm12, %v730_v21, %v737_v15  ;;  %v2506_v24 = vrot.slane %v2504_v20, 5  ;;  %v904_v34 = vsel %vm10264_vm13, %v739_v18, %v903_v4 }
 0x230   : > { %v2841_v28 = vrot.slane %v2688_v36, 5  ;;  %2063 = vrot.lane.b32.xlu0 %v9413_v17, %s9774_s28  ;;  %902 = vst.msk [vmem:[#allocation2 + $0xc4] sm:$0xf] %vm377_vm0, %v738_v32  ;;  %v2491_v16 = vor.u32 %v2490_v27, %v2487_v37  ;;  %905 = vst [vmem:[#allocation2 + $0xc8] sm:$0x1] %v904_v34  ;;  %v2844_v39 = vrot.slane %v2689_v22, 5 }
 0x231   : > { %v2599_v11 = vpop.permute.xlu1 %2598  ;;  %v2501_v35 = vor.u32 %v2500_v5, %v2496_v33  ;;  %v3553_v44 = vshrl.u32 %v3189_v8, 16  ;;  %v3556_v57 = vshll.u32 %v3189_v8, 16  ;;  %v3562_v61 = vshll.u32 %v11131_v25, 16  ;;  %vm12716_vm0 = vmmov %vm12715_vm8 }
 0x232   : > { %2638 = vst.msk [vmem:[#allocation3 + $0x48] sm:$0xff] %vm2628_vm3, %v2599_v11  ;;  %1888 = vrot.lane.b32.xlu1 %v8693_v7, %s9772_s8  ;;  %v2843_v56 = vrot.slane %v2841_v28, 4  ;;  %v2492_v45 = vrot.slane %v2491_v16, 4  ;;  %v2842_v49 = vsel %vm10226_vm9, %v8740_v26, %v2841_v28  ;;  %v3566_v53 = vshrl.u32 %v11131_v25, 16  ;;  %v3191_v11 = vld [vmem:[#allocation2 + $0xd4] sm:$0x1]  ;;  %vm12717_vm11 = vmmov %vm12716_vm0 }
 0x233   : > { %v2502_v40 = vrot.slane %v2501_v35, 4  ;;  %v11137_v46 = vrot.slane %v3553_v44, 4  ;;  %v11150_v55 = vrot.slane %v3556_v57, 5  ;;  %vm4370_vm13 = vcmask 60416   ;;  %vm12718_vm8 = vmmov %vm12716_vm0 }
 0x234   : > { %v2145_v47 = vld [vmem:[#allocation2 + $0xc0] sm:$0xf]  ;;  %v2845_v60 = vsel %vm10226_vm9, %v2843_v56, %v2844_v39  ;;  %v2497_v50 = vsel %vm10233_vm10, %v2492_v45, %v2496_v33  ;;  %4378 = vst.msk [vmem:[#allocation4 + $0x18] sm:$0xf] %vm4370_vm13, %v9771_v0  ;;  %4371 = vst.msk [vmem:[#allocation4] sm:$0xf] %vm4370_vm13, %v9771_v0 }
 0x235   : > { %v2690_v30 = vld [vmem:[#allocation2 + $0xc0] sm:$0xe]  ;;  %v2920_v58 = vpop.permute.xlu1 %2919  ;;  %v2507_v51 = vsel %vm10233_vm10, %v2502_v40, %v2506_v24  ;;  %v2509_v23 = vshrl.u32 %v2145_v47, 16  ;;  %v2512_v6 = vshll.u32 %v2145_v47, 16  ;;  %v3641_v62 = vpop.permute.xlu0 %3640  ;;  %v8756_v63 = vcombine.low %v2842_v49, %v2845_v60  ;;  %4372 = vst.msk [vmem:[#allocation4 + $0x4] sm:$0xf] %vm4370_vm13, %v9771_v0 }
 0x236   : > { %v3186_v54 = vld [vmem:[#allocation2 + $0xc0] sm:$0xf]  ;;  %2959 = vst.msk [vmem:[#allocation3 + $0x48] sm:$0xff] %vm2949_vm4, %v2920_v58  ;;  %v8724_v52 = vcombine.low %v2497_v50, %v2507_v51  ;;  %v8741_v21 = vrot.slane %v2690_v30, 9  ;;  %v3559_v16 = vor.u32 %v11150_v55, %v11137_v46  ;;  %v11169_v60 = vrot.slane %v3562_v61, 5 }
 0x237   : > { %v3529_v59 = vshrl.u32 %v3186_v54, 16  ;;  %v2511_v43 = vrot.slane %v2509_v23, 4  ;;  %v2514_v48 = vrot.slane %v2512_v6, 5  ;;  %v3532_v38 = vshll.u32 %v3186_v54, 16  ;;  %v9414_v13 = vld [vmem:[#allocation2 + $0xc0] sm:$0xff]   ;;  %3681 = vst.msk [vmem:[#allocation3 + $0x40] sm:$0xff] %vm3672_vm7, %v3641_v62 }
 0x238   : > { %2608 = vrot.lane.b32.xlu0 %v8724_v52, %s9778_s17  ;;  %v2146_v31 = vld [vmem:[#allocation2 + $0xc4] sm:$0xf]  ;;  %v2147_v17 = vld [vmem:[#allocation2 + $0xc8] sm:$0x1]  ;;  %2065 = vrot.lane.b32.xlu1 %v9414_v13, %s9774_s28  ;;  %v3731_v57 = vld [vmem:[#allocation2 + $0xc0] sm:$0xe] }
 0x239   : > { %v3531_v1 = vrot.slane %v3529_v59, 4  ;;  %v3098_v7 = vpop.permute.xlu1 %3097  ;;  %v2515_v2 = vor.u32 %v2514_v48, %v2511_v43  ;;  %v2518_v3 = vshll.u32 %v2146_v31, 16  ;;  %v2522_v4 = vshrl.u32 %v2146_v31, 16  ;;  %v2691_v8 = vld [vmem:[#allocation2 + $0xc4] sm:$0xf]  ;;  %v3962_v20 = vpop.permute.xlu0 %3961  ;;  %s9128_s28 = sshll.u32 %s9847_s30, 12 }
 0x23a   : > { %3137 = vst.msk [vmem:[#allocation3 + $0x48] sm:$0xff] %vm3127_vm5, %v3098_v7  ;;  %v2528_v9 = vshll.u32 %v2147_v17, 16  ;;  %v2692_v12 = vld [vmem:[#allocation2 + $0xc8] sm:$0x1]  ;;  %v2848_v10 = vrot.slane %v2691_v8, 5  ;;  %v9417_v26 = vld [vmem:[#allocation2 + $0xc0] sm:$0xff]  }
 0x23b   : > { %v2516_v42 = vrot.slane %v2515_v2, 4  ;;  %v2520_v36 = vrot.slane %v2518_v3, 5  ;;  %v2524_v15 = vrot.slane %v2522_v4, 4  ;;  %v2851_v18 = vrot.slane %v2692_v12, 5  ;;  %v3187_v14 = vld [vmem:[#allocation2 + $0xc4] sm:$0xf] }
 0x23c   : > { %2929 = vrot.lane.b32.xlu0 %v8756_v63, %s9776_s9  ;;  %v2850_v22 = vrot.slane %v2848_v10, 4  ;;  %v3188_v37 = vld [vmem:[#allocation2 + $0xc8] sm:$0x1]  ;;  %4002 = vst.msk [vmem:[#allocation3 + $0x40] sm:$0xff] %vm12716_vm0, %v3962_v20  ;;  %v2530_v33 = vrot.slane %v2528_v9, 5  ;;  %v3534_v5 = vrot.slane %v3532_v38, 5  ;;  %v2849_v24 = vsel %vm10226_vm9, %v8741_v21, %v2848_v10 }
 0x23d   : > { %v2525_v27 = vor.u32 %v2524_v15, %v2520_v36  ;;  %v3538_v32 = vshll.u32 %v3187_v14, 16  ;;  %v3542_v34 = vshrl.u32 %v3187_v14, 16  ;;  %v3548_v28 = vshll.u32 %v3188_v37, 16  ;;  %v3732_v45 = vld [vmem:[#allocation2 + $0xc4] sm:$0xf]  ;;  %v3964_v40 = vpop.permute.xlu0 %3963  ;;  %v11206_v10 = vld [vmem:[#allocation2 + $0xcc] sm:$0xff]  }
 0x23e   : > { %v2521_v35 = vsel %vm10233_vm10, %v2516_v42, %v2520_v36  ;;  %v3535_v44 = vor.u32 %v3534_v5, %v3531_v1  ;;  %v2852_v47 = vsel %vm10226_vm9, %v2850_v22, %v2851_v18  ;;  %v3568_v46 = vrot.slane %v3566_v53, 4  ;;  %v3733_v30 = vld [vmem:[#allocation2 + $0xc8] sm:$0x1]  ;;  %v3643_v58 = vpop.permute.xlu1 %3642  ;;  %v11175_v43 = vld [vmem:[#allocation2 + $0xd0] sm:$0xf]  ;;  %s8466_s30 = scalar_lea.sflag [#allocation8], %s10092_s20 }
 0x23f   : > { %v2526_v39 = vrot.slane %v2525_v27, 4  ;;  %v3540_v56 = vrot.slane %v3538_v32, 5  ;;  %v3544_v49 = vrot.slane %v3542_v34, 4  ;;  %v3550_v23 = vrot.slane %v3548_v28, 5  ;;  %3682 = vst.msk [vmem:[#allocation3 + $0x48] sm:$0xff] %vm3672_vm7, %v3643_v58 }
 0x240   : > { %3107 = vrot.lane.b32.xlu0 %v9417_v26, %s9775_s15  ;;  %v3536_v51 = vrot.slane %v3535_v44, 4  ;;  %v3572_v6 = vshll.u32 %v3191_v11, 16  ;;  %v3569_v21 = vor.u32 %v3568_v46, %v11169_v60  ;;  %v8804_v59 = vrot.slane %v3731_v57, 9  ;;  %4003 = vst.msk [vmem:[#allocation3 + $0x48] sm:$0xff] %vm12717_vm11, %v3964_v40  ;;  %v11188_v7 = vld [vmem:[#allocation2 + $0xcc] sm:$0xe]  ;;  %vm12719_vm11 = vmmov %vm12716_vm0 }
 0x241   : > { %v2531_v50 = vsel %vm10233_vm10, %v2526_v39, %v2530_v33  ;;  %v3545_v52 = vor.u32 %v3544_v49, %v3540_v56  ;;  %v3885_v25 = vrot.slane %v3732_v45, 5  ;;  %v3888_v61 = vrot.slane %v3733_v30, 5  ;;  %v11198_v4 = vld [vmem:[#allocation2 + $0xd4] sm:$0x1]  ;;  %4375 = vst.msk [vmem:[#allocation4 + $0xc] sm:$0xf] %vm4370_vm13, %v9771_v0 }
 0x242   : > { %v8725_v54 = vcombine.low %v2521_v35, %v2531_v50  ;;  %v8757_v48 = vcombine.low %v2849_v24, %v2852_v47  ;;  %v3541_v38 = vsel %vm10233_vm10, %v3536_v51, %v3540_v56  ;;  %v11181_v62 = vrot.slane %v3559_v16, 4  ;;  %v1555_v13 = vpop.permute.xlu1 %1554  ;;  %4376 = vst.msk [vmem:[#allocation4 + $0x10] sm:$0xf] %vm4370_vm13, %v9771_v0  ;;  %4379 = vst.msk [vmem:[#allocation4 + $0x1c] sm:$0xf] %vm4370_vm13, %v9771_v0 }
 0x243   : > { %v4018_v53 = vld [vmem:[#allocation3 + $0x40] sm:$0xff]  ;;  %v3546_v55 = vrot.slane %v3545_v52, 4  ;;  %v11184_v31 = vrot.slane %v3569_v21, 4  ;;  %v11186_v63 = vrot.slane %v3572_v6, 5  ;;  %v3887_v1 = vrot.slane %v3885_v25, 4  ;;  %1593 = vst.msk [vmem:[#allocation3 + $0x50] sm:$0xff] %vm1582_vm15, %v1555_v13 }
 0x244   : > { %2610 = vrot.lane.b32.xlu1 %v8725_v54, %s9778_s17  ;;  %9191 = vmatprep.mubr.msk.bf16.mxu0 %vm4046_vm6, %v4018_v53  ;;  %v3892_v17 = vrot.slane %v11175_v43, 5  ;;  %v11196_v3 = vsel %vm10226_vm9, %v8804_v59, %v3885_v25  ;;  %v1879_v8 = vpop.permute.xlu0 %1878  ;;  %v3565_v42 = vsel %vm10233_vm10, %v11181_v62, %v11169_v60  ;;  %v8805_v36 = vrot.slane %v11188_v7, 9  ;;  %4381 = vst.msk [vmem:[#allocation4 + $0x24] sm:$0xf] %vm4370_vm13, %v9771_v0  ;;  %v5104_v32 = vld [vmem:[#allocation4] sm:$0xf] }
 0x245   : > { %v3551_v2 = vsel %vm10233_vm10, %v3546_v55, %v3550_v23  ;;  %v11202_v12 = vsel %vm10226_vm9, %v3887_v1, %v3888_v61  ;;  %1917 = vst.msk [vmem:[#allocation3 + $0x50] sm:$0xff] %vm1906_vm1, %v1879_v8  ;;  %vm4373_vm14 = vcmask 57344   ;;  %v3575_v18 = vsel %vm10233_vm10, %v11184_v31, %v11186_v63  ;;  %v5105_v34 = vld [vmem:[#allocation4 + $0x4] sm:$0xf]  ;;  %v5649_v57 = vld [vmem:[#allocation4] sm:$0xe] }
 0x246   : > { %v8788_v9 = vcombine.low %v3541_v38, %v3551_v2  ;;  %v1557_v15 = vpop.permute.xlu1 %1556  ;;  %4382 = vst.msk [vmem:[#allocation4 + $0x28] sm:$0xf] %vm4370_vm13, %v9771_v0  ;;  %4384 = vst.msk [vmem:[#allocation4 + $0x30] sm:$0xf] %vm4370_vm13, %v9771_v0  ;;  %v8820_v20 = vcombine.low %v11196_v3, %v11202_v12  ;;  %v3894_v22 = vrot.slane %v3892_v17, 4  ;;  %v3895_v26 = vrot.slane %v11198_v4, 5 }
 0x247   : > { %4385 = vst.msk [vmem:[#allocation4 + $0x34] sm:$0xf] %vm4370_vm13, %v9771_v0  ;;  %4387 = vst.msk [vmem:[#allocation4 + $0x3c] sm:$0xf] %vm4370_vm13, %v9771_v0  ;;  %v4019_v14 = vld [vmem:[#allocation3 + $0x48] sm:$0xff]  ;;  %v8789_v27 = vcombine.low %v3565_v42, %v3575_v18  ;;  %v5153_v11 = vshrl.u32 %v5104_v32, 16 }
 0x248   : > { %2931 = vrot.lane.b32.xlu1 %v8757_v48, %s9776_s9  ;;  %4388 = vst.msk [vmem:[#allocation4 + $0x40] sm:$0xf] %vm4370_vm13, %v9771_v0  ;;  %4390 = vst.msk [vmem:[#allocation4 + $0x48] sm:$0xf] %vm4370_vm13, %v9771_v0  ;;  %3652 = vrot.lane.b32.xlu0 %v8788_v9, %s9779_s16  ;;  %v2056_v37 = vpop.permute.xlu0 %2055  ;;  %v3896_v5 = vsel %vm10226_vm9, %v3894_v22, %v3895_v26  ;;  %v5156_v16 = vshll.u32 %v5104_v32, 16  ;;  %v5162_v35 = vshll.u32 %v5105_v34, 16 }
 0x249   : > { %4391 = vst.msk [vmem:[#allocation4 + $0x4c] sm:$0xf] %vm4370_vm13, %v9771_v0  ;;  %4393 = vst.msk [vmem:[#allocation4 + $0x54] sm:$0xf] %vm4370_vm13, %v9771_v0  ;;  %9192 = vmatmul.mubr.msk.bf16.gmra.mrb[16].mxu0 %vm4046_vm6, %v4019_v14  ;;  %v5166_v39 = vshrl.u32 %v5105_v34, 16  ;;  %v5155_v40 = vrot.slane %v5153_v11, 4 }
 0x24a   : > { %4394 = vst.msk [vmem:[#allocation4 + $0x58] sm:$0xf] %vm4370_vm13, %v9771_v0  ;;  %4396 = vst.msk [vmem:[#allocation4 + $0x60] sm:$0xf] %vm4370_vm13, %v9771_v0  ;;  %v1881_v33 = vpop.permute.xlu1 %1880  ;;  %v5650_v45 = vld [vmem:[#allocation4 + $0x4] sm:$0xf] }
 0x24b   : > { %4397 = vst.msk [vmem:[#allocation4 + $0x64] sm:$0xf] %vm4370_vm13, %v9771_v0  ;;  %4399 = vst.msk [vmem:[#allocation4 + $0x6c] sm:$0xf] %vm4370_vm13, %v9771_v0  ;;  %v5158_v47 = vrot.slane %v5156_v16, 5  ;;  %v5164_v49 = vrot.slane %v5162_v35, 5 }
 0x24c   : > { %4400 = vst.msk [vmem:[#allocation4 + $0x70] sm:$0xf] %vm4370_vm13, %v9771_v0  ;;  %4402 = vst.msk [vmem:[#allocation4 + $0x78] sm:$0xf] %vm4370_vm13, %v9771_v0  ;;  %3109 = vrot.lane.b32.xlu1 %v11206_v10, %s9775_s15  ;;  %3973 = vrot.lane.b32.xlu0 %v8820_v20, %s9777_s12  ;;  %v5168_v60 = vrot.slane %v5166_v39, 4  ;;  %v5747_v50 = vrot.slane %v5650_v45, 5 }
 0x24d   : > { %4403 = vst.msk [vmem:[#allocation4 + $0x7c] sm:$0xf] %vm4370_vm13, %v9771_v0  ;;  %4405 = vst.msk [vmem:[#allocation4 + $0x84] sm:$0xf] %vm4370_vm13, %v9771_v0  ;;  %v5159_v51 = vor.u32 %v5158_v47, %v5155_v40  ;;  %v8907_v6 = vrot.slane %v5649_v57, 9 }
 0x24e   : > { %4406 = vst.msk [vmem:[#allocation4 + $0x88] sm:$0xf] %vm4370_vm13, %v9771_v0  ;;  %4408 = vst.msk [vmem:[#allocation4 + $0x90] sm:$0xf] %vm4370_vm13, %v9771_v0  ;;  %v5169_v23 = vor.u32 %v5168_v60, %v5164_v49  ;;  %v5749_v21 = vrot.slane %v5747_v50, 4 }
 0x24f   : > { %4409 = vst.msk [vmem:[#allocation4 + $0x94] sm:$0xf] %vm4370_vm13, %v9771_v0  ;;  %4411 = vst.msk [vmem:[#allocation4 + $0x9c] sm:$0xf] %vm4370_vm13, %v9771_v0  ;;  %v5160_v59 = vrot.slane %v5159_v51, 4  ;;  %v5748_v53 = vsel %vm10226_vm9, %v8907_v6, %v5747_v50 }
 0x250   : > { %4412 = vst.msk [vmem:[#allocation4 + $0xa0] sm:$0xf] %vm4370_vm13, %v9771_v0  ;;  %4414 = vst.msk [vmem:[#allocation4 + $0xa8] sm:$0xf] %vm4370_vm13, %v9771_v0  ;;  %3654 = vrot.lane.b32.xlu1 %v8789_v27, %s9779_s16  ;;  %v2601_v44 = vpop.permute.xlu0 %2600  ;;  %v5170_v43 = vrot.slane %v5169_v23, 4 }
 0x251   : > { %4415 = vst.msk [vmem:[#allocation4 + $0xac] sm:$0xf] %vm4370_vm13, %v9771_v0  ;;  %4417 = vst.msk [vmem:[#allocation4 + $0xb4] sm:$0xf] %vm4370_vm13, %v9771_v0  ;;  %v5165_v25 = vsel %vm10233_vm10, %v5160_v59, %v5164_v49  ;;  %v11388_v27 = vld [vmem:[#allocation11] ss:$0 sm:$0xff] }
 0x252   : > { %4418 = vst.msk [vmem:[#allocation4 + $0xb8] sm:$0xf] %vm4370_vm13, %v9771_v0  ;;  %4420 = vst.msk [vmem:[#allocation4 + $0xc0] sm:$0xf] %vm4370_vm13, %v9771_v0  ;;  %v2058_v30 = vpop.permute.xlu1 %2057 }
 0x253   : > { %4421 = vst.msk [vmem:[#allocation4 + $0xc4] sm:$0xf] %vm4370_vm13, %v9771_v0  ;;  %4423 = vst.msk [vmem:[#allocation4 + $0xcc] sm:$0xf] %vm4370_vm13, %v9771_v0 }
 0x254   : > { %4424 = vst.msk [vmem:[#allocation4 + $0xd0] sm:$0xf] %vm4370_vm13, %v9771_v0  ;;  %v2922_v52 = vpop.permute.xlu0 %2921 }
 0x255   : > { %1594 = vst.msk [vmem:[#allocation3 + $0x58] sm:$0xff] %vm1582_vm15, %v1557_v15 }
 0x256   : > { %4380 = vst.msk [vmem:[#allocation4 + $0x20] sm:$0x1] %vm4373_vm14, %v9771_v0  ;;  %4374 = vst.msk [vmem:[#allocation4 + $0x8] sm:$0x1] %vm4373_vm14, %v9771_v0 }
 0x257   : > { %4377 = vst.msk [vmem:[#allocation4 + $0x14] sm:$0x1] %vm4373_vm14, %v9771_v0  ;;  %4383 = vst.msk [vmem:[#allocation4 + $0x2c] sm:$0x1] %vm4373_vm14, %v9771_v0 }
 0x258   : > { %4386 = vst.msk [vmem:[#allocation4 + $0x38] sm:$0x1] %vm4373_vm14, %v9771_v0  ;;  %4389 = vst.msk [vmem:[#allocation4 + $0x44] sm:$0x1] %vm4373_vm14, %v9771_v0  ;;  %v3100_v38 = vpop.permute.xlu0 %3099 }
 0x259   : > { %4392 = vst.msk [vmem:[#allocation4 + $0x50] sm:$0x1] %vm4373_vm14, %v9771_v0  ;;  %4395 = vst.msk [vmem:[#allocation4 + $0x5c] sm:$0x1] %vm4373_vm14, %v9771_v0 }
 0x25a   : > { %4398 = vst.msk [vmem:[#allocation4 + $0x68] sm:$0x1] %vm4373_vm14, %v9771_v0  ;;  %4401 = vst.msk [vmem:[#allocation4 + $0x74] sm:$0x1] %vm4373_vm14, %v9771_v0 }
 0x25b   : > { %4404 = vst.msk [vmem:[#allocation4 + $0x80] sm:$0x1] %vm4373_vm14, %v9771_v0  ;;  %4407 = vst.msk [vmem:[#allocation4 + $0x8c] sm:$0x1] %vm4373_vm14, %v9771_v0 }
 0x25c   : > { %4410 = vst.msk [vmem:[#allocation4 + $0x98] sm:$0x1] %vm4373_vm14, %v9771_v0  ;;  %4413 = vst.msk [vmem:[#allocation4 + $0xa4] sm:$0x1] %vm4373_vm14, %v9771_v0 }
 0x25d   : > { %4416 = vst.msk [vmem:[#allocation4 + $0xb0] sm:$0x1] %vm4373_vm14, %v9771_v0  ;;  %4419 = vst.msk [vmem:[#allocation4 + $0xbc] sm:$0x1] %vm4373_vm14, %v9771_v0  ;;  %v5106_v28 = vld [vmem:[#allocation4 + $0x8] sm:$0x1] }
 0x25e   : > { %4422 = vst.msk [vmem:[#allocation4 + $0xc8] sm:$0x1] %vm4373_vm14, %v9771_v0  ;;  %4425 = vst.msk [vmem:[#allocation4 + $0xd4] sm:$0x1] %vm4373_vm14, %v9771_v0  ;;  %v3893_v0 = vsel %vm10226_vm9, %v8805_v36, %v3892_v17  ;;  %v5172_v56 = vshll.u32 %v5106_v28, 16  ;;  %v2603_v13 = vpop.permute.xlu1 %2602 }
 0x25f   : > { %2094 = vst.msk [vmem:[#allocation3 + $0x50] sm:$0xff] %vm2083_vm2, %v2056_v37  ;;  %v8821_v24 = vcombine.low %v3893_v0, %v3896_v5  ;;  %v5651_v46 = vld [vmem:[#allocation4 + $0x8] sm:$0x1]  ;;  %v11392_v5 = vld [vmem:[#allocation12] ss:$0 sm:$0xff] }
 0x260   : > { %1918 = vst.msk [vmem:[#allocation3 + $0x58] sm:$0xff] %vm1906_vm1, %v1881_v33  ;;  %v5174_v58 = vrot.slane %v5172_v56, 5  ;;  %v5750_v54 = vrot.slane %v5651_v46, 5 }
 0x261   : > { %2639 = vst.msk [vmem:[#allocation3 + $0x50] sm:$0xff] %vm2628_vm3, %v2601_v44  ;;  %3975 = vrot.lane.b32.xlu1 %v8821_v24, %s9777_s12 }
 0x262   : > { %2095 = vst.msk [vmem:[#allocation3 + $0x58] sm:$0xff] %vm2083_vm2, %v2058_v30  ;;  %v5175_v61 = vsel %vm10233_vm10, %v5170_v43, %v5174_v58  ;;  %v5751_v48 = vsel %vm10226_vm9, %v5749_v21, %v5750_v54  ;;  %v2924_v31 = vpop.permute.xlu1 %2923 }
 0x263   : > { %2960 = vst.msk [vmem:[#allocation3 + $0x50] sm:$0xff] %vm2949_vm4, %v2922_v52  ;;  %v8891_v55 = vcombine.low %v5165_v25, %v5175_v61  ;;  %v8923_v62 = vcombine.low %v5748_v53, %v5751_v48  ;;  %v3645_v63 = vpop.permute.xlu0 %3644 }
 0x264   : > { %3138 = vst.msk [vmem:[#allocation3 + $0x50] sm:$0xff] %vm3127_vm5, %v3100_v38 }
 0x265   : > { %5584 = vrot.lane.b32.xlu0 %v8891_v55, %s9772_s8  ;;  %2640 = vst.msk [vmem:[#allocation3 + $0x58] sm:$0xff] %vm2628_vm3, %v2603_v13 }
 0x266   : > { %2961 = vst.msk [vmem:[#allocation3 + $0x58] sm:$0xff] %vm2949_vm4, %v2924_v31  ;;  %v3102_v1 = vpop.permute.xlu1 %3101 }
 0x267   : > { %3683 = vst.msk [vmem:[#allocation3 + $0x50] sm:$0xff] %vm3672_vm7, %v3645_v63  ;;  %v3966_v7 = vpop.permute.xlu0 %3965 }
 0x268   : > { %3139 = vst.msk [vmem:[#allocation3 + $0x58] sm:$0xff] %vm3127_vm5, %v3102_v1 }
 0x269   : > { %5905 = vrot.lane.b32.xlu0 %v8923_v62, %s9778_s17  ;;  %4004 = vst.msk [vmem:[#allocation3 + $0x50] sm:$0xff] %vm12718_vm8, %v3966_v7  ;;  %vm12720_vm8 = vmmov %vm12716_vm0 }
 0x26b   : > { %v3647_v17 = vpop.permute.xlu1 %3646  ;;  %v3968_v2 = vpop.permute.xlu0 %3967 }
 0x26c   : > { %3684 = vst.msk [vmem:[#allocation3 + $0x58] sm:$0xff] %vm3672_vm7, %v3647_v17 }
 0x26d   : > { %4005 = vst.msk [vmem:[#allocation3 + $0x58] sm:$0xff] %vm12716_vm0, %v3968_v2  ;;  %vm12721_vm0 = vsmask.f32 7938  ;;  %v4854_v2 = vld [vmem:[#allocation4 + $0x18] sm:$0xf] }
 0x26f   : > { %v1559_v3 = vpop.permute.xlu1 %1558 }
 0x270   : > { %v4020_v4 = vld [vmem:[#allocation3 + $0x50] sm:$0xff]  ;;  %1595 = vst.msk [vmem:[#allocation3 + $0x60] sm:$0xff] %vm1582_vm15, %v1559_v3 }
 0x271   : > { %9195 = vmatprep.mubr.msk.bf16.mxu0 %vm4046_vm6, %v4020_v4 }
 0x272   : > { %v1883_v8 = vpop.permute.xlu0 %1882 }
 0x273   : > { %v1561_v9 = vpop.permute.xlu1 %1560  ;;  %1919 = vst.msk [vmem:[#allocation3 + $0x60] sm:$0xff] %vm1906_vm1, %v1883_v8 }
 0x274   : > { %1596 = vst.msk [vmem:[#allocation3 + $0x68] sm:$0xff] %vm1582_vm15, %v1561_v9  ;;  %v4021_v12 = vld [vmem:[#allocation3 + $0x58] sm:$0xff] }
 0x275   : > { %9196 = vmatmul.mubr.msk.bf16.gmra.mrb[20].mxu0 %vm4046_vm6, %v4021_v12 }
 0x276   : > { %v2060_v10 = vpop.permute.xlu0 %2059 }
 0x277   : > { %v1885_v42 = vpop.permute.xlu1 %1884  ;;  %2096 = vst.msk [vmem:[#allocation3 + $0x60] sm:$0xff] %vm2083_vm2, %v2060_v10 }
 0x278   : > { %1920 = vst.msk [vmem:[#allocation3 + $0x68] sm:$0xff] %vm1906_vm1, %v1885_v42  ;;  %v4845_v42 = vld [vmem:[#allocation4 + $0xc] sm:$0xf] }
 0x27e   : > { %v2605_v36 = vpop.permute.xlu0 %2604  ;;  %v2062_v15 = vpop.permute.xlu1 %2061 }
 0x27f   : > { %2641 = vst.msk [vmem:[#allocation3 + $0x60] sm:$0xff] %vm2628_vm3, %v2605_v36 }
 0x280   : > { %2097 = vst.msk [vmem:[#allocation3 + $0x68] sm:$0xff] %vm2083_vm2, %v2062_v15 }
 0x282   : > { %v2926_v18 = vpop.permute.xlu0 %2925 }
 0x283   : > { %2962 = vst.msk [vmem:[#allocation3 + $0x60] sm:$0xff] %vm2949_vm4, %v2926_v18 }
 0x286   : > { %v3104_v20 = vpop.permute.xlu0 %3103 }
 0x287   : > { %3140 = vst.msk [vmem:[#allocation3 + $0x60] sm:$0xff] %vm3127_vm5, %v3104_v20 }
 0x28a   : > { %v2607_v22 = vpop.permute.xlu1 %2606 }
 0x28b   : > { %2642 = vst.msk [vmem:[#allocation3 + $0x68] sm:$0xff] %vm2628_vm3, %v2607_v22 }
 0x28e   : > { %v2928_v26 = vpop.permute.xlu1 %2927  ;;  %v3649_v14 = vpop.permute.xlu0 %3648 }
 0x28f   : > { %2963 = vst.msk [vmem:[#allocation3 + $0x68] sm:$0xff] %vm2949_vm4, %v2928_v26  ;;  %v4858_v26 = vld [vmem:[#allocation4 + $0x20] sm:$0x1] }
 0x290   : > { %3685 = vst.msk [vmem:[#allocation3 + $0x60] sm:$0xff] %vm3672_vm7, %v3649_v14 }
 0x292   : > { %v3106_v37 = vpop.permute.xlu1 %3105  ;;  %v3970_v33 = vpop.permute.xlu0 %3969 }
 0x293   : > { %3141 = vst.msk [vmem:[#allocation3 + $0x68] sm:$0xff] %vm3127_vm5, %v3106_v37  ;;  %v9177_v0 = vpop.f32.mrb[0].mxu0 }
 0x294   : > { %4006 = vst.msk [vmem:[#allocation3 + $0x60] sm:$0xff] %vm12719_vm11, %v3970_v33  ;;  %v4269_v32 = vmul.f32 %v9177_v0, %v11388_v27  ;;  %v4133_v24 = vpop.f32.mrb[1].mxu0  ;;  %vm11412_vm11 = vmand %vm4370_vm13, %vm12721_vm0 }
 0x295   : > { %v4267_v28 = vmul.f32 %v11388_v27, %v4133_v24  ;;  %v9178_v11 = vpop.f32.mrb[2].mxu0 }
 0x296   : > { %v3651_v34 = vpop.permute.xlu1 %3650  ;;  %v4308_v16 = vadd.f32 %v11392_v5, %v4269_v32  ;;  %v4270_v35 = vmul.f32 %v9178_v11, %v11388_v27  ;;  %v4136_v39 = vpop.f32.mrb[3].mxu0 }
 0x297   : > { %3686 = vst.msk [vmem:[#allocation3 + $0x68] sm:$0xff] %vm3672_vm7, %v3651_v34  ;;  %v3972_v44 = vpop.permute.xlu0 %3971  ;;  %v4306_v56 = vadd.f32 %v11392_v5, %v4267_v28  ;;  %v4268_v57 = vmul.f32 %v11388_v27, %v4136_v39  ;;  %v4851_v34 = vld [vmem:[#allocation4 + $0x14] sm:$0x1] }
 0x298   : > { %4007 = vst.msk [vmem:[#allocation3 + $0x68] sm:$0xff] %vm12720_vm8, %v3972_v44  ;;  %v4340_v45 = vmax.f32 %v4308_v16, 0.0  ;;  %v4309_v40 = vadd.f32 %v11392_v5, %v4270_v35  ;;  %vm12724_vm8 = vsmask.f32 256 }
 0x299   : > { %v4338_v49 = vmax.f32 %v4306_v56, 0.0  ;;  %v4307_v60 = vadd.f32 %v11392_v5, %v4268_v57  ;;  %vm11421_vm0 = vmand %vm4373_vm14, %vm12724_vm8  ;;  %vm7174_vm14 = vcmask 458112   ;;  %vm7719_vm8 = vcmask 523712  }
 0x29a   : > { %v1563_v47 = vpop.permute.xlu1 %1562  ;;  %v9098_v30 = vpack.c.bf16 %v4340_v45, %v4340_v45  ;;  %v4341_v58 = vmax.f32 %v4309_v40, 0.0 }
 0x29b   : > { %1597 = vst.msk [vmem:[#allocation3 + $0x70] sm:$0xff] %vm1582_vm15, %v1563_v47  ;;  %v4022_v46 = vld [vmem:[#allocation3 + $0x60] sm:$0xff]  ;;  %v9096_v50 = vpack.c.bf16 %v4338_v49, %v4338_v49  ;;  %v4339_v51 = vmax.f32 %v4307_v60, 0.0  ;;  %v9181_v23 = vpop.f32.mrb[4].mxu0 }
 0x29c   : > { %9199 = vmatprep.mubr.msk.bf16.mxu0 %vm4046_vm6, %v4022_v46  ;;  %v4540_v6 = vshrl.u32 %v9098_v30, 16  ;;  %v4543_v54 = vshll.u32 %v9098_v30, 16  ;;  %v9099_v52 = vpack.c.bf16 %v4341_v58, %v4341_v58  ;;  %v4273_v21 = vmul.f32 %v9181_v23, %v11388_v27  ;;  %v4149_v59 = vpop.f32.mrb[5].mxu0 }
 0x29d   : > { %v4523_v43 = vshrl.u32 %v9096_v50, 16  ;;  %v4526_v25 = vshll.u32 %v9096_v50, 16  ;;  %v9097_v61 = vpack.c.bf16 %v4339_v51, %v4339_v51  ;;  %v4271_v53 = vmul.f32 %v11388_v27, %v4149_v59  ;;  %v9182_v48 = vpop.f32.mrb[6].mxu0  ;;  %v4868_v50 = vld [vmem:[#allocation4 + $0x30] sm:$0xf] }
 0x29e   : > { %v1887_v38 = vpop.permute.xlu0 %1886  ;;  %v4542_v55 = vrot.slane %v4540_v6, 7  ;;  %v4548_v62 = vshrl.u32 %v9099_v52, 16  ;;  %v4551_v13 = vshll.u32 %v9099_v52, 16  ;;  %v4312_v31 = vadd.f32 %v11392_v5, %v4273_v21  ;;  %v4152_v63 = vpop.f32.mrb[7].mxu0 }
 0x29f   : > { %1921 = vst.msk [vmem:[#allocation3 + $0x70] sm:$0xff] %vm1906_vm1, %v1887_v38  ;;  %v4023_v7 = vld [vmem:[#allocation3 + $0x68] sm:$0xff]  ;;  %v4525_v3 = vrot.slane %v4523_v43, 7  ;;  %v4531_v4 = vshrl.u32 %v9097_v61, 16  ;;  %v4534_v8 = vshll.u32 %v9097_v61, 16  ;;  %v4310_v9 = vadd.f32 %v11392_v5, %v4271_v53 }
 0x2a0   : > { %v1565_v1 = vpop.permute.xlu1 %1564  ;;  %9200 = vmatmul.mubr.msk.bf16.gmra.mrb[24].mxu0 %vm4046_vm6, %v4023_v7  ;;  %v4545_v12 = vor.u32 %v4543_v54, %v4542_v55  ;;  %v4546_v10 = vrot.slane %v4542_v55, 4  ;;  %v4550_v36 = vrot.slane %v4548_v62, 7  ;;  %v4344_v15 = vmax.f32 %v4312_v31, 0.0  ;;  %v4861_v54 = vld [vmem:[#allocation4 + $0x24] sm:$0xf] }
 0x2a1   : > { %1598 = vst.msk [vmem:[#allocation3 + $0x78] sm:$0xff] %vm1582_vm15, %v1565_v1  ;;  %v4528_v18 = vor.u32 %v4526_v25, %v4525_v3  ;;  %v4529_v20 = vrot.slane %v4525_v3, 4  ;;  %v4533_v14 = vrot.slane %v4531_v4, 7  ;;  %v4342_v37 = vmax.f32 %v4310_v9, 0.0 }
 0x2a2   : > { %v2064_v33 = vpop.permute.xlu0 %2063  ;;  %v4855_v0 = vsel %vm11412_vm11, %v4545_v12, %v4854_v2  ;;  %v4553_v32 = vor.u32 %v4551_v13, %v4550_v36  ;;  %v4555_v24 = vrot.slane %v4550_v36, 4  ;;  %v9102_v28 = vpack.c.bf16 %v4344_v15, %v4344_v15  ;;  %v4872_v15 = vld [vmem:[#allocation4 + $0x38] sm:$0x1] }
 0x2a3   : > { %2098 = vst.msk [vmem:[#allocation3 + $0x70] sm:$0xff] %vm2083_vm2, %v2064_v33  ;;  %4856 = vst [vmem:[#allocation4 + $0x18] sm:$0xf] %v4855_v0  ;;  %v4846_v16 = vsel %vm11412_vm11, %v4528_v18, %v4845_v42  ;;  %v4536_v35 = vor.u32 %v4534_v8, %v4533_v14  ;;  %v4538_v39 = vrot.slane %v4533_v14, 4  ;;  %v9100_v44 = vpack.c.bf16 %v4342_v37, %v4342_v37  ;;  %v4865_v0 = vld [vmem:[#allocation4 + $0x2c] sm:$0x1] }
 0x2a4   : > { %v1889_v11 = vpop.permute.xlu1 %1888  ;;  %4847 = vst [vmem:[#allocation4 + $0xc] sm:$0xf] %v4846_v16  ;;  %v4554_v56 = vsel %vm10249_vm12, %v4546_v10, %v4553_v32  ;;  %v4859_v57 = vsel %vm11421_vm0, %v4555_v24, %v4858_v26  ;;  %v4574_v45 = vshrl.u32 %v9102_v28, 16  ;;  %v4577_v46 = vshll.u32 %v9102_v28, 16 }
 0x2a5   : > { %1922 = vst.msk [vmem:[#allocation3 + $0x78] sm:$0xff] %vm1906_vm1, %v1889_v11  ;;  %4860 = vst [vmem:[#allocation4 + $0x20] sm:$0x1] %v4859_v57  ;;  %v4537_v40 = vsel %vm10249_vm12, %v4529_v20, %v4536_v35  ;;  %v4852_v47 = vsel %vm11421_vm0, %v4538_v39, %v4851_v34  ;;  %v4557_v49 = vshrl.u32 %v9100_v44, 16  ;;  %v4274_v30 = vmul.f32 %v9182_v48, %v11388_v27 }
 0x2a6   : > { %4857 = vst.msk [vmem:[#allocation4 + $0x1c] sm:$0xf] %vm4370_vm13, %v4554_v56  ;;  %4848 = vst.msk [vmem:[#allocation4 + $0x10] sm:$0xf] %vm4370_vm13, %v4537_v40  ;;  %v11441_v60 = vrot.slane %v4574_v45, 7  ;;  %v4272_v58 = vmul.f32 %v11388_v27, %v4152_v63  ;;  %v4560_v23 = vshll.u32 %v9100_v44, 16 }
 0x2a7   : > { %4853 = vst [vmem:[#allocation4 + $0x14] sm:$0x1] %v4852_v47  ;;  %v11445_v51 = vrot.slane %v4557_v49, 7  ;;  %v4313_v52 = vadd.f32 %v11392_v5, %v4274_v30  ;;  %vm12687_vm15 = vcmask 64512   ;;  %v9440_v56 = vld [vmem:[#allocation4] sm:$0xff]   ;;  %vm12727_vm1 = vcmask 294144  }
 0x2a8   : > { %v4579_v6 = vor.u32 %v4577_v46, %v11441_v60  ;;  %v4311_v21 = vadd.f32 %v11392_v5, %v4272_v58  ;;  %v4580_v31 = vrot.slane %v11441_v60, 4  ;;  %5088 = vst.msk [vmem:[#allocation5] sm:$0xff] %vm12687_vm15, %v9440_v56 }
 0x2a9   : > { %v4562_v43 = vor.u32 %v4560_v23, %v11445_v51  ;;  %v4345_v61 = vmax.f32 %v4313_v52, 0.0  ;;  %v4563_v3 = vrot.slane %v11445_v51, 4 }
 0x2aa   : > { %v2609_v59 = vpop.permute.xlu0 %2608  ;;  %v4869_v25 = vsel %vm11412_vm11, %v4579_v6, %v4868_v50  ;;  %v4343_v53 = vmax.f32 %v4311_v21, 0.0  ;;  %v2066_v48 = vpop.permute.xlu1 %2065  ;;  %v6695_v55 = vld [vmem:[#allocation4 + $0x18] sm:$0xe] }
 0x2ab   : > { %2643 = vst.msk [vmem:[#allocation3 + $0x70] sm:$0xff] %vm2628_vm3, %v2609_v59  ;;  %4870 = vst [vmem:[#allocation4 + $0x30] sm:$0xf] %v4869_v25  ;;  %v4862_v38 = vsel %vm11412_vm11, %v4562_v43, %v4861_v54  ;;  %v7736_v62 = vld [vmem:[#allocation4 + $0x18] sm:$0xe]  ;;  %v9103_v63 = vpack.c.bf16 %v4345_v61, %v4345_v61  ;;  %v8972_v4 = vrot.slane %v6695_v55, 9 }
 0x2ac   : > { %2099 = vst.msk [vmem:[#allocation3 + $0x78] sm:$0xff] %vm2083_vm2, %v2066_v48  ;;  %4863 = vst [vmem:[#allocation4 + $0x24] sm:$0xf] %v4862_v38  ;;  %v9101_v1 = vpack.c.bf16 %v4343_v53, %v4343_v53  ;;  %v9035_v8 = vrot.slane %v7736_v62, 9  ;;  %v6697_v36 = vld [vmem:[#allocation4 + $0x20] sm:$0x1] }
 0x2ad   : > { %v9425_v13 = vld [vmem:[#allocation4 + $0x18] sm:$0xff]   ;;  %v9427_v9 = vld [vmem:[#allocation4 + $0xc] sm:$0xff]   ;;  %v4582_v12 = vshrl.u32 %v9103_v63, 16  ;;  %v4585_v10 = vshll.u32 %v9103_v63, 16  ;;  %v6800_v20 = vrot.slane %v6697_v36, 5  ;;  %vm12728_vm2 = vmmov %vm12727_vm1 }
 0x2ae   : > { %v2930_v7 = vpop.permute.xlu0 %2929  ;;  %v9426_v2 = vld [vmem:[#allocation4 + $0x18] sm:$0xff]   ;;  %7126 = vrot.lane.b32.xlu0 %v9425_v13, %s9780_s14  ;;  %v4565_v26 = vshrl.u32 %v9101_v1, 16  ;;  %v4568_v14 = vshll.u32 %v9101_v1, 16  ;;  %v7738_v32 = vld [vmem:[#allocation4 + $0x20] sm:$0x1] }
 0x2af   : > { %2964 = vst.msk [vmem:[#allocation3 + $0x70] sm:$0xff] %vm2949_vm4, %v2930_v7  ;;  %v6696_v42 = vld [vmem:[#allocation4 + $0x1c] sm:$0xf]  ;;  %6084 = vrot.lane.b32.xlu1 %v9426_v2, %s9775_s15  ;;  %v4584_v33 = vrot.slane %v4582_v12, 7  ;;  %v5652_v34 = vld [vmem:[#allocation4 + $0xc] sm:$0xe] }
 0x2b0   : > { %v6797_v18 = vrot.slane %v6696_v42, 5  ;;  %v7737_v37 = vld [vmem:[#allocation4 + $0x1c] sm:$0xf]  ;;  %v4567_v35 = vrot.slane %v4565_v26, 7  ;;  %v7837_v39 = vrot.slane %v7738_v32, 5  ;;  %v8908_v50 = vrot.slane %v5652_v34, 9 }
 0x2b1   : > { %v7834_v24 = vrot.slane %v7737_v37, 5  ;;  %v5653_v44 = vld [vmem:[#allocation4 + $0x10] sm:$0xf]  ;;  %v4587_v57 = vor.u32 %v4585_v10, %v4584_v33  ;;  %v4589_v45 = vrot.slane %v4584_v33, 4  ;;  %v5654_v49 = vld [vmem:[#allocation4 + $0x14] sm:$0x1] }
 0x2b2   : > { %v3108_v28 = vpop.permute.xlu0 %3107  ;;  %v6798_v11 = vsel %vm10226_vm9, %v8972_v4, %v6797_v18  ;;  %v6799_v16 = vrot.slane %v6797_v18, 4  ;;  %6082 = vrot.lane.b32.xlu0 %v9427_v9, %s9775_s15  ;;  %v5655_v60 = vld [vmem:[#allocation4 + $0x18] sm:$0xe]  ;;  %v4570_v30 = vor.u32 %v4568_v14, %v4567_v35  ;;  %v4572_v58 = vrot.slane %v4567_v35, 4  ;;  %v5656_v51 = vld [vmem:[#allocation4 + $0x1c] sm:$0xf] }
 0x2b3   : > { %3142 = vst.msk [vmem:[#allocation3 + $0x70] sm:$0xff] %vm3127_vm5, %v3108_v28  ;;  %v7835_v40 = vsel %vm10226_vm9, %v9035_v8, %v7834_v24  ;;  %v7836_v47 = vrot.slane %v7834_v24, 4  ;;  %v5657_v23 = vld [vmem:[#allocation4 + $0x20] sm:$0x1]  ;;  %v4588_v6 = vsel %vm10249_vm12, %v4580_v31, %v4587_v57  ;;  %v4873_v54 = vsel %vm11421_vm0, %v4589_v45, %v4872_v15  ;;  %v6692_v59 = vld [vmem:[#allocation4 + $0xc] sm:$0xe] }
 0x2b4   : > { %v6801_v46 = vsel %vm10226_vm9, %v6799_v16, %v6800_v20  ;;  %v6693_v43 = vld [vmem:[#allocation4 + $0x10] sm:$0xf]  ;;  %v6694_v25 = vld [vmem:[#allocation4 + $0x14] sm:$0x1]  ;;  %4871 = vst.msk [vmem:[#allocation4 + $0x34] sm:$0xf] %vm4370_vm13, %v4588_v6  ;;  %v4571_v53 = vsel %vm10249_vm12, %v4563_v3, %v4570_v30  ;;  %v4866_v48 = vsel %vm11421_vm0, %v4572_v58, %v4865_v0 }
 0x2b5   : > { %v8988_v52 = vcombine.low %v6798_v11, %v6801_v46  ;;  %v7838_v21 = vsel %vm10226_vm9, %v7836_v47, %v7837_v39  ;;  %4874 = vst [vmem:[#allocation4 + $0x38] sm:$0x1] %v4873_v54  ;;  %v5754_v55 = vrot.slane %v5653_v44, 5  ;;  %v9445_v62 = vld [vmem:[#allocation4 + $0x18] sm:$0xff]   ;;  %4864 = vst.msk [vmem:[#allocation4 + $0x28] sm:$0xf] %vm4370_vm13, %v4571_v53 }
 0x2b6   : > { %v2611_v61 = vpop.permute.xlu1 %2610  ;;  %v9051_v38 = vcombine.low %v7835_v40, %v7838_v21  ;;  %4867 = vst [vmem:[#allocation4 + $0x2c] sm:$0x1] %v4866_v48  ;;  %v5757_v13 = vrot.slane %v5654_v49, 5  ;;  %v8909_v31 = vrot.slane %v5655_v60, 9  ;;  %v5761_v63 = vrot.slane %v5656_v51, 5  ;;  %5090 = vst.msk [vmem:[#allocation5 + $0x10] sm:$0xff] %vm12687_vm15, %v9445_v62 }
 0x2b7   : > { %2644 = vst.msk [vmem:[#allocation3 + $0x78] sm:$0xff] %vm2628_vm3, %v2611_v61  ;;  %6950 = vrot.lane.b32.xlu1 %v8988_v52, %s9781_s13  ;;  %v5764_v1 = vrot.slane %v5657_v23, 5  ;;  %v7191_v7 = vld [vmem:[#allocation4 + $0x18] sm:$0xf]  ;;  %v5755_v2 = vsel %vm10226_vm9, %v8908_v50, %v5754_v55  ;;  %v5756_v3 = vrot.slane %v5754_v55, 4  ;;  %v8971_v4 = vrot.slane %v6692_v59, 9 }
 0x2b8   : > { %7992 = vrot.lane.b32.xlu0 %v9051_v38, %s9782_s19  ;;  %v6790_v8 = vrot.slane %v6693_v43, 5  ;;  %v7192_v9 = vld [vmem:[#allocation4 + $0x1c] sm:$0xf]  ;;  %v9448_v12 = vld [vmem:[#allocation4 + $0xc] sm:$0xff]   ;;  %v5762_v10 = vsel %vm10226_vm9, %v8909_v31, %v5761_v63  ;;  %v5763_v42 = vrot.slane %v5761_v63, 4  ;;  %v6793_v36 = vrot.slane %v6694_v25, 5 }
 0x2b9   : > { %v7240_v15 = vshrl.u32 %v7191_v7, 16  ;;  %v5758_v20 = vsel %vm10226_vm9, %v5756_v3, %v5757_v13  ;;  %v7193_v37 = vld [vmem:[#allocation4 + $0x20] sm:$0x1]  ;;  %v7243_v33 = vshll.u32 %v7191_v7, 16  ;;  %v6150_v0 = vld [vmem:[#allocation4 + $0x18] sm:$0xf] }
 0x2ba   : > { %v2932_v18 = vpop.permute.xlu1 %2931  ;;  %v6791_v26 = vsel %vm10226_vm9, %v8971_v4, %v6790_v8  ;;  %v6792_v14 = vrot.slane %v6790_v8, 4  ;;  %5089 = vst.msk [vmem:[#allocation5 + $0x8] sm:$0xff] %vm12687_vm15, %v9448_v12  ;;  %v3653_v32 = vpop.permute.xlu0 %3652  ;;  %v8924_v24 = vcombine.low %v5755_v2, %v5758_v20  ;;  %v5765_v34 = vsel %vm10226_vm9, %v5763_v42, %v5764_v1  ;;  %v6151_v16 = vld [vmem:[#allocation4 + $0x1c] sm:$0xf]  ;;  %v6152_v57 = vld [vmem:[#allocation4 + $0x20] sm:$0x1] }
 0x2bb   : > { %2965 = vst.msk [vmem:[#allocation3 + $0x78] sm:$0xff] %vm2949_vm4, %v2932_v18  ;;  %v7242_v28 = vrot.slane %v7240_v15, 4  ;;  %v7249_v11 = vshll.u32 %v7192_v9, 16  ;;  %v8925_v35 = vcombine.low %v5762_v10, %v5765_v34  ;;  %v7245_v44 = vrot.slane %v7243_v33, 5  ;;  %v9429_v49 = vld [vmem:[#allocation4 + $0x30] sm:$0xff]  }
 0x2bc   : > { %3687 = vst.msk [vmem:[#allocation3 + $0x70] sm:$0xff] %vm3672_vm7, %v3653_v32  ;;  %v6794_v39 = vsel %vm10226_vm9, %v6792_v14, %v6793_v36  ;;  %v7253_v56 = vshrl.u32 %v7192_v9, 16  ;;  %5907 = vrot.lane.b32.xlu1 %v8924_v24, %s9778_s17  ;;  %v7259_v30 = vshll.u32 %v7193_v37, 16  ;;  %v6220_v58 = vshrl.u32 %v6150_v0, 16  ;;  %v5110_v52 = vld [vmem:[#allocation4 + $0x18] sm:$0xf] }
 0x2bd   : > { %v8987_v45 = vcombine.low %v6791_v26, %v6794_v39  ;;  %v7251_v40 = vrot.slane %v7249_v11, 5  ;;  %5909 = vrot.lane.b32.xlu0 %v8925_v35, %s9778_s17  ;;  %v7246_v60 = vor.u32 %v7245_v44, %v7242_v28  ;;  %v6223_v51 = vshll.u32 %v6150_v0, 16  ;;  %v9453_v61 = vld [vmem:[#allocation4 + $0x30] sm:$0xff]   ;;  %v5111_v62 = vld [vmem:[#allocation4 + $0x1c] sm:$0xf]  ;;  %v9458_v3 = vld [vmem:[#allocation4 + $0x24] sm:$0xff]  }
 0x2be   : > { %v3110_v47 = vpop.permute.xlu1 %3109  ;;  %v7255_v46 = vrot.slane %v7253_v56, 4  ;;  %v3974_v50 = vpop.permute.xlu0 %3973  ;;  %v6229_v23 = vshll.u32 %v6151_v16, 16  ;;  %v6233_v6 = vshrl.u32 %v6151_v16, 16  ;;  %v6239_v54 = vshll.u32 %v6152_v57, 16  ;;  %v9428_v31 = vld [vmem:[#allocation4 + $0x30] sm:$0xff]   ;;  %5092 = vst.msk [vmem:[#allocation5 + $0x20] sm:$0xff] %vm12687_vm15, %v9453_v61 }
 0x2bf   : > { %3143 = vst.msk [vmem:[#allocation3 + $0x78] sm:$0xff] %vm3127_vm5, %v3110_v47  ;;  %v7247_v21 = vrot.slane %v7246_v60, 4  ;;  %v7261_v43 = vrot.slane %v7259_v30, 5  ;;  %v6222_v25 = vrot.slane %v6220_v58, 4  ;;  %v6225_v53 = vrot.slane %v6223_v51, 5 }
 0x2c0   : > { %4008 = vst.msk [vmem:[#allocation3 + $0x70] sm:$0xff] %vm12727_vm1, %v3974_v50  ;;  %v7256_v59 = vor.u32 %v7255_v46, %v7251_v40  ;;  %6088 = vrot.lane.b32.xlu1 %v9429_v49, %s9775_s15  ;;  %v6231_v48 = vrot.slane %v6229_v23, 5  ;;  %v6235_v38 = vrot.slane %v6233_v6, 4  ;;  %v6241_v55 = vrot.slane %v6239_v54, 5  ;;  %v5112_v11 = vld [vmem:[#allocation4 + $0x20] sm:$0x1] }
 0x2c1   : > { %6948 = vrot.lane.b32.xlu0 %v8987_v45, %s9781_s13  ;;  %v7252_v63 = vsel %vm10233_vm10, %v7247_v21, %v7251_v40  ;;  %v5201_v7 = vshrl.u32 %v5110_v52, 16  ;;  %v5204_v2 = vshll.u32 %v5110_v52, 16  ;;  %v6226_v4 = vor.u32 %v6225_v53, %v6222_v25  ;;  %v9185_v9 = vpop.f32.mrb[8].mxu0  ;;  %5091 = vst.msk [vmem:[#allocation5 + $0x18] sm:$0xff] %vm12687_vm15, %v9458_v3  ;;  %v6147_v40 = vld [vmem:[#allocation4 + $0xc] sm:$0xf] }
 0x2c2   : > { %v3655_v13 = vpop.permute.xlu1 %3654  ;;  %v7257_v1 = vrot.slane %v7256_v59, 4  ;;  %v6236_v8 = vor.u32 %v6235_v38, %v6231_v48  ;;  %v5210_v12 = vshll.u32 %v5111_v62, 16  ;;  %v5214_v10 = vshrl.u32 %v5111_v62, 16  ;;  %v4165_v15 = vpop.f32.mrb[9].mxu0  ;;  %v9430_v53 = vld [vmem:[#allocation4 + $0x24] sm:$0xff]  }
 0x2c3   : > { %3688 = vst.msk [vmem:[#allocation3 + $0x78] sm:$0xff] %vm3672_vm7, %v3655_v13  ;;  %v4277_v36 = vmul.f32 %v9185_v9, %v11388_v27  ;;  %v5203_v18 = vrot.slane %v5201_v7, 4  ;;  %v5206_v20 = vrot.slane %v5204_v2, 5  ;;  %v6227_v14 = vrot.slane %v6226_v4, 4  ;;  %v9186_v0 = vpop.f32.mrb[10].mxu0 }
 0x2c4   : > { %v7262_v42 = vsel %vm10233_vm10, %v7257_v1, %v7261_v43  ;;  %v6237_v37 = vrot.slane %v6236_v8, 4  ;;  %v4275_v33 = vmul.f32 %v11388_v27, %v4165_v15  ;;  %v4278_v34 = vmul.f32 %v9186_v0, %v11388_v27  ;;  %v4168_v28 = vpop.f32.mrb[11].mxu0 }
 0x2c5   : > { %v9019_v26 = vcombine.low %v7252_v63, %v7262_v42  ;;  %7130 = vrot.lane.b32.xlu0 %v9428_v31, %s9780_s14  ;;  %v4316_v24 = vadd.f32 %v11392_v5, %v4277_v36  ;;  %v5207_v16 = vor.u32 %v5206_v20, %v5203_v18  ;;  %v5212_v35 = vrot.slane %v5210_v12, 5  ;;  %v6148_v42 = vld [vmem:[#allocation4 + $0x10] sm:$0xf]  ;;  %v4875_v18 = vld [vmem:[#allocation4 + $0x3c] sm:$0xf] }
 0x2c6   : > { %v6232_v44 = vsel %vm10233_vm10, %v6227_v14, %v6231_v48  ;;  %v6242_v56 = vsel %vm10233_vm10, %v6237_v37, %v6241_v55  ;;  %v4314_v57 = vadd.f32 %v11392_v5, %v4275_v33  ;;  %v4276_v45 = vmul.f32 %v11388_v27, %v4168_v28  ;;  %v9431_v48 = vld [vmem:[#allocation4 + $0x24] sm:$0xff]  }
 0x2c7   : > { %v4024_v39 = vld [vmem:[#allocation3 + $0x70] sm:$0xff]  ;;  %v8956_v47 = vcombine.low %v6232_v44, %v6242_v56  ;;  %v4348_v49 = vmax.f32 %v4316_v24, 0.0  ;;  %v4317_v60 = vadd.f32 %v11392_v5, %v4278_v34  ;;  %v5208_v46 = vrot.slane %v5207_v16, 4  ;;  %v4882_v55 = vld [vmem:[#allocation4 + $0x48] sm:$0xf] }
 0x2c8   : > { %9203 = vmatprep.mubr.msk.bf16.mxu0 %vm4046_vm6, %v4024_v39  ;;  %v4346_v30 = vmax.f32 %v4314_v57, 0.0  ;;  %v4315_v58 = vadd.f32 %v11392_v5, %v4276_v45  ;;  %v5216_v50 = vrot.slane %v5214_v10, 4  ;;  %v5220_v51 = vshll.u32 %v5112_v11, 16  ;;  %v6149_v16 = vld [vmem:[#allocation4 + $0x14] sm:$0x1] }
 0x2c9   : > { %7671 = vrot.lane.b32.xlu0 %v9019_v26, %s9783_s21  ;;  %6629 = vrot.lane.b32.xlu1 %v8956_v47, %s9777_s12  ;;  %v9106_v23 = vpack.c.bf16 %v4348_v49, %v4348_v49  ;;  %v4349_v27 = vmax.f32 %v4317_v60, 0.0  ;;  %v5213_v6 = vsel %vm10233_vm10, %v5208_v46, %v5212_v35  ;;  %v6196_v54 = vshrl.u32 %v6147_v40, 16  ;;  %v4886_v26 = vld [vmem:[#allocation4 + $0x50] sm:$0x1]  ;;  %v5107_v39 = vld [vmem:[#allocation4 + $0xc] sm:$0xf] }
 0x2ca   : > { %v9104_v52 = vpack.c.bf16 %v4346_v30, %v4346_v30  ;;  %v4347_v21 = vmax.f32 %v4315_v58, 0.0  ;;  %v5217_v59 = vor.u32 %v5216_v50, %v5212_v35  ;;  %v5222_v43 = vrot.slane %v5220_v51, 5  ;;  %v5109_v47 = vld [vmem:[#allocation4 + $0x14] sm:$0x1]  ;;  %v7742_v58 = vld [vmem:[#allocation4 + $0x30] sm:$0xe] }
 0x2cb   : > { %v4608_v25 = vshrl.u32 %v9106_v23, 16  ;;  %v4611_v61 = vshll.u32 %v9106_v23, 16  ;;  %v9107_v5 = vpack.c.bf16 %v4349_v27, %v4349_v27  ;;  %v6198_v38 = vrot.slane %v6196_v54, 4  ;;  %v7743_v50 = vld [vmem:[#allocation4 + $0x34] sm:$0xf] }
 0x2cc   : > { %v4591_v62 = vshrl.u32 %v9104_v52, 16  ;;  %v4594_v13 = vshll.u32 %v9104_v52, 16  ;;  %v9105_v31 = vpack.c.bf16 %v4347_v21, %v4347_v21  ;;  %v5218_v63 = vrot.slane %v5217_v59, 4  ;;  %v7744_v54 = vld [vmem:[#allocation4 + $0x38] sm:$0x1] }
 0x2cd   : > { %v4610_v7 = vrot.slane %v4608_v25, 7  ;;  %v4616_v2 = vshrl.u32 %v9107_v5, 16  ;;  %v4619_v3 = vshll.u32 %v9107_v5, 16  ;;  %7128 = vrot.lane.b32.xlu1 %v9430_v53, %s9780_s14  ;;  %6086 = vrot.lane.b32.xlu0 %v9431_v48, %s9775_s15  ;;  %v6199_v4 = vshll.u32 %v6147_v40, 16  ;;  %v5108_v40 = vld [vmem:[#allocation4 + $0x10] sm:$0xf] }
 0x2ce   : > { %v4593_v8 = vrot.slane %v4591_v62, 7  ;;  %v4599_v9 = vshrl.u32 %v9105_v31, 16  ;;  %v4602_v12 = vshll.u32 %v9105_v31, 16  ;;  %v5223_v10 = vsel %vm10233_vm10, %v5218_v63, %v5222_v43  ;;  %v6701_v52 = vld [vmem:[#allocation4 + $0x30] sm:$0xe] }
 0x2cf   : > { %v4613_v36 = vor.u32 %v4611_v61, %v4610_v7  ;;  %v4614_v15 = vrot.slane %v4610_v7, 4  ;;  %v4618_v20 = vrot.slane %v4616_v2, 7  ;;  %v8893_v14 = vcombine.low %v5213_v6, %v5223_v10  ;;  %v6702_v61 = vld [vmem:[#allocation4 + $0x34] sm:$0xf] }
 0x2d0   : > { %v4596_v37 = vor.u32 %v4594_v13, %v4593_v8  ;;  %v4597_v33 = vrot.slane %v4593_v8, 4  ;;  %v4601_v0 = vrot.slane %v4599_v9, 7  ;;  %v6201_v24 = vrot.slane %v6199_v4, 5  ;;  %v5662_v8 = vld [vmem:[#allocation4 + $0x34] sm:$0xf] }
 0x2d1   : > { %v4883_v34 = vsel %vm11412_vm11, %v4613_v36, %v4882_v55  ;;  %v4621_v28 = vor.u32 %v4619_v3, %v4618_v20  ;;  %v4623_v11 = vrot.slane %v4618_v20, 4  ;;  %5588 = vrot.lane.b32.xlu1 %v8893_v14, %s9772_s8  ;;  %v6205_v35 = vshll.u32 %v6148_v42, 16  ;;  %v6703_v55 = vld [vmem:[#allocation4 + $0x38] sm:$0x1] }
 0x2d2   : > { %4884 = vst [vmem:[#allocation4 + $0x48] sm:$0xf] %v4883_v34  ;;  %v4876_v44 = vsel %vm11412_vm11, %v4596_v37, %v4875_v18  ;;  %v4604_v56 = vor.u32 %v4602_v12, %v4601_v0  ;;  %v4606_v57 = vrot.slane %v4601_v0, 4  ;;  %v6202_v45 = vor.u32 %v6201_v24, %v6198_v38  ;;  %v5663_v36 = vld [vmem:[#allocation4 + $0x38] sm:$0x1] }
 0x2d3   : > { %v3976_v32 = vpop.permute.xlu1 %3975  ;;  %4877 = vst [vmem:[#allocation4 + $0x3c] sm:$0xf] %v4876_v44  ;;  %v4622_v49 = vsel %vm10249_vm12, %v4614_v15, %v4621_v28  ;;  %v4887_v60 = vsel %vm11421_vm0, %v4623_v11, %v4886_v26  ;;  %v6207_v46 = vrot.slane %v6205_v35, 5  ;;  %v6209_v30 = vshrl.u32 %v6148_v42, 16  ;;  %v7739_v15 = vld [vmem:[#allocation4 + $0x24] sm:$0xe] }
 0x2d4   : > { %4009 = vst.msk [vmem:[#allocation3 + $0x78] sm:$0xff] %vm12728_vm2, %v3976_v32  ;;  %v4879_v32 = vld [vmem:[#allocation4 + $0x44] sm:$0x1]  ;;  %4888 = vst [vmem:[#allocation4 + $0x50] sm:$0x1] %v4887_v60  ;;  %v4605_v51 = vsel %vm10249_vm12, %v4597_v33, %v4604_v56  ;;  %v6203_v27 = vrot.slane %v6202_v45, 4 }
 0x2d5   : > { %4885 = vst.msk [vmem:[#allocation4 + $0x4c] sm:$0xf] %vm4370_vm13, %v4622_v49  ;;  %v4880_v23 = vsel %vm11421_vm0, %v4606_v57, %v4879_v32  ;;  %v6215_v6 = vshll.u32 %v6149_v16, 16  ;;  %4878 = vst.msk [vmem:[#allocation4 + $0x40] sm:$0xf] %vm4370_vm13, %v4605_v51  ;;  %v6211_v21 = vrot.slane %v6209_v30, 4 }
 0x2d6   : > { %4881 = vst [vmem:[#allocation4 + $0x44] sm:$0x1] %v4880_v23  ;;  %v5177_v59 = vshrl.u32 %v5107_v39, 16  ;;  %v5180_v43 = vshll.u32 %v5107_v39, 16  ;;  %v5186_v25 = vshll.u32 %v5108_v40, 16  ;;  %v6208_v5 = vsel %vm10233_vm10, %v6203_v27, %v6207_v46 }
 0x2d7   : > { %v6217_v53 = vrot.slane %v6215_v6, 5  ;;  %v5190_v48 = vshrl.u32 %v5108_v40, 16  ;;  %v5196_v38 = vshll.u32 %v5109_v47, 16  ;;  %v6212_v62 = vor.u32 %v6211_v21, %v6207_v46  ;;  %v7740_v18 = vld [vmem:[#allocation4 + $0x28] sm:$0xf] }
 0x2d8   : > { %v5179_v13 = vrot.slane %v5177_v59, 4  ;;  %v5182_v31 = vrot.slane %v5180_v43, 5  ;;  %v5188_v63 = vrot.slane %v5186_v25, 5  ;;  %v9037_v3 = vrot.slane %v7742_v58, 9  ;;  %v7741_v34 = vld [vmem:[#allocation4 + $0x2c] sm:$0x1] }
 0x2d9   : > { %v5192_v7 = vrot.slane %v5190_v48, 4  ;;  %v5198_v2 = vrot.slane %v5196_v38, 5  ;;  %v7848_v4 = vrot.slane %v7743_v50, 5  ;;  %v6213_v9 = vrot.slane %v6212_v62, 4  ;;  %v5658_v39 = vld [vmem:[#allocation4 + $0x24] sm:$0xe] }
 0x2da   : > { %v5183_v12 = vor.u32 %v5182_v31, %v5179_v13  ;;  %v7851_v10 = vrot.slane %v7744_v54, 5  ;;  %v8974_v42 = vrot.slane %v6701_v52, 9  ;;  %v6811_v37 = vrot.slane %v6702_v61, 5  ;;  %v5659_v44 = vld [vmem:[#allocation4 + $0x28] sm:$0xf] }
 0x2db   : > { %v4025_v1 = vld [vmem:[#allocation3 + $0x78] sm:$0xff]  ;;  %v5193_v20 = vor.u32 %v5192_v7, %v5188_v63  ;;  %v7849_v26 = vsel %vm10226_vm9, %v9037_v3, %v7848_v4  ;;  %v7850_v14 = vrot.slane %v7848_v4, 4  ;;  %v6218_v33 = vsel %vm10233_vm10, %v6213_v9, %v6217_v53  ;;  %v5660_v47 = vld [vmem:[#allocation4 + $0x2c] sm:$0x1]  ;;  %v6698_v27 = vld [vmem:[#allocation4 + $0x24] sm:$0xe] }
 0x2dc   : > { %9204 = vmatmul.mubr.msk.bf16.gmra.mrb[28].mxu0 %vm4046_vm6, %v4025_v1  ;;  %v5661_v1 = vld [vmem:[#allocation4 + $0x30] sm:$0xe]  ;;  %v5184_v0 = vrot.slane %v5183_v12, 4  ;;  %v6814_v32 = vrot.slane %v6703_v55, 5  ;;  %v8955_v28 = vcombine.low %v6208_v5, %v6218_v33  ;;  %v6812_v35 = vsel %vm10226_vm9, %v8974_v42, %v6811_v37  ;;  %v6699_v6 = vld [vmem:[#allocation4 + $0x28] sm:$0xf] }
 0x2dd   : > { %v8911_v24 = vrot.slane %v5661_v1, 9  ;;  %v5194_v11 = vrot.slane %v5193_v20, 4  ;;  %v7852_v16 = vsel %vm10226_vm9, %v7850_v14, %v7851_v10  ;;  %v6813_v45 = vrot.slane %v6811_v37, 4  ;;  %v6700_v43 = vld [vmem:[#allocation4 + $0x2c] sm:$0x1] }
 0x2de   : > { %v5189_v56 = vsel %vm10233_vm10, %v5184_v0, %v5188_v63  ;;  %v9053_v57 = vcombine.low %v7849_v26, %v7852_v16  ;;  %v5775_v40 = vrot.slane %v5662_v8, 5  ;;  %6627 = vrot.lane.b32.xlu0 %v8955_v28, %s9777_s12  ;;  %v5778_v60 = vrot.slane %v5663_v36, 5  ;;  %v7197_v48 = vld [vmem:[#allocation4 + $0x30] sm:$0xf]  ;;  %v7198_v31 = vld [vmem:[#allocation4 + $0x34] sm:$0xf] }
 0x2df   : > { %v5199_v49 = vsel %vm10233_vm10, %v5194_v11, %v5198_v2  ;;  %v9036_v46 = vrot.slane %v7739_v15, 9  ;;  %v7841_v30 = vrot.slane %v7740_v18, 5  ;;  %v6815_v50 = vsel %vm10226_vm9, %v6813_v45, %v6814_v32  ;;  %v7199_v63 = vld [vmem:[#allocation4 + $0x38] sm:$0x1]  ;;  %v6156_v10 = vld [vmem:[#allocation4 + $0x30] sm:$0xf] }
 0x2e0   : > { %v8892_v58 = vcombine.low %v5189_v56, %v5199_v49  ;;  %v5776_v51 = vsel %vm10226_vm9, %v8911_v24, %v5775_v40  ;;  %v5777_v23 = vrot.slane %v5775_v40, 4  ;;  %v8990_v54 = vcombine.low %v6812_v35, %v6815_v50  ;;  %v6157_v20 = vld [vmem:[#allocation4 + $0x34] sm:$0xf]  ;;  %v6158_v0 = vld [vmem:[#allocation4 + $0x38] sm:$0x1]  ;;  %v9462_v16 = vld [vmem:[#allocation4 + $0x48] sm:$0xff]  }
 0x2e1   : > { %v7842_v52 = vsel %vm10226_vm9, %v9036_v46, %v7841_v30  ;;  %v7843_v21 = vrot.slane %v7841_v30, 4  ;;  %v7844_v59 = vrot.slane %v7741_v34, 5  ;;  %v8910_v61 = vrot.slane %v5658_v39, 9  ;;  %v5116_v32 = vld [vmem:[#allocation4 + $0x30] sm:$0xf]  ;;  %v9433_v45 = vld [vmem:[#allocation4 + $0x48] sm:$0xff]  }
 0x2e2   : > { %5586 = vrot.lane.b32.xlu1 %v8892_v58, %s9772_s8  ;;  %v5779_v25 = vsel %vm10226_vm9, %v5777_v23, %v5778_v60  ;;  %v5768_v5 = vrot.slane %v5659_v44, 5  ;;  %v5771_v53 = vrot.slane %v5660_v47, 5  ;;  %7996 = vrot.lane.b32.xlu0 %v9053_v57, %s9782_s19  ;;  %v8973_v62 = vrot.slane %v6698_v27, 9  ;;  %v9463_v57 = vld [vmem:[#allocation4 + $0x3c] sm:$0xff]   ;;  %v5117_v60 = vld [vmem:[#allocation4 + $0x34] sm:$0xf] }
 0x2e3   : > { %v8927_v38 = vcombine.low %v5776_v51, %v5779_v25  ;;  %v7845_v55 = vsel %vm10226_vm9, %v7843_v21, %v7844_v59  ;;  %v6804_v13 = vrot.slane %v6699_v6, 5  ;;  %v6807_v3 = vrot.slane %v6700_v43, 5  ;;  %5094 = vst.msk [vmem:[#allocation5 + $0x30] sm:$0xff] %vm12687_vm15, %v9462_v16  ;;  %v5118_v23 = vld [vmem:[#allocation4 + $0x38] sm:$0x1]  ;;  %5093 = vst.msk [vmem:[#allocation5 + $0x28] sm:$0xff] %vm12687_vm15, %v9463_v57 }
 0x2e4   : > { %v9052_v1 = vcombine.low %v7842_v52, %v7845_v55  ;;  %v5769_v7 = vsel %vm10226_vm9, %v8910_v61, %v5768_v5  ;;  %v5770_v2 = vrot.slane %v5768_v5, 4  ;;  %v7288_v9 = vshrl.u32 %v7197_v48, 16  ;;  %v6153_v61 = vld [vmem:[#allocation4 + $0x24] sm:$0xf]  ;;  %v9432_v55 = vld [vmem:[#allocation4 + $0x48] sm:$0xff]  }
 0x2e5   : > { %v6805_v4 = vsel %vm10226_vm9, %v8973_v62, %v6804_v13  ;;  %v6806_v8 = vrot.slane %v6804_v13, 4  ;;  %v7291_v12 = vshll.u32 %v7197_v48, 16  ;;  %v7297_v36 = vshll.u32 %v7198_v31, 16 }
 0x2e6   : > { %6954 = vrot.lane.b32.xlu1 %v8990_v54, %s9781_s13  ;;  %v5772_v42 = vsel %vm10226_vm9, %v5770_v2, %v5771_v53  ;;  %v7301_v15 = vshrl.u32 %v7198_v31, 16  ;;  %v7307_v18 = vshll.u32 %v7199_v63, 16  ;;  %5913 = vrot.lane.b32.xlu0 %v8927_v38, %s9778_s17  ;;  %v7290_v37 = vrot.slane %v7288_v9, 4  ;;  %v11603_v9 = vld [vmem:[#allocation11] ss:$0 sm:$0xff] }
 0x2e7   : > { %v8926_v26 = vcombine.low %v5769_v7, %v5772_v42  ;;  %v6808_v14 = vsel %vm10226_vm9, %v6806_v8, %v6807_v3  ;;  %v7293_v33 = vrot.slane %v7291_v12, 5  ;;  %v7299_v34 = vrot.slane %v7297_v36, 5 }
 0x2e8   : > { %v8989_v24 = vcombine.low %v6805_v4, %v6808_v14  ;;  %v7303_v28 = vrot.slane %v7301_v15, 4  ;;  %v7309_v11 = vrot.slane %v7307_v18, 5  ;;  %v6268_v39 = vshrl.u32 %v6156_v10, 16  ;;  %v6154_v14 = vld [vmem:[#allocation4 + $0x28] sm:$0xf] }
 0x2e9   : > { %v7294_v35 = vor.u32 %v7293_v33, %v7290_v37  ;;  %v6271_v44 = vshll.u32 %v6156_v10, 16  ;;  %v6277_v56 = vshll.u32 %v6157_v20, 16  ;;  %v6281_v47 = vshrl.u32 %v6157_v20, 16 }
 0x2ea   : > { %5911 = vrot.lane.b32.xlu1 %v8926_v26, %s9778_s17  ;;  %v7304_v40 = vor.u32 %v7303_v28, %v7299_v34  ;;  %v6287_v49 = vshll.u32 %v6158_v0, 16  ;;  %v5249_v46 = vshrl.u32 %v5116_v32, 16  ;;  %7994 = vrot.lane.b32.xlu0 %v9052_v1, %s9782_s19  ;;  %v6270_v58 = vrot.slane %v6268_v39, 4  ;;  %v11610_v0 = vld [vmem:[#allocation12] ss:$0 sm:$0xff] }
 0x2eb   : > { %v7295_v30 = vrot.slane %v7294_v35, 4  ;;  %v6273_v50 = vrot.slane %v6271_v44, 5  ;;  %v6279_v51 = vrot.slane %v6277_v56, 5  ;;  %v6283_v6 = vrot.slane %v6281_v47, 4 }
 0x2ec   : > { %v7305_v27 = vrot.slane %v7304_v40, 4  ;;  %v6289_v54 = vrot.slane %v6287_v49, 5  ;;  %v5251_v52 = vrot.slane %v5249_v46, 4  ;;  %v5252_v43 = vshll.u32 %v5116_v32, 16 }
 0x2ed   : > { %v7300_v21 = vsel %vm10233_vm10, %v7295_v30, %v7299_v34  ;;  %v6274_v59 = vor.u32 %v6273_v50, %v6270_v58  ;;  %v5258_v25 = vshll.u32 %v5117_v60, 16  ;;  %v6284_v53 = vor.u32 %v6283_v6, %v6279_v51  ;;  %v9189_v7 = vpop.f32.mrb[12].mxu0  ;;  %v9434_v50 = vld [vmem:[#allocation4 + $0x3c] sm:$0xff]  }
 0x2ee   : > { %6092 = vrot.lane.b32.xlu1 %v9433_v45, %s9775_s15  ;;  %v7310_v5 = vsel %vm10233_vm10, %v7305_v27, %v7309_v11  ;;  %v5262_v48 = vshrl.u32 %v5117_v60, 16  ;;  %v5268_v38 = vshll.u32 %v5118_v23, 16  ;;  %6952 = vrot.lane.b32.xlu0 %v8989_v24, %s9781_s13  ;;  %v5254_v31 = vrot.slane %v5252_v43, 5  ;;  %v4181_v10 = vpop.f32.mrb[13].mxu0  ;;  %v6155_v60 = vld [vmem:[#allocation4 + $0x2c] sm:$0x1] }
 0x2ef   : > { %v9021_v62 = vcombine.low %v7300_v21, %v7310_v5  ;;  %v6275_v13 = vrot.slane %v6274_v59, 4  ;;  %v5260_v63 = vrot.slane %v5258_v25, 5  ;;  %v6285_v1 = vrot.slane %v6284_v53, 4  ;;  %v9190_v20 = vpop.f32.mrb[14].mxu0  ;;  %v9435_v25 = vld [vmem:[#allocation4 + $0x3c] sm:$0xff]  }
 0x2f0   : > { %v5264_v2 = vrot.slane %v5262_v48, 4  ;;  %v5270_v3 = vrot.slane %v5268_v38, 5  ;;  %v6244_v4 = vshrl.u32 %v6153_v61, 16  ;;  %v4281_v12 = vmul.f32 %v11603_v9, %v9189_v7  ;;  %v4184_v34 = vpop.f32.mrb[15].mxu0 }
 0x2f1   : > { %v6280_v8 = vsel %vm10233_vm10, %v6275_v13, %v6279_v51  ;;  %v5255_v42 = vor.u32 %v5254_v31, %v5251_v52  ;;  %v6247_v36 = vshll.u32 %v6153_v61, 16  ;;  %v6290_v15 = vsel %vm10233_vm10, %v6285_v1, %v6289_v54  ;;  %v4896_v1 = vld [vmem:[#allocation4 + $0x60] sm:$0xf] }
 0x2f2   : > { %v4279_v18 = vmul.f32 %v11603_v9, %v4181_v10  ;;  %v5265_v26 = vor.u32 %v5264_v2, %v5260_v63  ;;  %v6246_v37 = vrot.slane %v6244_v4, 4  ;;  %7134 = vrot.lane.b32.xlu0 %v9432_v55, %s9780_s14  ;;  %v8958_v33 = vcombine.low %v6280_v8, %v6290_v15  ;;  %v4889_v10 = vld [vmem:[#allocation4 + $0x54] sm:$0xf] }
 0x2f3   : > { %v4320_v32 = vadd.f32 %v11610_v0, %v4281_v12  ;;  %v4282_v24 = vmul.f32 %v11603_v9, %v9190_v20  ;;  %v5256_v28 = vrot.slane %v5255_v42, 4  ;;  %v4280_v16 = vmul.f32 %v11603_v9, %v4184_v34 }
 0x2f4   : > { %v4318_v11 = vadd.f32 %v11610_v0, %v4279_v18  ;;  %v5266_v35 = vrot.slane %v5265_v26, 4  ;;  %v6249_v39 = vrot.slane %v6247_v36, 5  ;;  %6633 = vrot.lane.b32.xlu1 %v8958_v33, %s9777_s12  ;;  %v6253_v45 = vshll.u32 %v6154_v14, 16  ;;  %v4900_v36 = vld [vmem:[#allocation4 + $0x68] sm:$0x1] }
 0x2f5   : > { %v4352_v44 = vmax.f32 %v4320_v32, 0.0  ;;  %v4321_v56 = vadd.f32 %v11610_v0, %v4282_v24  ;;  %v5261_v57 = vsel %vm10233_vm10, %v5256_v28, %v5260_v63  ;;  %v4319_v47 = vadd.f32 %v11610_v0, %v4280_v16  ;;  %v7194_v63 = vld [vmem:[#allocation4 + $0x24] sm:$0xf]  ;;  %v7195_v28 = vld [vmem:[#allocation4 + $0x28] sm:$0xf] }
 0x2f6   : > { %v4350_v40 = vmax.f32 %v4318_v11, 0.0  ;;  %v5271_v49 = vsel %vm10233_vm10, %v5266_v35, %v5270_v3  ;;  %v6250_v46 = vor.u32 %v6249_v39, %v6246_v37  ;;  %7675 = vrot.lane.b32.xlu0 %v9021_v62, %s9783_s21  ;;  %v11624_v23 = vrot.slane %v6253_v45, 5  ;;  %v7196_v11 = vld [vmem:[#allocation4 + $0x2c] sm:$0x1] }
 0x2f7   : > { %v9110_v30 = vpack.c.bf16 %v4352_v44, %v4352_v44  ;;  %v4353_v58 = vmax.f32 %v4321_v56, 0.0  ;;  %v8895_v51 = vcombine.low %v5261_v57, %v5271_v49  ;;  %v4351_v6 = vmax.f32 %v4319_v47, 0.0  ;;  %v7748_v56 = vld [vmem:[#allocation4 + $0x48] sm:$0xe]  ;;  %v7749_v57 = vld [vmem:[#allocation4 + $0x4c] sm:$0xf] }
 0x2f8   : > { %v9108_v27 = vpack.c.bf16 %v4350_v40, %v4350_v40  ;;  %v6251_v54 = vrot.slane %v6250_v46, 4  ;;  %v6257_v52 = vshrl.u32 %v6154_v14, 16  ;;  %7132 = vrot.lane.b32.xlu1 %v9434_v50, %s9780_s14  ;;  %v6263_v61 = vshll.u32 %v6155_v60, 16  ;;  %v4893_v14 = vld [vmem:[#allocation4 + $0x5c] sm:$0x1] }
 0x2f9   : > { %v4642_v21 = vshrl.u32 %v9110_v30, 16  ;;  %v4645_v59 = vshll.u32 %v9110_v30, 16  ;;  %v9111_v43 = vpack.c.bf16 %v4353_v58, %v4353_v58  ;;  %v9109_v48 = vpack.c.bf16 %v4351_v6, %v4351_v6  ;;  %v7750_v60 = vld [vmem:[#allocation4 + $0x50] sm:$0x1]  ;;  %v5113_v46 = vld [vmem:[#allocation4 + $0x24] sm:$0xf] }
 0x2fa   : > { %v4625_v5 = vshrl.u32 %v9108_v27, 16  ;;  %v4628_v53 = vshll.u32 %v9108_v27, 16  ;;  %v6256_v38 = vsel %vm10233_vm10, %v6251_v54, %v11624_v23  ;;  %6090 = vrot.lane.b32.xlu0 %v9435_v25, %s9775_s15  ;;  %v6259_v31 = vrot.slane %v6257_v52, 4 }
 0x2fb   : > { %v4644_v55 = vrot.slane %v4642_v21, 7  ;;  %v4650_v62 = vshrl.u32 %v9111_v43, 16  ;;  %v4653_v13 = vshll.u32 %v9111_v43, 16  ;;  %v4633_v2 = vshrl.u32 %v9109_v48, 16  ;;  %v5115_v21 = vld [vmem:[#allocation4 + $0x2c] sm:$0x1] }
 0x2fc   : > { %v4627_v7 = vrot.slane %v4625_v5, 7  ;;  %v4636_v3 = vshll.u32 %v9109_v48, 16  ;;  %v6265_v4 = vrot.slane %v6263_v61, 5  ;;  %5592 = vrot.lane.b32.xlu1 %v8895_v51, %s9772_s8  ;;  %v6260_v15 = vor.u32 %v6259_v31, %v11624_v23  ;;  %v5114_v23 = vld [vmem:[#allocation4 + $0x28] sm:$0xf] }
 0x2fd   : > { %v4647_v8 = vor.u32 %v4645_v59, %v4644_v55  ;;  %v4648_v12 = vrot.slane %v4644_v55, 4  ;;  %v4652_v42 = vrot.slane %v4650_v62, 7  ;;  %v4635_v26 = vrot.slane %v4633_v2, 7  ;;  %v5667_v59 = vld [vmem:[#allocation4 + $0x48] sm:$0xe] }
 0x2fe   : > { %v4630_v18 = vor.u32 %v4628_v53, %v4627_v7  ;;  %v4631_v20 = vrot.slane %v4627_v7, 4  ;;  %v7264_v37 = vshrl.u32 %v7194_v63, 16  ;;  %v6261_v34 = vrot.slane %v6260_v15, 4  ;;  %v5668_v62 = vld [vmem:[#allocation4 + $0x4c] sm:$0xf] }
 0x2ff   : > { %v4897_v33 = vsel %vm11412_vm11, %v4647_v8, %v4896_v1  ;;  %v4655_v32 = vor.u32 %v4653_v13, %v4652_v42  ;;  %v4657_v24 = vrot.slane %v4652_v42, 4  ;;  %v4638_v35 = vor.u32 %v4636_v3, %v4635_v26  ;;  %v5669_v13 = vld [vmem:[#allocation4 + $0x50] sm:$0x1]  ;;  %v6707_v2 = vld [vmem:[#allocation4 + $0x48] sm:$0xe] }
 0x300   : > { %4898 = vst [vmem:[#allocation4 + $0x60] sm:$0xf] %v4897_v33  ;;  %v4890_v16 = vsel %vm11412_vm11, %v4630_v18, %v4889_v10  ;;  %v4640_v39 = vrot.slane %v4635_v26, 4  ;;  %v7266_v44 = vrot.slane %v7264_v37, 4  ;;  %v6266_v47 = vsel %vm10233_vm10, %v6261_v34, %v6265_v4  ;;  %v6708_v3 = vld [vmem:[#allocation4 + $0x4c] sm:$0xf] }
 0x301   : > { %4891 = vst [vmem:[#allocation4 + $0x54] sm:$0xf] %v4890_v16  ;;  %v4656_v45 = vsel %vm10249_vm12, %v4648_v12, %v4655_v32  ;;  %v4901_v40 = vsel %vm11421_vm0, %v4657_v24, %v4900_v36  ;;  %v7267_v49 = vshll.u32 %v7194_v63, 16  ;;  %v4639_v30 = vsel %vm10249_vm12, %v4631_v20, %v4638_v35  ;;  %v6709_v20 = vld [vmem:[#allocation4 + $0x50] sm:$0x1] }
 0x302   : > { %4899 = vst.msk [vmem:[#allocation4 + $0x64] sm:$0xf] %vm4370_vm13, %v4656_v45  ;;  %4902 = vst [vmem:[#allocation4 + $0x68] sm:$0x1] %v4901_v40  ;;  %v4894_v58 = vsel %vm11421_vm0, %v4640_v39, %v4893_v14  ;;  %v8957_v50 = vcombine.low %v6256_v38, %v6266_v47  ;;  %v7273_v51 = vshll.u32 %v7195_v28, 16  ;;  %v7277_v6 = vshrl.u32 %v7195_v28, 16 }
 0x303   : > { %4892 = vst.msk [vmem:[#allocation4 + $0x58] sm:$0xf] %vm4370_vm13, %v4639_v30  ;;  %4895 = vst [vmem:[#allocation4 + $0x5c] sm:$0x1] %v4894_v58  ;;  %v7269_v27 = vrot.slane %v7267_v49, 5  ;;  %v7283_v54 = vshll.u32 %v7196_v11, 16 }
 0x304   : > { %v9039_v52 = vrot.slane %v7748_v56, 9  ;;  %6631 = vrot.lane.b32.xlu0 %v8957_v50, %s9777_s12  ;;  %v7275_v43 = vrot.slane %v7273_v51, 5  ;;  %v7862_v25 = vrot.slane %v7749_v57, 5  ;;  %v7865_v61 = vrot.slane %v7750_v60, 5  ;;  %v7745_v32 = vld [vmem:[#allocation4 + $0x3c] sm:$0xe] }
 0x305   : > { %v5225_v5 = vshrl.u32 %v5113_v46, 16  ;;  %v7270_v53 = vor.u32 %v7269_v27, %v7266_v44  ;;  %v7279_v48 = vrot.slane %v7277_v6, 4  ;;  %v7285_v38 = vrot.slane %v7283_v54, 5  ;;  %v7746_v24 = vld [vmem:[#allocation4 + $0x40] sm:$0xf] }
 0x306   : > { %v5228_v55 = vshll.u32 %v5113_v46, 16  ;;  %v7863_v31 = vsel %vm10226_vm9, %v9039_v52, %v7862_v25  ;;  %v7864_v63 = vrot.slane %v7862_v25, 4  ;;  %v5234_v7 = vshll.u32 %v5114_v23, 16  ;;  %v7747_v35 = vld [vmem:[#allocation4 + $0x44] sm:$0x1] }
 0x307   : > { %v5227_v1 = vrot.slane %v5225_v5, 4  ;;  %v7271_v4 = vrot.slane %v7270_v53, 4  ;;  %v7280_v8 = vor.u32 %v7279_v48, %v7275_v43  ;;  %v5238_v10 = vshrl.u32 %v5114_v23, 16  ;;  %v6704_v39 = vld [vmem:[#allocation4 + $0x3c] sm:$0xe] }
 0x308   : > { %v5230_v12 = vrot.slane %v5228_v55, 5  ;;  %v7866_v42 = vsel %vm10226_vm9, %v7864_v63, %v7865_v61  ;;  %v5236_v36 = vrot.slane %v5234_v7, 5  ;;  %v5244_v15 = vshll.u32 %v5115_v21, 16  ;;  %v6705_v46 = vld [vmem:[#allocation4 + $0x40] sm:$0xf] }
 0x309   : > { %v8913_v18 = vrot.slane %v5667_v59, 9  ;;  %v7276_v26 = vsel %vm10233_vm10, %v7271_v4, %v7275_v43  ;;  %v7281_v14 = vrot.slane %v7280_v8, 4  ;;  %v9055_v37 = vcombine.low %v7863_v31, %v7866_v42  ;;  %v6706_v30 = vld [vmem:[#allocation4 + $0x44] sm:$0x1]  ;;  %v5664_v27 = vld [vmem:[#allocation4 + $0x3c] sm:$0xe] }
 0x30a   : > { %v5231_v33 = vor.u32 %v5230_v12, %v5227_v1  ;;  %v5240_v34 = vrot.slane %v5238_v10, 4  ;;  %v5246_v28 = vrot.slane %v5244_v15, 5  ;;  %v5789_v11 = vrot.slane %v5668_v62, 5  ;;  %v5665_v59 = vld [vmem:[#allocation4 + $0x40] sm:$0xf] }
 0x30b   : > { %v5792_v16 = vrot.slane %v5669_v13, 5  ;;  %v7286_v44 = vsel %vm10233_vm10, %v7281_v14, %v7285_v38  ;;  %8000 = vrot.lane.b32.xlu0 %v9055_v37, %s9782_s19  ;;  %v8976_v57 = vrot.slane %v6707_v2, 9  ;;  %v6825_v45 = vrot.slane %v6708_v3, 5  ;;  %v5666_v53 = vld [vmem:[#allocation4 + $0x44] sm:$0x1] }
 0x30c   : > { %v5232_v56 = vrot.slane %v5231_v33, 4  ;;  %v9020_v40 = vcombine.low %v7276_v26, %v7286_v44  ;;  %v5241_v47 = vor.u32 %v5240_v34, %v5236_v36  ;;  %v5790_v49 = vsel %vm10226_vm9, %v8913_v18, %v5789_v11  ;;  %v7203_v48 = vld [vmem:[#allocation4 + $0x48] sm:$0xf]  ;;  %v7204_v2 = vld [vmem:[#allocation4 + $0x4c] sm:$0xf]  ;;  %v9467_v3 = vld [vmem:[#allocation4 + $0x60] sm:$0xff]  }
 0x30d   : > { %v5791_v60 = vrot.slane %v5789_v11, 4  ;;  %v6826_v50 = vsel %vm10226_vm9, %v8976_v57, %v6825_v45  ;;  %v6827_v51 = vrot.slane %v6825_v45, 4  ;;  %v6828_v23 = vrot.slane %v6709_v20, 5  ;;  %v7205_v10 = vld [vmem:[#allocation4 + $0x50] sm:$0x1]  ;;  %5096 = vst.msk [vmem:[#allocation5 + $0x40] sm:$0xff] %vm12687_vm15, %v9467_v3 }
 0x30e   : > { %v5237_v58 = vsel %vm10233_vm10, %v5232_v56, %v5236_v36  ;;  %7673 = vrot.lane.b32.xlu1 %v9020_v40, %s9783_s21  ;;  %v5242_v6 = vrot.slane %v5241_v47, 4  ;;  %v9038_v52 = vrot.slane %v7745_v32, 9  ;;  %v7855_v21 = vrot.slane %v7746_v24, 5  ;;  %v9469_v36 = vld [vmem:[#allocation4 + $0x54] sm:$0xff]   ;;  %v6162_v14 = vld [vmem:[#allocation4 + $0x48] sm:$0xf] }
 0x30f   : > { %v5793_v54 = vsel %vm10226_vm9, %v5791_v60, %v5792_v16  ;;  %v6829_v25 = vsel %vm10226_vm9, %v6827_v51, %v6828_v23  ;;  %v7858_v61 = vrot.slane %v7747_v35, 5  ;;  %v8975_v5 = vrot.slane %v6704_v39, 9  ;;  %5095 = vst.msk [vmem:[#allocation5 + $0x38] sm:$0xff] %vm12687_vm15, %v9469_v36  ;;  %v6163_v35 = vld [vmem:[#allocation4 + $0x4c] sm:$0xf]  ;;  %v5585_v39 = vpop.permute.xlu0 %5584 }
 0x310   : > { %v8929_v43 = vcombine.low %v5790_v49, %v5793_v54  ;;  %v5247_v38 = vsel %vm10233_vm10, %v5242_v6, %v5246_v28  ;;  %v8992_v55 = vcombine.low %v6826_v50, %v6829_v25  ;;  %v7856_v62 = vsel %vm10226_vm9, %v9038_v52, %v7855_v21  ;;  %v6164_v45 = vld [vmem:[#allocation4 + $0x50] sm:$0x1] }
 0x311   : > { %v7857_v13 = vrot.slane %v7855_v21, 4  ;;  %v8894_v31 = vcombine.low %v5237_v58, %v5247_v38  ;;  %v6818_v63 = vrot.slane %v6705_v46, 5  ;;  %v6821_v1 = vrot.slane %v6706_v30, 5  ;;  %v5122_v30 = vld [vmem:[#allocation4 + $0x48] sm:$0xf] }
 0x312   : > { %5917 = vrot.lane.b32.xlu0 %v8929_v43, %s9778_s17  ;;  %v8912_v7 = vrot.slane %v5664_v27, 9  ;;  %v5782_v8 = vrot.slane %v5665_v59, 5  ;;  %v5785_v12 = vrot.slane %v5666_v53, 5  ;;  %v7336_v42 = vshrl.u32 %v7203_v48, 16  ;;  %v9436_v27 = vld [vmem:[#allocation4 + $0x60] sm:$0xff]  }
 0x313   : > { %v7859_v4 = vsel %vm10226_vm9, %v7857_v13, %v7858_v61  ;;  %5590 = vrot.lane.b32.xlu1 %v8894_v31, %s9772_s8  ;;  %v6819_v18 = vsel %vm10226_vm9, %v8975_v5, %v6818_v63  ;;  %v6820_v20 = vrot.slane %v6818_v63, 4  ;;  %v7339_v26 = vshll.u32 %v7203_v48, 16  ;;  %v5123_v21 = vld [vmem:[#allocation4 + $0x4c] sm:$0xf]  ;;  %v5124_v61 = vld [vmem:[#allocation4 + $0x50] sm:$0x1]  ;;  %v11695_v13 = vpop.permute.xlu0 %5905 }
 0x314   : > { %v9054_v15 = vcombine.low %v7856_v62, %v7859_v4  ;;  %v5783_v37 = vsel %vm10226_vm9, %v8912_v7, %v5782_v8  ;;  %v5784_v33 = vrot.slane %v5782_v8, 4  ;;  %v7338_v32 = vrot.slane %v7336_v42, 4  ;;  %v9437_v53 = vld [vmem:[#allocation4 + $0x60] sm:$0xff]  }
 0x315   : > { %v7345_v24 = vshll.u32 %v7204_v2, 16  ;;  %v6822_v34 = vsel %vm10226_vm9, %v6820_v20, %v6821_v1  ;;  %v7341_v28 = vrot.slane %v7339_v26, 5  ;;  %v7349_v11 = vshrl.u32 %v7204_v2, 16 }
 0x316   : > { %7998 = vrot.lane.b32.xlu0 %v9054_v15, %s9782_s19  ;;  %v7355_v16 = vshll.u32 %v7205_v10, 16  ;;  %v8991_v44 = vcombine.low %v6819_v18, %v6822_v34  ;;  %v5786_v56 = vsel %vm10226_vm9, %v5784_v33, %v5785_v12  ;;  %v6316_v40 = vshrl.u32 %v6162_v14, 16 }
 0x317   : > { %v7347_v57 = vrot.slane %v7345_v24, 5  ;;  %6958 = vrot.lane.b32.xlu1 %v8992_v55, %s9781_s13  ;;  %v8928_v47 = vcombine.low %v5783_v37, %v5786_v56  ;;  %v7342_v49 = vor.u32 %v7341_v28, %v7338_v32  ;;  %v7351_v60 = vrot.slane %v7349_v11, 4 }
 0x318   : > { %v7357_v46 = vrot.slane %v7355_v16, 5  ;;  %v6318_v58 = vrot.slane %v6316_v40, 4  ;;  %v6319_v50 = vshll.u32 %v6162_v14, 16  ;;  %v6325_v51 = vshll.u32 %v6163_v35, 16  ;;  %v6159_v16 = vld [vmem:[#allocation4 + $0x3c] sm:$0xf] }
 0x319   : > { %v6329_v23 = vshrl.u32 %v6163_v35, 16  ;;  %v7343_v6 = vrot.slane %v7342_v49, 4  ;;  %v7352_v54 = vor.u32 %v7351_v60, %v7347_v57  ;;  %v6335_v52 = vshll.u32 %v6164_v45, 16  ;;  %v9451_v45 = vld [vmem:[#allocation14] sm:$0xff]  }
 0x31a   : > { %6956 = vrot.lane.b32.xlu0 %v8991_v44, %s9781_s13  ;;  %vm5632_vm6 = vcmask 130112   ;;  %v6321_v59 = vrot.slane %v6319_v50, 5  ;;  %v6327_v43 = vrot.slane %v6325_v51, 5  ;;  %v5297_v5 = vshrl.u32 %v5122_v30, 16  ;;  %v9439_v50 = vld [vmem:[#allocation4 + $0x54] sm:$0xff]   ;;  %9207 = vmatprep.subr.bf16.mxu1 %v9451_v45 }
 0x31b   : > { %v6331_v25 = vrot.slane %v6329_v23, 4  ;;  %5633 = vst.msk [vmem:[#allocation5] sm:$0xff] %vm5632_vm6, %v5585_v39  ;;  %5915 = vrot.lane.b32.xlu1 %v8928_v47, %s9778_s17  ;;  %v7348_v48 = vsel %vm10233_vm10, %v7343_v6, %v7347_v57  ;;  %v7353_v38 = vrot.slane %v7352_v54, 4  ;;  %v6337_v55 = vrot.slane %v6335_v52, 5  ;;  %9208 = vmatpush3.bf16.msra.mxu1 %v9451_v45 }
 0x31c   : > { %v5300_v62 = vshll.u32 %v5122_v30, 16  ;;  %v6322_v31 = vor.u32 %v6321_v59, %v6318_v58  ;;  %v5299_v1 = vrot.slane %v5297_v5, 4  ;;  %v5306_v7 = vshll.u32 %v5123_v21, 16  ;;  %v9193_v3 = vpop.f32.mrb[16].mxu0  ;;  %v9438_v59 = vld [vmem:[#allocation4 + $0x54] sm:$0xff]  }
 0x31d   : > { %v6332_v63 = vor.u32 %v6331_v25, %v6327_v43  ;;  %v7358_v2 = vsel %vm10233_vm10, %v7353_v38, %v7357_v46  ;;  %v5310_v8 = vshrl.u32 %v5123_v21, 16  ;;  %v5316_v12 = vshll.u32 %v5124_v61, 16  ;;  %v4197_v18 = vpop.f32.mrb[17].mxu0  ;;  %v11715_v46 = vld [vmem:[#allocation4 + $0x40] sm:$0xf]  ;;  %v9452_v61 = vld [vmem:[#allocation14 + $0x8] sm:$0xff]  }
 0x31e   : > { %7138 = vrot.lane.b32.xlu0 %v9436_v27, %s9780_s14  ;;  %v5302_v4 = vrot.slane %v5300_v62, 5  ;;  %v9023_v10 = vcombine.low %v7348_v48, %v7358_v2  ;;  %v6323_v42 = vrot.slane %v6322_v31, 4  ;;  %v4285_v15 = vmul.f32 %v11603_v9, %v9193_v3  ;;  %v9194_v26 = vpop.f32.mrb[18].mxu0  ;;  %9209 = vmatprep.subr.bf16.mxu1 %v9452_v61  ;;  %v4903_v2 = vld [vmem:[#allocation4 + $0x6c] sm:$0xf] }
 0x31f   : > { %v6333_v36 = vrot.slane %v6332_v63, 4  ;;  %6096 = vrot.lane.b32.xlu1 %v9437_v53, %s9775_s15  ;;  %v4283_v20 = vmul.f32 %v11603_v9, %v4197_v18  ;;  %v5308_v37 = vrot.slane %v5306_v7, 5  ;;  %v5312_v33 = vrot.slane %v5310_v8, 4  ;;  %v4200_v11 = vpop.f32.mrb[19].mxu0  ;;  %9210 = vmatpush3.bf16.msra.mxu1 %v9452_v61  ;;  %v6161_v18 = vld [vmem:[#allocation4 + $0x44] sm:$0x1] }
 0x320   : > { %v5303_v14 = vor.u32 %v5302_v4, %v5299_v1  ;;  %v6328_v32 = vsel %vm10233_vm10, %v6323_v42, %v6327_v43  ;;  %v4324_v34 = vadd.f32 %v11610_v0, %v4285_v15  ;;  %v4286_v28 = vmul.f32 %v11603_v9, %v9194_v26  ;;  %v11712_v57 = vpop.permute.xlu0 %7126  ;;  %v4914_v42 = vld [vmem:[#allocation4 + $0x80] sm:$0x1] }
 0x321   : > { %v6338_v24 = vsel %vm10233_vm10, %v6333_v36, %v6337_v55  ;;  %v4322_v39 = vadd.f32 %v11610_v0, %v4283_v20  ;;  %v4284_v44 = vmul.f32 %v11603_v9, %v4200_v11  ;;  %v5313_v49 = vor.u32 %v5312_v33, %v5308_v37  ;;  %v4910_v55 = vld [vmem:[#allocation4 + $0x78] sm:$0xf]  ;;  %v4907_v33 = vld [vmem:[#allocation4 + $0x74] sm:$0x1] }
 0x322   : > { %7679 = vrot.lane.b32.xlu0 %v9023_v10, %s9783_s21  ;;  %v8960_v35 = vcombine.low %v6328_v32, %v6338_v24  ;;  %v5304_v56 = vrot.slane %v5303_v14, 4  ;;  %v4356_v40 = vmax.f32 %v4324_v34, 0.0  ;;  %v4325_v47 = vadd.f32 %v11610_v0, %v4286_v28  ;;  %v9454_v34 = vld [vmem:[#allocation14 + $0x10] sm:$0xff]  }
 0x323   : > { %v5318_v60 = vrot.slane %v5316_v12, 5  ;;  %v4354_v30 = vmax.f32 %v4322_v39, 0.0  ;;  %v4323_v58 = vadd.f32 %v11610_v0, %v4284_v44  ;;  %v6292_v51 = vshrl.u32 %v6159_v16, 16  ;;  %v11728_v12 = vpop.permute.xlu1 %6084  ;;  %v7200_v39 = vld [vmem:[#allocation4 + $0x3c] sm:$0xf]  ;;  %9211 = vmatprep.subr.bf16.mxu1 %v9454_v34 }
 0x324   : > { %6637 = vrot.lane.b32.xlu1 %v8960_v35, %s9777_s12  ;;  %v5309_v9 = vsel %vm10233_vm10, %v5304_v56, %v5308_v37  ;;  %v9114_v23 = vpack.c.bf16 %v4356_v40, %v4356_v40  ;;  %v4357_v27 = vmax.f32 %v4325_v47, 0.0  ;;  %v5314_v6 = vrot.slane %v5313_v49, 4  ;;  %v11723_v0 = vpop.permute.xlu0 %6082  ;;  %v7201_v44 = vld [vmem:[#allocation4 + $0x40] sm:$0xf]  ;;  %v7202_v49 = vld [vmem:[#allocation4 + $0x44] sm:$0x1]  ;;  %9212 = vmatpush3.bf16.msra.mxu1 %v9454_v34 }
 0x325   : > { %v6295_v54 = vshll.u32 %v6159_v16, 16  ;;  %v9112_v52 = vpack.c.bf16 %v4354_v30, %v4354_v30  ;;  %v4355_v21 = vmax.f32 %v4323_v58, 0.0  ;;  %v6294_v43 = vrot.slane %v6292_v51, 4  ;;  %v7755_v51 = vld [vmem:[#allocation4 + $0x64] sm:$0xf] }
 0x326   : > { %6094 = vrot.lane.b32.xlu0 %v9439_v50, %s9775_s15  ;;  %v6301_v25 = vshll.u32 %v11715_v46, 16  ;;  %v4676_v5 = vshrl.u32 %v9114_v23, 16  ;;  %v4679_v53 = vshll.u32 %v9114_v23, 16  ;;  %v9115_v48 = vpack.c.bf16 %v4357_v27, %v4357_v27 }
 0x327   : > { %v5319_v38 = vsel %vm10233_vm10, %v5314_v6, %v5318_v60  ;;  %v4659_v62 = vshrl.u32 %v9112_v52, 16  ;;  %v4662_v31 = vshll.u32 %v9112_v52, 16  ;;  %v9113_v63 = vpack.c.bf16 %v4355_v21, %v4355_v21  ;;  %v7754_v60 = vld [vmem:[#allocation4 + $0x60] sm:$0xe] }
 0x328   : > { %7136 = vrot.lane.b32.xlu1 %v9438_v59, %s9780_s14  ;;  %v8897_v1 = vcombine.low %v5309_v9, %v5319_v38  ;;  %v4678_v7 = vrot.slane %v4676_v5, 7  ;;  %v4684_v3 = vshrl.u32 %v9115_v48, 16  ;;  %v4687_v4 = vshll.u32 %v9115_v48, 16 }
 0x329   : > { %v6297_v8 = vrot.slane %v6295_v54, 5  ;;  %v4661_v10 = vrot.slane %v4659_v62, 7  ;;  %v4667_v36 = vshrl.u32 %v9113_v63, 16  ;;  %v4670_v15 = vshll.u32 %v9113_v63, 16  ;;  %v11738_v30 = vpop.permute.xlu1 %6950  ;;  %v5119_v63 = vld [vmem:[#allocation4 + $0x3c] sm:$0xf] }
 0x32a   : > { %v11730_v20 = vrot.slane %v6301_v25, 5  ;;  %v4681_v26 = vor.u32 %v4679_v53, %v4678_v7  ;;  %v4682_v14 = vrot.slane %v4678_v7, 4  ;;  %v4686_v37 = vrot.slane %v4684_v3, 7  ;;  %v11732_v24 = vpop.permute.xlu0 %7992  ;;  %v7756_v53 = vld [vmem:[#allocation4 + $0x68] sm:$0x1] }
 0x32b   : > { %v6298_v32 = vor.u32 %v6297_v8, %v6294_v43  ;;  %v4664_v28 = vor.u32 %v4662_v31, %v4661_v10  ;;  %v4665_v11 = vrot.slane %v4661_v10, 4  ;;  %v4669_v16 = vrot.slane %v4667_v36, 7 }
 0x32c   : > { %5596 = vrot.lane.b32.xlu1 %v8897_v1, %s9772_s8  ;;  %v6305_v35 = vshrl.u32 %v11715_v46, 16  ;;  %v4911_v56 = vsel %vm11412_vm11, %v4681_v26, %v4910_v55  ;;  %v4689_v45 = vor.u32 %v4687_v4, %v4686_v37  ;;  %v4691_v40 = vrot.slane %v4686_v37, 4  ;;  %v5120_v4 = vld [vmem:[#allocation4 + $0x40] sm:$0xf] }
 0x32d   : > { %v6299_v47 = vrot.slane %v6298_v32, 4  ;;  %4912 = vst [vmem:[#allocation4 + $0x78] sm:$0xf] %v4911_v56  ;;  %v4904_v58 = vsel %vm11412_vm11, %v4664_v28, %v4903_v2  ;;  %v4672_v50 = vor.u32 %v4670_v15, %v4669_v16  ;;  %v4674_v9 = vrot.slane %v4669_v16, 4  ;;  %v5121_v15 = vld [vmem:[#allocation4 + $0x44] sm:$0x1] }
 0x32e   : > { %v6307_v46 = vrot.slane %v6305_v35, 4  ;;  %4905 = vst [vmem:[#allocation4 + $0x6c] sm:$0xf] %v4904_v58  ;;  %v4690_v23 = vsel %vm10249_vm12, %v4682_v14, %v4689_v45  ;;  %v4915_v27 = vsel %vm11421_vm0, %v4691_v40, %v4914_v42  ;;  %v6311_v54 = vshll.u32 %v6161_v18, 16  ;;  %v11760_v8 = vpop.permute.xlu1 %5907  ;;  %v5673_v37 = vld [vmem:[#allocation4 + $0x60] sm:$0xe] }
 0x32f   : > { %v6304_v6 = vsel %vm10233_vm10, %v6299_v47, %v11730_v20  ;;  %4913 = vst.msk [vmem:[#allocation4 + $0x7c] sm:$0xf] %vm4370_vm13, %v4690_v23  ;;  %4916 = vst [vmem:[#allocation4 + $0x80] sm:$0x1] %v4915_v27  ;;  %v4673_v52 = vsel %vm10249_vm12, %v4665_v11, %v4672_v50  ;;  %v4908_v21 = vsel %vm11421_vm0, %v4674_v9, %v4907_v33  ;;  %vm5953_vm3 = vcmask 195712   ;;  %v11758_v48 = vpop.permute.xlu0 %5909  ;;  %v9456_v35 = vld [vmem:[#allocation14 + $0x18] sm:$0xff]  }
 0x330   : > { %v6308_v59 = vor.u32 %v6307_v46, %v11730_v20  ;;  %4906 = vst.msk [vmem:[#allocation4 + $0x70] sm:$0xf] %vm4370_vm13, %v4673_v52  ;;  %4909 = vst [vmem:[#allocation4 + $0x74] sm:$0x1] %v4908_v21  ;;  %v6313_v43 = vrot.slane %v6311_v54, 5  ;;  %v7312_v25 = vshrl.u32 %v7200_v39, 16  ;;  %9213 = vmatprep.subr.bf16.mxu1 %v9456_v35 }
 0x331   : > { %5954 = vst.msk [vmem:[#allocation5] sm:$0xff] %vm5953_vm3, %v11695_v13  ;;  %v7315_v61 = vshll.u32 %v7200_v39, 16  ;;  %v7321_v5 = vshll.u32 %v7201_v44, 16  ;;  %v7325_v55 = vshrl.u32 %v7201_v44, 16  ;;  %v7331_v62 = vshll.u32 %v7202_v49, 16  ;;  %9214 = vmatpush3.bf16.msra.mxu1 %v9456_v35 }
 0x332   : > { %v6309_v38 = vrot.slane %v6308_v59, 4  ;;  %v9041_v31 = vrot.slane %v7754_v60, 9  ;;  %v7314_v1 = vrot.slane %v7312_v25, 4  ;;  %v7876_v3 = vrot.slane %v7755_v51, 5  ;;  %v5674_v33 = vld [vmem:[#allocation4 + $0x64] sm:$0xf]  ;;  %v11771_v49 = vpop.permute.xlu1 %6088 }
 0x333   : > { %v7317_v7 = vrot.slane %v7315_v61, 5  ;;  %v7323_v2 = vrot.slane %v7321_v5, 5  ;;  %v7327_v10 = vrot.slane %v7325_v55, 4  ;;  %v7333_v42 = vrot.slane %v7331_v62, 5  ;;  %v5675_v16 = vld [vmem:[#allocation4 + $0x68] sm:$0x1]  ;;  %v11769_v47 = vpop.permute.xlu0 %6948 }
 0x334   : > { %v6314_v13 = vsel %vm10233_vm10, %v6309_v38, %v6313_v43  ;;  %v7879_v36 = vrot.slane %v7756_v53, 5  ;;  %v7877_v26 = vsel %vm10226_vm9, %v9041_v31, %v7876_v3  ;;  %v7878_v14 = vrot.slane %v7876_v3, 4  ;;  %v6713_v40 = vld [vmem:[#allocation4 + $0x60] sm:$0xe]  ;;  %v6714_v46 = vld [vmem:[#allocation4 + $0x64] sm:$0xf] }
 0x335   : > { %v8959_v18 = vcombine.low %v6304_v6, %v6314_v13  ;;  %v7318_v20 = vor.u32 %v7317_v7, %v7314_v1  ;;  %v7328_v32 = vor.u32 %v7327_v10, %v7323_v2  ;;  %v5273_v34 = vshrl.u32 %v5119_v63, 16  ;;  %v6715_v51 = vld [vmem:[#allocation4 + $0x68] sm:$0x1]  ;;  %v7751_v23 = vld [vmem:[#allocation4 + $0x54] sm:$0xe] }
 0x336   : > { %v5276_v28 = vshll.u32 %v5119_v63, 16  ;;  %v5282_v11 = vshll.u32 %v5120_v4, 16  ;;  %v7880_v44 = vsel %vm10226_vm9, %v7878_v14, %v7879_v36  ;;  %v5286_v56 = vshrl.u32 %v5120_v4, 16  ;;  %v7752_v21 = vld [vmem:[#allocation4 + $0x58] sm:$0xf] }
 0x337   : > { %6635 = vrot.lane.b32.xlu0 %v8959_v18, %s9777_s12  ;;  %v7319_v39 = vrot.slane %v7318_v20, 4  ;;  %v5292_v45 = vshll.u32 %v5121_v15, 16  ;;  %v7329_v60 = vrot.slane %v7328_v32, 4  ;;  %v9057_v58 = vcombine.low %v7877_v26, %v7880_v44  ;;  %v7753_v55 = vld [vmem:[#allocation4 + $0x5c] sm:$0x1]  ;;  %v11778_v62 = vpop.permute.xlu0 %7130  ;;  %v9472_v4 = vld [vmem:[#allocation4 + $0x6c] sm:$0xff]  }
 0x338   : > { %v5275_v50 = vrot.slane %v5273_v34, 4  ;;  %v5278_v9 = vrot.slane %v5276_v28, 5  ;;  %v5284_v6 = vrot.slane %v5282_v11, 5  ;;  %v5288_v54 = vrot.slane %v5286_v56, 4  ;;  %v9471_v31 = vld [vmem:[#allocation4 + $0x78] sm:$0xff]   ;;  %5097 = vst.msk [vmem:[#allocation5 + $0x48] sm:$0xff] %vm12687_vm15, %v9472_v4 }
 0x339   : > { %v7324_v27 = vsel %vm10233_vm10, %v7319_v39, %v7323_v2  ;;  %v5294_v52 = vrot.slane %v5292_v45, 5  ;;  %v7334_v59 = vsel %vm10233_vm10, %v7329_v60, %v7333_v42  ;;  %v8915_v25 = vrot.slane %v5673_v37, 9  ;;  %v6710_v3 = vld [vmem:[#allocation4 + $0x54] sm:$0xe]  ;;  %v6711_v15 = vld [vmem:[#allocation4 + $0x58] sm:$0xf] }
 0x33a   : > { %v5279_v43 = vor.u32 %v5278_v9, %v5275_v50  ;;  %v5803_v61 = vrot.slane %v5674_v33, 5  ;;  %v9022_v5 = vcombine.low %v7324_v27, %v7334_v59  ;;  %v5289_v53 = vor.u32 %v5288_v54, %v5284_v6  ;;  %5098 = vst.msk [vmem:[#allocation5 + $0x50] sm:$0xff] %vm12687_vm15, %v9471_v31  ;;  %v6712_v37 = vld [vmem:[#allocation4 + $0x5c] sm:$0x1]  ;;  %v5670_v33 = vld [vmem:[#allocation4 + $0x54] sm:$0xe] }
 0x33b   : > { %8004 = vrot.lane.b32.xlu0 %v9057_v58, %s9782_s19  ;;  %v5806_v38 = vrot.slane %v5675_v16, 5  ;;  %vm6130_vm4 = vcmask 261312   ;;  %v8978_v2 = vrot.slane %v6713_v40, 9  ;;  %v6839_v10 = vrot.slane %v6714_v46, 5  ;;  %v11785_v18 = vpop.permute.xlu1 %6629  ;;  %v5671_v16 = vld [vmem:[#allocation4 + $0x58] sm:$0xf] }
 0x33c   : > { %v5280_v63 = vrot.slane %v5279_v43, 4  ;;  %v5804_v1 = vsel %vm10226_vm9, %v8915_v25, %v5803_v61  ;;  %v5805_v7 = vrot.slane %v5803_v61, 4  ;;  %6131 = vst.msk [vmem:[#allocation5] sm:$0xff] %vm6130_vm4, %v11723_v0  ;;  %7677 = vrot.lane.b32.xlu1 %v9022_v5, %s9783_s21  ;;  %v5290_v13 = vrot.slane %v5289_v53, 4  ;;  %v5672_v35 = vld [vmem:[#allocation4 + $0x5c] sm:$0x1] }
 0x33d   : > { %v6842_v42 = vrot.slane %v6715_v51, 5  ;;  %v9040_v36 = vrot.slane %v7751_v23, 9  ;;  %v7869_v26 = vrot.slane %v7752_v21, 5  ;;  %v7872_v14 = vrot.slane %v7753_v55, 5  ;;  %v7209_v40 = vld [vmem:[#allocation4 + $0x60] sm:$0xf]  ;;  %v11802_v51 = vpop.permute.xlu0 %7671 }
 0x33e   : > { %v5285_v20 = vsel %vm10233_vm10, %v5280_v63, %v5284_v6  ;;  %v5807_v0 = vsel %vm10226_vm9, %v5805_v7, %v5806_v38  ;;  %v5295_v32 = vsel %vm10233_vm10, %v5290_v13, %v5294_v52  ;;  %v6840_v28 = vsel %vm10226_vm9, %v8978_v2, %v6839_v10  ;;  %v7210_v46 = vld [vmem:[#allocation4 + $0x64] sm:$0xf]  ;;  %v7211_v21 = vld [vmem:[#allocation4 + $0x68] sm:$0x1]  ;;  %v6168_v31 = vld [vmem:[#allocation4 + $0x60] sm:$0xf] }
 0x33f   : > { %v8931_v34 = vcombine.low %v5804_v1, %v5807_v0  ;;  %v6841_v11 = vrot.slane %v6839_v10, 4  ;;  %v8896_v39 = vcombine.low %v5285_v20, %v5295_v32  ;;  %v7870_v44 = vsel %vm10226_vm9, %v9040_v36, %v7869_v26  ;;  %v11804_v23 = vpop.permute.xlu1 %7128  ;;  %v5128_v20 = vld [vmem:[#allocation4 + $0x60] sm:$0xf] }
 0x340   : > { %v7871_v56 = vrot.slane %v7869_v26, 4  ;;  %v8977_v45 = vrot.slane %v6710_v3, 9  ;;  %v6832_v58 = vrot.slane %v6711_v15, 5  ;;  %v6835_v50 = vrot.slane %v6712_v37, 5  ;;  %v6169_v3 = vld [vmem:[#allocation4 + $0x64] sm:$0xf] }
 0x341   : > { %5921 = vrot.lane.b32.xlu0 %v8931_v34, %s9778_s17  ;;  %v6843_v60 = vsel %vm10226_vm9, %v6841_v11, %v6842_v42  ;;  %v8914_v9 = vrot.slane %v5670_v33, 9  ;;  %5594 = vrot.lane.b32.xlu1 %v8896_v39, %s9772_s8  ;;  %v5796_v54 = vrot.slane %v5671_v16, 5  ;;  %v5799_v52 = vrot.slane %v5672_v35, 5  ;;  %v6170_v15 = vld [vmem:[#allocation4 + $0x68] sm:$0x1]  ;;  %v6087_v33 = vpop.permute.xlu0 %6086  ;;  %v9441_v16 = vld [vmem:[#allocation4 + $0x78] sm:$0xff]  }
 0x342   : > { %v8994_v27 = vcombine.low %v6840_v28, %v6843_v60  ;;  %v7873_v6 = vsel %vm10226_vm9, %v7871_v56, %v7872_v14  ;;  %v6833_v43 = vsel %vm10226_vm9, %v8977_v45, %v6832_v58  ;;  %v6834_v25 = vrot.slane %v6832_v58, 4  ;;  %v9442_v45 = vld [vmem:[#allocation4 + $0x78] sm:$0xff]  }
 0x343   : > { %v9056_v59 = vcombine.low %v7870_v44, %v7873_v6  ;;  %v7384_v61 = vshrl.u32 %v7209_v40, 16  ;;  %v5797_v5 = vsel %vm10226_vm9, %v8914_v9, %v5796_v54  ;;  %v5798_v53 = vrot.slane %v5796_v54, 4  ;;  %v5589_v4 = vpop.permute.xlu1 %5588 }
 0x344   : > { %v7387_v38 = vshll.u32 %v7209_v40, 16  ;;  %v7393_v55 = vshll.u32 %v7210_v46, 16  ;;  %v6836_v63 = vsel %vm10226_vm9, %v6834_v25, %v6835_v50  ;;  %v7397_v7 = vshrl.u32 %v7210_v46, 16  ;;  %5635 = vst.msk [vmem:[#allocation5 + $0x10] sm:$0xff] %vm5632_vm6, %v5589_v4 }
 0x345   : > { %8002 = vrot.lane.b32.xlu0 %v9056_v59, %s9782_s19  ;;  %v7386_v1 = vrot.slane %v7384_v61, 4  ;;  %v7403_v2 = vshll.u32 %v7211_v21, 16  ;;  %6962 = vrot.lane.b32.xlu1 %v8994_v27, %s9781_s13  ;;  %v8993_v13 = vcombine.low %v6833_v43, %v6836_v63  ;;  %v5800_v10 = vsel %vm10226_vm9, %v5798_v53, %v5799_v52  ;;  %5956 = vst.msk [vmem:[#allocation5 + $0x10] sm:$0xff] %vm5953_vm3, %v11758_v48  ;;  %v11825_v27 = vld [vmem:[#allocation11] ss:$0 sm:$0xff] }
 0x346   : > { %v7389_v42 = vrot.slane %v7387_v38, 5  ;;  %v7395_v36 = vrot.slane %v7393_v55, 5  ;;  %v8930_v0 = vcombine.low %v5797_v5, %v5800_v10  ;;  %v7399_v26 = vrot.slane %v7397_v7, 4  ;;  %6133 = vst.msk [vmem:[#allocation5 + $0x10] sm:$0xff] %vm6130_vm4, %v6087_v33  ;;  %v11834_v53 = vld [vmem:[#allocation12] ss:$0 sm:$0xff] }
 0x347   : > { %v7405_v14 = vrot.slane %v7403_v2, 5  ;;  %v6364_v37 = vshrl.u32 %v6168_v31, 16  ;;  %v6367_v34 = vshll.u32 %v6168_v31, 16  ;;  %v6373_v28 = vshll.u32 %v6169_v3, 16  ;;  %v5129_v63 = vld [vmem:[#allocation4 + $0x64] sm:$0xf] }
 0x348   : > { %v7390_v32 = vor.u32 %v7389_v42, %v7386_v1  ;;  %v6377_v11 = vshrl.u32 %v6169_v3, 16  ;;  %v7400_v35 = vor.u32 %v7399_v26, %v7395_v36  ;;  %v6383_v44 = vshll.u32 %v6170_v15, 16  ;;  %v9197_v50 = vpop.f32.mrb[20].mxu0 }
 0x349   : > { %6960 = vrot.lane.b32.xlu0 %v8993_v13, %s9781_s13  ;;  %v6366_v39 = vrot.slane %v6364_v37, 4  ;;  %v5345_v56 = vshrl.u32 %v5128_v20, 16  ;;  %5919 = vrot.lane.b32.xlu1 %v8930_v0, %s9778_s17  ;;  %v6369_v60 = vrot.slane %v6367_v34, 5  ;;  %v6375_v58 = vrot.slane %v6373_v28, 5  ;;  %v4213_v54 = vpop.f32.mrb[21].mxu0 }
 0x34a   : > { %v7391_v40 = vrot.slane %v7390_v32, 4  ;;  %v6379_v48 = vrot.slane %v6377_v11, 4  ;;  %v7401_v9 = vrot.slane %v7400_v35, 4  ;;  %v6385_v46 = vrot.slane %v6383_v44, 5  ;;  %v9198_v61 = vpop.f32.mrb[22].mxu0 }
 0x34b   : > { %v4289_v6 = vmul.f32 %v11825_v27, %v9197_v50  ;;  %v5347_v52 = vrot.slane %v5345_v56, 4  ;;  %v6370_v59 = vor.u32 %v6369_v60, %v6366_v39  ;;  %v4287_v25 = vmul.f32 %v11825_v27, %v4213_v54  ;;  %v4216_v31 = vpop.f32.mrb[23].mxu0  ;;  %v5130_v60 = vld [vmem:[#allocation4 + $0x68] sm:$0x1]  ;;  %v4917_v54 = vld [vmem:[#allocation4 + $0x84] sm:$0xf] }
 0x34c   : > { %v7396_v21 = vsel %vm10233_vm10, %v7391_v40, %v7395_v36  ;;  %v6380_v43 = vor.u32 %v6379_v48, %v6375_v58  ;;  %v7406_v5 = vsel %vm10233_vm10, %v7401_v9, %v7405_v14  ;;  %v4290_v55 = vmul.f32 %v11825_v27, %v9198_v61  ;;  %v9444_v40 = vld [vmem:[#allocation4 + $0x6c] sm:$0xff]  }
 0x34d   : > { %7142 = vrot.lane.b32.xlu0 %v9441_v16, %s9780_s14  ;;  %v4328_v38 = vadd.f32 %v11834_v53, %v4289_v6  ;;  %v5348_v1 = vshll.u32 %v5128_v20, 16  ;;  %6100 = vrot.lane.b32.xlu1 %v9442_v45, %s9775_s15  ;;  %v9025_v7 = vcombine.low %v7396_v21, %v7406_v5  ;;  %v6371_v2 = vrot.slane %v6370_v59, 4  ;;  %v4928_v5 = vld [vmem:[#allocation4 + $0x98] sm:$0x1] }
 0x34e   : > { %v6381_v3 = vrot.slane %v6380_v43, 4  ;;  %v4326_v4 = vadd.f32 %v11834_v53, %v4287_v25  ;;  %v4329_v10 = vadd.f32 %v11834_v53, %v4290_v55  ;;  %v4288_v42 = vmul.f32 %v11825_v27, %v4216_v31  ;;  %v9443_v43 = vld [vmem:[#allocation4 + $0x6c] sm:$0xff]  }
 0x34f   : > { %v4360_v13 = vmax.f32 %v4328_v38, 0.0  ;;  %v5350_v36 = vrot.slane %v5348_v1, 5  ;;  %v6376_v15 = vsel %vm10233_vm10, %v6371_v2, %v6375_v58  ;;  %v5354_v26 = vshll.u32 %v5129_v63, 16  ;;  %v4924_v58 = vld [vmem:[#allocation4 + $0x90] sm:$0xf] }
 0x350   : > { %v6386_v0 = vsel %vm10233_vm10, %v6381_v3, %v6385_v46  ;;  %v4358_v20 = vmax.f32 %v4326_v4, 0.0  ;;  %v4361_v33 = vmax.f32 %v4329_v10, 0.0  ;;  %v4327_v32 = vadd.f32 %v11834_v53, %v4288_v42  ;;  %v11850_v35 = vpop.permute.xlu0 %6627 }
 0x351   : > { %7683 = vrot.lane.b32.xlu0 %v9025_v7, %s9783_s21  ;;  %v8962_v14 = vcombine.low %v6376_v15, %v6386_v0  ;;  %v9118_v37 = vpack.c.bf16 %v4360_v13, %v4360_v13  ;;  %v5351_v28 = vor.u32 %v5350_v36, %v5347_v52  ;;  %v11848_v11 = vrot.slane %v5354_v26, 5 }
 0x352   : > { %v9116_v34 = vpack.c.bf16 %v4358_v20, %v4358_v20  ;;  %v5358_v16 = vshrl.u32 %v5129_v63, 16  ;;  %v9119_v56 = vpack.c.bf16 %v4361_v33, %v4361_v33  ;;  %v4359_v45 = vmax.f32 %v4327_v32, 0.0  ;;  %v6165_v63 = vld [vmem:[#allocation4 + $0x54] sm:$0xf]  ;;  %v4921_v33 = vld [vmem:[#allocation4 + $0x8c] sm:$0x1] }
 0x353   : > { %6641 = vrot.lane.b32.xlu1 %v8962_v14, %s9777_s12  ;;  %v4710_v39 = vshrl.u32 %v9118_v37, 16  ;;  %v4713_v44 = vshll.u32 %v9118_v37, 16  ;;  %v5352_v9 = vrot.slane %v5351_v28, 4  ;;  %v5364_v31 = vshll.u32 %v5130_v60, 16  ;;  %v6166_v14 = vld [vmem:[#allocation4 + $0x58] sm:$0xf] }
 0x354   : > { %v4693_v48 = vshrl.u32 %v9116_v34, 16  ;;  %v4696_v50 = vshll.u32 %v9116_v34, 16  ;;  %v5360_v46 = vrot.slane %v5358_v16, 4  ;;  %v4718_v52 = vshrl.u32 %v9119_v56, 16  ;;  %v5587_v25 = vpop.permute.xlu1 %5586  ;;  %v11859_v1 = vpop.permute.xlu0 %7996 }
 0x355   : > { %v4712_v6 = vrot.slane %v4710_v39, 7  ;;  %v4721_v21 = vshll.u32 %v9119_v56, 16  ;;  %v9117_v59 = vpack.c.bf16 %v4359_v45, %v4359_v45  ;;  %6098 = vrot.lane.b32.xlu0 %v9444_v40, %s9775_s15  ;;  %v5357_v38 = vsel %vm10233_vm10, %v5352_v9, %v11848_v11  ;;  %5634 = vst.msk [vmem:[#allocation5 + $0x8] sm:$0xff] %vm5632_vm6, %v5587_v25  ;;  %v6167_v56 = vld [vmem:[#allocation4 + $0x5c] sm:$0x1] }
 0x356   : > { %v4695_v61 = vrot.slane %v4693_v48, 7  ;;  %v5361_v55 = vor.u32 %v5360_v46, %v11848_v11  ;;  %v4720_v3 = vrot.slane %v4718_v52, 7  ;;  %5955 = vst.msk [vmem:[#allocation5 + $0x8] sm:$0xff] %vm5953_vm3, %v11760_v8  ;;  %v5366_v32 = vrot.slane %v5364_v31, 5  ;;  %v7206_v45 = vld [vmem:[#allocation4 + $0x54] sm:$0xf] }
 0x357   : > { %v4715_v7 = vor.u32 %v4713_v44, %v4712_v6  ;;  %v4716_v2 = vrot.slane %v4712_v6, 4  ;;  %v4701_v4 = vshrl.u32 %v9117_v59, 16  ;;  %7140 = vrot.lane.b32.xlu1 %v9443_v43, %s9780_s14  ;;  %v4704_v42 = vshll.u32 %v9117_v59, 16  ;;  %6132 = vst.msk [vmem:[#allocation5 + $0x8] sm:$0xff] %vm6130_vm4, %v11728_v12  ;;  %v7208_v52 = vld [vmem:[#allocation4 + $0x5c] sm:$0x1] }
 0x358   : > { %v4698_v13 = vor.u32 %v4696_v50, %v4695_v61  ;;  %v4699_v10 = vrot.slane %v4695_v61, 4  ;;  %v5362_v36 = vrot.slane %v5361_v55, 4  ;;  %v4723_v0 = vor.u32 %v4721_v21, %v4720_v3  ;;  %v11868_v37 = vpop.permute.xlu1 %6954  ;;  %v11872_v11 = vpop.permute.xlu0 %5913  ;;  %v7207_v50 = vld [vmem:[#allocation4 + $0x58] sm:$0xf] }
 0x359   : > { %v4925_v15 = vsel %vm11412_vm11, %v4715_v7, %v4924_v58  ;;  %v4725_v20 = vrot.slane %v4720_v3, 4  ;;  %v4703_v26 = vrot.slane %v4701_v4, 7  ;;  %v6340_v34 = vshrl.u32 %v6165_v63, 16  ;;  %v7760_v61 = vld [vmem:[#allocation4 + $0x78] sm:$0xe] }
 0x35a   : > { %4926 = vst [vmem:[#allocation4 + $0x90] sm:$0xf] %v4925_v15  ;;  %v4918_v8 = vsel %vm11412_vm11, %v4698_v13, %v4917_v54  ;;  %v6343_v28 = vshll.u32 %v6165_v63, 16  ;;  %v4724_v12 = vsel %vm10249_vm12, %v4716_v2, %v4723_v0  ;;  %v5367_v40 = vsel %vm10233_vm10, %v5362_v36, %v5366_v32  ;;  %v7761_v2 = vld [vmem:[#allocation4 + $0x7c] sm:$0xf] }
 0x35b   : > { %4919 = vst [vmem:[#allocation4 + $0x84] sm:$0xf] %v4918_v8  ;;  %v4929_v16 = vsel %vm11421_vm0, %v4725_v20, %v4928_v5  ;;  %v4706_v39 = vor.u32 %v4704_v42, %v4703_v26  ;;  %v4708_v44 = vrot.slane %v4703_v26, 4  ;;  %4927 = vst.msk [vmem:[#allocation4 + $0x94] sm:$0xf] %vm4370_vm13, %v4724_v12  ;;  %v6342_v60 = vrot.slane %v6340_v34, 4 }
 0x35c   : > { %4930 = vst [vmem:[#allocation4 + $0x98] sm:$0x1] %v4929_v16  ;;  %v6345_v58 = vrot.slane %v6343_v28, 5  ;;  %v6349_v48 = vshll.u32 %v6166_v14, 16  ;;  %v8899_v6 = vcombine.low %v5357_v38, %v5367_v40  ;;  %v6353_v54 = vshrl.u32 %v6166_v14, 16  ;;  %v11886_v5 = vpop.permute.xlu0 %7994  ;;  %v11888_v55 = vpop.permute.xlu1 %5911 }
 0x35d   : > { %v4707_v9 = vsel %vm10249_vm12, %v4699_v10, %v4706_v39  ;;  %v4922_v46 = vsel %vm11421_vm0, %v4708_v44, %v4921_v33  ;;  %v6359_v43 = vshll.u32 %v6167_v56, 16  ;;  %v7360_v25 = vshrl.u32 %v7206_v45, 16  ;;  %v5125_v3 = vld [vmem:[#allocation4 + $0x54] sm:$0xf]  ;;  %v7762_v36 = vld [vmem:[#allocation4 + $0x80] sm:$0x1] }
 0x35e   : > { %4920 = vst.msk [vmem:[#allocation4 + $0x88] sm:$0xf] %vm4370_vm13, %v4707_v9  ;;  %4923 = vst [vmem:[#allocation4 + $0x8c] sm:$0x1] %v4922_v46  ;;  %v6346_v21 = vor.u32 %v6345_v58, %v6342_v60  ;;  %v6351_v59 = vrot.slane %v6349_v48, 5  ;;  %5600 = vrot.lane.b32.xlu1 %v8899_v6, %s9772_s8  ;;  %v6355_v31 = vrot.slane %v6353_v54, 4 }
 0x35f   : > { %v7363_v63 = vshll.u32 %v7206_v45, 16  ;;  %v7369_v7 = vshll.u32 %v7207_v50, 16  ;;  %v7373_v38 = vshrl.u32 %v7207_v50, 16  ;;  %v6361_v13 = vrot.slane %v6359_v43, 5  ;;  %v5126_v15 = vld [vmem:[#allocation4 + $0x58] sm:$0xf] }
 0x360   : > { %v6347_v4 = vrot.slane %v6346_v21, 4  ;;  %v7362_v10 = vrot.slane %v7360_v25, 4  ;;  %v7379_v42 = vshll.u32 %v7208_v52, 16  ;;  %v6356_v0 = vor.u32 %v6355_v31, %v6351_v59  ;;  %v11893_v28 = vpop.permute.xlu0 %6952  ;;  %v11895_v12 = vpop.permute.xlu1 %6092  ;;  %v5127_v45 = vld [vmem:[#allocation4 + $0x5c] sm:$0x1] }
 0x361   : > { %v7365_v20 = vrot.slane %v7363_v63, 5  ;;  %v7371_v26 = vrot.slane %v7369_v7, 5  ;;  %v7375_v14 = vrot.slane %v7373_v38, 4  ;;  %v9043_v32 = vrot.slane %v7760_v61, 9  ;;  %v5679_v50 = vld [vmem:[#allocation4 + $0x78] sm:$0xe] }
 0x362   : > { %v6352_v8 = vsel %vm10233_vm10, %v6347_v4, %v6351_v59  ;;  %v7381_v33 = vrot.slane %v7379_v42, 5  ;;  %v7890_v34 = vrot.slane %v7761_v2, 5  ;;  %v6357_v16 = vrot.slane %v6356_v0, 4  ;;  %v5680_v9 = vld [vmem:[#allocation4 + $0x7c] sm:$0xf]  ;;  %v9473_v54 = vld [vmem:[#allocation4 + $0x90] sm:$0xff]  }
 0x363   : > { %v7366_v39 = vor.u32 %v7365_v20, %v7362_v10  ;;  %v7376_v44 = vor.u32 %v7375_v14, %v7371_v26  ;;  %v7893_v56 = vrot.slane %v7762_v36, 5  ;;  %v5321_v58 = vshrl.u32 %v5125_v3, 16  ;;  %v5681_v46 = vld [vmem:[#allocation4 + $0x80] sm:$0x1]  ;;  %v6719_v6 = vld [vmem:[#allocation4 + $0x78] sm:$0xe] }
 0x364   : > { %v7891_v40 = vsel %vm10226_vm9, %v9043_v32, %v7890_v34  ;;  %v7892_v60 = vrot.slane %v7890_v34, 4  ;;  %v5324_v48 = vshll.u32 %v5125_v3, 16  ;;  %v6362_v52 = vsel %vm10233_vm10, %v6357_v16, %v6361_v13  ;;  %v6720_v25 = vld [vmem:[#allocation4 + $0x7c] sm:$0xf]  ;;  %v11903_v38 = vpop.permute.xlu0 %7134  ;;  %5100 = vst.msk [vmem:[#allocation5 + $0x60] sm:$0xff] %vm12687_vm15, %v9473_v54 }
 0x365   : > { %v7367_v21 = vrot.slane %v7366_v39, 4  ;;  %v7377_v59 = vrot.slane %v7376_v44, 4  ;;  %v5330_v43 = vshll.u32 %v5126_v15, 16  ;;  %v8961_v61 = vcombine.low %v6352_v8, %v6362_v52  ;;  %v6721_v10 = vld [vmem:[#allocation4 + $0x80] sm:$0x1] }
 0x366   : > { %v7894_v31 = vsel %vm10226_vm9, %v7892_v60, %v7893_v56  ;;  %v5323_v63 = vrot.slane %v5321_v58, 4  ;;  %v5326_v7 = vrot.slane %v5324_v48, 5  ;;  %v5334_v0 = vshrl.u32 %v5126_v15, 16  ;;  %v7757_v14 = vld [vmem:[#allocation4 + $0x6c] sm:$0xe]  ;;  %v11911_v32 = vpop.permute.xlu1 %6633 }
 0x367   : > { %v7372_v2 = vsel %vm10233_vm10, %v7367_v21, %v7371_v26  ;;  %v7382_v3 = vsel %vm10233_vm10, %v7377_v59, %v7381_v33  ;;  %v9059_v4 = vcombine.low %v7891_v40, %v7894_v31  ;;  %v5332_v13 = vrot.slane %v5330_v43, 5  ;;  %6639 = vrot.lane.b32.xlu0 %v8961_v61, %s9777_s12  ;;  %v7758_v8 = vld [vmem:[#allocation4 + $0x70] sm:$0xf]  ;;  %v7759_v44 = vld [vmem:[#allocation4 + $0x74] sm:$0x1] }
 0x368   : > { %v9024_v42 = vcombine.low %v7372_v2, %v7382_v3  ;;  %v5327_v36 = vor.u32 %v5326_v7, %v5323_v63  ;;  %v5340_v20 = vshll.u32 %v5127_v45, 16  ;;  %v8917_v34 = vrot.slane %v5679_v50, 9  ;;  %v6716_v58 = vld [vmem:[#allocation4 + $0x6c] sm:$0xe]  ;;  %v6717_v52 = vld [vmem:[#allocation4 + $0x70] sm:$0xf]  ;;  %v11916_v21 = vpop.permute.xlu0 %7675 }
 0x369   : > { %v5817_v16 = vrot.slane %v5680_v9, 5  ;;  %v5820_v39 = vrot.slane %v5681_v46, 5  ;;  %v8980_v26 = vrot.slane %v6719_v6, 9  ;;  %v5336_v56 = vrot.slane %v5334_v0, 4  ;;  %v9474_v50 = vld [vmem:[#allocation4 + $0x84] sm:$0xff]  }
 0x36a   : > { %7681 = vrot.lane.b32.xlu1 %v9024_v42, %s9783_s21  ;;  %v5328_v33 = vrot.slane %v5327_v36, 4  ;;  %v5342_v40 = vrot.slane %v5340_v20, 5  ;;  %v6853_v60 = vrot.slane %v6720_v25, 5  ;;  %v6856_v48 = vrot.slane %v6721_v10, 5  ;;  %v6718_v43 = vld [vmem:[#allocation4 + $0x74] sm:$0x1]  ;;  %v11925_v25 = vpop.permute.xlu1 %7132 }
 0x36b   : > { %v5818_v15 = vsel %vm10226_vm9, %v8917_v34, %v5817_v16  ;;  %v5819_v45 = vrot.slane %v5817_v16, 4  ;;  %v9042_v54 = vrot.slane %v7757_v14, 9  ;;  %8008 = vrot.lane.b32.xlu0 %v9059_v4, %s9782_s19  ;;  %v5337_v46 = vor.u32 %v5336_v56, %v5332_v13  ;;  %v5676_v2 = vld [vmem:[#allocation4 + $0x6c] sm:$0xe]  ;;  %5099 = vst.msk [vmem:[#allocation5 + $0x58] sm:$0xff] %vm12687_vm15, %v9474_v50 }
 0x36c   : > { %v5333_v9 = vsel %vm10233_vm10, %v5328_v33, %v5332_v13  ;;  %v11923_v6 = vsel %vm10226_vm9, %v8980_v26, %v6853_v60  ;;  %v6855_v59 = vrot.slane %v6853_v60, 4  ;;  %v7883_v31 = vrot.slane %v7758_v8, 5  ;;  %v5677_v42 = vld [vmem:[#allocation4 + $0x70] sm:$0xf]  ;;  %v5678_v36 = vld [vmem:[#allocation4 + $0x74] sm:$0x1] }
 0x36d   : > { %v5821_v61 = vsel %vm10226_vm9, %v5819_v45, %v5820_v39  ;;  %v7886_v63 = vrot.slane %v7759_v44, 5  ;;  %v8979_v7 = vrot.slane %v6716_v58, 9  ;;  %v5338_v3 = vrot.slane %v5337_v46, 4  ;;  %v6091_v45 = vpop.permute.xlu0 %6090 }
 0x36e   : > { %v8933_v4 = vcombine.low %v5818_v15, %v5821_v61  ;;  %v6857_v13 = vsel %vm10226_vm9, %v6855_v59, %v6856_v48  ;;  %v6846_v10 = vrot.slane %v6717_v52, 5  ;;  %v7884_v20 = vsel %vm10226_vm9, %v9042_v54, %v7883_v31  ;;  %v5593_v44 = vpop.permute.xlu1 %5592  ;;  %v7215_v15 = vld [vmem:[#allocation4 + $0x78] sm:$0xf]  ;;  %v7216_v54 = vld [vmem:[#allocation4 + $0x7c] sm:$0xf] }
 0x36f   : > { %v8996_v0 = vcombine.low %v11923_v6, %v6857_v13  ;;  %v7885_v14 = vrot.slane %v7883_v31, 4  ;;  %v6849_v8 = vrot.slane %v6718_v43, 5  ;;  %v5343_v34 = vsel %vm10233_vm10, %v5338_v3, %v5342_v40  ;;  %5637 = vst.msk [vmem:[#allocation5 + $0x20] sm:$0xff] %vm5632_vm6, %v5593_v44  ;;  %v7217_v52 = vld [vmem:[#allocation4 + $0x80] sm:$0x1] }
 0x370   : > { %5925 = vrot.lane.b32.xlu0 %v8933_v4, %s9778_s17  ;;  %v6847_v16 = vsel %vm10226_vm9, %v8979_v7, %v6846_v10  ;;  %v6848_v39 = vrot.slane %v6846_v10, 4  ;;  %v8916_v26 = vrot.slane %v5676_v2, 9  ;;  %v8898_v33 = vcombine.low %v5333_v9, %v5343_v34  ;;  %5958 = vst.msk [vmem:[#allocation5 + $0x20] sm:$0xff] %vm5953_vm3, %v11872_v11  ;;  %v6174_v6 = vld [vmem:[#allocation4 + $0x78] sm:$0xf] }
 0x371   : > { %v7887_v56 = vsel %vm10226_vm9, %v7885_v14, %v7886_v63  ;;  %v5810_v60 = vrot.slane %v5677_v42, 5  ;;  %v5813_v58 = vrot.slane %v5678_v36, 5  ;;  %vm6675_vm5 = vcmask 326912   ;;  %6135 = vst.msk [vmem:[#allocation5 + $0x20] sm:$0xff] %vm6130_vm4, %v6091_v45  ;;  %v6175_v31 = vld [vmem:[#allocation4 + $0x7c] sm:$0xf] }
 0x372   : > { %v9058_v48 = vcombine.low %v7884_v20, %v7887_v56  ;;  %v6850_v40 = vsel %vm10226_vm9, %v6848_v39, %v6849_v8  ;;  %vm6996_vm7 = vcmask 392512   ;;  %5598 = vrot.lane.b32.xlu1 %v8898_v33, %s9772_s8  ;;  %6676 = vst.msk [vmem:[#allocation5] sm:$0xff] %vm6675_vm5, %v11850_v35  ;;  %6677 = vst.msk [vmem:[#allocation5 + $0x8] sm:$0xff] %vm6675_vm5, %v11785_v18  ;;  %vm8040_vm1 = vcmask 589312   ;;  %v6176_v2 = vld [vmem:[#allocation4 + $0x80] sm:$0x1] }
 0x373   : > { %v8995_v50 = vcombine.low %v6847_v16, %v6850_v40  ;;  %v5811_v9 = vsel %vm10226_vm9, %v8916_v26, %v5810_v60  ;;  %v5812_v46 = vrot.slane %v5810_v60, 4  ;;  %6997 = vst.msk [vmem:[#allocation5] sm:$0xff] %vm6996_vm7, %v11769_v47  ;;  %6998 = vst.msk [vmem:[#allocation5 + $0x8] sm:$0xff] %vm6996_vm7, %v11738_v30  ;;  %v7432_v11 = vshrl.u32 %v7215_v15, 16  ;;  %v9201_v63 = vpop.f32.mrb[24].mxu0  ;;  %v9446_v20 = vld [vmem:[#allocation4 + $0x90] sm:$0xff]  }
 0x374   : > { %8006 = vrot.lane.b32.xlu0 %v9058_v48, %s9782_s19  ;;  %v7435_v59 = vshll.u32 %v7215_v15, 16  ;;  %7175 = vst.msk [vmem:[#allocation5] sm:$0xff] %vm7174_vm14, %v11712_v57  ;;  %v7441_v18 = vshll.u32 %v7216_v54, 16  ;;  %v7445_v43 = vshrl.u32 %v7216_v54, 16  ;;  %v7451_v61 = vshll.u32 %v7217_v52, 16  ;;  %7176 = vst.msk [vmem:[#allocation5 + $0x8] sm:$0xff] %vm7174_vm14, %v11804_v23 }
 0x375   : > { %v5814_v35 = vsel %vm10226_vm9, %v5812_v46, %v5813_v58  ;;  %7720 = vst.msk [vmem:[#allocation5] sm:$0xff] %vm7719_vm8, %v11802_v51  ;;  %v7434_v30 = vrot.slane %v7432_v11, 4  ;;  %v6412_v3 = vshrl.u32 %v6174_v6, 16  ;;  %v4229_v4 = vpop.f32.mrb[25].mxu0  ;;  %v6415_v23 = vshll.u32 %v6174_v6, 16  ;;  %v9447_v58 = vld [vmem:[#allocation4 + $0x90] sm:$0xff]  }
 0x376   : > { %v8932_v47 = vcombine.low %v5811_v9, %v5814_v35  ;;  %v7437_v7 = vrot.slane %v7435_v59, 5  ;;  %6966 = vrot.lane.b32.xlu1 %v8996_v0, %s9781_s13  ;;  %8041 = vst.msk [vmem:[#allocation5] sm:$0xff] %vm8040_vm1, %v11732_v24  ;;  %v7443_v57 = vrot.slane %v7441_v18, 5  ;;  %v7447_v13 = vrot.slane %v7445_v43, 4  ;;  %v9202_v42 = vpop.f32.mrb[26].mxu0  ;;  %v6632_v36 = vpop.permute.xlu0 %6631 }
 0x377   : > { %v7453_v10 = vrot.slane %v7451_v61, 5  ;;  %v6414_v14 = vrot.slane %v6412_v3, 4  ;;  %v6421_v8 = vshll.u32 %v6175_v31, 16  ;;  %v6425_v34 = vshrl.u32 %v6175_v31, 16  ;;  %v4232_v16 = vpop.f32.mrb[27].mxu0  ;;  %6678 = vst.msk [vmem:[#allocation5 + $0x10] sm:$0xff] %vm6675_vm5, %v6632_v36 }
 0x378   : > { %6964 = vrot.lane.b32.xlu0 %v8995_v50, %s9781_s13  ;;  %v7438_v51 = vor.u32 %v7437_v7, %v7434_v30  ;;  %v7448_v0 = vor.u32 %v7447_v13, %v7443_v57  ;;  %v6417_v39 = vrot.slane %v6415_v23, 5  ;;  %v6431_v26 = vshll.u32 %v6176_v2, 16  ;;  %6999 = vst.msk [vmem:[#allocation5 + $0x10] sm:$0xff] %vm6996_vm7, %v11893_v28  ;;  %v5134_v6 = vld [vmem:[#allocation4 + $0x78] sm:$0xf] }
 0x379   : > { %v4293_v24 = vmul.f32 %v11825_v27, %v9201_v63  ;;  %v6423_v33 = vrot.slane %v6421_v8, 5  ;;  %v6427_v56 = vrot.slane %v6425_v34, 4  ;;  %v4291_v60 = vmul.f32 %v11825_v27, %v4229_v4  ;;  %7177 = vst.msk [vmem:[#allocation5 + $0x10] sm:$0xff] %vm7174_vm14, %v11778_v62  ;;  %v5135_v61 = vld [vmem:[#allocation4 + $0x7c] sm:$0xf] }
 0x37a   : > { %v7439_v44 = vrot.slane %v7438_v51, 4  ;;  %5923 = vrot.lane.b32.xlu1 %v8932_v47, %s9778_s17  ;;  %v7449_v15 = vrot.slane %v7448_v0, 4  ;;  %v6418_v45 = vor.u32 %v6417_v39, %v6414_v14  ;;  %v6433_v48 = vrot.slane %v6431_v26, 5  ;;  %7722 = vst.msk [vmem:[#allocation5 + $0x10] sm:$0xff] %vm7719_vm8, %v11916_v21  ;;  %v4938_v14 = vld [vmem:[#allocation4 + $0xa8] sm:$0xf] }
 0x37b   : > { %v4332_v40 = vadd.f32 %v11834_v53, %v4293_v24  ;;  %v6428_v54 = vor.u32 %v6427_v56, %v6423_v33  ;;  %v4330_v52 = vadd.f32 %v11834_v53, %v4291_v60  ;;  %v4294_v62 = vmul.f32 %v11825_v27, %v9202_v42  ;;  %8043 = vst.msk [vmem:[#allocation5 + $0x10] sm:$0xff] %vm8040_vm1, %v11859_v1  ;;  %v4931_v39 = vld [vmem:[#allocation4 + $0x9c] sm:$0xf] }
 0x37c   : > { %7146 = vrot.lane.b32.xlu0 %v9446_v20, %s9780_s14  ;;  %v7444_v28 = vsel %vm10233_vm10, %v7439_v44, %v7443_v57  ;;  %v7454_v50 = vsel %vm10233_vm10, %v7449_v15, %v7453_v10  ;;  %v6419_v9 = vrot.slane %v6418_v45, 4  ;;  %v4292_v21 = vmul.f32 %v11825_v27, %v4232_v16 }
 0x37d   : > { %v4364_v46 = vmax.f32 %v4332_v40, 0.0  ;;  %v9027_v11 = vcombine.low %v7444_v28, %v7454_v50  ;;  %v6429_v59 = vrot.slane %v6428_v54, 4  ;;  %v4362_v35 = vmax.f32 %v4330_v52, 0.0  ;;  %v8057_v43 = vld [vmem:[#allocation5] sm:$0xff]  ;;  %v11994_v31 = vpop.permute.xlu0 %8000  ;;  %v5136_v52 = vld [vmem:[#allocation4 + $0x80] sm:$0x1] }
 0x37e   : > { %v4333_v18 = vadd.f32 %v11834_v53, %v4294_v62  ;;  %6104 = vrot.lane.b32.xlu1 %v9447_v58, %s9775_s15  ;;  %v6424_v1 = vsel %vm10233_vm10, %v6419_v9, %v6423_v33  ;;  %v4331_v47 = vadd.f32 %v11834_v53, %v4292_v21  ;;  %vm8109_vm2 = vcmask 588800   ;;  %v9450_v53 = vld [vmem:[#allocation4 + $0x84] sm:$0xff]   ;;  %v4942_v58 = vld [vmem:[#allocation4 + $0xb0] sm:$0x1] }
 0x37f   : > { %v9122_v63 = vpack.c.bf16 %v4364_v46, %v4364_v46  ;;  %v6434_v27 = vsel %vm10233_vm10, %v6429_v59, %v6433_v48  ;;  %v9120_v30 = vpack.c.bf16 %v4362_v35, %v4362_v35  ;;  %9217 = vmatprep.mubr.msk.bf16.mxu1 %vm8109_vm2, %v8057_v43  ;;  %v5393_v2 = vshrl.u32 %v5134_v6, 16  ;;  %v9449_v48 = vld [vmem:[#allocation4 + $0x84] sm:$0xff]  }
 0x380   : > { %7687 = vrot.lane.b32.xlu0 %v9027_v11, %s9783_s21  ;;  %v4365_v7 = vmax.f32 %v4333_v18, 0.0  ;;  %v8964_v3 = vcombine.low %v6424_v1, %v6434_v27  ;;  %v4363_v13 = vmax.f32 %v4331_v47, 0.0  ;;  %v7674_v10 = vpop.permute.xlu1 %7673  ;;  %v5396_v34 = vshll.u32 %v5134_v6, 16  ;;  %v6171_v6 = vld [vmem:[#allocation4 + $0x6c] sm:$0xf] }
 0x381   : > { %v4744_v4 = vshrl.u32 %v9122_v63, 16  ;;  %v4747_v57 = vshll.u32 %v9122_v63, 16  ;;  %v4727_v23 = vshrl.u32 %v9120_v30, 16  ;;  %v4730_v42 = vshll.u32 %v9120_v30, 16  ;;  %7721 = vst.msk [vmem:[#allocation5 + $0x8] sm:$0xff] %vm7719_vm8, %v7674_v10 }
 0x382   : > { %v9123_v36 = vpack.c.bf16 %v4365_v7, %v4365_v7  ;;  %v5395_v20 = vrot.slane %v5393_v2, 4  ;;  %6645 = vrot.lane.b32.xlu1 %v8964_v3, %s9777_s12  ;;  %v9121_v8 = vpack.c.bf16 %v4363_v13, %v4363_v13  ;;  %v5402_v16 = vshll.u32 %v5135_v61, 16  ;;  %8042 = vst.msk [vmem:[#allocation5 + $0x8] sm:$0xff] %vm8040_vm1, %v11886_v5  ;;  %v4935_v18 = vld [vmem:[#allocation4 + $0xa4] sm:$0x1] }
 0x383   : > { %v4746_v51 = vrot.slane %v4744_v4, 7  ;;  %v4729_v0 = vrot.slane %v4727_v23, 7  ;;  %v5406_v44 = vshrl.u32 %v5135_v61, 16  ;;  %v5398_v5 = vrot.slane %v5396_v34, 5  ;;  %v6172_v30 = vld [vmem:[#allocation4 + $0x70] sm:$0xf] }
 0x384   : > { %v4752_v26 = vshrl.u32 %v9123_v36, 16  ;;  %v4755_v24 = vshll.u32 %v9123_v36, 16  ;;  %6102 = vrot.lane.b32.xlu0 %v9450_v53, %s9775_s15  ;;  %v12009_v33 = vpop.permute.xlu0 %5917  ;;  %v4735_v15 = vshrl.u32 %v9121_v8, 16  ;;  %v4738_v45 = vshll.u32 %v9121_v8, 16  ;;  %v6173_v4 = vld [vmem:[#allocation4 + $0x74] sm:$0x1] }
 0x385   : > { %v4749_v56 = vor.u32 %v4747_v57, %v4746_v51  ;;  %v4750_v60 = vrot.slane %v4746_v51, 4  ;;  %v4732_v40 = vor.u32 %v4730_v42, %v4729_v0  ;;  %v4733_v28 = vrot.slane %v4729_v0, 4  ;;  %v5591_v62 = vpop.permute.xlu1 %5590  ;;  %v7212_v57 = vld [vmem:[#allocation4 + $0x6c] sm:$0xf]  ;;  %v7213_v36 = vld [vmem:[#allocation4 + $0x70] sm:$0xf] }
 0x386   : > { %v4754_v54 = vrot.slane %v4752_v26, 7  ;;  %v4737_v9 = vrot.slane %v4735_v15, 7  ;;  %7144 = vrot.lane.b32.xlu1 %v9449_v48, %s9780_s14  ;;  %v5404_v46 = vrot.slane %v5402_v16, 5  ;;  %v5408_v21 = vrot.slane %v5406_v44, 4  ;;  %5636 = vst.msk [vmem:[#allocation5 + $0x18] sm:$0xff] %vm5632_vm6, %v5591_v62 }
 0x387   : > { %v4939_v50 = vsel %vm11412_vm11, %v4749_v56, %v4938_v14  ;;  %v4932_v11 = vsel %vm11412_vm11, %v4732_v40, %v4931_v39  ;;  %v5399_v43 = vor.u32 %v5398_v5, %v5395_v20  ;;  %5957 = vst.msk [vmem:[#allocation5 + $0x18] sm:$0xff] %vm5953_vm3, %v11888_v55  ;;  %v5412_v27 = vshll.u32 %v5136_v52, 16  ;;  %v7214_v53 = vld [vmem:[#allocation4 + $0x74] sm:$0x1]  ;;  %v7766_v8 = vld [vmem:[#allocation4 + $0x90] sm:$0xe] }
 0x388   : > { %4940 = vst [vmem:[#allocation4 + $0xa8] sm:$0xf] %v4939_v50  ;;  %v4757_v59 = vor.u32 %v4755_v24, %v4754_v54  ;;  %v4759_v35 = vrot.slane %v4754_v54, 4  ;;  %v12019_v61 = vpop.permute.xlu0 %7998  ;;  %4933 = vst [vmem:[#allocation4 + $0x9c] sm:$0xf] %v4932_v11  ;;  %v4740_v1 = vor.u32 %v4738_v45, %v4737_v9  ;;  %v4742_v63 = vrot.slane %v4737_v9, 4 }
 0x389   : > { %v5409_v47 = vor.u32 %v5408_v21, %v5404_v46  ;;  %6134 = vst.msk [vmem:[#allocation5 + $0x18] sm:$0xff] %vm6130_vm4, %v11771_v49  ;;  %v5400_v3 = vrot.slane %v5399_v43, 4  ;;  %v6388_v55 = vshrl.u32 %v6171_v6, 16  ;;  %v12029_v13 = vpop.permute.xlu1 %6958  ;;  %v5414_v42 = vrot.slane %v5412_v27, 5  ;;  %v5132_v50 = vld [vmem:[#allocation4 + $0x70] sm:$0xf] }
 0x38a   : > { %v4758_v7 = vsel %vm10249_vm12, %v4750_v60, %v4757_v59  ;;  %v4943_v2 = vsel %vm11421_vm0, %v4759_v35, %v4942_v58  ;;  %6679 = vst.msk [vmem:[#allocation5 + $0x18] sm:$0xff] %vm6675_vm5, %v11911_v32  ;;  %v4741_v49 = vsel %vm10249_vm12, %v4733_v28, %v4740_v1  ;;  %v4936_v10 = vsel %vm11421_vm0, %v4742_v63, %v4935_v18  ;;  %v7768_v60 = vld [vmem:[#allocation4 + $0x98] sm:$0x1]  ;;  %v5131_v28 = vld [vmem:[#allocation4 + $0x6c] sm:$0xf] }
 0x38b   : > { %4941 = vst.msk [vmem:[#allocation4 + $0xac] sm:$0xf] %vm4370_vm13, %v4758_v7  ;;  %4944 = vst [vmem:[#allocation4 + $0xb0] sm:$0x1] %v4943_v2  ;;  %v5410_v23 = vrot.slane %v5409_v47, 4  ;;  %v5405_v32 = vsel %vm10233_vm10, %v5400_v3, %v5404_v46  ;;  %v6390_v20 = vrot.slane %v6388_v55, 4 }
 0x38c   : > { %7000 = vst.msk [vmem:[#allocation5 + $0x18] sm:$0xff] %vm6996_vm7, %v11868_v37  ;;  %4937 = vst [vmem:[#allocation4 + $0xa4] sm:$0x1] %v4936_v10  ;;  %v6391_v51 = vshll.u32 %v6171_v6, 16  ;;  %v6397_v14 = vshll.u32 %v6172_v30, 16  ;;  %v6401_v16 = vshrl.u32 %v6172_v30, 16  ;;  %v12045_v58 = vpop.permute.xlu0 %6956 }
 0x38d   : > { %4934 = vst.msk [vmem:[#allocation4 + $0xa0] sm:$0xf] %vm4370_vm13, %v4741_v49  ;;  %v5415_v34 = vsel %vm10233_vm10, %v5410_v23, %v5414_v42  ;;  %v6407_v0 = vshll.u32 %v6173_v4, 16  ;;  %v7408_v39 = vshrl.u32 %v7212_v57, 16  ;;  %v7767_v37 = vld [vmem:[#allocation4 + $0x94] sm:$0xf]  ;;  %v12047_v15 = vpop.permute.xlu1 %5915 }
 0x38e   : > { %7178 = vst.msk [vmem:[#allocation5 + $0x18] sm:$0xff] %vm7174_vm14, %v11925_v25  ;;  %v8901_v26 = vcombine.low %v5405_v32, %v5415_v34  ;;  %v6393_v24 = vrot.slane %v6391_v51, 5  ;;  %v6399_v44 = vrot.slane %v6397_v14, 5  ;;  %v7411_v56 = vshll.u32 %v7212_v57, 16  ;;  %v5133_v30 = vld [vmem:[#allocation4 + $0x74] sm:$0x1] }
 0x38f   : > { %v6403_v45 = vrot.slane %v6401_v16, 4  ;;  %v6409_v48 = vrot.slane %v6407_v0, 5  ;;  %v7410_v40 = vrot.slane %v7408_v39, 4  ;;  %v7417_v25 = vshll.u32 %v7213_v36, 16  ;;  %v5685_v7 = vld [vmem:[#allocation4 + $0x90] sm:$0xe] }
 0x390   : > { %5604 = vrot.lane.b32.xlu1 %v8901_v26, %s9772_s8  ;;  %v6394_v54 = vor.u32 %v6393_v24, %v6390_v20  ;;  %v7413_v52 = vrot.slane %v7411_v56, 5  ;;  %v7421_v5 = vshrl.u32 %v7213_v36, 16  ;;  %v7427_v62 = vshll.u32 %v7214_v53, 16  ;;  %v5686_v57 = vld [vmem:[#allocation4 + $0x94] sm:$0xf]  ;;  %v12056_v49 = vpop.permute.xlu0 %7138 }
 0x391   : > { %v6404_v9 = vor.u32 %v6403_v45, %v6399_v44  ;;  %v7419_v46 = vrot.slane %v7417_v25, 5  ;;  %v9045_v21 = vrot.slane %v7766_v8, 9  ;;  %v7904_v6 = vrot.slane %v7767_v37, 5  ;;  %v12050_v43 = vpop.permute.xlu1 %6096  ;;  %v5687_v53 = vld [vmem:[#allocation4 + $0x98] sm:$0x1] }
 0x392   : > { %v6395_v11 = vrot.slane %v6394_v54, 4  ;;  %v7414_v59 = vor.u32 %v7413_v52, %v7410_v40  ;;  %v7423_v35 = vrot.slane %v7421_v5, 4  ;;  %v7429_v18 = vrot.slane %v7427_v62, 5  ;;  %v6725_v32 = vld [vmem:[#allocation4 + $0x90] sm:$0xe] }
 0x393   : > { %v6405_v1 = vrot.slane %v6404_v9, 4  ;;  %v7905_v63 = vsel %vm10226_vm9, %v9045_v21, %v7904_v6  ;;  %v7906_v47 = vrot.slane %v7904_v6, 4  ;;  %v7907_v27 = vrot.slane %v7768_v60, 5  ;;  %v6726_v34 = vld [vmem:[#allocation4 + $0x94] sm:$0xf] }
 0x394   : > { %v6400_v2 = vsel %vm10233_vm10, %v6395_v11, %v6399_v44  ;;  %v7415_v3 = vrot.slane %v7414_v59, 4  ;;  %v7424_v4 = vor.u32 %v7423_v35, %v7419_v46  ;;  %v5369_v55 = vshrl.u32 %v5131_v28, 16  ;;  %v12064_v16 = vld [vmem:[#allocation4 + $0x98] sm:$0x1]  ;;  %v7763_v44 = vld [vmem:[#allocation4 + $0x84] sm:$0xe] }
 0x395   : > { %v6410_v10 = vsel %vm10233_vm10, %v6405_v1, %v6409_v48  ;;  %v7908_v23 = vsel %vm10226_vm9, %v7906_v47, %v7907_v27  ;;  %v5372_v42 = vshll.u32 %v5131_v28, 16  ;;  %v5378_v36 = vshll.u32 %v5132_v50, 16  ;;  %v7764_v40 = vld [vmem:[#allocation4 + $0x88] sm:$0xf]  ;;  %v9475_v25 = vld [vmem:[#allocation4 + $0x9c] sm:$0xff]  }
 0x396   : > { %v8963_v20 = vcombine.low %v6400_v2, %v6410_v10  ;;  %v7420_v51 = vsel %vm10233_vm10, %v7415_v3, %v7419_v46  ;;  %v7425_v14 = vrot.slane %v7424_v4, 4  ;;  %v9061_v8 = vcombine.low %v7905_v63, %v7908_v23  ;;  %v12066_v0 = vpop.permute.xlu1 %6637  ;;  %v7765_v62 = vld [vmem:[#allocation4 + $0x8c] sm:$0x1]  ;;  %v6722_v9 = vld [vmem:[#allocation4 + $0x84] sm:$0xe]  ;;  %5101 = vst.msk [vmem:[#allocation5 + $0x68] sm:$0xff] %vm12687_vm15, %v9475_v25 }
 0x397   : > { %v5371_v39 = vrot.slane %v5369_v55, 4  ;;  %v5374_v37 = vrot.slane %v5372_v42, 5  ;;  %v5380_v26 = vrot.slane %v5378_v36, 5  ;;  %v5382_v24 = vshrl.u32 %v5132_v50, 16  ;;  %v6723_v11 = vld [vmem:[#allocation4 + $0x88] sm:$0xf] }
 0x398   : > { %6643 = vrot.lane.b32.xlu0 %v8963_v20, %s9777_s12  ;;  %v7430_v56 = vsel %vm10233_vm10, %v7425_v14, %v7429_v18  ;;  %v5388_v60 = vshll.u32 %v5133_v30, 16  ;;  %v8919_v45 = vrot.slane %v5685_v7, 9  ;;  %v5831_v48 = vrot.slane %v5686_v57, 5  ;;  %v6724_v59 = vld [vmem:[#allocation4 + $0x8c] sm:$0x1]  ;;  %v12073_v18 = vpop.permute.xlu0 %7679 }
 0x399   : > { %v9026_v28 = vcombine.low %v7420_v51, %v7430_v56  ;;  %v5375_v54 = vor.u32 %v5374_v37, %v5371_v39  ;;  %v5384_v52 = vrot.slane %v5382_v24, 4  ;;  %v5834_v5 = vrot.slane %v5687_v53, 5  ;;  %v5682_v35 = vld [vmem:[#allocation4 + $0x84] sm:$0xe]  ;;  %v9476_v63 = vld [vmem:[#allocation4 + $0xa8] sm:$0xff]  }
 0x39a   : > { %v5390_v46 = vrot.slane %v5388_v60, 5  ;;  %v5832_v50 = vsel %vm10226_vm9, %v8919_v45, %v5831_v48  ;;  %v5833_v21 = vrot.slane %v5831_v48, 4  ;;  %v8982_v6 = vrot.slane %v6725_v32, 9  ;;  %v12075_v1 = vpop.permute.xlu1 %7136  ;;  %5102 = vst.msk [vmem:[#allocation5 + $0x70] sm:$0xff] %vm12687_vm15, %v9476_v63  ;;  %v5683_v36 = vld [vmem:[#allocation4 + $0x88] sm:$0xf] }
 0x39b   : > { %7685 = vrot.lane.b32.xlu1 %v9026_v28, %s9783_s21  ;;  %v5376_v47 = vrot.slane %v5375_v54, 4  ;;  %v5385_v27 = vor.u32 %v5384_v52, %v5380_v26  ;;  %v6867_v30 = vrot.slane %v6726_v34, 5  ;;  %v6870_v7 = vrot.slane %v12064_v16, 5  ;;  %v5684_v14 = vld [vmem:[#allocation4 + $0x8c] sm:$0x1] }
 0x39c   : > { %8012 = vrot.lane.b32.xlu0 %v9061_v8, %s9782_s19  ;;  %v5835_v2 = vsel %vm10226_vm9, %v5833_v21, %v5834_v5  ;;  %v9044_v3 = vrot.slane %v7763_v44, 9  ;;  %v7897_v4 = vrot.slane %v7764_v40, 5  ;;  %v7900_v55 = vrot.slane %v7765_v62, 5  ;;  %v7222_v45 = vld [vmem:[#allocation4 + $0x94] sm:$0xf]  ;;  %v6095_v48 = vpop.permute.xlu0 %6094 }
 0x39d   : > { %v5381_v57 = vsel %vm10233_vm10, %v5376_v47, %v5380_v26  ;;  %v5386_v10 = vrot.slane %v5385_v27, 4  ;;  %v8935_v23 = vcombine.low %v5832_v50, %v5835_v2  ;;  %v6868_v42 = vsel %vm10226_vm9, %v8982_v6, %v6867_v30  ;;  %v7221_v26 = vld [vmem:[#allocation4 + $0x90] sm:$0xf]  ;;  %v7223_v52 = vld [vmem:[#allocation4 + $0x98] sm:$0x1] }
 0x39e   : > { %v6869_v53 = vrot.slane %v6867_v30, 4  ;;  %v7898_v32 = vsel %vm10226_vm9, %v9044_v3, %v7897_v4  ;;  %v7899_v20 = vrot.slane %v7897_v4, 4  ;;  %v8981_v51 = vrot.slane %v6722_v9, 9  ;;  %v5597_v8 = vpop.permute.xlu1 %5596  ;;  %v6180_v30 = vld [vmem:[#allocation4 + $0x90] sm:$0xf] }
 0x39f   : > { %v5391_v34 = vsel %vm10233_vm10, %v5386_v10, %v5390_v46  ;;  %v6860_v16 = vrot.slane %v6723_v11, 5  ;;  %v6863_v39 = vrot.slane %v6724_v59, 5  ;;  %v8918_v37 = vrot.slane %v5682_v35, 9  ;;  %5639 = vst.msk [vmem:[#allocation5 + $0x30] sm:$0xff] %vm5632_vm6, %v5597_v8 }
 0x3a0   : > { %v8900_v24 = vcombine.low %v5381_v57, %v5391_v34  ;;  %5929 = vrot.lane.b32.xlu0 %v8935_v23, %s9778_s17  ;;  %v6871_v44 = vsel %vm10226_vm9, %v6869_v53, %v6870_v7  ;;  %v7901_v56 = vsel %vm10226_vm9, %v7899_v20, %v7900_v55  ;;  %v5824_v60 = vrot.slane %v5683_v36, 5  ;;  %5960 = vst.msk [vmem:[#allocation5 + $0x30] sm:$0xff] %vm5953_vm3, %v12009_v33  ;;  %v6181_v57 = vld [vmem:[#allocation4 + $0x94] sm:$0xf]  ;;  %v9482_v23 = vld [vmem:[#allocation11] ss:$0 sm:$0xff] }
 0x3a1   : > { %v8998_v40 = vcombine.low %v6868_v42, %v6871_v44  ;;  %v9060_v25 = vcombine.low %v7898_v32, %v7901_v56  ;;  %v6861_v28 = vsel %vm10226_vm9, %v8981_v51, %v6860_v16  ;;  %v6862_v54 = vrot.slane %v6860_v16, 4  ;;  %6137 = vst.msk [vmem:[#allocation5 + $0x30] sm:$0xff] %vm6130_vm4, %v6095_v48  ;;  %v9483_v34 = vld [vmem:[#allocation12] ss:$0 sm:$0xff]  ;;  %v6182_v56 = vld [vmem:[#allocation4 + $0x98] sm:$0x1] }
 0x3a2   : > { %5602 = vrot.lane.b32.xlu1 %v8900_v24, %s9772_s8  ;;  %v5825_v5 = vsel %vm10226_vm9, %v8918_v37, %v5824_v60  ;;  %v5826_v62 = vrot.slane %v5824_v60, 4  ;;  %v5827_v9 = vrot.slane %v5684_v14, 5  ;;  %v7480_v46 = vshrl.u32 %v7221_v26, 16 }
 0x3a3   : > { %v6864_v33 = vsel %vm10226_vm9, %v6862_v54, %v6863_v39  ;;  %v7483_v50 = vshll.u32 %v7221_v26, 16  ;;  %v7489_v21 = vshll.u32 %v7222_v45, 16  ;;  %v7493_v6 = vshrl.u32 %v7222_v45, 16 }
 0x3a4   : > { %8010 = vrot.lane.b32.xlu0 %v9060_v25, %s9782_s19  ;;  %v8997_v59 = vcombine.low %v6861_v28, %v6864_v33  ;;  %v5828_v35 = vsel %vm10226_vm9, %v5826_v62, %v5827_v9  ;;  %v7482_v63 = vrot.slane %v7480_v46, 4  ;;  %v7499_v47 = vshll.u32 %v7223_v52, 16 }
 0x3a5   : > { %v8934_v7 = vcombine.low %v5825_v5, %v5828_v35  ;;  %v7485_v2 = vrot.slane %v7483_v50, 5  ;;  %v7491_v3 = vrot.slane %v7489_v21, 5  ;;  %v7495_v4 = vrot.slane %v7493_v6, 4 }
 0x3a6   : > { %6970 = vrot.lane.b32.xlu1 %v8998_v40, %s9781_s13  ;;  %v7501_v10 = vrot.slane %v7499_v47, 5  ;;  %v6460_v14 = vshrl.u32 %v6180_v30, 16  ;;  %v6463_v8 = vshll.u32 %v6180_v30, 16  ;;  %v6469_v26 = vshll.u32 %v6181_v57, 16  ;;  %v9455_v40 = vld [vmem:[#allocation4 + $0xa8] sm:$0xff]  }
 0x3a7   : > { %v7486_v20 = vor.u32 %v7485_v2, %v7482_v63  ;;  %v7496_v51 = vor.u32 %v7495_v4, %v7491_v3  ;;  %v6473_v46 = vshrl.u32 %v6181_v57, 16  ;;  %v6479_v35 = vshll.u32 %v6182_v56, 16  ;;  %v12123_v47 = vld [vmem:[#allocation14 + $0x20] ss:$0 sps:$4 sm:$0xff]   ;;  %v6177_v2 = vld [vmem:[#allocation4 + $0x84] sm:$0xf] }
 0x3a8   : > { %6968 = vrot.lane.b32.xlu0 %v8997_v59, %s9781_s13  ;;  %v6462_v60 = vrot.slane %v6460_v14, 4  ;;  %v6465_v45 = vrot.slane %v6463_v8, 5  ;;  %v6471_v52 = vrot.slane %v6469_v26, 5  ;;  %vm8158_vm15 = vcmask 1043456   ;;  %v6178_v8 = vld [vmem:[#allocation4 + $0x88] sm:$0xf] }
 0x3a9   : > { %v7487_v24 = vrot.slane %v7486_v20, 4  ;;  %v7497_v44 = vrot.slane %v7496_v51, 4  ;;  %v6636_v48 = vpop.permute.xlu0 %6635  ;;  %v6475_v59 = vrot.slane %v6473_v46, 4  ;;  %v9457_v20 = vld [vmem:[#allocation4 + $0x9c] sm:$0xff]   ;;  %9250 = vmatprep.subr.msk.bf16.mxu1 %vm8158_vm15, %v12123_v47  ;;  %v5141_v46 = vld [vmem:[#allocation4 + $0x94] sm:$0xf] }
 0x3aa   : > { %5927 = vrot.lane.b32.xlu1 %v8934_v7, %s9778_s17  ;;  %6680 = vst.msk [vmem:[#allocation5 + $0x20] sm:$0xff] %vm6675_vm5, %v6636_v48  ;;  %v6466_v9 = vor.u32 %v6465_v45, %v6462_v60  ;;  %v6445_v17 = vshll.u32 %v6178_v8, 16 }
 0x3ab   : > { %v7492_v5 = vsel %vm10233_vm10, %v7487_v24, %v7491_v3  ;;  %v7502_v62 = vsel %vm10233_vm10, %v7497_v44, %v7501_v10  ;;  %7001 = vst.msk [vmem:[#allocation5 + $0x20] sm:$0xff] %vm6996_vm7, %v12045_v58  ;;  %v4945_v3 = vld [vmem:[#allocation4 + $0xb4] sm:$0xf]  ;;  %v5140_v44 = vld [vmem:[#allocation4 + $0x90] sm:$0xf] }
 0x3ac   : > { %v9029_v33 = vcombine.low %v7492_v5, %v7502_v62  ;;  %7179 = vst.msk [vmem:[#allocation5 + $0x20] sm:$0xff] %vm7174_vm14, %v11903_v38  ;;  %v4952_v38 = vld [vmem:[#allocation4 + $0xc0] sm:$0xf] }
 0x3ad   : > { %7724 = vst.msk [vmem:[#allocation5 + $0x20] sm:$0xff] %vm7719_vm8, %v12073_v18  ;;  %v6476_v18 = vor.u32 %v6475_v59, %v6471_v52 }
 0x3ae   : > { %7691 = vrot.lane.b32.xlu0 %v9029_v33, %s9783_s21  ;;  %6108 = vrot.lane.b32.xlu1 %v9455_v40, %s9775_s15  ;;  %8045 = vst.msk [vmem:[#allocation5 + $0x20] sm:$0xff] %vm8040_vm1, %v11994_v31  ;;  %v7678_v10 = vpop.permute.xlu1 %7677 }
 0x3af   : > { %v9205_v11 = vpop.f32.mrb[28].mxu0  ;;  %7723 = vst.msk [vmem:[#allocation5 + $0x18] sm:$0xff] %vm7719_vm8, %v7678_v10  ;;  %v6477_v14 = vrot.slane %v6476_v18, 4  ;;  %v5450_v18 = vshll.u32 %v5141_v46, 16 }
 0x3b0   : > { %v4245_v27 = vpop.f32.mrb[29].mxu0  ;;  %v4297_v42 = vmul.f32 %v9482_v23, %v9205_v11  ;;  %v6467_v11 = vrot.slane %v6466_v9, 4  ;;  %8044 = vst.msk [vmem:[#allocation5 + $0x18] sm:$0xff] %vm8040_vm1, %v12019_v61  ;;  %v6439_v9 = vshll.u32 %v6177_v2, 16 }
 0x3b1   : > { %v9206_v55 = vpop.f32.mrb[30].mxu0  ;;  %v4295_v36 = vmul.f32 %v9482_v23, %v4245_v27 }
 0x3b2   : > { %v4298_v53 = vmul.f32 %v9482_v23, %v9206_v55  ;;  %v4248_v32 = vpop.f32.mrb[31].mxu0  ;;  %v4336_v16 = vadd.f32 %v9483_v34, %v4297_v42  ;;  %v6472_v57 = vsel %vm10233_vm10, %v6467_v11, %v6471_v52  ;;  %6106 = vrot.lane.b32.xlu0 %v9457_v20, %s9775_s15  ;;  %v5142_v11 = vld [vmem:[#allocation4 + $0x98] sm:$0x1]  ;;  %v7218_v20 = vld [vmem:[#allocation4 + $0x84] sm:$0xf] }
 0x3b3   : > { %v4334_v39 = vadd.f32 %v9483_v34, %v4295_v36  ;;  %v4296_v63 = vmul.f32 %v9482_v23, %v4248_v32  ;;  %v12133_v23 = vpop.permute.xlu0 %8004  ;;  %v6481_v32 = vrot.slane %v6479_v35, 5  ;;  %v7459_v22 = vshll.u32 %v7218_v20, 16 }
 0x3b4   : > { %v4337_v37 = vadd.f32 %v9483_v34, %v4298_v53  ;;  %v4368_v25 = vmax.f32 %v4336_v16, 0.0  ;;  %v4956_v53 = vld [vmem:[#allocation4 + $0xc8] sm:$0x1]  ;;  %v6436_v16 = vshrl.u32 %v6177_v2, 16 }
 0x3b5   : > { %v4366_v28 = vmax.f32 %v4334_v39, 0.0  ;;  %v4335_v51 = vadd.f32 %v9483_v34, %v4296_v63  ;;  %v6179_v34 = vld [vmem:[#allocation4 + $0x8c] sm:$0x1]  ;;  %v6482_v45 = vsel %vm10233_vm10, %v6477_v14, %v6481_v32  ;;  %v6441_v63 = vrot.slane %v6439_v9, 5  ;;  %v7769_v32 = vld [vmem:[#allocation4 + $0x9c] sm:$0xe] }
 0x3b6   : > { %v4369_v54 = vmax.f32 %v4337_v37, 0.0  ;;  %v9126_v50 = vpack.c.bf16 %v4368_v25, %v4368_v25  ;;  %v8966_v25 = vcombine.low %v6472_v57, %v6482_v45 }
 0x3b7   : > { %v9124_v21 = vpack.c.bf16 %v4366_v28, %v4366_v28  ;;  %v4367_v48 = vmax.f32 %v4335_v51, 0.0  ;;  %v6438_v28 = vrot.slane %v6436_v16, 4  ;;  %v12156_v33 = vpop.permute.xlu0 %5921  ;;  %v7770_v16 = vld [vmem:[#allocation4 + $0xa0] sm:$0xf] }
 0x3b8   : > { %v9127_v6 = vpack.c.bf16 %v4369_v54, %v4369_v54  ;;  %v4778_v58 = vshrl.u32 %v9126_v50, 16  ;;  %v4781_v27 = vshll.u32 %v9126_v50, 16  ;;  %v5595_v54 = vpop.permute.xlu1 %5594  ;;  %6649 = vrot.lane.b32.xlu1 %v8966_v25, %s9777_s12  ;;  %v6449_v50 = vshrl.u32 %v6178_v8, 16 }
 0x3b9   : > { %v4761_v30 = vshrl.u32 %v9124_v21, 16  ;;  %v4764_v7 = vshll.u32 %v9124_v21, 16  ;;  %v9125_v62 = vpack.c.bf16 %v4367_v48, %v4367_v48  ;;  %5638 = vst.msk [vmem:[#allocation5 + $0x28] sm:$0xff] %vm5632_vm6, %v5595_v54  ;;  %v6455_v21 = vshll.u32 %v6179_v34, 16  ;;  %v7220_v54 = vld [vmem:[#allocation4 + $0x8c] sm:$0x1] }
 0x3ba   : > { %v4786_v4 = vshrl.u32 %v9127_v6, 16  ;;  %v4789_v55 = vshll.u32 %v9127_v6, 16  ;;  %v4780_v42 = vrot.slane %v4778_v58, 7  ;;  %v8160_v6 = vsel %vm8158_vm15, %v12123_v47, 0  ;;  %5959 = vst.msk [vmem:[#allocation5 + $0x28] sm:$0xff] %vm5953_vm3, %v12047_v15  ;;  %v8058_v58 = vld [vmem:[#allocation5 + $0x8] sm:$0xff] }
 0x3bb   : > { %v12135_v36 = vrot.slane %v4761_v30, 7  ;;  %v4769_v59 = vshrl.u32 %v9125_v62, 16  ;;  %v4772_v35 = vshll.u32 %v9125_v62, 16  ;;  %9216 = vmatpush3.bf16.msra.mxu1 %v8160_v6  ;;  %6136 = vst.msk [vmem:[#allocation5 + $0x28] sm:$0xff] %vm6130_vm4, %v11895_v12  ;;  %v9460_v30 = vld [vmem:[#allocation4 + $0x9c] sm:$0xff]   ;;  %v6451_v2 = vrot.slane %v6449_v50, 4 }
 0x3bc   : > { %v4788_v31 = vrot.slane %v4786_v4, 7  ;;  %v4783_v39 = vor.u32 %v4781_v27, %v4780_v42  ;;  %v4784_v37 = vrot.slane %v4780_v42, 4  ;;  %v5441_v27 = vshrl.u32 %v5140_v44, 16  ;;  %6681 = vst.msk [vmem:[#allocation5 + $0x28] sm:$0xff] %vm6675_vm5, %v12066_v0  ;;  %v12168_v47 = vpop.permute.xlu1 %6962  ;;  %v4949_v4 = vld [vmem:[#allocation4 + $0xbc] sm:$0x1]  ;;  %7148 = vrot.lane.b32.xlu1 %v9460_v30, %s9780_s14 }
 0x3bd   : > { %v4766_v26 = vor.u32 %v4764_v7, %v12135_v36  ;;  %v4767_v24 = vrot.slane %v12135_v36, 4  ;;  %v6447_v7 = vrot.slane %v6445_v17, 5  ;;  %v4771_v15 = vrot.slane %v4769_v59, 7  ;;  %7002 = vst.msk [vmem:[#allocation5 + $0x28] sm:$0xff] %vm6996_vm7, %v12029_v13  ;;  %v8059_v0 = vld [vmem:[#allocation5 + $0x10] sm:$0xff]  ;;  %v12177_v13 = vpop.permute.xlu0 %8002  ;;  %v8060_v62 = vld [vmem:[#allocation5 + $0x18] sm:$0xff] }
 0x3be   : > { %v4791_v56 = vor.u32 %v4789_v55, %v4788_v31  ;;  %v4793_v60 = vrot.slane %v4788_v31, 4  ;;  %v4953_v61 = vsel %vm11412_vm11, %v4783_v39, %v4952_v38  ;;  %v6457_v38 = vrot.slane %v6455_v21, 5  ;;  %9218 = vmatmul.mubr.msk.bf16.vlgmr.msra.gmra.mrb[0].mxu1 %vm8109_vm2, %v8058_v58  ;;  %7180 = vst.msk [vmem:[#allocation5 + $0x28] sm:$0xff] %vm7174_vm14, %v12075_v1  ;;  %v7219_v36 = vld [vmem:[#allocation4 + $0x88] sm:$0xf] }
 0x3bf   : > { %v4946_v40 = vsel %vm11412_vm11, %v4766_v26, %v4945_v3  ;;  %4954 = vst [vmem:[#allocation4 + $0xc0] sm:$0xf] %v4953_v61  ;;  %v5444_v3 = vshll.u32 %v5140_v44, 16  ;;  %v6442_v55 = vor.u32 %v6441_v63, %v6438_v28  ;;  %v5443_v57 = vrot.slane %v5441_v27, 4  ;;  %9221 = vmatprep.mubr.msk.bf16.mxu1 %vm8109_vm2, %v8059_v0  ;;  %v7771_v44 = vld [vmem:[#allocation4 + $0xa4] sm:$0x1] }
 0x3c0   : > { %4947 = vst [vmem:[#allocation4 + $0xb4] sm:$0xf] %v4946_v40  ;;  %v4792_v52 = vsel %vm10249_vm12, %v4784_v37, %v4791_v56  ;;  %v4957_v5 = vsel %vm11421_vm0, %v4793_v60, %v4956_v53  ;;  %v6452_v12 = vor.u32 %v6451_v2, %v6447_v7  ;;  %v5454_v42 = vshrl.u32 %v5141_v46, 16  ;;  %v12179_v56 = vpop.permute.xlu1 %5919  ;;  %v6184_v63 = vld [vmem:[#allocation4 + $0xa0] sm:$0xf] }
 0x3c1   : > { %4955 = vst.msk [vmem:[#allocation4 + $0xc4] sm:$0xf] %vm4370_vm13, %v4792_v52  ;;  %4958 = vst [vmem:[#allocation4 + $0xc8] sm:$0x1] %v4957_v5  ;;  %v5446_v10 = vrot.slane %v5444_v3, 5  ;;  %v5460_v53 = vshll.u32 %v5142_v11, 16  ;;  %v4774_v51 = vor.u32 %v4772_v35, %v4771_v15  ;;  %v12199_v58 = vpop.permute.xlu0 %6960 }
 0x3c2   : > { %v4776_v31 = vrot.slane %v4771_v15, 4  ;;  %v6443_v14 = vrot.slane %v6442_v55, 4  ;;  %v5452_v8 = vrot.slane %v5450_v18, 5  ;;  %v6453_v39 = vrot.slane %v6452_v12, 4  ;;  %v6183_v5 = vld [vmem:[#allocation4 + $0x9c] sm:$0xf] }
 0x3c3   : > { %v5447_v37 = vor.u32 %v5446_v10, %v5443_v57  ;;  %v5456_v26 = vrot.slane %v5454_v42, 4  ;;  %v5462_v34 = vrot.slane %v5460_v53, 5  ;;  %v4775_v1 = vsel %vm10249_vm12, %v4767_v24, %v4774_v51  ;;  %v6185_v2 = vld [vmem:[#allocation4 + $0xa4] sm:$0x1]  ;;  %v8061_v3 = vld [vmem:[#allocation5 + $0x20] sm:$0xff] }
 0x3c4   : > { %v4950_v60 = vsel %vm11421_vm0, %v4776_v31, %v4949_v4  ;;  %v6448_v45 = vsel %vm10233_vm10, %v6443_v14, %v6447_v7  ;;  %v9046_v48 = vrot.slane %v7769_v32, 9  ;;  %4948 = vst.msk [vmem:[#allocation4 + $0xb8] sm:$0xf] %vm4370_vm13, %v4775_v1  ;;  %v6458_v61 = vsel %vm10233_vm10, %v6453_v39, %v6457_v38  ;;  %v12196_v21 = vpop.permute.xlu1 %6100  ;;  %v5137_v18 = vld [vmem:[#allocation4 + $0x84] sm:$0xf] }
 0x3c5   : > { %4951 = vst [vmem:[#allocation4 + $0xbc] sm:$0x1] %v4950_v60  ;;  %v5448_v40 = vrot.slane %v5447_v37, 4  ;;  %v5457_v25 = vor.u32 %v5456_v26, %v5452_v8  ;;  %v7911_v28 = vrot.slane %v7770_v16, 5  ;;  %v8965_v41 = vcombine.low %v6448_v45, %v6458_v61  ;;  %v5138_v32 = vld [vmem:[#allocation4 + $0x88] sm:$0xf]  ;;  %v12213_v61 = vpop.permute.xlu0 %7142 }
 0x3c6   : > { %v7914_v24 = vrot.slane %v7771_v44, 5  ;;  %v7456_v52 = vshrl.u32 %v7218_v20, 16  ;;  %v7461_v11 = vrot.slane %v7459_v22, 5  ;;  %v7465_v59 = vshll.u32 %v7219_v36, 16  ;;  %9222 = vmatmul.mubr.msk.bf16.gmra.mrb[4].mxu1 %vm8109_vm2, %v8060_v62  ;;  %v5139_v14 = vld [vmem:[#allocation4 + $0x8c] sm:$0x1] }
 0x3c7   : > { %v5453_v9 = vsel %vm10233_vm10, %v5448_v40, %v5452_v8  ;;  %v5458_v46 = vrot.slane %v5457_v25, 4  ;;  %v7912_v17 = vsel %vm10226_vm9, %v9046_v48, %v7911_v28  ;;  %v7913_v50 = vrot.slane %v7911_v28, 4  ;;  %6647 = vrot.lane.b32.xlu0 %v8965_v41, %s9777_s12  ;;  %9225 = vmatprep.mubr.msk.bf16.mxu1 %vm8109_vm2, %v8061_v3  ;;  %v6729_v48 = vld [vmem:[#allocation4 + $0xa0] sm:$0xf] }
 0x3c8   : > { %v7458_v6 = vrot.slane %v7456_v52, 4  ;;  %v7469_v35 = vshrl.u32 %v7219_v36, 16  ;;  %v7475_v7 = vshll.u32 %v7220_v54, 16  ;;  %v6484_v38 = vshrl.u32 %v6183_v5, 16  ;;  %v12209_v8 = vpop.permute.xlu1 %6641 }
 0x3c9   : > { %v5463_v27 = vsel %vm10233_vm10, %v5458_v46, %v5462_v34  ;;  %v7915_v30 = vsel %vm10226_vm9, %v7913_v50, %v7914_v24  ;;  %v7467_v57 = vrot.slane %v7465_v59, 5  ;;  %v6487_v53 = vshll.u32 %v6183_v5, 16  ;;  %v6728_v34 = vld [vmem:[#allocation4 + $0x9c] sm:$0xe]  ;;  %v6730_v5 = vld [vmem:[#allocation4 + $0xa4] sm:$0x1] }
 0x3ca   : > { %v8903_v15 = vcombine.low %v5453_v9, %v5463_v27  ;;  %v9062_v4 = vcombine.low %v7912_v17, %v7915_v30  ;;  %v7462_v55 = vor.u32 %v7461_v11, %v7458_v6  ;;  %v7471_v12 = vrot.slane %v7469_v35, 4  ;;  %v5688_v50 = vld [vmem:[#allocation4 + $0x9c] sm:$0xe]  ;;  %v5689_v6 = vld [vmem:[#allocation4 + $0xa0] sm:$0xf] }
 0x3cb   : > { %v7477_v10 = vrot.slane %v7475_v7, 5  ;;  %v6486_v42 = vrot.slane %v6484_v38, 4  ;;  %v6493_v20 = vshll.u32 %v6184_v63, 16  ;;  %v6497_v51 = vshrl.u32 %v6184_v63, 16  ;;  %v9477_v54 = vld [vmem:[#allocation4 + $0xb4] sm:$0xff]  }
 0x3cc   : > { %5608 = vrot.lane.b32.xlu1 %v8903_v15, %s9772_s8  ;;  %8014 = vrot.lane.b32.xlu0 %v9062_v4, %s9782_s19  ;;  %v7463_v0 = vrot.slane %v7462_v55, 4  ;;  %v6503_v31 = vshll.u32 %v6185_v2, 16  ;;  %v7472_v16 = vor.u32 %v7471_v12, %v7467_v57  ;;  %v6489_v39 = vrot.slane %v6487_v53, 5  ;;  %v5690_v27 = vld [vmem:[#allocation4 + $0xa4] sm:$0x1]  ;;  %v12218_v30 = vpop.permute.xlu1 %7140 }
 0x3cd   : > { %v5417_v37 = vshrl.u32 %v5137_v18, 16  ;;  %v5420_v26 = vshll.u32 %v5137_v18, 16  ;;  %v6495_v1 = vrot.slane %v6493_v20, 5  ;;  %v6499_v60 = vrot.slane %v6497_v51, 4  ;;  %v7227_v15 = vld [vmem:[#allocation4 + $0xa8] sm:$0xf] }
 0x3ce   : > { %v7468_v44 = vsel %vm10233_vm10, %v7463_v0, %v7467_v57  ;;  %v6505_v45 = vrot.slane %v6503_v31, 5  ;;  %v7473_v40 = vrot.slane %v7472_v16, 4  ;;  %v6490_v25 = vor.u32 %v6489_v39, %v6486_v42  ;;  %v7228_v12 = vld [vmem:[#allocation4 + $0xac] sm:$0xf] }
 0x3cf   : > { %v5419_v28 = vrot.slane %v5417_v37, 4  ;;  %v5422_v36 = vrot.slane %v5420_v26, 5  ;;  %v6500_v41 = vor.u32 %v6499_v60, %v6495_v1  ;;  %v5426_v24 = vshll.u32 %v5138_v32, 16 }
 0x3d0   : > { %v5430_v52 = vshrl.u32 %v5138_v32, 16  ;;  %v5436_v22 = vshll.u32 %v5139_v14, 16  ;;  %v7478_v62 = vsel %vm10233_vm10, %v7473_v40, %v7477_v10  ;;  %v6491_v9 = vrot.slane %v6490_v25, 4  ;;  %v12225_v10 = vpop.permute.xlu0 %7683  ;;  %v7229_v14 = vld [vmem:[#allocation4 + $0xb0] sm:$0x1]  ;;  %v5601_v25 = vpop.permute.xlu1 %5600 }
 0x3d1   : > { %v5423_v46 = vor.u32 %v5422_v36, %v5419_v28  ;;  %v8983_v17 = vrot.slane %v6728_v34, 9  ;;  %vm12729_vm12 = vcmask 64512   ;;  %v9028_v11 = vcombine.low %v7468_v44, %v7478_v62  ;;  %v6186_v44 = vld [vmem:[#allocation4 + $0xa8] sm:$0xf]  ;;  %v6187_v40 = vld [vmem:[#allocation4 + $0xac] sm:$0xf] }
 0x3d2   : > { %5103 = vst.msk [vmem:[#allocation5 + $0x78] sm:$0xff] %vm12729_vm12, %v9477_v54  ;;  %v6501_v59 = vrot.slane %v6500_v41, 4  ;;  %v5428_v35 = vrot.slane %v5426_v24, 5  ;;  %v5432_v63 = vrot.slane %v5430_v52, 4  ;;  %v6496_v7 = vsel %vm10233_vm10, %v6491_v9, %v6495_v1 }
 0x3d3   : > { %v5424_v2 = vrot.slane %v5423_v46, 4  ;;  %v5438_v38 = vrot.slane %v5436_v22, 5  ;;  %v6874_v3 = vrot.slane %v6729_v48, 5  ;;  %7689 = vrot.lane.b32.xlu1 %v9028_v11, %s9783_s21  ;;  %v6877_v57 = vrot.slane %v6730_v5, 5  ;;  %5641 = vst.msk [vmem:[#allocation5 + $0x40] sm:$0xff] %vm5632_vm6, %v5601_v25 }
 0x3d4   : > { %v6506_v4 = vsel %vm10233_vm10, %v6501_v59, %v6505_v45  ;;  %v5433_v55 = vor.u32 %v5432_v63, %v5428_v35  ;;  %v8920_v18 = vrot.slane %v5688_v50, 9  ;;  %v5838_v51 = vrot.slane %v5689_v6, 5  ;;  %v6188_v5 = vld [vmem:[#allocation4 + $0xb0] sm:$0x1]  ;;  %v6099_v9 = vpop.permute.xlu0 %6098  ;;  %5962 = vst.msk [vmem:[#allocation5 + $0x40] sm:$0xff] %vm5953_vm3, %v12156_v33 }
 0x3d5   : > { %v8967_v42 = vcombine.low %v6496_v7, %v6506_v4  ;;  %v5429_v53 = vsel %vm10233_vm10, %v5424_v2, %v5428_v35  ;;  %v6875_v32 = vsel %vm10226_vm9, %v8983_v17, %v6874_v3  ;;  %v6876_v0 = vrot.slane %v6874_v3, 4  ;;  %v7772_v11 = vld [vmem:[#allocation4 + $0xa8] sm:$0xe]  ;;  %v7773_v59 = vld [vmem:[#allocation4 + $0xac] sm:$0xf]  ;;  %6139 = vst.msk [vmem:[#allocation5 + $0x40] sm:$0xff] %vm6130_vm4, %v6099_v9 }
 0x3d6   : > { %v5434_v20 = vrot.slane %v5433_v55, 4  ;;  %v5841_v31 = vrot.slane %v5690_v27, 5  ;;  %v7528_v16 = vshrl.u32 %v7227_v15, 16  ;;  %v7531_v37 = vshll.u32 %v7227_v15, 16  ;;  %v9461_v35 = vld [vmem:[#allocation4 + $0xa8] sm:$0xff]  }
 0x3d7   : > { %6651 = vrot.lane.b32.xlu0 %v8967_v42, %s9777_s12  ;;  %v6878_v39 = vsel %vm10226_vm9, %v6876_v0, %v6877_v57  ;;  %v7537_v26 = vshll.u32 %v7228_v12, 16  ;;  %v7541_v34 = vshrl.u32 %v7228_v12, 16  ;;  %v5839_v45 = vsel %vm10226_vm9, %v8920_v18, %v5838_v51  ;;  %v7224_v55 = vld [vmem:[#allocation4 + $0x9c] sm:$0xf] }
 0x3d8   : > { %v5439_v1 = vsel %vm10233_vm10, %v5434_v20, %v5438_v38  ;;  %v8999_v60 = vcombine.low %v6875_v32, %v6878_v39  ;;  %v5840_v48 = vrot.slane %v5838_v51, 4  ;;  %v7530_v36 = vrot.slane %v7528_v16, 4  ;;  %v7774_v38 = vld [vmem:[#allocation4 + $0xb0] sm:$0x1] }
 0x3d9   : > { %v8902_v28 = vcombine.low %v5429_v53, %v5439_v1  ;;  %v7533_v54 = vrot.slane %v7531_v37, 5  ;;  %v7539_v41 = vrot.slane %v7537_v26, 5  ;;  %v7543_v52 = vrot.slane %v7541_v34, 4  ;;  %v7225_v53 = vld [vmem:[#allocation4 + $0xa0] sm:$0xf] }
 0x3da   : > { %v5842_v24 = vsel %vm10226_vm9, %v5840_v48, %v5841_v31  ;;  %v7547_v22 = vshll.u32 %v7229_v14, 16  ;;  %v6508_v62 = vshrl.u32 %v6186_v44, 16  ;;  %v6511_v50 = vshll.u32 %v6186_v44, 16  ;;  %v7226_v34 = vld [vmem:[#allocation4 + $0xa4] sm:$0x1] }
 0x3db   : > { %5606 = vrot.lane.b32.xlu1 %v8902_v28, %s9772_s8  ;;  %6972 = vrot.lane.b32.xlu0 %v8999_v60, %s9781_s13  ;;  %v8936_v46 = vcombine.low %v5839_v45, %v5842_v24  ;;  %v7534_v17 = vor.u32 %v7533_v54, %v7530_v36  ;;  %v6517_v6 = vshll.u32 %v6187_v40, 16  ;;  %v7544_v63 = vor.u32 %v7543_v52, %v7539_v41  ;;  %v6640_v60 = vpop.permute.xlu0 %6639  ;;  %v5143_v28 = vld [vmem:[#allocation4 + $0x9c] sm:$0xf]  ;;  %v5144_v52 = vld [vmem:[#allocation4 + $0xa0] sm:$0xf] }
 0x3dc   : > { %v7549_v27 = vrot.slane %v7547_v22, 5  ;;  %v6510_v7 = vrot.slane %v6508_v62, 4  ;;  %v6521_v2 = vshrl.u32 %v6187_v40, 16  ;;  %v6513_v33 = vrot.slane %v6511_v50, 5  ;;  %6682 = vst.msk [vmem:[#allocation5 + $0x30] sm:$0xff] %vm6675_vm5, %v6640_v60  ;;  %v7682_v22 = vpop.permute.xlu1 %7681 }
 0x3dd   : > { %v7535_v3 = vrot.slane %v7534_v17, 4  ;;  %v6519_v15 = vrot.slane %v6517_v6, 5  ;;  %v6527_v4 = vshll.u32 %v6188_v5, 16  ;;  %v7545_v57 = vrot.slane %v7544_v63, 4  ;;  %7003 = vst.msk [vmem:[#allocation5 + $0x30] sm:$0xff] %vm6996_vm7, %v12199_v58 }
 0x3de   : > { %v6523_v18 = vrot.slane %v6521_v2, 4  ;;  %v9047_v12 = vrot.slane %v7772_v11, 9  ;;  %v7918_v42 = vrot.slane %v7773_v59, 5  ;;  %v6514_v0 = vor.u32 %v6513_v33, %v6510_v7  ;;  %v5145_v17 = vld [vmem:[#allocation4 + $0xa4] sm:$0x1]  ;;  %7181 = vst.msk [vmem:[#allocation5 + $0x30] sm:$0xff] %vm7174_vm14, %v12056_v49 }
 0x3df   : > { %7150 = vrot.lane.b32.xlu0 %v9461_v35, %s9780_s14  ;;  %5931 = vrot.lane.b32.xlu1 %v8936_v46, %s9778_s17  ;;  %v7540_v32 = vsel %vm10233_vm10, %v7535_v3, %v7539_v41  ;;  %v6529_v20 = vrot.slane %v6527_v4, 5  ;;  %v7921_v51 = vrot.slane %v7774_v38, 5  ;;  %v7550_v31 = vsel %vm10233_vm10, %v7545_v57, %v7549_v27  ;;  %7725 = vst.msk [vmem:[#allocation5 + $0x28] sm:$0xff] %vm7719_vm8, %v7682_v22  ;;  %v7775_v35 = vld [vmem:[#allocation4 + $0xb4] sm:$0xe]  ;;  %v12275_v4 = vpop.permute.xlu0 %8008 }
 0x3e0   : > { %v6524_v14 = vor.u32 %v6523_v18, %v6519_v15  ;;  %v7919_v16 = vsel %vm10226_vm9, %v9047_v12, %v7918_v42  ;;  %v7920_v39 = vrot.slane %v7918_v42, 4  ;;  %v9031_v37 = vcombine.low %v7540_v32, %v7550_v31  ;;  %v6731_v63 = vld [vmem:[#allocation4 + $0xa8] sm:$0xe]  ;;  %7726 = vst.msk [vmem:[#allocation5 + $0x30] sm:$0xff] %vm7719_vm8, %v12225_v10  ;;  %v7776_v38 = vld [vmem:[#allocation4 + $0xb8] sm:$0xf] }
 0x3e1   : > { %v6515_v26 = vrot.slane %v6514_v0, 4  ;;  %v7504_v44 = vshrl.u32 %v7224_v55, 16  ;;  %v7507_v1 = vshll.u32 %v7224_v55, 16  ;;  %v7513_v40 = vshll.u32 %v7225_v53, 16  ;;  %8046 = vst.msk [vmem:[#allocation5 + $0x28] sm:$0xff] %vm8040_vm1, %v12177_v13  ;;  %8047 = vst.msk [vmem:[#allocation5 + $0x30] sm:$0xff] %vm8040_vm1, %v12133_v23 }
 0x3e2   : > { %v6525_v45 = vrot.slane %v6524_v14, 4  ;;  %v7922_v48 = vsel %vm10226_vm9, %v7920_v39, %v7921_v51  ;;  %v7517_v25 = vshrl.u32 %v7225_v53, 16  ;;  %v7523_v46 = vshll.u32 %v7226_v34, 16  ;;  %v7777_v10 = vld [vmem:[#allocation4 + $0xbc] sm:$0x1] }
 0x3e3   : > { %7695 = vrot.lane.b32.xlu0 %v9031_v37, %s9783_s21  ;;  %v6520_v36 = vsel %vm10233_vm10, %v6515_v26, %v6519_v15  ;;  %v9063_v54 = vcombine.low %v7919_v16, %v7922_v48  ;;  %v7506_v41 = vrot.slane %v7504_v44, 4  ;;  %v7509_v24 = vrot.slane %v7507_v1, 5  ;;  %v6732_v12 = vld [vmem:[#allocation4 + $0xac] sm:$0xf]  ;;  %v6733_v0 = vld [vmem:[#allocation4 + $0xb0] sm:$0x1] }
 0x3e4   : > { %v6530_v5 = vsel %vm10233_vm10, %v6525_v45, %v6529_v20  ;;  %v7515_v62 = vrot.slane %v7513_v40, 5  ;;  %v7519_v9 = vrot.slane %v7517_v25, 4  ;;  %v5465_v11 = vshrl.u32 %v5143_v28, 16  ;;  %v5691_v20 = vld [vmem:[#allocation4 + $0xa8] sm:$0xe] }
 0x3e5   : > { %v8968_v50 = vcombine.low %v6520_v36, %v6530_v5  ;;  %v7510_v6 = vor.u32 %v7509_v24, %v7506_v41  ;;  %v5468_v59 = vshll.u32 %v5143_v28, 16  ;;  %v7525_v27 = vrot.slane %v7523_v46, 5  ;;  %v5692_v39 = vld [vmem:[#allocation4 + $0xac] sm:$0xf]  ;;  %v5693_v37 = vld [vmem:[#allocation4 + $0xb0] sm:$0x1]  ;;  %v5599_v28 = vpop.permute.xlu1 %5598  ;;  %v12289_v5 = vpop.permute.xlu0 %5925 }
 0x3e6   : > { %v7520_v58 = vor.u32 %v7519_v9, %v7515_v62  ;;  %v5474_v7 = vshll.u32 %v5144_v52, 16  ;;  %v5478_v2 = vshrl.u32 %v5144_v52, 16  ;;  %v5467_v3 = vrot.slane %v5465_v11, 4  ;;  %v7230_v60 = vld [vmem:[#allocation4 + $0xb4] sm:$0xf]  ;;  %5640 = vst.msk [vmem:[#allocation5 + $0x38] sm:$0xff] %vm5632_vm6, %v5599_v28 }
 0x3e7   : > { %6653 = vrot.lane.b32.xlu1 %v8968_v50, %s9777_s12  ;;  %8016 = vrot.lane.b32.xlu0 %v9063_v54, %s9782_s19  ;;  %v7511_v49 = vrot.slane %v7510_v6, 4  ;;  %v5470_v33 = vrot.slane %v5468_v59, 5  ;;  %v5484_v15 = vshll.u32 %v5145_v17, 16  ;;  %v9048_v18 = vrot.slane %v7775_v35, 9  ;;  %v7231_v22 = vld [vmem:[#allocation4 + $0xb8] sm:$0xf] }
 0x3e8   : > { %v7521_v13 = vrot.slane %v7520_v58, 4  ;;  %v5476_v55 = vrot.slane %v5474_v7, 5  ;;  %v5480_v57 = vrot.slane %v5478_v2, 4  ;;  %v7925_v32 = vrot.slane %v7776_v38, 5  ;;  %v8062_v36 = vld [vmem:[#allocation5 + $0x28] sm:$0xff]  ;;  %5961 = vst.msk [vmem:[#allocation5 + $0x38] sm:$0xff] %vm5953_vm3, %v12179_v56 }
 0x3e9   : > { %v7516_v42 = vsel %vm10233_vm10, %v7511_v49, %v7515_v62  ;;  %v5471_v23 = vor.u32 %v5470_v33, %v5467_v3  ;;  %v5486_v53 = vrot.slane %v5484_v15, 5  ;;  %v7928_v14 = vrot.slane %v7777_v10, 5  ;;  %9226 = vmatmul.mubr.msk.bf16.gmra.mrb[8].mxu1 %vm8109_vm2, %v8062_v36  ;;  %v8063_v62 = vld [vmem:[#allocation5 + $0x30] sm:$0xff]  ;;  %v7232_v6 = vld [vmem:[#allocation4 + $0xbc] sm:$0x1]  ;;  %6138 = vst.msk [vmem:[#allocation5 + $0x38] sm:$0xff] %vm6130_vm4, %v12050_v43  ;;  %v12308_v49 = vpop.permute.xlu1 %6966 }
 0x3ea   : > { %v7526_v51 = vsel %vm10233_vm10, %v7521_v13, %v7525_v27  ;;  %v5481_v31 = vor.u32 %v5480_v57, %v5476_v55  ;;  %v8984_v16 = vrot.slane %v6731_v63, 9  ;;  %v7926_v44 = vsel %vm10226_vm9, %v9048_v18, %v7925_v32  ;;  %9229 = vmatprep.mubr.msk.bf16.mxu1 %vm8109_vm2, %v8063_v62  ;;  %v6189_v58 = vld [vmem:[#allocation4 + $0xb4] sm:$0xf]  ;;  %v6190_v38 = vld [vmem:[#allocation4 + $0xb8] sm:$0xf]  ;;  %6683 = vst.msk [vmem:[#allocation5 + $0x38] sm:$0xff] %vm6675_vm5, %v12209_v8 }
 0x3eb   : > { %v9030_v26 = vcombine.low %v7516_v42, %v7526_v51  ;;  %v5472_v34 = vrot.slane %v5471_v23, 4  ;;  %v7927_v1 = vrot.slane %v7925_v32, 4  ;;  %v6881_v48 = vrot.slane %v6732_v12, 5  ;;  %v6191_v10 = vld [vmem:[#allocation4 + $0xbc] sm:$0x1]  ;;  %7004 = vst.msk [vmem:[#allocation5 + $0x38] sm:$0xff] %vm6996_vm7, %v12168_v47  ;;  %v12317_v32 = vpop.permute.xlu0 %8006 }
 0x3ec   : > { %v5482_v45 = vrot.slane %v5481_v31, 4  ;;  %v6884_v40 = vrot.slane %v6733_v0, 5  ;;  %v8921_v25 = vrot.slane %v5691_v20, 9  ;;  %v5845_v24 = vrot.slane %v5692_v39, 5  ;;  %v5146_v12 = vld [vmem:[#allocation4 + $0xa8] sm:$0xf] }
 0x3ed   : > { %7693 = vrot.lane.b32.xlu1 %v9030_v26, %s9783_s21  ;;  %v5477_v54 = vsel %vm10233_vm10, %v5472_v34, %v5476_v55  ;;  %v7929_v41 = vsel %vm10226_vm9, %v7927_v1, %v7928_v14  ;;  %v5848_v52 = vrot.slane %v5693_v37, 5  ;;  %v6882_v17 = vsel %vm10226_vm9, %v8984_v16, %v6881_v48  ;;  %7182 = vst.msk [vmem:[#allocation5 + $0x38] sm:$0xff] %vm7174_vm14, %v12218_v30  ;;  %v5147_v31 = vld [vmem:[#allocation4 + $0xac] sm:$0xf]  ;;  %v12320_v14 = vpop.permute.xlu1 %5923  ;;  %v5148_v37 = vld [vmem:[#allocation4 + $0xb0] sm:$0x1] }
 0x3ee   : > { %v5487_v9 = vsel %vm10233_vm10, %v5482_v45, %v5486_v53  ;;  %v9064_v46 = vcombine.low %v7926_v44, %v7929_v41  ;;  %v6883_v50 = vrot.slane %v6881_v48, 4  ;;  %v5846_v59 = vsel %vm10226_vm9, %v8921_v25, %v5845_v24  ;;  %v9465_v34 = vld [vmem:[#allocation4 + $0xb4] sm:$0xff]  }
 0x3ef   : > { %v8904_v11 = vcombine.low %v5477_v54, %v5487_v9  ;;  %v5847_v35 = vrot.slane %v5845_v24, 4  ;;  %v7552_v63 = vshrl.u32 %v7230_v60, 16  ;;  %v7555_v7 = vshll.u32 %v7230_v60, 16  ;;  %v9464_v48 = vld [vmem:[#allocation4 + $0xb4] sm:$0xff]   ;;  %v6736_v9 = vld [vmem:[#allocation4 + $0xbc] sm:$0x1] }
 0x3f0   : > { %8018 = vrot.lane.b32.xlu0 %v9064_v46, %s9782_s19  ;;  %v6885_v27 = vsel %vm10226_vm9, %v6883_v50, %v6884_v40  ;;  %v7561_v2 = vshll.u32 %v7231_v22, 16  ;;  %v7565_v56 = vshrl.u32 %v7231_v22, 16  ;;  %v7571_v15 = vshll.u32 %v7232_v6, 16  ;;  %v6734_v54 = vld [vmem:[#allocation4 + $0xb4] sm:$0xe] }
 0x3f1   : > { %5610 = vrot.lane.b32.xlu1 %v8904_v11, %s9772_s8  ;;  %v9000_v3 = vcombine.low %v6882_v17, %v6885_v27  ;;  %v5849_v43 = vsel %vm10226_vm9, %v5847_v35, %v5848_v52  ;;  %v7554_v33 = vrot.slane %v7552_v63, 4  ;;  %v7557_v55 = vrot.slane %v7555_v7, 5  ;;  %v6735_v62 = vld [vmem:[#allocation4 + $0xb8] sm:$0xf]  ;;  %v12328_v46 = vpop.permute.xlu1 %6104  ;;  %v12331_v35 = vpop.permute.xlu0 %6964 }
 0x3f2   : > { %v8937_v13 = vcombine.low %v5846_v59, %v5849_v43  ;;  %v7563_v57 = vrot.slane %v7561_v2, 5  ;;  %v7567_v18 = vrot.slane %v7565_v56, 4  ;;  %v7573_v8 = vrot.slane %v7571_v15, 5  ;;  %v5149_v59 = vld [vmem:[#allocation4 + $0xb4] sm:$0xf] }
 0x3f3   : > { %v6532_v42 = vshrl.u32 %v6189_v58, 16  ;;  %v6535_v23 = vshll.u32 %v6189_v58, 16  ;;  %v6541_v53 = vshll.u32 %v6190_v38, 16  ;;  %v7558_v0 = vor.u32 %v7557_v55, %v7554_v33  ;;  %v5150_v43 = vld [vmem:[#allocation4 + $0xb8] sm:$0xf] }
 0x3f4   : > { %5933 = vrot.lane.b32.xlu0 %v8937_v13, %s9778_s17  ;;  %v7568_v20 = vor.u32 %v7567_v18, %v7563_v57  ;;  %v6545_v51 = vshrl.u32 %v6190_v38, 16  ;;  %v6551_v47 = vshll.u32 %v6191_v10, 16  ;;  %v5489_v26 = vshrl.u32 %v5146_v12, 16  ;;  %v5151_v13 = vld [vmem:[#allocation4 + $0xbc] sm:$0x1] }
 0x3f5   : > { %6974 = vrot.lane.b32.xlu1 %v9000_v3, %s9781_s13  ;;  %v6534_v16 = vrot.slane %v6532_v42, 4  ;;  %v6537_v39 = vrot.slane %v6535_v23, 5  ;;  %v6543_v30 = vrot.slane %v6541_v53, 5  ;;  %v7559_v44 = vrot.slane %v7558_v0, 4  ;;  %v12340_v42 = vpop.permute.xlu1 %6645 }
 0x3f6   : > { %v7569_v1 = vrot.slane %v7568_v20, 4  ;;  %v6547_v60 = vrot.slane %v6545_v51, 4  ;;  %v6553_v45 = vrot.slane %v6551_v47, 5  ;;  %v5491_v25 = vrot.slane %v5489_v26, 4  ;;  %v7233_v51 = vld [vmem:[#allocation4 + $0xc0] sm:$0xf] }
 0x3f7   : > { %v6538_v40 = vor.u32 %v6537_v39, %v6534_v16  ;;  %v5492_v28 = vshll.u32 %v5146_v12, 16  ;;  %v5498_v36 = vshll.u32 %v5147_v31, 16  ;;  %v7564_v41 = vsel %vm10233_vm10, %v7559_v44, %v7563_v57 }
 0x3f8   : > { %6110 = vrot.lane.b32.xlu0 %v9465_v34, %s9775_s15  ;;  %v7574_v24 = vsel %vm10233_vm10, %v7569_v1, %v7573_v8  ;;  %v6548_v52 = vor.u32 %v6547_v60, %v6543_v30  ;;  %v5502_v22 = vshrl.u32 %v5147_v31, 16  ;;  %v5508_v27 = vshll.u32 %v5148_v37, 16  ;;  %v12347_v37 = vpop.permute.xlu0 %7146  ;;  %v7235_v60 = vld [vmem:[#allocation4 + $0xc8] sm:$0x1] }
 0x3f9   : > { %7152 = vrot.lane.b32.xlu1 %v9464_v48, %s9780_s14  ;;  %v9032_v17 = vcombine.low %v7564_v41, %v7574_v24  ;;  %v6539_v50 = vrot.slane %v6538_v40, 4  ;;  %v5494_v6 = vrot.slane %v5492_v28, 5  ;;  %v5500_v11 = vrot.slane %v5498_v36, 5  ;;  %v5695_v36 = vld [vmem:[#allocation4 + $0xb8] sm:$0xf] }
 0x3fa   : > { %v6549_v63 = vrot.slane %v6548_v52, 4  ;;  %v5504_v58 = vrot.slane %v5502_v22, 4  ;;  %v8985_v7 = vrot.slane %v6734_v54, 9  ;;  %v6888_v38 = vrot.slane %v6735_v62, 5  ;;  %v5696_v22 = vld [vmem:[#allocation4 + $0xbc] sm:$0x1] }
 0x3fb   : > { %v6544_v2 = vsel %vm10233_vm10, %v6539_v50, %v6543_v30  ;;  %v5495_v56 = vor.u32 %v5494_v6, %v5491_v25  ;;  %v6891_v3 = vrot.slane %v6736_v9, 5  ;;  %v5510_v10 = vrot.slane %v5508_v27, 5  ;;  %v7234_v30 = vld [vmem:[#allocation4 + $0xc4] sm:$0xf] }
 0x3fc   : > { %v6554_v33 = vsel %vm10233_vm10, %v6549_v63, %v6553_v45  ;;  %v5505_v15 = vor.u32 %v5504_v58, %v5500_v11  ;;  %v5513_v55 = vshrl.u32 %v5149_v59, 16  ;;  %v6889_v12 = vsel %vm10226_vm9, %v8985_v7, %v6888_v38  ;;  %v5694_v45 = vld [vmem:[#allocation4 + $0xb4] sm:$0xe]  ;;  %v9466_v62 = vld [vmem:[#allocation4 + $0xc0] sm:$0xff]  }
 0x3fd   : > { %7697 = vrot.lane.b32.xlu1 %v9032_v17, %s9783_s21  ;;  %v8969_v57 = vcombine.low %v6544_v2, %v6554_v33  ;;  %v5496_v18 = vrot.slane %v5495_v56, 4  ;;  %v6890_v8 = vrot.slane %v6888_v38, 4  ;;  %v5516_v0 = vshll.u32 %v5149_v59, 16  ;;  %v12353_v59 = vpop.permute.xlu1 %7144  ;;  %v7779_v2 = vld [vmem:[#allocation4 + $0xc4] sm:$0xf] }
 0x3fe   : > { %v5506_v23 = vrot.slane %v5505_v15, 4  ;;  %v5515_v53 = vrot.slane %v5513_v55, 4  ;;  %v5522_v20 = vshll.u32 %v5150_v43, 16  ;;  %v5526_v16 = vshrl.u32 %v5150_v43, 16  ;;  %v7780_v33 = vld [vmem:[#allocation4 + $0xc8] sm:$0x1]  ;;  %v12355_v15 = vpop.permute.xlu0 %7687 }
 0x3ff   : > { %6655 = vrot.lane.b32.xlu0 %v8969_v57, %s9777_s12  ;;  %v5501_v47 = vsel %vm10233_vm10, %v5496_v18, %v5500_v11  ;;  %v6892_v31 = vsel %vm10226_vm9, %v6890_v8, %v6891_v3  ;;  %v5532_v39 = vshll.u32 %v5151_v13, 16  ;;  %v5518_v44 = vrot.slane %v5516_v0, 5  ;;  %v7778_v11 = vld [vmem:[#allocation4 + $0xc0] sm:$0xe] }
 0x400   : > { %v5511_v26 = vsel %vm10233_vm10, %v5506_v23, %v5510_v10  ;;  %v9001_v34 = vcombine.low %v6889_v12, %v6892_v31  ;;  %v5524_v1 = vrot.slane %v5522_v20, 5  ;;  %v5528_v40 = vrot.slane %v5526_v16, 4  ;;  %v6192_v18 = vld [vmem:[#allocation4 + $0xc0] sm:$0xf]  ;;  %v6193_v31 = vld [vmem:[#allocation4 + $0xc4] sm:$0xf] }
 0x401   : > { %v8905_v48 = vcombine.low %v5501_v47, %v5511_v26  ;;  %v5534_v25 = vrot.slane %v5532_v39, 5  ;;  %v7576_v28 = vshrl.u32 %v7233_v51, 16  ;;  %v5519_v54 = vor.u32 %v5518_v44, %v5515_v53 }
 0x402   : > { %v7579_v41 = vshll.u32 %v7233_v51, 16  ;;  %v7585_v24 = vshll.u32 %v7234_v30, 16  ;;  %v7589_v52 = vshrl.u32 %v7234_v30, 16  ;;  %v5529_v9 = vor.u32 %v5528_v40, %v5524_v1  ;;  %v6194_v30 = vld [vmem:[#allocation4 + $0xc8] sm:$0x1] }
 0x403   : > { %5612 = vrot.lane.b32.xlu1 %v8905_v48, %s9772_s8  ;;  %6976 = vrot.lane.b32.xlu0 %v9001_v34, %s9781_s13  ;;  %v7578_v17 = vrot.slane %v7576_v28, 4  ;;  %v7595_v50 = vshll.u32 %v7235_v60, 16  ;;  %v8922_v6 = vrot.slane %v5694_v45, 9  ;;  %v5520_v63 = vrot.slane %v5519_v54, 4  ;;  %v5605_v34 = vpop.permute.xlu1 %5604  ;;  %v7236_v54 = vld [vmem:[#allocation4 + $0xcc] sm:$0xf] }
 0x404   : > { %v7581_v58 = vrot.slane %v7579_v41, 5  ;;  %v7587_v27 = vrot.slane %v7585_v24, 5  ;;  %v7591_v7 = vrot.slane %v7589_v52, 4  ;;  %v5530_v56 = vrot.slane %v5529_v9, 4  ;;  %5643 = vst.msk [vmem:[#allocation5 + $0x50] sm:$0xff] %vm5632_vm6, %v5605_v34  ;;  %v6103_v41 = vpop.permute.xlu0 %6102 }
 0x405   : > { %v7597_v38 = vrot.slane %v7595_v50, 5  ;;  %v5852_v3 = vrot.slane %v5695_v36, 5  ;;  %v5855_v43 = vrot.slane %v5696_v22, 5  ;;  %v5525_v10 = vsel %vm10233_vm10, %v5520_v63, %v5524_v1  ;;  %v6738_v36 = vld [vmem:[#allocation4 + $0xc4] sm:$0xf]  ;;  %5964 = vst.msk [vmem:[#allocation5 + $0x50] sm:$0xff] %vm5953_vm3, %v12289_v5 }
 0x406   : > { %v7582_v13 = vor.u32 %v7581_v58, %v7578_v17  ;;  %v7592_v55 = vor.u32 %v7591_v7, %v7587_v27  ;;  %v9049_v57 = vrot.slane %v7778_v11, 9  ;;  %v5535_v12 = vsel %vm10233_vm10, %v5530_v56, %v5534_v25  ;;  %v7237_v9 = vld [vmem:[#allocation4 + $0xd0] sm:$0xf]  ;;  %6141 = vst.msk [vmem:[#allocation5 + $0x50] sm:$0xff] %vm6130_vm4, %v6103_v41  ;;  %v6737_v50 = vld [vmem:[#allocation4 + $0xc0] sm:$0xe] }
 0x407   : > { %7154 = vrot.lane.b32.xlu0 %v9466_v62, %s9780_s14  ;;  %v5853_v8 = vsel %vm10226_vm9, %v8922_v6, %v5852_v3  ;;  %v5854_v23 = vrot.slane %v5852_v3, 4  ;;  %v7932_v53 = vrot.slane %v7779_v2, 5  ;;  %v8906_v0 = vcombine.low %v5525_v10, %v5535_v12  ;;  %v6739_v63 = vld [vmem:[#allocation4 + $0xc8] sm:$0x1] }
 0x408   : > { %v7583_v20 = vrot.slane %v7582_v13, 4  ;;  %v7593_v51 = vrot.slane %v7592_v55, 4  ;;  %v7935_v47 = vrot.slane %v7780_v33, 5  ;;  %v6556_v26 = vshrl.u32 %v6192_v18, 16 }
 0x409   : > { %v5856_v16 = vsel %vm10226_vm9, %v5854_v23, %v5855_v43  ;;  %v7934_v39 = vrot.slane %v7932_v53, 4  ;;  %5614 = vrot.lane.b32.xlu1 %v8906_v0, %s9772_s8  ;;  %v7933_v60 = vsel %vm10226_vm9, %v9049_v57, %v7932_v53  ;;  %v6559_v45 = vshll.u32 %v6192_v18, 16  ;;  %v7238_v57 = vld [vmem:[#allocation4 + $0xd4] sm:$0x1] }
 0x40a   : > { %v7588_v44 = vsel %vm10233_vm10, %v7583_v20, %v7587_v27  ;;  %v7598_v1 = vsel %vm10233_vm10, %v7593_v51, %v7597_v38  ;;  %v8938_v40 = vcombine.low %v5853_v8, %v5856_v16  ;;  %v6558_v25 = vrot.slane %v6556_v26, 4  ;;  %v9468_v38 = vld [vmem:[#allocation4 + $0xc0] sm:$0xff]   ;;  %v6644_v8 = vpop.permute.xlu0 %6643  ;;  %v7782_v26 = vld [vmem:[#allocation4 + $0xd0] sm:$0xf] }
 0x40b   : > { %v9033_v48 = vcombine.low %v7588_v44, %v7598_v1  ;;  %v6565_v28 = vshll.u32 %v6193_v31, 16  ;;  %v7936_v24 = vsel %vm10226_vm9, %v7934_v39, %v7935_v47  ;;  %v6561_v52 = vrot.slane %v6559_v45, 5  ;;  %6684 = vst.msk [vmem:[#allocation5 + $0x40] sm:$0xff] %vm6675_vm5, %v6644_v8 }
 0x40c   : > { %v6569_v22 = vshrl.u32 %v6193_v31, 16  ;;  %v6575_v62 = vshll.u32 %v6194_v30, 16  ;;  %v6895_v58 = vrot.slane %v6738_v36, 5  ;;  %v7600_v5 = vshrl.u32 %v7236_v54, 16  ;;  %7005 = vst.msk [vmem:[#allocation5 + $0x40] sm:$0xff] %vm6996_vm7, %v12331_v35 }
 0x40d   : > { %7699 = vrot.lane.b32.xlu0 %v9033_v48, %s9783_s21  ;;  %v6567_v17 = vrot.slane %v6565_v28, 5  ;;  %5935 = vrot.lane.b32.xlu1 %v8938_v40, %s9778_s17  ;;  %v6562_v6 = vor.u32 %v6561_v52, %v6558_v25  ;;  %v9065_v27 = vcombine.low %v7933_v60, %v7936_v24  ;;  %v7603_v2 = vshll.u32 %v7236_v54, 16  ;;  %7183 = vst.msk [vmem:[#allocation5 + $0x40] sm:$0xff] %vm7174_vm14, %v12213_v61  ;;  %v7686_v39 = vpop.permute.xlu1 %7685  ;;  %v7781_v60 = vld [vmem:[#allocation4 + $0xcc] sm:$0xe]  ;;  %s12619_s17 = scalar_lea.hbm %s12679_s7, %s9128_s28 }
 0x40e   : > { %v6571_v11 = vrot.slane %v6569_v22, 4  ;;  %v6577_v7 = vrot.slane %v6575_v62, 5  ;;  %v7609_v56 = vshll.u32 %v7237_v9, 16  ;;  %v7602_v33 = vrot.slane %v7600_v5, 4  ;;  %7728 = vst.msk [vmem:[#allocation5 + $0x40] sm:$0xff] %vm7719_vm8, %v12355_v15  ;;  %7727 = vst.msk [vmem:[#allocation5 + $0x38] sm:$0xff] %vm7719_vm8, %v7686_v39  ;;  %v8013_v61 = vpop.permute.xlu0 %8012 }
 0x40f   : > { %v6563_v3 = vrot.slane %v6562_v6, 4  ;;  %v7613_v10 = vshrl.u32 %v7237_v9, 16  ;;  %v8986_v13 = vrot.slane %v6737_v50, 9  ;;  %v6898_v55 = vrot.slane %v6739_v63, 5  ;;  %8049 = vst.msk [vmem:[#allocation5 + $0x40] sm:$0xff] %vm8040_vm1, %v12275_v4  ;;  %8048 = vst.msk [vmem:[#allocation5 + $0x38] sm:$0xff] %vm8040_vm1, %v12317_v32 }
 0x410   : > { %v6572_v43 = vor.u32 %v6571_v11, %v6567_v17  ;;  %v7605_v18 = vrot.slane %v7603_v2, 5  ;;  %v7611_v12 = vrot.slane %v7609_v56, 5  ;;  %v6897_v0 = vrot.slane %v6895_v58, 4  ;;  %v7783_v40 = vld [vmem:[#allocation4 + $0xd4] sm:$0x1]  ;;  %v9470_v25 = vld [vmem:[#allocation4 + $0xcc] sm:$0xff]  }
 0x411   : > { %8020 = vrot.lane.b32.xlu0 %v9065_v27, %s9782_s19  ;;  %6112 = vrot.lane.b32.xlu1 %v9468_v38, %s9775_s15  ;;  %v6568_v23 = vsel %vm10233_vm10, %v6563_v3, %v6567_v17  ;;  %v7615_v20 = vrot.slane %v7613_v10, 4  ;;  %v7619_v16 = vshll.u32 %v7238_v57, 16  ;;  %v6896_v35 = vsel %vm10226_vm9, %v8986_v13, %v6895_v58  ;;  %s8479_s15 = sshll.u32 %s12497_s23, 4  ;;  %s12623_s15 = int_to_ptr.vmem [resolvable:$true] %s8479_s15 }
 0x412   : > { %v6573_v53 = vrot.slane %v6572_v43, 4  ;;  %v7606_v47 = vor.u32 %v7605_v18, %v7602_v33  ;;  %v6899_v34 = vsel %vm10226_vm9, %v6897_v0, %v6898_v55  ;;  %v7939_v45 = vrot.slane %v7782_v26, 5  ;;  %v5930_v24 = vpop.permute.xlu0 %5929  ;;  %s9682_s16 = scalar_lea.vmem %s12623_s15, 4096 }
 0x413   : > { %v7616_v31 = vor.u32 %v7615_v20, %v7611_v12  ;;  %v7621_v15 = vrot.slane %v7619_v16, 5  ;;  %v9002_v48 = vcombine.low %v6896_v35, %v6899_v34  ;;  %v9050_v28 = vrot.slane %v7781_v60, 9  ;;  %p9683_p6 = scmp.ne.s32.totalorder %s12623_s15, %s9682_s16 }
 0x414   : > { %v6578_v51 = vsel %vm10233_vm10, %v6573_v53, %v6577_v7  ;;  %v7607_v44 = vrot.slane %v7606_v47, 4  ;;  %v5603_v36 = vpop.permute.xlu1 %5602  ;;  %v7941_v54 = vrot.slane %v7939_v45, 4  ;;  %v7942_v41 = vrot.slane %v7783_v40, 5  ;;  %v12484_v40 = vld [vmem:[#allocation17] ss:$0 sm:$0xff] }
 0x415   : > { %v8970_v30 = vcombine.low %v6568_v23, %v6578_v51  ;;  %v7617_v1 = vrot.slane %v7616_v31, 4  ;;  %5642 = vst.msk [vmem:[#allocation5 + $0x48] sm:$0xff] %vm5632_vm6, %v5603_v36  ;;  %v7940_v29 = vsel %vm10226_vm9, %v9050_v28, %v7939_v45  ;;  %v12482_v45 = vld [vmem:[#allocation15] ss:$0 sm:$0xff]  ;;  %p9684_p12 = pnand %p9683_p6, %p12761_p9 }
 0x416   : > { %v7612_v4 = vsel %vm10233_vm10, %v7607_v44, %v7611_v12  ;;  %5963 = vst.msk [vmem:[#allocation5 + $0x48] sm:$0xff] %vm5953_vm3, %v12320_v14  ;;  %v8064_v52 = vld [vmem:[#allocation5 + $0x38] sm:$0xff]  ;;  %v8065_v22 = vld [vmem:[#allocation5 + $0x40] sm:$0xff]  ;;  %v7943_v14 = vsel %vm10226_vm9, %v7941_v54, %v7942_v41  ;;  %v8011_v9 = vpop.permute.xlu0 %8010  ;;  %vm12730_vm9 = vmmov %vm12729_vm12 }
 0x417   : > { %6657 = vrot.lane.b32.xlu1 %v8970_v30, %s9777_s12  ;;  %v7622_v32 = vsel %vm10233_vm10, %v7617_v1, %v7621_v15  ;;  %6140 = vst.msk [vmem:[#allocation5 + $0x48] sm:$0xff] %vm6130_vm4, %v12196_v21  ;;  %9230 = vmatmul.mubr.msk.bf16.gmra.mrb[12].mxu1 %vm8109_vm2, %v8064_v52  ;;  %v9066_v17 = vcombine.low %v7940_v29, %v7943_v14  ;;  %vm12731_vm10 = vmmov %vm12730_vm9  ;;  %p9685_p13 = pneg %p9684_p12 }
 0x418   : > { %v9034_v62 = vcombine.low %v7612_v4, %v7622_v32  ;;  %6685 = vst.msk [vmem:[#allocation5 + $0x48] sm:$0xff] %vm6675_vm5, %v12340_v42  ;;  %9233 = vmatprep.mubr.msk.bf16.mxu1 %vm8109_vm2, %v8065_v22  ;;  %v6971_v21 = vpop.permute.xlu1 %6970  ;;  %vm12732_vm13 = vmmov %vm12730_vm9 }
 0x419   : > { %7006 = vst.msk [vmem:[#allocation5 + $0x48] sm:$0xff] %vm6996_vm7, %v12308_v49  ;;  %vm12733_vm11 = vmmov %vm12730_vm9 }
 0x41a   : > { %7184 = vst.msk [vmem:[#allocation5 + $0x48] sm:$0xff] %vm7174_vm14, %v12353_v59  ;;  %v6969_v50 = vpop.permute.xlu0 %6968  ;;  %vm12734_vm0 = vmmov %vm12730_vm9 }
 0x41b   : > { %6978 = vrot.lane.b32.xlu1 %v9002_v48, %s9781_s13  ;;  %vm12735_vm15 = vmmov %vm12734_vm0 }
 0x41c   : > { %v5928_v42 = vpop.permute.xlu1 %5927  ;;  %vm12745_vm12 = vmmov %vm12734_vm0 }
 0x41f   : > { %7156 = vrot.lane.b32.xlu1 %v9470_v25, %s9780_s14  ;;  %s9784_s14 = smov [#allocation18]  }
 0x420   : > { %v6109_v6 = vpop.permute.xlu1 %6108  ;;  %v7692_v11 = vpop.permute.xlu0 %7691  ;;  %s9686_s13 = sshll.u32 %s9784_s14, 4  ;;  %s9687_s13 = int_to_ptr.vmem [resolvable:$false] %s9686_s13 }
 0x421   : > { %p9689_p1 = scmp.lt.s32.totalorder %s12623_s15, %s9687_s13 }
 0x423   : > { %7701 = vrot.lane.b32.xlu1 %v9034_v62, %s9783_s21 }
 0x424   : > { %v6107_v19 = vpop.permute.xlu0 %6106 }
 0x427   : > { %8022 = vrot.lane.b32.xlu1 %v9066_v17, %s9782_s19  ;;  %s9688_s19 = scalar_lea.vmem %s9687_s13, 8192 }
 0x428   : > { %p9690_p3 = scmp.lt.s32.totalorder %s9688_s19, %s9682_s16 }
 0x42a   : > { %v6650_v63 = vpop.permute.xlu1 %6649  ;;  %p9691_p2 = por %p9690_p3, %p9689_p1 }
 0x42c   : > { %p9692_p8 = pnand %p9691_p2, %p9685_p13 }
 0x42e   : > { %v7149_v58 = vpop.permute.xlu1 %7148 }
 0x439   : > { %v6648_v5 = vpop.permute.xlu0 %6647 }
 0x43a   : > { %6686 = vst.msk [vmem:[#allocation5 + $0x50] sm:$0xff] %vm6675_vm5, %v6648_v5 }
 0x43b   : > { %7007 = vst.msk [vmem:[#allocation5 + $0x50] sm:$0xff] %vm6996_vm7, %v6969_v50 }
 0x43c   : > { %7185 = vst.msk [vmem:[#allocation5 + $0x50] sm:$0xff] %vm7174_vm14, %v12347_v37 }
 0x43d   : > { %7730 = vst.msk [vmem:[#allocation5 + $0x50] sm:$0xff] %vm7719_vm8, %v7692_v11 }
 0x43e   : > { %v5609_v49 = vpop.permute.xlu1 %5608  ;;  %8051 = vst.msk [vmem:[#allocation5 + $0x50] sm:$0xff] %vm8040_vm1, %v8013_v61  ;;  %v8015_v59 = vpop.permute.xlu0 %8014 }
 0x43f   : > { %5645 = vst.msk [vmem:[#allocation5 + $0x60] sm:$0xff] %vm5632_vm6, %v5609_v49 }
 0x440   : > { %5966 = vst.msk [vmem:[#allocation5 + $0x60] sm:$0xff] %vm5953_vm3, %v5930_v24 }
 0x441   : > { %6143 = vst.msk [vmem:[#allocation5 + $0x60] sm:$0xff] %vm6130_vm4, %v6107_v19 }
 0x445   : > { %v7690_v27 = vpop.permute.xlu1 %7689  ;;  %v8067_v38 = vld [vmem:[#allocation5 + $0x50] sm:$0xff] }
 0x446   : > { %7729 = vst.msk [vmem:[#allocation5 + $0x48] sm:$0xff] %vm7719_vm8, %v7690_v27 }
 0x447   : > { %8050 = vst.msk [vmem:[#allocation5 + $0x48] sm:$0xff] %vm8040_vm1, %v8011_v9 }
 0x449   : > { %v6652_v7 = vpop.permute.xlu0 %6651 }
 0x44a   : > { %6688 = vst.msk [vmem:[#allocation5 + $0x60] sm:$0xff] %vm6675_vm5, %v6652_v7 }
 0x44d   : > { %v5607_v37 = vpop.permute.xlu1 %5606  ;;  %v6973_v2 = vpop.permute.xlu0 %6972 }
 0x44e   : > { %5644 = vst.msk [vmem:[#allocation5 + $0x58] sm:$0xff] %vm5632_vm6, %v5607_v37  ;;  %v8066_v56 = vld [vmem:[#allocation5 + $0x48] sm:$0xff] }
 0x44f   : > { %7009 = vst.msk [vmem:[#allocation5 + $0x60] sm:$0xff] %vm6996_vm7, %v6973_v2  ;;  %9234 = vmatmul.mubr.msk.bf16.gmra.mrb[16].mxu1 %vm8109_vm2, %v8066_v56 }
 0x450   : > { %5965 = vst.msk [vmem:[#allocation5 + $0x58] sm:$0xff] %vm5953_vm3, %v5928_v42  ;;  %9237 = vmatprep.mubr.msk.bf16.mxu1 %vm8109_vm2, %v8067_v38 }
 0x451   : > { %6142 = vst.msk [vmem:[#allocation5 + $0x58] sm:$0xff] %vm6130_vm4, %v12328_v46  ;;  %v7151_v3 = vpop.permute.xlu0 %7150  ;;  %v5932_v43 = vpop.permute.xlu1 %5931 }
 0x452   : > { %6687 = vst.msk [vmem:[#allocation5 + $0x58] sm:$0xff] %vm6675_vm5, %v6650_v63 }
 0x453   : > { %7008 = vst.msk [vmem:[#allocation5 + $0x58] sm:$0xff] %vm6996_vm7, %v6971_v21 }
 0x454   : > { %7187 = vst.msk [vmem:[#allocation5 + $0x60] sm:$0xff] %vm7174_vm14, %v7151_v3  ;;  %7186 = vst.msk [vmem:[#allocation5 + $0x58] sm:$0xff] %vm7174_vm14, %v7149_v58 }
 0x455   : > { %v7696_v33 = vpop.permute.xlu0 %7695 }
 0x456   : > { %7732 = vst.msk [vmem:[#allocation5 + $0x60] sm:$0xff] %vm7719_vm8, %v7696_v33 }
 0x459   : > { %v6654_v10 = vpop.permute.xlu1 %6653  ;;  %v8017_v46 = vpop.permute.xlu0 %8016 }
 0x45a   : > { %8053 = vst.msk [vmem:[#allocation5 + $0x60] sm:$0xff] %vm8040_vm1, %v8017_v46 }
 0x45f   : > { %v7694_v13 = vpop.permute.xlu1 %7693 }
 0x460   : > { %7731 = vst.msk [vmem:[#allocation5 + $0x58] sm:$0xff] %vm7719_vm8, %v7694_v13 }
 0x461   : > { %8052 = vst.msk [vmem:[#allocation5 + $0x58] sm:$0xff] %vm8040_vm1, %v8015_v59  ;;  %v8069_v23 = vld [vmem:[#allocation5 + $0x60] sm:$0xff] }
 0x462   : > { %v8019_v55 = vpop.permute.xlu0 %8018 }
 0x463   : > { %v5611_v57 = vpop.permute.xlu1 %5610 }
 0x464   : > { %5646 = vst.msk [vmem:[#allocation5 + $0x68] sm:$0xff] %vm5632_vm6, %v5611_v57 }
 0x465   : > { %5967 = vst.msk [vmem:[#allocation5 + $0x68] sm:$0xff] %vm5953_vm3, %v5932_v43 }
 0x466   : > { %6144 = vst.msk [vmem:[#allocation5 + $0x68] sm:$0xff] %vm6130_vm4, %v6109_v6  ;;  %v5934_v18 = vpop.permute.xlu0 %5933 }
 0x467   : > { %6689 = vst.msk [vmem:[#allocation5 + $0x68] sm:$0xff] %vm6675_vm5, %v6654_v10  ;;  %v6975_v12 = vpop.permute.xlu1 %6974 }
 0x468   : > { %7010 = vst.msk [vmem:[#allocation5 + $0x68] sm:$0xff] %vm6996_vm7, %v6975_v12  ;;  %v8068_v8 = vld [vmem:[#allocation5 + $0x58] sm:$0xff] }
 0x469   : > { %9238 = vmatmul.mubr.msk.bf16.gmra.mrb[20].mxu1 %vm8109_vm2, %v8068_v8 }
 0x46a   : > { %9241 = vmatprep.mubr.msk.bf16.mxu1 %vm8109_vm2, %v8069_v23  ;;  %v6111_v0 = vpop.permute.xlu0 %6110 }
 0x46b   : > { %v7153_v53 = vpop.permute.xlu1 %7152 }
 0x46c   : > { %7188 = vst.msk [vmem:[#allocation5 + $0x68] sm:$0xff] %vm7174_vm14, %v7153_v53 }
 0x46f   : > { %v7698_v20 = vpop.permute.xlu1 %7697 }
 0x470   : > { %7733 = vst.msk [vmem:[#allocation5 + $0x68] sm:$0xff] %vm7719_vm8, %v7698_v20 }
 0x471   : > { %8054 = vst.msk [vmem:[#allocation5 + $0x68] sm:$0xff] %vm8040_vm1, %v8019_v55  ;;  %v6656_v51 = vpop.permute.xlu0 %6655 }
 0x475   : > { %v5613_v47 = vpop.permute.xlu1 %5612  ;;  %v6977_v31 = vpop.permute.xlu0 %6976 }
 0x476   : > { %5647 = vst.msk [vmem:[#allocation5 + $0x70] sm:$0xff] %vm5632_vm6, %v5613_v47 }
 0x477   : > { %5968 = vst.msk [vmem:[#allocation5 + $0x70] sm:$0xff] %vm5953_vm3, %v5934_v18 }
 0x478   : > { %6145 = vst.msk [vmem:[#allocation5 + $0x70] sm:$0xff] %vm6130_vm4, %v6111_v0  ;;  %v8070_v16 = vld [vmem:[#allocation5 + $0x68] sm:$0xff] }
 0x479   : > { %6690 = vst.msk [vmem:[#allocation5 + $0x70] sm:$0xff] %vm6675_vm5, %v6656_v51  ;;  %v7155_v39 = vpop.permute.xlu0 %7154  ;;  %9242 = vmatmul.mubr.msk.bf16.gmra.mrb[24].mxu1 %vm8109_vm2, %v8070_v16 }
 0x47a   : > { %7011 = vst.msk [vmem:[#allocation5 + $0x70] sm:$0xff] %vm6996_vm7, %v6977_v31 }
 0x47b   : > { %7189 = vst.msk [vmem:[#allocation5 + $0x70] sm:$0xff] %vm7174_vm14, %v7155_v39  ;;  %v5615_v30 = vpop.permute.xlu1 %5614 }
 0x47c   : > { %5648 = vst.msk [vmem:[#allocation5 + $0x78] sm:$0xff] %vm5632_vm6, %v5615_v30  ;;  %vm12736_vm6 = vmmov %vm12734_vm0 }
 0x47f   : > { %v7700_v26 = vpop.permute.xlu0 %7699  ;;  %v5936_v35 = vpop.permute.xlu1 %5935 }
 0x480   : > { %7734 = vst.msk [vmem:[#allocation5 + $0x70] sm:$0xff] %vm7719_vm8, %v7700_v26 }
 0x481   : > { %5969 = vst.msk [vmem:[#allocation5 + $0x78] sm:$0xff] %vm5953_vm3, %v5936_v35  ;;  %vm12737_vm3 = vmmov %vm12734_vm0 }
 0x483   : > { %v8021_v34 = vpop.permute.xlu0 %8020  ;;  %v6113_v61 = vpop.permute.xlu1 %6112 }
 0x484   : > { %8055 = vst.msk [vmem:[#allocation5 + $0x70] sm:$0xff] %vm8040_vm1, %v8021_v34 }
 0x485   : > { %6146 = vst.msk [vmem:[#allocation5 + $0x78] sm:$0xff] %vm6130_vm4, %v6113_v61  ;;  %vm12738_vm4 = vmmov %vm12734_vm0 }
 0x489   : > { %v6658_v44 = vpop.permute.xlu1 %6657 }
 0x48a   : > { %6691 = vst.msk [vmem:[#allocation5 + $0x78] sm:$0xff] %vm6675_vm5, %v6658_v44  ;;  %vm12739_vm5 = vmmov %vm12734_vm0 }
 0x48b   : > { %v8071_v1 = vld [vmem:[#allocation5 + $0x70] sm:$0xff] }
 0x48c   : > { %9245 = vmatprep.mubr.msk.bf16.mxu1 %vm8109_vm2, %v8071_v1 }
 0x48d   : > { %v6979_v15 = vpop.permute.xlu1 %6978 }
 0x48e   : > { %7012 = vst.msk [vmem:[#allocation5 + $0x78] sm:$0xff] %vm6996_vm7, %v6979_v15  ;;  %vm12740_vm7 = vmmov %vm12734_vm0 }
 0x491   : > { %v7157_v60 = vpop.permute.xlu1 %7156  ;;  %v9219_v48 = vpop.f32.mrb[0].mxu1 }
 0x492   : > { %7190 = vst.msk [vmem:[#allocation5 + $0x78] sm:$0xff] %vm7174_vm14, %v7157_v60  ;;  %v8332_v28 = vmul.f32 %v9219_v48, %v12482_v45  ;;  %v8196_v36 = vpop.f32.mrb[1].mxu1  ;;  %vm12741_vm14 = vmmov %vm12734_vm0 }
 0x493   : > { %v8330_v4 = vmul.f32 %v12482_v45, %v8196_v36  ;;  %v9220_v32 = vpop.f32.mrb[2].mxu1 }
 0x494   : > { %v8371_v54 = vadd.f32 %v12484_v40, %v8332_v28  ;;  %v8333_v41 = vmul.f32 %v9220_v32, %v12482_v45  ;;  %v8199_v24 = vpop.f32.mrb[3].mxu1 }
 0x495   : > { %v7702_v25 = vpop.permute.xlu1 %7701  ;;  %v8369_v52 = vadd.f32 %v12484_v40, %v8330_v4  ;;  %v8331_v22 = vmul.f32 %v12482_v45, %v8199_v24 }
 0x496   : > { %7735 = vst.msk [vmem:[#allocation5 + $0x78] sm:$0xff] %vm7719_vm8, %v7702_v25  ;;  %v8403_v29 = vmax.f32 %v8371_v54, 0.0  ;;  %v8372_v14 = vadd.f32 %v12484_v40, %v8333_v41  ;;  %vm12742_vm8 = vmmov %vm12734_vm0 }
 0x497   : > { %v8401_v21 = vmax.f32 %v8369_v52, 0.0  ;;  %v8370_v9 = vadd.f32 %v12484_v40, %v8331_v22 }
 0x498   : > { %8435 = vst.msk [vmem:[%s12497_s23 + $0x10] sm:$0xff] %vm12730_vm9, %v8403_v29  ;;  %v8404_v17 = vmax.f32 %v8372_v14, 0.0  ;;  %vm12746_vm9 = vmmov %vm12734_vm0 }
 0x499   : > { %v8023_v62 = vpop.permute.xlu1 %8022  ;;  %8433 = vst.msk [vmem:[%s12497_s23] sm:$0xff] %vm12731_vm10, %v8401_v21  ;;  %v8402_v42 = vmax.f32 %v8370_v9, 0.0  ;;  %v9223_v50 = vpop.f32.mrb[4].mxu1  ;;  %vm12747_vm10 = vmmov %vm12734_vm0 }
 0x49a   : > { %8056 = vst.msk [vmem:[#allocation5 + $0x78] sm:$0xff] %vm8040_vm1, %v8023_v62  ;;  %v8336_v6 = vmul.f32 %v9223_v50, %v12482_v45  ;;  %v8212_v11 = vpop.f32.mrb[5].mxu1  ;;  %vm12743_vm1 = vmmov %vm12734_vm0 }
 0x49b   : > { %8436 = vst.msk [vmem:[%s12497_s23 + $0x18] sm:$0xff] %vm12732_vm13, %v8404_v17  ;;  %v8334_v63 = vmul.f32 %v12482_v45, %v8212_v11  ;;  %v9224_v19 = vpop.f32.mrb[6].mxu1  ;;  %vm12748_vm13 = vmmov %vm12734_vm0 }
 0x49c   : > { %8434 = vst.msk [vmem:[%s12497_s23 + $0x8] sm:$0xff] %vm12733_vm11, %v8402_v42  ;;  %v8375_v58 = vadd.f32 %v12484_v40, %v8336_v6  ;;  %v8337_v5 = vmul.f32 %v9224_v19, %v12482_v45  ;;  %v8215_v49 = vpop.f32.mrb[7].mxu1  ;;  %vm12749_vm11 = vmmov %vm12734_vm0 }
 0x49d   : > { %v8373_v59 = vadd.f32 %v12484_v40, %v8334_v63  ;;  %v8335_v27 = vmul.f32 %v12482_v45, %v8215_v49 }
 0x49e   : > { %v8407_v37 = vmax.f32 %v8375_v58, 0.0  ;;  %v8376_v2 = vadd.f32 %v12484_v40, %v8337_v5 }
 0x49f   : > { %v8405_v56 = vmax.f32 %v8373_v59, 0.0  ;;  %v8374_v38 = vadd.f32 %v12484_v40, %v8335_v27 }
 0x4a0   : > { %8439 = vst.msk [vmem:[%s12497_s23 + $0x30] sm:$0xff] %vm12734_vm0, %v8407_v37  ;;  %v8408_v3 = vmax.f32 %v8376_v2, 0.0 }
 0x4a1   : > { %v8072_v7 = vld [vmem:[#allocation5 + $0x78] sm:$0xff]  ;;  %8437 = vst.msk [vmem:[%s12497_s23 + $0x20] sm:$0xff] %vm12735_vm15, %v8405_v56  ;;  %v8406_v43 = vmax.f32 %v8374_v38, 0.0  ;;  %vm12750_vm15 = vmmov %vm12734_vm0 }
 0x4a2   : > { %9246 = vmatmul.mubr.msk.bf16.gmra.mrb[28].mxu1 %vm8109_vm2, %v8072_v7  ;;  %8440 = vst.msk [vmem:[%s12497_s23 + $0x38] sm:$0xff] %vm12736_vm6, %v8408_v3  ;;  %vm12744_vm2 = vmmov %vm12734_vm0 }
 0x4a3   : > { %8438 = vst.msk [vmem:[%s12497_s23 + $0x28] sm:$0xff] %vm12737_vm3, %v8406_v43  ;;  %vm12751_vm6 = vmmov %vm12734_vm0 }
 0x4a4   : > { %vm12752_vm3 = vmmov %vm12734_vm0 }
 0x4bc   : > { %v9227_v33 = vpop.f32.mrb[8].mxu1 }
 0x4bd   : > { %v8340_v10 = vmul.f32 %v9227_v33, %v12482_v45  ;;  %v8228_v46 = vpop.f32.mrb[9].mxu1 }
 0x4be   : > { %v8338_v13 = vmul.f32 %v12482_v45, %v8228_v46  ;;  %v9228_v55 = vpop.f32.mrb[10].mxu1 }
 0x4bf   : > { %v8379_v57 = vadd.f32 %v12484_v40, %v8340_v10  ;;  %v8341_v18 = vmul.f32 %v9228_v55, %v12482_v45  ;;  %v8231_v12 = vpop.f32.mrb[11].mxu1 }
 0x4c0   : > { %v8377_v8 = vadd.f32 %v12484_v40, %v8338_v13  ;;  %v8339_v23 = vmul.f32 %v12482_v45, %v8231_v12 }
 0x4c1   : > { %v8411_v53 = vmax.f32 %v8379_v57, 0.0  ;;  %v8380_v0 = vadd.f32 %v12484_v40, %v8341_v18 }
 0x4c2   : > { %v8409_v20 = vmax.f32 %v8377_v8, 0.0  ;;  %v8378_v51 = vadd.f32 %v12484_v40, %v8339_v23 }
 0x4c3   : > { %8443 = vst.msk [vmem:[%s12497_s23 + $0x50] sm:$0xff] %vm12738_vm4, %v8411_v53  ;;  %v8412_v47 = vmax.f32 %v8380_v0, 0.0  ;;  %vm12753_vm4 = vmmov %vm12734_vm0 }
 0x4c4   : > { %8441 = vst.msk [vmem:[%s12497_s23 + $0x40] sm:$0xff] %vm12739_vm5, %v8409_v20  ;;  %v8410_v31 = vmax.f32 %v8378_v51, 0.0  ;;  %vm12754_vm5 = vmmov %vm12734_vm0 }
 0x4c5   : > { %8444 = vst.msk [vmem:[%s12497_s23 + $0x58] sm:$0xff] %vm12740_vm7, %v8412_v47  ;;  %vm12755_vm7 = vmmov %vm12734_vm0 }
 0x4c6   : > { %8442 = vst.msk [vmem:[%s12497_s23 + $0x48] sm:$0xff] %vm12741_vm14, %v8410_v31  ;;  %vm12756_vm14 = vmmov %vm12734_vm0 }
 0x4ea   : > { %v9231_v16 = vpop.f32.mrb[12].mxu1 }
 0x4eb   : > { %v8344_v39 = vmul.f32 %v9231_v16, %v12482_v45  ;;  %v8244_v30 = vpop.f32.mrb[13].mxu1 }
 0x4ec   : > { %v8342_v26 = vmul.f32 %v12482_v45, %v8244_v30  ;;  %v9232_v35 = vpop.f32.mrb[14].mxu1 }
 0x4ed   : > { %v8383_v34 = vadd.f32 %v12484_v40, %v8344_v39  ;;  %v8345_v61 = vmul.f32 %v9232_v35, %v12482_v45  ;;  %v8247_v44 = vpop.f32.mrb[15].mxu1 }
 0x4ee   : > { %v8381_v1 = vadd.f32 %v12484_v40, %v8342_v26  ;;  %v8343_v15 = vmul.f32 %v12482_v45, %v8247_v44 }
 0x4ef   : > { %v8415_v60 = vmax.f32 %v8383_v34, 0.0  ;;  %v8384_v48 = vadd.f32 %v12484_v40, %v8345_v61 }
 0x4f0   : > { %v8413_v25 = vmax.f32 %v8381_v1, 0.0  ;;  %v8382_v28 = vadd.f32 %v12484_v40, %v8343_v15 }
 0x4f1   : > { %8447 = vst.msk [vmem:[%s12497_s23 + $0x70] sm:$0xff] %vm12742_vm8, %v8415_v60  ;;  %v8416_v36 = vmax.f32 %v8384_v48, 0.0  ;;  %vm12757_vm8 = vmmov %vm12734_vm0 }
 0x4f2   : > { %8445 = vst.msk [vmem:[%s12497_s23 + $0x60] sm:$0xff] %vm12743_vm1, %v8413_v25  ;;  %v8414_v4 = vmax.f32 %v8382_v28, 0.0  ;;  %vm12758_vm1 = vmmov %vm12734_vm0 }
 0x4f3   : > { %8448 = vst.msk [vmem:[%s12497_s23 + $0x78] sm:$0xff] %vm12744_vm2, %v8416_v36  ;;  %vm12759_vm2 = vmmov %vm12734_vm0 }
 0x4f4   : > { %8446 = vst.msk [vmem:[%s12497_s23 + $0x68] sm:$0xff] %vm12745_vm12, %v8414_v4  ;;  %vm12760_vm12 = vmmov %vm12734_vm0 }
 0x522   : > { %v9235_v32 = vpop.f32.mrb[16].mxu1 }
 0x523   : > { %v8348_v54 = vmul.f32 %v9235_v32, %v12482_v45  ;;  %v8260_v41 = vpop.f32.mrb[17].mxu1 }
 0x524   : > { %v8346_v24 = vmul.f32 %v12482_v45, %v8260_v41  ;;  %v9236_v52 = vpop.f32.mrb[18].mxu1 }
 0x525   : > { %v8387_v22 = vadd.f32 %v12484_v40, %v8348_v54  ;;  %v8349_v62 = vmul.f32 %v9236_v52, %v12482_v45  ;;  %v8263_v29 = vpop.f32.mrb[19].mxu1 }
 0x526   : > { %v8385_v14 = vadd.f32 %v12484_v40, %v8346_v24  ;;  %v8347_v21 = vmul.f32 %v12482_v45, %v8263_v29 }
 0x527   : > { %v8419_v9 = vmax.f32 %v8387_v22, 0.0  ;;  %v8388_v17 = vadd.f32 %v12484_v40, %v8349_v62 }
 0x528   : > { %v8417_v42 = vmax.f32 %v8385_v14, 0.0  ;;  %v8386_v50 = vadd.f32 %v12484_v40, %v8347_v21 }
 0x529   : > { %8451 = vst.msk [vmem:[%s12497_s23 + $0x90] sm:$0xff] %vm12746_vm9, %v8419_v9  ;;  %v8420_v6 = vmax.f32 %v8388_v17, 0.0 }
 0x52a   : > { %8449 = vst.msk [vmem:[%s12497_s23 + $0x80] sm:$0xff] %vm12747_vm10, %v8417_v42  ;;  %v8418_v11 = vmax.f32 %v8386_v50, 0.0 }
 0x52b   : > { %8452 = vst.msk [vmem:[%s12497_s23 + $0x98] sm:$0xff] %vm12748_vm13, %v8420_v6 }
 0x52c   : > { %8450 = vst.msk [vmem:[%s12497_s23 + $0x88] sm:$0xff] %vm12749_vm11, %v8418_v11 }
 0x53c   : > { %v9239_v63 = vpop.f32.mrb[20].mxu1 }
 0x53d   : > { %v8352_v19 = vmul.f32 %v9239_v63, %v12482_v45  ;;  %v8276_v58 = vpop.f32.mrb[21].mxu1 }
 0x53e   : > { %v8350_v5 = vmul.f32 %v12482_v45, %v8276_v58  ;;  %v9240_v49 = vpop.f32.mrb[22].mxu1 }
 0x53f   : > { %v8391_v59 = vadd.f32 %v12484_v40, %v8352_v19  ;;  %v8353_v27 = vmul.f32 %v9240_v49, %v12482_v45  ;;  %v8279_v7 = vpop.f32.mrb[23].mxu1 }
 0x540   : > { %v8389_v37 = vadd.f32 %v12484_v40, %v8350_v5  ;;  %v8351_v2 = vmul.f32 %v12482_v45, %v8279_v7 }
 0x541   : > { %v8423_v56 = vmax.f32 %v8391_v59, 0.0  ;;  %v8392_v38 = vadd.f32 %v12484_v40, %v8353_v27 }
 0x542   : > { %v8421_v3 = vmax.f32 %v8389_v37, 0.0  ;;  %v8390_v43 = vadd.f32 %v12484_v40, %v8351_v2 }
 0x543   : > { %8455 = vst.msk [vmem:[%s12497_s23 + $0xb0] sm:$0xff] %vm12734_vm0, %v8423_v56  ;;  %v8424_v33 = vmax.f32 %v8392_v38, 0.0 }
 0x544   : > { %8453 = vst.msk [vmem:[%s12497_s23 + $0xa0] sm:$0xff] %vm12750_vm15, %v8421_v3  ;;  %v8422_v10 = vmax.f32 %v8390_v43, 0.0 }
 0x545   : > { %8456 = vst.msk [vmem:[%s12497_s23 + $0xb8] sm:$0xff] %vm12751_vm6, %v8424_v33 }
 0x546   : > { %8454 = vst.msk [vmem:[%s12497_s23 + $0xa8] sm:$0xff] %vm12752_vm3, %v8422_v10 }
 0x54c   : > { %v9243_v46 = vpop.f32.mrb[24].mxu1 }
 0x54d   : > { %v8356_v13 = vmul.f32 %v9243_v46, %v12482_v45  ;;  %v8292_v55 = vpop.f32.mrb[25].mxu1 }
 0x54e   : > { %v8354_v57 = vmul.f32 %v12482_v45, %v8292_v55  ;;  %v9244_v18 = vpop.f32.mrb[26].mxu1 }
 0x54f   : > { %v8395_v12 = vadd.f32 %v12484_v40, %v8356_v13  ;;  %v8357_v8 = vmul.f32 %v9244_v18, %v12482_v45  ;;  %v8295_v23 = vpop.f32.mrb[27].mxu1 }
 0x550   : > { %v8393_v53 = vadd.f32 %v12484_v40, %v8354_v57  ;;  %v8355_v0 = vmul.f32 %v12482_v45, %v8295_v23 }
 0x551   : > { %v8427_v20 = vmax.f32 %v8395_v12, 0.0  ;;  %v8396_v51 = vadd.f32 %v12484_v40, %v8357_v8 }
 0x552   : > { %v8425_v47 = vmax.f32 %v8393_v53, 0.0  ;;  %v8394_v31 = vadd.f32 %v12484_v40, %v8355_v0 }
 0x553   : > { %8459 = vst.msk [vmem:[%s12497_s23 + $0xd0] sm:$0xff] %vm12753_vm4, %v8427_v20  ;;  %v8428_v16 = vmax.f32 %v8396_v51, 0.0 }
 0x554   : > { %8457 = vst.msk [vmem:[%s12497_s23 + $0xc0] sm:$0xff] %vm12754_vm5, %v8425_v47  ;;  %v8426_v39 = vmax.f32 %v8394_v31, 0.0 }
 0x555   : > { %8460 = vst.msk [vmem:[%s12497_s23 + $0xd8] sm:$0xff] %vm12755_vm7, %v8428_v16 }
 0x556   : > { %8458 = vst.msk [vmem:[%s12497_s23 + $0xc8] sm:$0xff] %vm12756_vm14, %v8426_v39 }
 0x575   : > { %v9247_v30 = vpop.f32.mrb[28].mxu1 }
 0x576   : > { %v8360_v26 = vmul.f32 %v9247_v30, %v12482_v45  ;;  %v8308_v35 = vpop.f32.mrb[29].mxu1 }
 0x577   : > { %v8358_v34 = vmul.f32 %v12482_v45, %v8308_v35  ;;  %v9248_v61 = vpop.f32.mrb[30].mxu1 }
 0x578   : > { %v8399_v44 = vadd.f32 %v12484_v40, %v8360_v26  ;;  %v8361_v1 = vmul.f32 %v9248_v61, %v12482_v45  ;;  %v8311_v15 = vpop.f32.mrb[31].mxu1 }
 0x579   : > { %v8397_v60 = vadd.f32 %v12484_v40, %v8358_v34  ;;  %v8359_v48 = vmul.f32 %v12482_v45, %v8311_v15 }
 0x57a   : > { %v8431_v25 = vmax.f32 %v8399_v44, 0.0  ;;  %v8400_v28 = vadd.f32 %v12484_v40, %v8361_v1 }
 0x57b   : > { %v8429_v36 = vmax.f32 %v8397_v60, 0.0  ;;  %v8398_v4 = vadd.f32 %v12484_v40, %v8359_v48 }
 0x57c   : > { %8463 = vst.msk [vmem:[%s12497_s23 + $0xf0] sm:$0xff] %vm12757_vm8, %v8431_v25  ;;  %v8432_v32 = vmax.f32 %v8400_v28, 0.0 }
 0x57d   : > { %8461 = vst.msk [vmem:[%s12497_s23 + $0xe0] sm:$0xff] %vm12758_vm1, %v8429_v36  ;;  %v8430_v45 = vmax.f32 %v8398_v4, 0.0 }
 0x57e   : > { %8464 = vst.msk [vmem:[%s12497_s23 + $0xf8] sm:$0xff] %vm12759_vm2, %v8432_v32 }
 0x57f   : > { %8462 = vst.msk [vmem:[%s12497_s23 + $0xe8] sm:$0xff] %vm12760_vm12, %v8430_v45 }
 0x580   : > { %9695 = shalt.err (!%p9692_p8)
}
 0x581   : > { %s9696_s21 = scalar_lea.hbm %s12619_s17, 4096  ;;  %s9700_s28 = scalar_lea.hbm %s12679_s7, 8192 }
 0x582   : > { %p9697_p4 = scmp.ne.s32.totalorder %s12619_s17, %s9696_s21  ;;  %p9701_p0 = scmp.lt.u32.totalorder %s12619_s17, %s12679_s7 }
 0x583   : > { %p9702_p5 = scmp.lt.u32.totalorder %s9700_s28, %s9696_s21  ;;  %p9704_p6 = scmp.lt.u32.totalorder %s9696_s21, %s12619_s17 }
 0x584   : > { %p9698_p10 = pnand %p9697_p4, %p12761_p9 }
 0x585   : > { %p9703_p7 = por %p9702_p5, %p9701_p0 }
 0x586   : > { %p9699_p11 = pneg %p9698_p10 }
 0x587   : > { %p9705_p12 = por %p9704_p6, %p9703_p7 }
 0x589   : > { %p9706_p13 = pnand %p9705_p12, %p9699_p11 }
 0x58b   : > { %9709 = shalt.err (!%p9706_p13)
}
 0x58c   : > { %s9785_s16 = smov 128  }
 0x58d   : > { %9277 = dma.vmem_to_hbm [thread:$0]  (%p12761_p9), %s12623_s15, 4096, %s12619_s17, %s8466_s30, %s9785_s16, %s9785_s16, %s9772_s8  }
 0x58e PF: > { %s8494_s14 = sand.u32 1, %s9748_s24   ;;  %p12762_p1 = scmp.ne.s32.totalorder %s12695_s29, 0 }
 0x58f   : > { %p12763_p3 = scmp.ge.s32.totalorder %s9760_s27, 2  ;;  %s8495_s13 = scalar_lea.sflag [#allocation8], %s8494_s14 }
 0x591   : > { %p9303_p2 = pnand %p12763_p3, %p12762_p1 }
 0x593   : > { %9743 = dma.done.wait (!%p9303_p2), %s8495_s13, 4096  }
 0x594   : > { %9745 = vsyncadd (!%p9303_p2), %s8495_s13, 4294963200  ;;  %p23_p8 = scmp.ge.s32.totalorder %s10010_s11, 4   ;;  %s12764_s24 = smov %s9752_s25 }
 0x595   : > { %s12765_s25 = smov %s9756_s26  ;;  %s12766_s26 = smov %s10021_s18 }
 0x596   : > { %s12767_s27 = smov %s10010_s11  ;;  %25 = sbr.rel (!%p23_p8) target bundleno = 8 (0x8), region = 121 }
 0x59d   :  { %8500 = vsyncpa [#allocation7], 1 }
 0x59e   :  { %8502 = vsyncpa [#allocation7 + $0x1], 1 }
 0x59f   :  { %8503 = vsyncpa [#allocation10], 1 }
 0x5a0   :  { %8504 = vsyncpa [#allocation13], 1 }
 0x5a1   :  { %8505 = vsyncpa [#allocation16], 1 }
 0x5a2   :  { %8506 = vsyncpa [#allocation8], 1 }
 0x5a3   :  { %8508 = vsyncpa [#allocation8 + $0x1], 1 }

</bundles_post_ra>
